<compile_context>
chip_gen: v7x
topology: tpu7x:2x2x1
jax: 0.10.0
libtpu: 0.0.40
codegen_flags: <defaults>
</compile_context>

<pallas_src>
import functools
import math

import jax
import jax.numpy as jnp
from jax.experimental import pallas as pl
from jax.experimental.pallas import tpu as pltpu

EPS = 1e-6


# ---------------------------------------------------------------------------
# In-kernel helper: PyTorch-semantics LayerNorm of this codebase
# (torch.std => unbiased (N-1) estimator, denominator is (std + eps)).
# ---------------------------------------------------------------------------
def _ln(x, a, b, eps=EPS):
    d = x.shape[-1]
    mean = jnp.mean(x, axis=-1, keepdims=True)
    var = jnp.sum((x - mean) ** 2, axis=-1, keepdims=True) * (1.0 / (d - 1))
    std = jnp.sqrt(var)
    return a * (x - mean) / (std + eps) + b


# ---------------------------------------------------------------------------
# Fused kernel: one grid step = (one batch block) x (one decoder layer).
# Grid = (B // Bt, N_layers); layer axis is serial ("arbitrary"), the
# activation lives in a VMEM scratch across it.  Final LayerNorm is applied
# on the last layer step before the single output write.
# ---------------------------------------------------------------------------
def fused_decoder_kernel(x_ref, bias_ref,
                         ln1a_ref, ln1b_ref,
                         wqkv_ref, bqkv_ref,
                         wo_ref, bo_ref,
                         ln2a_ref, ln2b_ref,
                         w1_ref, b1_ref, w2_ref, b2_ref,
                         norma_ref, normb_ref,
                         o_ref,
                         x_scr,
                         *, resident_weights):
    l = pl.program_id(1)
    n_layers = pl.num_programs(1)
    # Resident weights keep the full (n_layers, ...) stack in VMEM and are
    # indexed by the layer grid position; streamed weights arrive as a
    # single-layer block.
    li = l if resident_weights else 0

    # Load the activation block into the resident scratch on the first layer.
    @pl.when(l == 0)
    def _():
        x_scr[...] = x_ref[...]

    bt, s, d = x_scr.shape
    x = x_scr[...].reshape(bt * s, d)              # (M, D) f32, M = Bt*S
    bias = bias_ref[...]                           # (S, S) additive 0 / -1e9

    # ---- sublayer 1: x + self_attn(LayerNorm(x), mask) --------------------
    h = _ln(x, ln1a_ref[li], ln1b_ref[li])                       # f32
    # Fused QKV projection: one MXU pass with N = 3D (bf16 operands).
    qkv = jnp.dot(h.astype(jnp.bfloat16), wqkv_ref[li],
                  preferred_element_type=jnp.float32) + bqkv_ref[li]
    inv_sqrt_d = jnp.float32(1.0 / math.sqrt(d))
    # Fold 1/sqrt(d) into q (cheaper than scaling the (S,S) scores).
    q = qkv[:, :d] * inv_sqrt_d
    k = qkv[:, d:2 * d]
    v = qkv[:, 2 * d:]

    qb = q.reshape(bt, s, d).astype(jnp.bfloat16)
    kb = k.reshape(bt, s, d).astype(jnp.bfloat16)
    vb = v.reshape(bt, s, d).astype(jnp.bfloat16)

    # Contract D axes directly — no explicit transpose of k.
    scores = jnp.einsum('bqd,bkd->bqk', qb, kb,
                        preferred_element_type=jnp.float32)      # (Bt, S, S)
    scores = scores + bias                                       # additive mask

    scores = scores - jnp.max(scores, axis=-1, keepdims=True)
    p = jnp.exp(scores)
    attn = p * pl.reciprocal(jnp.sum(p, axis=-1, keepdims=True), approx=True)

    ctx = jnp.einsum('bqk,bkd->bqd', attn.astype(jnp.bfloat16), vb,
                     preferred_element_type=jnp.float32)         # (Bt, S, D)
    ctx = ctx.reshape(bt * s, d)
    ctx = jnp.dot(ctx.astype(jnp.bfloat16), wo_ref[li],
                  preferred_element_type=jnp.float32) + bo_ref[li]
    x = x + ctx

    # ---- sublayer 2: x + ffn(LayerNorm(x)) ---------------------------------
    h2 = _ln(x, ln2a_ref[li], ln2b_ref[li])
    f = jnp.dot(h2.astype(jnp.bfloat16), w1_ref[li],
                preferred_element_type=jnp.float32) + b1_ref[li]
    f = jnp.maximum(f, 0.0)
    f = jnp.dot(f.astype(jnp.bfloat16), w2_ref[li],
                preferred_element_type=jnp.float32) + b2_ref[li]
    x = x + f

    # Carry the activation to the next layer step.
    x_scr[...] = x.reshape(bt, s, d)

    # ---- final LayerNorm + single output write on the last layer -----------
    @pl.when(l == n_layers - 1)
    def _():
        y = _ln(x, norma_ref[...], normb_ref[...])
        o_ref[...] = y.reshape(bt, s, d)


# ---------------------------------------------------------------------------
# Wrapper: packs per-layer params, builds BlockSpecs, launches one kernel.
# ---------------------------------------------------------------------------
def decoder_forward(x, mask, stacked, norm_a, norm_b, *,
                    batch_block=None,
                    resident_weight_budget=24 * 1024 * 1024,
                    vmem_limit_bytes=40 * 1024 * 1024):
    B, S, D = x.shape
    n_layers = stacked["wqkv"].shape[0]
    d_ff = stacked["w1"].shape[-1]

    if batch_block is None:
        # Aim for M = Bt*S >= 256 while keeping >= 2 batch blocks (v7x 2 TCs).
        divisors = [c for c in range(1, B + 1) if B % c == 0]
        batch_block = divisors[0]
        for c in divisors:
            if 2 * c <= B or c == B == 1:
                batch_block = c
                if c * S >= 256:
                    break
    Bt = batch_block
    assert B % Bt == 0

    # Additive attention bias: 0 where attend, -1e9 where masked.
    mask_bias = jnp.where(mask == 0, jnp.float32(-1e9), jnp.float32(0.0))

    weight_order = ["ln1_a", "ln1_b", "wqkv", "bqkv", "wo", "bo",
                    "ln2_a", "ln2_b", "w1", "b1", "w2", "b2"]
    weight_bytes = sum(int(stacked[k].size) * stacked[k].dtype.itemsize
                       for k in weight_order)
    resident = weight_bytes <= resident_weight_budget

    x_map = lambda b, l: (b, 0, 0)        # activation / output: per-batch block
    const2_map = lambda b, l: (0, 0)      # mask bias / final-norm params

    if resident:
        # Full-extent, constant-index blocks: DMA'd once, reused every step.
        w_map = lambda b, l: (0, 0, 0)
        def wspec(arr):
            return pl.BlockSpec(arr.shape, w_map)
    else:
        # Per-layer streaming with deeper buffering to hide the weight DMA.
        layer_map = lambda b, l: (l, 0, 0)
        def wspec(arr):
            return pl.BlockSpec((1,) + arr.shape[1:], layer_map,
                                pipeline_mode=pl.Buffered(3))

    in_specs = [
        pl.BlockSpec((Bt, S, D), x_map),          # x
        pl.BlockSpec((S, S), const2_map),         # additive mask bias
        wspec(stacked["ln1_a"]),                  # ln1_a
        wspec(stacked["ln1_b"]),                  # ln1_b
        wspec(stacked["wqkv"]),                   # fused Wq|Wk|Wv  (bf16)
        wspec(stacked["bqkv"]),                   # fused bq|bk|bv  (f32)
        wspec(stacked["wo"]),                     # wo (bf16)
        wspec(stacked["bo"]),                     # bo
        wspec(stacked["ln2_a"]),                  # ln2_a
        wspec(stacked["ln2_b"]),                  # ln2_b
        wspec(stacked["w1"]),                     # w1 (bf16)
        wspec(stacked["b1"]),                     # b1
        wspec(stacked["w2"]),                     # w2 (bf16)
        wspec(stacked["b2"]),                     # b2
        pl.BlockSpec((1, D), const2_map),         # final norm a
        pl.BlockSpec((1, D), const2_map),         # final norm b
    ]

    kernel = functools.partial(fused_decoder_kernel, resident_weights=resident)

    return pl.pallas_call(
        kernel,
        out_shape=jax.ShapeDtypeStruct((B, S, D), jnp.float32),
        grid_spec=pltpu.PrefetchScalarGridSpec(
            num_scalar_prefetch=0,
            grid=(B // Bt, n_layers),
            in_specs=in_specs,
            out_specs=pl.BlockSpec((Bt, S, D), x_map),
            scratch_shapes=[pltpu.VMEM((Bt, S, D), jnp.float32)]),
        compiler_params=pltpu.CompilerParams(
            dimension_semantics=("parallel", "arbitrary"),
            vmem_limit_bytes=vmem_limit_bytes),
    )(x, mask_bias,
      stacked["ln1_a"], stacked["ln1_b"],
      stacked["wqkv"], stacked["bqkv"],
      stacked["wo"], stacked["bo"],
      stacked["ln2_a"], stacked["ln2_b"],
      stacked["w1"], stacked["b1"], stacked["w2"], stacked["b2"],
      norm_a, norm_b)


# ---------------------------------------------------------------------------
# Pure-JAX f32 reference (PyTorch semantics) for a correctness spot check.
# ---------------------------------------------------------------------------
def decoder_reference(x, mask, layer_params, norm_a, norm_b):
    def ln(x, a, b):
        d = x.shape[-1]
        mean = jnp.mean(x, axis=-1, keepdims=True)
        var = jnp.sum((x - mean) ** 2, axis=-1, keepdims=True) / (d - 1)
        return a * (x - mean) / (jnp.sqrt(var) + EPS) + b

    B, S, D = x.shape
    for p in layer_params:
        h = ln(x, p["ln1_a"], p["ln1_b"])
        q = h @ p["wq"] + p["bq"]
        k = h @ p["wk"] + p["bk"]
        v = h @ p["wv"] + p["bv"]
        scores = jnp.einsum('bqd,bkd->bqk', q, k) / math.sqrt(D)
        scores = jnp.where(mask == 0.0, -1e9, scores)
        attn = jax.nn.softmax(scores, axis=-1)
        ctx = jnp.einsum('bqk,bkd->bqd', attn, v) @ p["wo"] + p["bo"]
        x = x + ctx
        h2 = ln(x, p["ln2_a"], p["ln2_b"])
        f = jnp.maximum(h2 @ p["w1"] + p["b1"], 0.0) @ p["w2"] + p["b2"]
        x = x + f
    return ln(x, norm_a, norm_b)


# ---------------------------------------------------------------------------
# Parameter construction.
# ---------------------------------------------------------------------------
def make_layer_params(key, d_model, d_ff):
    ks = jax.random.split(key, 6)
    scale = 0.02
    return {
        "ln1_a": jnp.ones((1, d_model), jnp.float32),
        "ln1_b": jnp.zeros((1, d_model), jnp.float32),
        "wq": scale * jax.random.normal(ks[0], (d_model, d_model), jnp.float32),
        "bq": jnp.zeros((1, d_model), jnp.float32),
        "wk": scale * jax.random.normal(ks[1], (d_model, d_model), jnp.float32),
        "bk": jnp.zeros((1, d_model), jnp.float32),
        "wv": scale * jax.random.normal(ks[2], (d_model, d_model), jnp.float32),
        "bv": jnp.zeros((1, d_model), jnp.float32),
        "wo": scale * jax.random.normal(ks[3], (d_model, d_model), jnp.float32),
        "bo": jnp.zeros((1, d_model), jnp.float32),
        "ln2_a": jnp.ones((1, d_model), jnp.float32),
        "ln2_b": jnp.zeros((1, d_model), jnp.float32),
        "w1": scale * jax.random.normal(ks[4], (d_model, d_ff), jnp.float32),
        "b1": jnp.zeros((1, d_ff), jnp.float32),
        "w2": scale * jax.random.normal(ks[5], (d_ff, d_model), jnp.float32),
        "b2": jnp.zeros((1, d_model), jnp.float32),
    }


def stack_and_pack_params(layer_params, weight_dtype=jnp.bfloat16):
    """Stack per-layer params on a leading layer axis, fuse QKV, cast weight
    matrices to bf16 for the MXU (biases / LN params stay f32)."""
    def stack(name):
        return jnp.stack([p[name] for p in layer_params], axis=0)

    wq, wk, wv = stack("wq"), stack("wk"), stack("wv")
    bq, bk, bv = stack("bq"), stack("bk"), stack("bv")
    return {
        "ln1_a": stack("ln1_a"), "ln1_b": stack("ln1_b"),
        "wqkv": jnp.concatenate([wq, wk, wv], axis=-1).astype(weight_dtype),
        "bqkv": jnp.concatenate([bq, bk, bv], axis=-1),
        "wo": stack("wo").astype(weight_dtype), "bo": stack("bo"),
        "ln2_a": stack("ln2_a"), "ln2_b": stack("ln2_b"),
        "w1": stack("w1").astype(weight_dtype), "b1": stack("b1"),
        "w2": stack("w2").astype(weight_dtype), "b2": stack("b2"),
    }


if __name__ == "__main__":
    # Small but lane-dense shapes: D, d_ff, S multiples of 128.
    # Bt=2 -> M = Bt*S = 256 rows per matmul, and B//Bt = 2 parallel batch
    # blocks for v7x's two TensorCores.
    B, S, D, D_FF, N_LAYERS = 4, 128, 128, 256, 2

    key = jax.random.PRNGKey(0)
    kx, *lkeys = jax.random.split(key, 1 + N_LAYERS)

    x = jax.random.normal(kx, (B, S, D), jnp.float32)
    # Causal mask: (S, S), 1 = attend, 0 = masked.
    mask = jnp.tril(jnp.ones((S, S), jnp.float32))

    layer_params = [make_layer_params(lk, D, D_FF) for lk in lkeys]
    stacked = stack_and_pack_params(layer_params)
    norm_a = jnp.ones((1, D), jnp.float32)
    norm_b = jnp.zeros((1, D), jnp.float32)

    out = decoder_forward(x, mask, stacked, norm_a, norm_b, batch_block=2)
    out = jax.block_until_ready(out)

    assert out.shape == (B, S, D) and out.dtype == jnp.float32
    assert bool(jnp.all(jnp.isfinite(out)))

    # Correctness spot check against the pure-f32 reference.  Tolerance covers
    # bf16 MXU operands and the approximate softmax reciprocal.
    ref = decoder_reference(x, mask, layer_params, norm_a, norm_b)
    max_err = float(jnp.max(jnp.abs(out - ref)))
    assert max_err < 2e-2, f"mismatch vs reference: {max_err}"

    print("KERNEL_OK")
</pallas_src>

<mosaic_0001>
module attributes {stable_mosaic.version = 11 : i64} {
  func.func @fused_decoder_kernel(%arg0: i32, %arg1: i32, %arg2: memref<2x128x128xf32, #tpu.memory_space<vmem>>, %arg3: memref<128x128xf32, #tpu.memory_space<vmem>>, %arg4: memref<2x1x128xf32, #tpu.memory_space<vmem>>, %arg5: memref<2x1x128xf32, #tpu.memory_space<vmem>>, %arg6: memref<2x128x384xbf16, #tpu.memory_space<vmem>>, %arg7: memref<2x1x384xf32, #tpu.memory_space<vmem>>, %arg8: memref<2x128x128xbf16, #tpu.memory_space<vmem>>, %arg9: memref<2x1x128xf32, #tpu.memory_space<vmem>>, %arg10: memref<2x1x128xf32, #tpu.memory_space<vmem>>, %arg11: memref<2x1x128xf32, #tpu.memory_space<vmem>>, %arg12: memref<2x128x256xbf16, #tpu.memory_space<vmem>>, %arg13: memref<2x1x256xf32, #tpu.memory_space<vmem>>, %arg14: memref<2x256x128xbf16, #tpu.memory_space<vmem>>, %arg15: memref<2x1x128xf32, #tpu.memory_space<vmem>>, %arg16: memref<1x128xf32, #tpu.memory_space<vmem>>, %arg17: memref<1x128xf32, #tpu.memory_space<vmem>>, %arg18: memref<2x128x128xf32, #tpu.memory_space<vmem>>, %arg19: memref<2x128x128xf32, #tpu.memory_space<vmem>>) attributes {dimension_semantics = [#tpu.dimension_semantics<parallel>, #tpu.dimension_semantics<arbitrary>], iteration_bounds = array<i64: 2, 2>, scalar_prefetch = 0 : i64, scratch_operands = 1 : i64, tpu.core_type = #tpu.core_type<tc>, window_params = [{transform_indices = @transform_0, window_bounds = array<i64: 2, 128, 128>}, {pipeline_mode = #tpu.pipeline_mode<synchronous>, transform_indices = @transform_1, window_bounds = array<i64: 128, 128>}, {pipeline_mode = #tpu.pipeline_mode<synchronous>, transform_indices = @transform_2, window_bounds = array<i64: 2, 1, 128>}, {pipeline_mode = #tpu.pipeline_mode<synchronous>, transform_indices = @transform_3, window_bounds = array<i64: 2, 1, 128>}, {pipeline_mode = #tpu.pipeline_mode<synchronous>, transform_indices = @transform_4, window_bounds = array<i64: 2, 128, 384>}, {pipeline_mode = #tpu.pipeline_mode<synchronous>, transform_indices = @transform_5, window_bounds = array<i64: 2, 1, 384>}, {pipeline_mode = #tpu.pipeline_mode<synchronous>, transform_indices = @transform_6, window_bounds = array<i64: 2, 128, 128>}, {pipeline_mode = #tpu.pipeline_mode<synchronous>, transform_indices = @transform_7, window_bounds = array<i64: 2, 1, 128>}, {pipeline_mode = #tpu.pipeline_mode<synchronous>, transform_indices = @transform_8, window_bounds = array<i64: 2, 1, 128>}, {pipeline_mode = #tpu.pipeline_mode<synchronous>, transform_indices = @transform_9, window_bounds = array<i64: 2, 1, 128>}, {pipeline_mode = #tpu.pipeline_mode<synchronous>, transform_indices = @transform_10, window_bounds = array<i64: 2, 128, 256>}, {pipeline_mode = #tpu.pipeline_mode<synchronous>, transform_indices = @transform_11, window_bounds = array<i64: 2, 1, 256>}, {pipeline_mode = #tpu.pipeline_mode<synchronous>, transform_indices = @transform_12, window_bounds = array<i64: 2, 256, 128>}, {pipeline_mode = #tpu.pipeline_mode<synchronous>, transform_indices = @transform_13, window_bounds = array<i64: 2, 1, 128>}, {pipeline_mode = #tpu.pipeline_mode<synchronous>, transform_indices = @transform_14, window_bounds = array<i64: 1, 128>}, {pipeline_mode = #tpu.pipeline_mode<synchronous>, transform_indices = @transform_15, window_bounds = array<i64: 1, 128>}, {transform_indices = @transform_16, window_bounds = array<i64: 2, 128, 128>}]} {
    %c0_i32 = arith.constant 0 : i32
    %0 = arith.cmpi eq, %arg1, %c0_i32 : i32
    %1 = arith.extui %0 : i1 to i32
    %c0_i32_0 = arith.constant 0 : i32
    %2 = arith.cmpi ne, %1, %c0_i32_0 : i32
    scf.if %2 {
      %c0_52 = arith.constant 0 : index
      %c0_53 = arith.constant 0 : index
      %c0_54 = arith.constant 0 : index
      %139 = vector.load %arg2[%c0_52, %c0_53, %c0_54] : memref<2x128x128xf32, #tpu.memory_space<vmem>>, vector<2x128x128xf32>
      %c0_55 = arith.constant 0 : index
      %c0_56 = arith.constant 0 : index
      %c0_57 = arith.constant 0 : index
      %140 = vector.load %arg19[%c0_55, %c0_56, %c0_57] : memref<2x128x128xf32, #tpu.memory_space<vmem>>, vector<2x128x128xf32>
      tpu.vector_store %arg19[%c0_55, %c0_56, %c0_57], %139 {strides = array<i32>} : memref<2x128x128xf32, #tpu.memory_space<vmem>>, vector<2x128x128xf32>,
    } else {
    }
    %c0 = arith.constant 0 : index
    %c0_1 = arith.constant 0 : index
    %c0_2 = arith.constant 0 : index
    %3 = vector.load %arg19[%c0, %c0_1, %c0_2] : memref<2x128x128xf32, #tpu.memory_space<vmem>>, vector<2x128x128xf32>
    %4 = vector.shape_cast %3 : vector<2x128x128xf32> to vector<256x128xf32>
    %c0_3 = arith.constant 0 : index
    %c0_4 = arith.constant 0 : index
    %5 = vector.load %arg3[%c0_3, %c0_4] : memref<128x128xf32, #tpu.memory_space<vmem>>, vector<128x128xf32>
    %6 = arith.index_cast %arg1 : i32 to index
    %c0_5 = arith.constant 0 : index
    %c0_6 = arith.constant 0 : index
    %7 = vector.load %arg4[%6, %c0_5, %c0_6] : memref<2x1x128xf32, #tpu.memory_space<vmem>>, vector<1x1x128xf32>
    %8 = vector.shape_cast %7 : vector<1x1x128xf32> to vector<1x128xf32>
    %9 = arith.index_cast %arg1 : i32 to index
    %c0_7 = arith.constant 0 : index
    %c0_8 = arith.constant 0 : index
    %10 = vector.load %arg5[%9, %c0_7, %c0_8] : memref<2x1x128xf32, #tpu.memory_space<vmem>>, vector<1x1x128xf32>
    %11 = vector.shape_cast %10 : vector<1x1x128xf32> to vector<1x128xf32>
    %cst = arith.constant dense<0.000000e+00> : vector<256xf32>
    %12 = vector.multi_reduction <add>, %4, %cst [1] : vector<256x128xf32> to vector<256xf32>
    %13 = vector.shape_cast %12 : vector<256xf32> to vector<256x1xf32>
    %cst_9 = arith.constant 1.280000e+02 : f32
    %14 = vector.broadcast %cst_9 : f32 to vector<256x1xf32>
    %15 = arith.divf %13, %14 : vector<256x1xf32>
    %16 = vector.broadcast %15 : vector<256x1xf32> to vector<256x128xf32>
    %17 = arith.subf %4, %16 : vector<256x128xf32>
    %18 = arith.mulf %17, %17 : vector<256x128xf32>
    %cst_10 = arith.constant dense<0.000000e+00> : vector<256xf32>
    %19 = vector.multi_reduction <add>, %18, %cst_10 [1] : vector<256x128xf32> to vector<256xf32>
    %20 = vector.shape_cast %19 : vector<256xf32> to vector<256x1xf32>
    %cst_11 = arith.constant 0.00787401571 : f32
    %21 = vector.broadcast %cst_11 : f32 to vector<256x1xf32>
    %22 = arith.mulf %20, %21 : vector<256x1xf32>
    %23 = math.sqrt %22 : vector<256x1xf32>
    %24 = vector.broadcast %15 : vector<256x1xf32> to vector<256x128xf32>
    %25 = arith.subf %4, %24 : vector<256x128xf32>
    %26 = vector.broadcast %8 : vector<1x128xf32> to vector<256x128xf32>
    %27 = arith.mulf %26, %25 : vector<256x128xf32>
    %cst_12 = arith.constant 9.99999997E-7 : f32
    %28 = vector.broadcast %cst_12 : f32 to vector<256x1xf32>
    %29 = arith.addf %23, %28 : vector<256x1xf32>
    %30 = vector.broadcast %29 : vector<256x1xf32> to vector<256x128xf32>
    %31 = arith.divf %27, %30 : vector<256x128xf32>
    %32 = vector.broadcast %11 : vector<1x128xf32> to vector<256x128xf32>
    %33 = arith.addf %31, %32 : vector<256x128xf32>
    %34 = arith.truncf %33 : vector<256x128xf32> to vector<256x128xbf16>
    %35 = arith.index_cast %arg1 : i32 to index
    %c0_13 = arith.constant 0 : index
    %c0_14 = arith.constant 0 : index
    %36 = vector.load %arg6[%35, %c0_13, %c0_14] : memref<2x128x384xbf16, #tpu.memory_space<vmem>>, vector<1x128x384xbf16>
    %37 = vector.shape_cast %36 : vector<1x128x384xbf16> to vector<128x384xbf16>
    %cst_15 = arith.constant dense<0.000000e+00> : vector<256x384xf32>
    %38 = tpu.matmul %34, %37, %cst_15 {dimension_numbers = #tpu.dot_dimension_numbers<[1], [0], [0], [1], [0, 0, 1, 1], [], []>} : vector<256x128xbf16>, vector<128x384xbf16>, vector<256x384xf32> -> vector<256x384xf32>
    %39 = arith.index_cast %arg1 : i32 to index
    %c0_16 = arith.constant 0 : index
    %c0_17 = arith.constant 0 : index
    %40 = vector.load %arg7[%39, %c0_16, %c0_17] : memref<2x1x384xf32, #tpu.memory_space<vmem>>, vector<1x1x384xf32>
    %41 = vector.shape_cast %40 : vector<1x1x384xf32> to vector<1x384xf32>
    %42 = vector.broadcast %41 : vector<1x384xf32> to vector<256x384xf32>
    %43 = arith.addf %38, %42 : vector<256x384xf32>
    %44 = vector.extract_strided_slice %43 {offsets = [0, 0], sizes = [256, 128], strides = [1, 1]} : vector<256x384xf32> to vector<256x128xf32>
    %cst_18 = arith.constant 0.0883883461 : f32
    %45 = vector.broadcast %cst_18 : f32 to vector<256x128xf32>
    %46 = arith.mulf %44, %45 : vector<256x128xf32>
    %47 = vector.extract_strided_slice %43 {offsets = [0, 128], sizes = [256, 128], strides = [1, 1]} : vector<256x384xf32> to vector<256x128xf32>
    %48 = vector.extract_strided_slice %43 {offsets = [0, 256], sizes = [256, 128], strides = [1, 1]} : vector<256x384xf32> to vector<256x128xf32>
    %49 = vector.shape_cast %46 : vector<256x128xf32> to vector<2x128x128xf32>
    %50 = arith.truncf %49 : vector<2x128x128xf32> to vector<2x128x128xbf16>
    %51 = vector.shape_cast %47 : vector<256x128xf32> to vector<2x128x128xf32>
    %52 = arith.truncf %51 : vector<2x128x128xf32> to vector<2x128x128xbf16>
    %53 = vector.shape_cast %48 : vector<256x128xf32> to vector<2x128x128xf32>
    %54 = arith.truncf %53 : vector<2x128x128xf32> to vector<2x128x128xbf16>
    "tpu.trace_start"() <{level = 10 : i32, message = "bqd,bkd->bqk"}> : () -> ()
    %cst_19 = arith.constant dense<0.000000e+00> : vector<2x128x128xf32>
    %55 = tpu.matmul %50, %52, %cst_19 {dimension_numbers = #tpu.dot_dimension_numbers<[2], [2], [1], [1], [0, 0, 0, 1, 1, 1], [0], [0]>} : vector<2x128x128xbf16>, vector<2x128x128xbf16>, vector<2x128x128xf32> -> vector<2x128x128xf32>
    "tpu.trace_stop"() : () -> ()
    %56 = vector.shape_cast %5 : vector<128x128xf32> to vector<1x128x128xf32>
    %57 = vector.broadcast %56 : vector<1x128x128xf32> to vector<2x128x128xf32>
    %58 = arith.addf %55, %57 : vector<2x128x128xf32>
    %cst_20 = arith.constant dense<0xFF800000> : vector<2x128xf32>
    %59 = vector.multi_reduction <maximumf>, %58, %cst_20 [2] : vector<2x128x128xf32> to vector<2x128xf32>
    %60 = vector.shape_cast %59 : vector<2x128xf32> to vector<2x128x1xf32>
    %61 = vector.broadcast %60 : vector<2x128x1xf32> to vector<2x128x128xf32>
    %62 = arith.subf %58, %61 : vector<2x128x128xf32>
    %63 = math.exp %62 : vector<2x128x128xf32>
    %cst_21 = arith.constant dense<0.000000e+00> : vector<2x128xf32>
    %64 = vector.multi_reduction <add>, %63, %cst_21 [2] : vector<2x128x128xf32> to vector<2x128xf32>
    %65 = vector.shape_cast %64 : vector<2x128xf32> to vector<2x128x1xf32>
    %66 = tpu.reciprocal %65 {approx = true} : vector<2x128x1xf32> -> vector<2x128x1xf32>
    %67 = vector.broadcast %66 : vector<2x128x1xf32> to vector<2x128x128xf32>
    %68 = arith.mulf %63, %67 : vector<2x128x128xf32>
    %69 = arith.truncf %68 : vector<2x128x128xf32> to vector<2x128x128xbf16>
    "tpu.trace_start"() <{level = 10 : i32, message = "bqk,bkd->bqd"}> : () -> ()
    %cst_22 = arith.constant dense<0.000000e+00> : vector<2x128x128xf32>
    %70 = tpu.matmul %69, %54, %cst_22 {dimension_numbers = #tpu.dot_dimension_numbers<[2], [1], [1], [2], [0, 0, 0, 1, 1, 2], [0], [0]>} : vector<2x128x128xbf16>, vector<2x128x128xbf16>, vector<2x128x128xf32> -> vector<2x128x128xf32>
    "tpu.trace_stop"() : () -> ()
    %71 = vector.shape_cast %70 : vector<2x128x128xf32> to vector<256x128xf32>
    %72 = arith.truncf %71 : vector<256x128xf32> to vector<256x128xbf16>
    %73 = arith.index_cast %arg1 : i32 to index
    %c0_23 = arith.constant 0 : index
    %c0_24 = arith.constant 0 : index
    %74 = vector.load %arg8[%73, %c0_23, %c0_24] : memref<2x128x128xbf16, #tpu.memory_space<vmem>>, vector<1x128x128xbf16>
    %75 = vector.shape_cast %74 : vector<1x128x128xbf16> to vector<128x128xbf16>
    %cst_25 = arith.constant dense<0.000000e+00> : vector<256x128xf32>
    %76 = tpu.matmul %72, %75, %cst_25 {dimension_numbers = #tpu.dot_dimension_numbers<[1], [0], [0], [1], [0, 0, 1, 1], [], []>} : vector<256x128xbf16>, vector<128x128xbf16>, vector<256x128xf32> -> vector<256x128xf32>
    %77 = arith.index_cast %arg1 : i32 to index
    %c0_26 = arith.constant 0 : index
    %c0_27 = arith.constant 0 : index
    %78 = vector.load %arg9[%77, %c0_26, %c0_27] : memref<2x1x128xf32, #tpu.memory_space<vmem>>, vector<1x1x128xf32>
    %79 = vector.shape_cast %78 : vector<1x1x128xf32> to vector<1x128xf32>
    %80 = vector.broadcast %79 : vector<1x128xf32> to vector<256x128xf32>
    %81 = arith.addf %76, %80 : vector<256x128xf32>
    %82 = arith.addf %4, %81 : vector<256x128xf32>
    %83 = arith.index_cast %arg1 : i32 to index
    %c0_28 = arith.constant 0 : index
    %c0_29 = arith.constant 0 : index
    %84 = vector.load %arg10[%83, %c0_28, %c0_29] : memref<2x1x128xf32, #tpu.memory_space<vmem>>, vector<1x1x128xf32>
    %85 = vector.shape_cast %84 : vector<1x1x128xf32> to vector<1x128xf32>
    %86 = arith.index_cast %arg1 : i32 to index
    %c0_30 = arith.constant 0 : index
    %c0_31 = arith.constant 0 : index
    %87 = vector.load %arg11[%86, %c0_30, %c0_31] : memref<2x1x128xf32, #tpu.memory_space<vmem>>, vector<1x1x128xf32>
    %88 = vector.shape_cast %87 : vector<1x1x128xf32> to vector<1x128xf32>
    %cst_32 = arith.constant dense<0.000000e+00> : vector<256xf32>
    %89 = vector.multi_reduction <add>, %82, %cst_32 [1] : vector<256x128xf32> to vector<256xf32>
    %90 = vector.shape_cast %89 : vector<256xf32> to vector<256x1xf32>
    %cst_33 = arith.constant 1.280000e+02 : f32
    %91 = vector.broadcast %cst_33 : f32 to vector<256x1xf32>
    %92 = arith.divf %90, %91 : vector<256x1xf32>
    %93 = vector.broadcast %92 : vector<256x1xf32> to vector<256x128xf32>
    %94 = arith.subf %82, %93 : vector<256x128xf32>
    %95 = arith.mulf %94, %94 : vector<256x128xf32>
    %cst_34 = arith.constant dense<0.000000e+00> : vector<256xf32>
    %96 = vector.multi_reduction <add>, %95, %cst_34 [1] : vector<256x128xf32> to vector<256xf32>
    %97 = vector.shape_cast %96 : vector<256xf32> to vector<256x1xf32>
    %cst_35 = arith.constant 0.00787401571 : f32
    %98 = vector.broadcast %cst_35 : f32 to vector<256x1xf32>
    %99 = arith.mulf %97, %98 : vector<256x1xf32>
    %100 = math.sqrt %99 : vector<256x1xf32>
    %101 = vector.broadcast %92 : vector<256x1xf32> to vector<256x128xf32>
    %102 = arith.subf %82, %101 : vector<256x128xf32>
    %103 = vector.broadcast %85 : vector<1x128xf32> to vector<256x128xf32>
    %104 = arith.mulf %103, %102 : vector<256x128xf32>
    %cst_36 = arith.constant 9.99999997E-7 : f32
    %105 = vector.broadcast %cst_36 : f32 to vector<256x1xf32>
    %106 = arith.addf %100, %105 : vector<256x1xf32>
    %107 = vector.broadcast %106 : vector<256x1xf32> to vector<256x128xf32>
    %108 = arith.divf %104, %107 : vector<256x128xf32>
    %109 = vector.broadcast %88 : vector<1x128xf32> to vector<256x128xf32>
    %110 = arith.addf %108, %109 : vector<256x128xf32>
    %111 = arith.truncf %110 : vector<256x128xf32> to vector<256x128xbf16>
    %112 = arith.index_cast %arg1 : i32 to index
    %c0_37 = arith.constant 0 : index
    %c0_38 = arith.constant 0 : index
    %113 = vector.load %arg12[%112, %c0_37, %c0_38] : memref<2x128x256xbf16, #tpu.memory_space<vmem>>, vector<1x128x256xbf16>
    %114 = vector.shape_cast %113 : vector<1x128x256xbf16> to vector<128x256xbf16>
    %cst_39 = arith.constant dense<0.000000e+00> : vector<256x256xf32>
    %115 = tpu.matmul %111, %114, %cst_39 {dimension_numbers = #tpu.dot_dimension_numbers<[1], [0], [0], [1], [0, 0, 1, 1], [], []>} : vector<256x128xbf16>, vector<128x256xbf16>, vector<256x256xf32> -> vector<256x256xf32>
    %116 = arith.index_cast %arg1 : i32 to index
    %c0_40 = arith.constant 0 : index
    %c0_41 = arith.constant 0 : index
    %117 = vector.load %arg13[%116, %c0_40, %c0_41] : memref<2x1x256xf32, #tpu.memory_space<vmem>>, vector<1x1x256xf32>
    %118 = vector.shape_cast %117 : vector<1x1x256xf32> to vector<1x256xf32>
    %119 = vector.broadcast %118 : vector<1x256xf32> to vector<256x256xf32>
    %120 = arith.addf %115, %119 : vector<256x256xf32>
    %cst_42 = arith.constant 0.000000e+00 : f32
    %121 = vector.broadcast %cst_42 : f32 to vector<256x256xf32>
    %122 = arith.maximumf %120, %121 : vector<256x256xf32>
    %123 = arith.truncf %122 : vector<256x256xf32> to vector<256x256xbf16>
    %124 = arith.index_cast %arg1 : i32 to index
    %c0_43 = arith.constant 0 : index
    %c0_44 = arith.constant 0 : index
    %125 = vector.load %arg14[%124, %c0_43, %c0_44] : memref<2x256x128xbf16, #tpu.memory_space<vmem>>, vector<1x256x128xbf16>
    %126 = vector.shape_cast %125 : vector<1x256x128xbf16> to vector<256x128xbf16>
    %cst_45 = arith.constant dense<0.000000e+00> : vector<256x128xf32>
    %127 = tpu.matmul %123, %126, %cst_45 {dimension_numbers = #tpu.dot_dimension_numbers<[1], [0], [0], [1], [0, 0, 1, 1], [], []>} : vector<256x256xbf16>, vector<256x128xbf16>, vector<256x128xf32> -> vector<256x128xf32>
    %128 = arith.index_cast %arg1 : i32 to index
    %c0_46 = arith.constant 0 : index
    %c0_47 = arith.constant 0 : index
    %129 = vector.load %arg15[%128, %c0_46, %c0_47] : memref<2x1x128xf32, #tpu.memory_space<vmem>>, vector<1x1x128xf32>
    %130 = vector.shape_cast %129 : vector<1x1x128xf32> to vector<1x128xf32>
    %131 = vector.broadcast %130 : vector<1x128xf32> to vector<256x128xf32>
    %132 = arith.addf %127, %131 : vector<256x128xf32>
    %133 = arith.addf %82, %132 : vector<256x128xf32>
    %134 = vector.shape_cast %133 : vector<256x128xf32> to vector<2x128x128xf32>
    %c0_48 = arith.constant 0 : index
    %c0_49 = arith.constant 0 : index
    %c0_50 = arith.constant 0 : index
    %135 = vector.load %arg19[%c0_48, %c0_49, %c0_50] : memref<2x128x128xf32, #tpu.memory_space<vmem>>, vector<2x128x128xf32>
    tpu.vector_store %arg19[%c0_48, %c0_49, %c0_50], %134 {strides = array<i32>} : memref<2x128x128xf32, #tpu.memory_space<vmem>>, vector<2x128x128xf32>,
    %c1_i32 = arith.constant 1 : i32
    %136 = arith.cmpi eq, %arg1, %c1_i32 : i32
    %137 = arith.extui %136 : i1 to i32
    %c0_i32_51 = arith.constant 0 : i32
    %138 = arith.cmpi ne, %137, %c0_i32_51 : i32
    scf.if %138 {
      %c0_52 = arith.constant 0 : index
      %c0_53 = arith.constant 0 : index
      %139 = vector.load %arg16[%c0_52, %c0_53] : memref<1x128xf32, #tpu.memory_space<vmem>>, vector<1x128xf32>
      %c0_54 = arith.constant 0 : index
      %c0_55 = arith.constant 0 : index
      %140 = vector.load %arg17[%c0_54, %c0_55] : memref<1x128xf32, #tpu.memory_space<vmem>>, vector<1x128xf32>
      %cst_56 = arith.constant dense<0.000000e+00> : vector<256xf32>
      %141 = vector.multi_reduction <add>, %133, %cst_56 [1] : vector<256x128xf32> to vector<256xf32>
      %142 = vector.shape_cast %141 : vector<256xf32> to vector<256x1xf32>
      %cst_57 = arith.constant 1.280000e+02 : f32
      %143 = vector.broadcast %cst_57 : f32 to vector<256x1xf32>
      %144 = arith.divf %142, %143 : vector<256x1xf32>
      %145 = vector.broadcast %144 : vector<256x1xf32> to vector<256x128xf32>
      %146 = arith.subf %133, %145 : vector<256x128xf32>
      %147 = arith.mulf %146, %146 : vector<256x128xf32>
      %cst_58 = arith.constant dense<0.000000e+00> : vector<256xf32>
      %148 = vector.multi_reduction <add>, %147, %cst_58 [1] : vector<256x128xf32> to vector<256xf32>
      %149 = vector.shape_cast %148 : vector<256xf32> to vector<256x1xf32>
      %cst_59 = arith.constant 0.00787401571 : f32
      %150 = vector.broadcast %cst_59 : f32 to vector<256x1xf32>
      %151 = arith.mulf %149, %150 : vector<256x1xf32>
      %152 = math.sqrt %151 : vector<256x1xf32>
      %153 = vector.broadcast %144 : vector<256x1xf32> to vector<256x128xf32>
      %154 = arith.subf %133, %153 : vector<256x128xf32>
      %155 = vector.broadcast %139 : vector<1x128xf32> to vector<256x128xf32>
      %156 = arith.mulf %155, %154 : vector<256x128xf32>
      %cst_60 = arith.constant 9.99999997E-7 : f32
      %157 = vector.broadcast %cst_60 : f32 to vector<256x1xf32>
      %158 = arith.addf %152, %157 : vector<256x1xf32>
      %159 = vector.broadcast %158 : vector<256x1xf32> to vector<256x128xf32>
      %160 = arith.divf %156, %159 : vector<256x128xf32>
      %161 = vector.broadcast %140 : vector<1x128xf32> to vector<256x128xf32>
      %162 = arith.addf %160, %161 : vector<256x128xf32>
      %163 = vector.shape_cast %162 : vector<256x128xf32> to vector<2x128x128xf32>
      %c0_61 = arith.constant 0 : index
      %c0_62 = arith.constant 0 : index
      %c0_63 = arith.constant 0 : index
      %164 = vector.load %arg18[%c0_61, %c0_62, %c0_63] : memref<2x128x128xf32, #tpu.memory_space<vmem>>, vector<2x128x128xf32>
      tpu.vector_store %arg18[%c0_61, %c0_62, %c0_63], %163 {strides = array<i32>} : memref<2x128x128xf32, #tpu.memory_space<vmem>>, vector<2x128x128xf32>,
    } else {
    }
    return
  }
  func.func @transform_0(%arg0: i32, %arg1: i32) -> (i32, i32, i32) {
    %c0_i32 = arith.constant 0 : i32
    %c0_i32_0 = arith.constant 0 : i32
    %c0_i32_1 = arith.constant 0 : i32
    return %arg0, %c0_i32, %c0_i32_0 : i32, i32, i32
  }
  func.func @transform_1(%arg0: i32, %arg1: i32) -> (i32, i32) {
    %c0_i32 = arith.constant 0 : i32
    %c0_i32_0 = arith.constant 0 : i32
    %c0_i32_1 = arith.constant 0 : i32
    return %c0_i32, %c0_i32_0 : i32, i32
  }
  func.func @transform_2(%arg0: i32, %arg1: i32) -> (i32, i32, i32) {
    %c0_i32 = arith.constant 0 : i32
    %c0_i32_0 = arith.constant 0 : i32
    %c0_i32_1 = arith.constant 0 : i32
    %c0_i32_2 = arith.constant 0 : i32
    return %c0_i32, %c0_i32_0, %c0_i32_1 : i32, i32, i32
  }
  func.func @transform_3(%arg0: i32, %arg1: i32) -> (i32, i32, i32) {
    %c0_i32 = arith.constant 0 : i32
    %c0_i32_0 = arith.constant 0 : i32
    %c0_i32_1 = arith.constant 0 : i32
    %c0_i32_2 = arith.constant 0 : i32
    return %c0_i32, %c0_i32_0, %c0_i32_1 : i32, i32, i32
  }
  func.func @transform_4(%arg0: i32, %arg1: i32) -> (i32, i32, i32) {
    %c0_i32 = arith.constant 0 : i32
    %c0_i32_0 = arith.constant 0 : i32
    %c0_i32_1 = arith.constant 0 : i32
    %c0_i32_2 = arith.constant 0 : i32
    return %c0_i32, %c0_i32_0, %c0_i32_1 : i32, i32, i32
  }
  func.func @transform_5(%arg0: i32, %arg1: i32) -> (i32, i32, i32) {
    %c0_i32 = arith.constant 0 : i32
    %c0_i32_0 = arith.constant 0 : i32
    %c0_i32_1 = arith.constant 0 : i32
    %c0_i32_2 = arith.constant 0 : i32
    return %c0_i32, %c0_i32_0, %c0_i32_1 : i32, i32, i32
  }
  func.func @transform_6(%arg0: i32, %arg1: i32) -> (i32, i32, i32) {
    %c0_i32 = arith.constant 0 : i32
    %c0_i32_0 = arith.constant 0 : i32
    %c0_i32_1 = arith.constant 0 : i32
    %c0_i32_2 = arith.constant 0 : i32
    return %c0_i32, %c0_i32_0, %c0_i32_1 : i32, i32, i32
  }
  func.func @transform_7(%arg0: i32, %arg1: i32) -> (i32, i32, i32) {
    %c0_i32 = arith.constant 0 : i32
    %c0_i32_0 = arith.constant 0 : i32
    %c0_i32_1 = arith.constant 0 : i32
    %c0_i32_2 = arith.constant 0 : i32
    return %c0_i32, %c0_i32_0, %c0_i32_1 : i32, i32, i32
  }
  func.func @transform_8(%arg0: i32, %arg1: i32) -> (i32, i32, i32) {
    %c0_i32 = arith.constant 0 : i32
    %c0_i32_0 = arith.constant 0 : i32
    %c0_i32_1 = arith.constant 0 : i32
    %c0_i32_2 = arith.constant 0 : i32
    return %c0_i32, %c0_i32_0, %c0_i32_1 : i32, i32, i32
  }
  func.func @transform_9(%arg0: i32, %arg1: i32) -> (i32, i32, i32) {
    %c0_i32 = arith.constant 0 : i32
    %c0_i32_0 = arith.constant 0 : i32
    %c0_i32_1 = arith.constant 0 : i32
    %c0_i32_2 = arith.constant 0 : i32
    return %c0_i32, %c0_i32_0, %c0_i32_1 : i32, i32, i32
  }
  func.func @transform_10(%arg0: i32, %arg1: i32) -> (i32, i32, i32) {
    %c0_i32 = arith.constant 0 : i32
    %c0_i32_0 = arith.constant 0 : i32
    %c0_i32_1 = arith.constant 0 : i32
    %c0_i32_2 = arith.constant 0 : i32
    return %c0_i32, %c0_i32_0, %c0_i32_1 : i32, i32, i32
  }
  func.func @transform_11(%arg0: i32, %arg1: i32) -> (i32, i32, i32) {
    %c0_i32 = arith.constant 0 : i32
    %c0_i32_0 = arith.constant 0 : i32
    %c0_i32_1 = arith.constant 0 : i32
    %c0_i32_2 = arith.constant 0 : i32
    return %c0_i32, %c0_i32_0, %c0_i32_1 : i32, i32, i32
  }
  func.func @transform_12(%arg0: i32, %arg1: i32) -> (i32, i32, i32) {
    %c0_i32 = arith.constant 0 : i32
    %c0_i32_0 = arith.constant 0 : i32
    %c0_i32_1 = arith.constant 0 : i32
    %c0_i32_2 = arith.constant 0 : i32
    return %c0_i32, %c0_i32_0, %c0_i32_1 : i32, i32, i32
  }
  func.func @transform_13(%arg0: i32, %arg1: i32) -> (i32, i32, i32) {
    %c0_i32 = arith.constant 0 : i32
    %c0_i32_0 = arith.constant 0 : i32
    %c0_i32_1 = arith.constant 0 : i32
    %c0_i32_2 = arith.constant 0 : i32
    return %c0_i32, %c0_i32_0, %c0_i32_1 : i32, i32, i32
  }
  func.func @transform_14(%arg0: i32, %arg1: i32) -> (i32, i32) {
    %c0_i32 = arith.constant 0 : i32
    %c0_i32_0 = arith.constant 0 : i32
    %c0_i32_1 = arith.constant 0 : i32
    return %c0_i32, %c0_i32_0 : i32, i32
  }
  func.func @transform_15(%arg0: i32, %arg1: i32) -> (i32, i32) {
    %c0_i32 = arith.constant 0 : i32
    %c0_i32_0 = arith.constant 0 : i32
    %c0_i32_1 = arith.constant 0 : i32
    return %c0_i32, %c0_i32_0 : i32, i32
  }
  func.func @transform_16(%arg0: i32, %arg1: i32) -> (i32, i32, i32) {
    %c0_i32 = arith.constant 0 : i32
    %c0_i32_0 = arith.constant 0 : i32
    %c0_i32_1 = arith.constant 0 : i32
    return %arg0, %c0_i32, %c0_i32_0 : i32, i32, i32
  }
}

</mosaic_0001>

<bundles_post_ra>
// kernel: tpu_custom_call.1
= control target key start
LH: loop header
LB: loop body
LE: loop exit
PB: predicated region body
PF: predicated region fallthrough
CT: control target
= control target key end

     0   :  { %s10497_s0 = inlined_call_operand.hbm [shape: f32[4,128,128], index: 0, kind: input, shape index: {}]   ;;  %s10498_s1 = inlined_call_operand.hbm [shape: f32[128,128], index: 1, kind: input, shape index: {}]   ;;  %s10499_s2 = inlined_call_operand.hbm [shape: f32[2,1,128], index: 2, kind: input, shape index: {}]   ;;  %s10500_s3 = inlined_call_operand.hbm [shape: f32[2,1,128], index: 3, kind: input, shape index: {}]   ;;  %s10501_s4 = inlined_call_operand.hbm [shape: bf16[2,128,384], index: 4, kind: input, shape index: {}]   ;;  %s10502_s5 = inlined_call_operand.vmem [shape: f32[2,1,384], index: 5, kind: input, shape index: {}]   ;;  %s10503_s6 = inlined_call_operand.hbm [shape: bf16[2,128,128], index: 6, kind: input, shape index: {}]   ;;  %s10504_s7 = inlined_call_operand.vmem [shape: f32[2,1,128], index: 7, kind: input, shape index: {}]   ;;  %s10505_s8 = inlined_call_operand.vmem [shape: f32[2,1,128], index: 8, kind: input, shape index: {}]   ;;  %s10506_s9 = inlined_call_operand.vmem [shape: f32[2,1,128], index: 9, kind: input, shape index: {}]   ;;  %s10507_s10 = inlined_call_operand.hbm [shape: bf16[2,128,256], index: 10, kind: input, shape index: {}]   ;;  %s10508_s11 = inlined_call_operand.vmem [shape: f32[2,1,256], index: 11, kind: input, shape index: {}]   ;;  %s10509_s12 = inlined_call_operand.hbm [shape: bf16[2,256,128], index: 12, kind: input, shape index: {}]   ;;  %s10510_s13 = inlined_call_operand.vmem [shape: f32[2,1,128], index: 13, kind: input, shape index: {}]   ;;  %s10511_s14 = inlined_call_operand.vmem [shape: f32[1,128], index: 14, kind: input, shape index: {}]   ;;  %s10512_s15 = inlined_call_operand.vmem [shape: f32[1,128], index: 15, kind: input, shape index: {}]   ;;  %s10513_s16 = inlined_call_operand.hbm [shape: f32[4,128,128], index: 16, kind: output, shape index: {}]  }
   0x1   :  { %10560 = sst [smem:[#allocation52_spill]] %s10497_s0 }
   0x2   :  { %10561 = sst [smem:[#allocation53_spill]] %s10498_s1 }
   0x3   :  { %10562 = sst [smem:[#allocation54_spill]] %s10499_s2 }
   0x4   :  { %10563 = sst [smem:[#allocation55_spill]] %s10500_s3 }
   0x5   :  { %10564 = sst [smem:[#allocation56_spill]] %s10502_s5 }
   0x6   :  { %10565 = sst [smem:[#allocation57_spill]] %s10504_s7 }
   0x7   :  { %10566 = sst [smem:[#allocation58_spill]] %s10505_s8 }
   0x8   :  { %10567 = sst [smem:[#allocation59_spill]] %s10506_s9 }
   0x9   :  { %10568 = sst [smem:[#allocation60_spill]] %s10508_s11 }
   0xa   :  { %10569 = sst [smem:[#allocation61_spill]] %s10510_s13 }
   0xb   :  { %10570 = sst [smem:[#allocation62_spill]] %s10511_s14 }
   0xc   :  { %10571 = sst [smem:[#allocation63_spill]] %s10512_s15 }
   0xd   :  { %10572 = sst [smem:[#allocation64_spill]] %s10513_s16 }
   0xe   :  { %21 = vsyncpa [#allocation4], 0 }
   0xf   :  { %23 = vsyncpa [#allocation4 + $0x1], 0 }
  0x10   :  { %24 = vsyncpa [#allocation7], 0 }
  0x11   :  { %25 = vsyncpa [#allocation10], 0 }
  0x12   :  { %26 = vsyncpa [#allocation13], 0 }
  0x13   :  { %27 = vsyncpa [#allocation16], 0 }
  0x14   :  { %28 = vsyncpa [#allocation5], 0 }
  0x15   :  { %30 = vsyncpa [#allocation5 + $0x1], 0  ;;  %s7169_s21 = smov 0   ;;  %s7171_s22 = smov 0  }
  0x16   :  { %s7173_s23 = smov 0   ;;  %s7175_s24 = smov 0  }
  0x17   :  { %s7177_s25 = smov 0   ;;  %s7179_s26 = smov 0  }
  0x18   :  { %s7181_s27 = smov 0   ;;  %s7183_s28 = smov 0  }
  0x19 LB: > { %10573 = sst [smem:[#allocation24_spill]] %s7046_s24  ;;  %s10515_s29 = sadd.s32 4294967295, %s7062_s28   ;;  %s7062_s28 = sphi %s7183_s28, %s36_s28   ;;  %s7058_s27 = sphi %s7181_s27, %s10674_s27   ;;  %s7054_s26 = sphi %s7179_s26, %s10673_s26   ;;  %s7050_s25 = sphi %s7177_s25, %s10672_s25   ;;  %s7046_s24 = sphi %s7175_s24, %s10671_s24   ;;  %s7042_s23 = sphi %s7173_s23, %s10670_s23   ;;  %s7038_s22 = sphi %s7171_s22, %s10669_s22   ;;  %s7034_s21 = sphi %s7169_s21, %s10668_s21  }
  0x1a   : > { %10574 = sst [smem:[#allocation25_spill]] %s7050_s25  ;;  %p5352_p0 = scmp.ge.s32.totalorder %s7062_s28, 1 }
  0x1b   : > { %p7213_p1 = scmp.eq.s32.totalorder %s10515_s29, 0  ;;  %p420_p2 = scmp.lt.s32.totalorder %s7062_s28, 5 }
  0x1c   : > { %s7064_s17 = smov [#allocation6]   ;;  %s7065_s20 = smov [#allocation9]  }
  0x1d   : > { %s10575_s30 = scalar_select %p7213_p1, 1, 0 }
  0x1e   : > { %p7218_p3 = pnand %p5352_p0, %p420_p2  ;;  %s432_s18 = sshll.u32 %s7064_s17, 4  ;;  %s433_s18 = int_to_ptr.vmem [resolvable:$true] %s432_s18 }
  0x1f   : > { %s458_s29 = sshll.u32 %s7065_s20, 4  ;;  %s10579_s1 = sld [smem:[#allocation53_spill]]  ;;  %s459_s29 = int_to_ptr.vmem [resolvable:$true] %s458_s29 }
  0x20   : > { %s10576_s0 = scalar_select %p7218_p3, 1, 0 }
  0x21   : > { %p5966_p4 = pneg %p7218_p3 }
  0x22   : > { %10577 = sst [smem:[#allocation26_spill]] %s10576_s0 }
  0x23   : > { %p7226_p5 = pnand %p5966_p4, %p7213_p1 }
  0x25   : > { %s6722_s15 = scalar_lea.hbm %s10579_s1, 2048  ;;  %p7238_p7 = pneg %p7226_p5 }
  0x26   : > { %p6723_p6 = scmp.ne.s32.totalorder %s10579_s1, %s6722_s15  ;;  %p6729_p10 = scmp.lt.u32.totalorder %s6722_s15, %s10579_s1 }
  0x28   : > { %p6725_p8 = pnand %p7238_p7, %p6723_p6 }
  0x2a   : > { %p6726_p9 = pneg %p6725_p8 }
  0x2c   : > { %p6731_p11 = pnand %p6729_p10, %p6726_p9 }
  0x2e   : > { %6734 = shalt.err (!%p6731_p11)
}
  0x2f   : > { %s6735_s16 = scalar_lea.vmem %s433_s18, 2048  ;;  %p6743_p2 = scmp.lt.s32.totalorder %s433_s18, %s433_s18 }
  0x30   : > { %p6736_p12 = scmp.ne.s32.totalorder %s433_s18, %s6735_s16  ;;  %p6744_p4 = scmp.lt.s32.totalorder %s6735_s16, %s6735_s16 }
  0x32   : > { %p6738_p13 = pnand %p6736_p12, %p7238_p7  ;;  %p6745_p3 = por %p6744_p4, %p6743_p2 }
  0x34   : > { %p6739_p0 = pneg %p6738_p13 }
  0x36   : > { %p6746_p1 = pnand %p6745_p3, %p6739_p0 }
  0x38   : > { %6749 = shalt.err (!%p6746_p1)
}
  0x39   : > { %s10522_s13 = smov 128   ;;  %s10524_s14 = smov 8  }
  0x3a   : > { %5969 = dma.hbm_to_vmem [thread:$0]  (!%p7226_p5), %s10579_s1, 2048, %s433_s18, [#allocation7], %s10522_s13, %s10522_s13, %s10524_s14  }
  0x3b   : > { %s7068_s15 = smov [#allocation12]   ;;  %s10581_s3 = sld [smem:[#allocation55_spill]] }
  0x3c   : > { %s487_s25 = sshll.u32 %s7068_s15, 4  ;;  %s488_s25 = int_to_ptr.vmem [resolvable:$true] %s487_s25 }
  0x41   : > { %s6750_s8 = scalar_lea.hbm %s10581_s3, 32 }
  0x42   : > { %p6751_p1 = scmp.ne.s32.totalorder %s10581_s3, %s6750_s8  ;;  %p6757_p8 = scmp.lt.u32.totalorder %s6750_s8, %s10581_s3 }
  0x44   : > { %p6753_p3 = pnand %p6751_p1, %p7238_p7 }
  0x46   : > { %p6754_p6 = pneg %p6753_p3 }
  0x48   : > { %p6759_p9 = pnand %p6757_p8, %p6754_p6 }
  0x4a   : > { %6762 = shalt.err (!%p6759_p9)
}
  0x4b   : > { %s6763_s18 = scalar_lea.vmem %s459_s29, 32  ;;  %p6771_p13 = scmp.lt.s32.totalorder %s459_s29, %s459_s29 }
  0x4c   : > { %p6764_p10 = scmp.ne.s32.totalorder %s459_s29, %s6763_s18  ;;  %p6772_p0 = scmp.lt.s32.totalorder %s6763_s18, %s6763_s18 }
  0x4e   : > { %p6766_p11 = pnand %p6764_p10, %p7238_p7  ;;  %p6773_p2 = por %p6772_p0, %p6771_p13 }
  0x50   : > { %p6767_p12 = pneg %p6766_p11 }
  0x52   : > { %p6774_p4 = pnand %p6773_p2, %p6767_p12 }
  0x54   : > { %6777 = shalt.err (!%p6774_p4)
}
  0x55   : > { %s10526_s5 = smov 16   ;;  %s10527_s7 = smov 1  }
  0x56   : > { %5975 = dma.hbm_to_vmem [thread:$0]  (!%p7226_p5), %s10581_s3, 32, %s459_s29, [#allocation10], %s10526_s5, %s10526_s5, %s10527_s7  }
  0x57   : > { %s6778_s11 = scalar_lea.hbm %s10503_s6, 2048 }
  0x58   : > { %p6779_p1 = scmp.ne.s32.totalorder %s10503_s6, %s6778_s11  ;;  %p6785_p8 = scmp.lt.u32.totalorder %s6778_s11, %s10503_s6 }
  0x5a   : > { %p6781_p3 = pnand %p6779_p1, %p7238_p7 }
  0x5c   : > { %p6782_p6 = pneg %p6781_p3 }
  0x5e   : > { %p6787_p9 = pnand %p6785_p8, %p6782_p6 }
  0x60   : > { %6790 = shalt.err (!%p6787_p9)
}
  0x61   : > { %s6791_s8 = scalar_lea.vmem %s488_s25, 2048  ;;  %p6799_p13 = scmp.lt.s32.totalorder %s488_s25, %s488_s25 }
  0x62   : > { %p6792_p10 = scmp.ne.s32.totalorder %s488_s25, %s6791_s8  ;;  %p6800_p0 = scmp.lt.s32.totalorder %s6791_s8, %s6791_s8 }
  0x64   : > { %p6794_p11 = pnand %p6792_p10, %p7238_p7  ;;  %p6801_p2 = por %p6800_p0, %p6799_p13 }
  0x66   : > { %p6795_p12 = pneg %p6794_p11 }
  0x68   : > { %p6802_p4 = pnand %p6801_p2, %p6795_p12 }
  0x6a   : > { %6805 = shalt.err (!%p6802_p4)
}
  0x6b   : > { %s10528_s29 = smov 64   ;;  %s10529_s24 = smov 4  }
  0x6c   : > { %5981 = dma.hbm_to_vmem [thread:$0]  (!%p7226_p5), %s10503_s6, 2048, %s488_s25, [#allocation13], %s10528_s29, %s10528_s29, %s10529_s24  }
  0x6d   : > { %s7073_s11 = smov [#allocation8]   ;;  %s7074_s20 = smov [#allocation11]  }
  0x6e   : > { %s445_s15 = sshll.u32 %s7073_s11, 4  ;;  %s471_s16 = sshll.u32 %s7074_s20, 4  ;;  %s446_s15 = int_to_ptr.vmem [resolvable:$true] %s445_s15  ;;  %s472_s16 = int_to_ptr.vmem [resolvable:$true] %s471_s16 }
  0x6f   : > { %s10582_s2 = sld [smem:[#allocation54_spill]] }
  0x75   : > { %s6806_s13 = scalar_lea.hbm %s10582_s2, 32 }
  0x76   : > { %p6807_p1 = scmp.ne.s32.totalorder %s10582_s2, %s6806_s13  ;;  %p6813_p8 = scmp.lt.u32.totalorder %s6806_s13, %s10582_s2 }
  0x78   : > { %p6809_p3 = pnand %p6807_p1, %p7238_p7 }
  0x7a   : > { %p6810_p6 = pneg %p6809_p3 }
  0x7c   : > { %p6815_p9 = pnand %p6813_p8, %p6810_p6 }
  0x7e   : > { %6818 = shalt.err (!%p6815_p9)
}
  0x7f   : > { %s6819_s25 = scalar_lea.vmem %s446_s15, 32  ;;  %p6827_p13 = scmp.lt.s32.totalorder %s446_s15, %s446_s15 }
  0x80   : > { %p6820_p10 = scmp.ne.s32.totalorder %s446_s15, %s6819_s25  ;;  %p6828_p0 = scmp.lt.s32.totalorder %s6819_s25, %s6819_s25 }
  0x82   : > { %p6822_p11 = pnand %p6820_p10, %p7238_p7  ;;  %p6829_p2 = por %p6828_p0, %p6827_p13 }
  0x84   : > { %p6823_p12 = pneg %p6822_p11 }
  0x86   : > { %p6830_p4 = pnand %p6829_p2, %p6823_p12 }
  0x88   : > { %6833 = shalt.err (!%p6830_p4)
}
  0x89   : > { %s10583_s14 = smov 1   ;;  %s10584_s5 = smov 16  }
  0x8a   : > { %5972 = dma.hbm_to_vmem [thread:$0]  (!%p7226_p5), %s10582_s2, 32, %s446_s15, [#allocation7], %s10584_s5, %s10584_s5, %s10583_s14  }
  0x8b   : > { %s6834_s9 = scalar_lea.hbm %s10501_s4, 6144 }
  0x8c   : > { %p6835_p1 = scmp.ne.s32.totalorder %s10501_s4, %s6834_s9  ;;  %p6841_p8 = scmp.lt.u32.totalorder %s6834_s9, %s10501_s4 }
  0x8e   : > { %p6837_p3 = pnand %p6835_p1, %p7238_p7 }
  0x90   : > { %p6838_p6 = pneg %p6837_p3 }
  0x92   : > { %p6843_p9 = pnand %p6841_p8, %p6838_p6 }
  0x94   : > { %6846 = shalt.err (!%p6843_p9)
}
  0x95   : > { %s6847_s25 = scalar_lea.vmem %s472_s16, 6144  ;;  %p6855_p13 = scmp.lt.s32.totalorder %s472_s16, %s472_s16 }
  0x96   : > { %p6848_p10 = scmp.ne.s32.totalorder %s472_s16, %s6847_s25  ;;  %p6856_p0 = scmp.lt.s32.totalorder %s6847_s25, %s6847_s25 }
  0x98   : > { %p6850_p11 = pnand %p6848_p10, %p7238_p7  ;;  %p6857_p2 = por %p6856_p0, %p6855_p13 }
  0x9a   : > { %p6851_p12 = pneg %p6850_p11 }
  0x9c   : > { %p6858_p4 = pnand %p6857_p2, %p6851_p12 }
  0x9e   : > { %6861 = shalt.err (!%p6858_p4)
}
  0x9f   : > { %s7075_s15 = smov 192   ;;  %s7076_s14 = smov 12  }
  0xa0   : > { %5978 = dma.hbm_to_vmem [thread:$0]  (!%p7226_p5), %s10501_s4, 6144, %s472_s16, [#allocation10], %s7075_s15, %s7075_s15, %s7076_s14  }
  0xa1   : > { %s7077_s13 = smov [#allocation14]   ;;  %s7078_s0 = smov [#allocation15]  }
  0xa2   : > { %s509_s7 = sshll.u32 %s7077_s13, 4  ;;  %s525_s9 = sshll.u32 %s7078_s0, 4  ;;  %s510_s7 = int_to_ptr.vmem [resolvable:$true] %s509_s7  ;;  %s526_s9 = int_to_ptr.vmem [resolvable:$true] %s525_s9 }
  0xa3   : > { %s6862_s18 = scalar_lea.hbm %s10507_s10, 4096 }
  0xa4   : > { %p6863_p1 = scmp.ne.s32.totalorder %s10507_s10, %s6862_s18  ;;  %p6869_p8 = scmp.lt.u32.totalorder %s6862_s18, %s10507_s10 }
  0xa6   : > { %p6865_p3 = pnand %p6863_p1, %p7238_p7 }
  0xa8   : > { %p6866_p6 = pneg %p6865_p3 }
  0xaa   : > { %p6871_p9 = pnand %p6869_p8, %p6866_p6 }
  0xac   : > { %6874 = shalt.err (!%p6871_p9)
}
  0xad   : > { %s6875_s16 = scalar_lea.vmem %s510_s7, 4096  ;;  %p6883_p13 = scmp.lt.s32.totalorder %s510_s7, %s510_s7 }
  0xae   : > { %p6876_p10 = scmp.ne.s32.totalorder %s510_s7, %s6875_s16  ;;  %p6884_p0 = scmp.lt.s32.totalorder %s6875_s16, %s6875_s16 }
  0xb0   : > { %p6878_p11 = pnand %p6876_p10, %p7238_p7  ;;  %p6885_p2 = por %p6884_p0, %p6883_p13 }
  0xb2   : > { %p6879_p12 = pneg %p6878_p11 }
  0xb4   : > { %p6886_p4 = pnand %p6885_p2, %p6879_p12 }
  0xb6   : > { %6889 = shalt.err (!%p6886_p4)
}
  0xb7   : > { %s10585_s15 = smov 8   ;;  %s10586_s14 = smov 128  }
  0xb8   : > { %5984 = dma.hbm_to_vmem [thread:$0]  (!%p7226_p5), %s10507_s10, 4096, %s510_s7, [#allocation13], %s10586_s14, %s10586_s14, %s10585_s15  }
  0xb9   : > { %s6890_s13 = scalar_lea.hbm %s10509_s12, 4096 }
  0xba   : > { %p6891_p1 = scmp.ne.s32.totalorder %s10509_s12, %s6890_s13  ;;  %p6897_p8 = scmp.lt.u32.totalorder %s6890_s13, %s10509_s12 }
  0xbc   : > { %p6893_p3 = pnand %p6891_p1, %p7238_p7 }
  0xbe   : > { %p6894_p6 = pneg %p6893_p3 }
  0xc0   : > { %p6899_p9 = pnand %p6897_p8, %p6894_p6 }
  0xc2   : > { %6902 = shalt.err (!%p6899_p9)
}
  0xc3   : > { %s6903_s8 = scalar_lea.vmem %s526_s9, 4096  ;;  %p6911_p13 = scmp.lt.s32.totalorder %s526_s9, %s526_s9 }
  0xc4   : > { %p6904_p10 = scmp.ne.s32.totalorder %s526_s9, %s6903_s8  ;;  %p6912_p0 = scmp.lt.s32.totalorder %s6903_s8, %s6903_s8 }
  0xc6   : > { %p6906_p11 = pnand %p6904_p10, %p7238_p7  ;;  %p6913_p2 = por %p6912_p0, %p6911_p13 }
  0xc8   : > { %p6907_p12 = pneg %p6906_p11 }
  0xca   : > { %p6914_p4 = pnand %p6913_p2, %p6907_p12 }
  0xcc   : > { %6917 = shalt.err (!%p6914_p4)
}
  0xcd   : > { %s10587_s7 = smov 4   ;;  %s10588_s25 = smov 64  }
  0xce   : > { %5987 = dma.hbm_to_vmem [thread:$0]  (!%p7226_p5), %s10509_s12, 4096, %s526_s9, [#allocation16], %s10588_s25, %s10588_s25, %s10587_s7  }
  0xcf   : > { %s5351_s19 = sadd.s32 4294967294, %s7062_s28   ;;  %s45_s17 = sadd.s32 1, %s7054_s26 }
  0xd0   : > { %s48_s24 = sadd.s32 1, %s7058_s27  ;;  %p46_p7 = scmp.ge.s32.totalorder %s45_s17, 2 }
  0xd1   : > { %s55_s5 = sadd.s32 1, %s7042_s23  ;;  %p62_p1 = scmp.ne.s32.totalorder %s7042_s23, %s7038_s22 }
  0xd2   : > { %p63_p3 = scmp.eq.s32.totalorder %s7062_s28, 0  ;;  %s10676_s17 = smov (%p46_p7, %s45_s17), 0 }
  0xd3   : > { %s10678_s24 = smov (!%p46_p7, %s48_s24), %s7058_s27  ;;  %p68_p5 = scmp.ne.s32.totalorder %s7038_s22, %s7034_s21 }
  0xd4   : > { %p7390_p6 = por %p63_p3, %p62_p1  ;;  %p50_p8 = scmp.ge.s32.totalorder %s10678_s24, 2 }
  0xd5   : > { %s10590_s9 = sadd.s32 4294967295, %s7062_s28   ;;  %p10591_p10 = scmp.ne.s32.totalorder %s10575_s30, 0 }
  0xd6   : > { %p407_p9 = scmp.eq.s32.totalorder %s10590_s9, 3  ;;  %p413_p12 = scmp.eq.s32.totalorder %s5351_s19, 3 }
  0xd7   : > { %p7400_p11 = por %p10591_p10, %p68_p5  ;;  %s10680_s24 = smov (%p50_p8, %s10678_s24), 0 }
  0xd8   : > { %p7406_p13 = por %p407_p9, %p62_p1  ;;  %p7410_p0 = por %p413_p12, %p68_p5 }
  0xd9   : > { %s52_s20 = ssub.s32 %s7058_s27, %s10680_s24  ;;  %p6003_p2 = scmp.lt.s32.totalorder %s7062_s28, 4 }
  0xda   : > { %s10593_s0 = scalar_select %p7406_p13, 1, 0 }
  0xdb   : > { %s10594_s11 = scalar_select %p7410_p0, 1, 0 }
  0xdc   : > { %p53_p4 = scmp.eq.s32.totalorder %s52_s20, 0  ;;  %s548_s18 = sand.u32 1, %s7042_s23  }
  0xdd   : > { %s5361_s8 = sshll.u32 %s548_s18, 8  ;;  %s5463_s25 = sshll.u32 %s7058_s27, 12 }
  0xde   : > { %s7419_s7 = scalar_select %p53_p4, %s7042_s23, %s55_s5  }
  0xdf   : > { %s10595_s19 = sld [smem:[#allocation52_spill]]  ;;  %s552_s2 = scalar_lea.vmem [#allocation3], %s5361_s8 }
  0xe0   : > { %s560_s3 = sshll.u32 %s552_s2, 4  ;;  %p7431_p7 = pnand %p6003_p2, %p7390_p6  ;;  %s7427_s3 = int_to_ptr.vmem [resolvable:$true] %s560_s3 }
  0xe1   : > { %s7435_s5 = scalar_lea.sflag [#allocation4], %s548_s18 }
  0xe2   : > { %p6920_p3 = pneg %p7431_p7 }
  0xe5   : > { %s7425_s9 = scalar_lea.hbm %s10595_s19, %s5463_s25  ;;  %s6923_s1 = scalar_lea.hbm %s10595_s19, 8192 }
  0xe6   : > { %s6918_s16 = scalar_lea.hbm %s7425_s9, 4096  ;;  %p6924_p6 = scmp.lt.u32.totalorder %s7425_s9, %s10595_s19 }
  0xe7   : > { %p6919_p1 = scmp.ne.s32.totalorder %s7425_s9, %s6918_s16  ;;  %p6925_p9 = scmp.lt.u32.totalorder %s6923_s1, %s6918_s16 }
  0xe8   : > { %p6927_p12 = scmp.lt.u32.totalorder %s6918_s16, %s7425_s9 }
  0xe9   : > { %p6921_p5 = pnand %p6920_p3, %p6919_p1  ;;  %p6926_p10 = por %p6925_p9, %p6924_p6 }
  0xeb   : > { %p6922_p8 = pneg %p6921_p5  ;;  %p6928_p2 = por %p6927_p12, %p6926_p10 }
  0xed   : > { %p6929_p4 = pnand %p6928_p2, %p6922_p8 }
  0xef   : > { %6932 = shalt.err (!%p6929_p4)
}
  0xf0   : > { %s6933_s18 = scalar_lea.vmem %s7427_s3, 4096  ;;  %s7079_s2 = smov [#allocation3]  }
  0xf1   : > { %p6934_p1 = scmp.ne.s32.totalorder %s7427_s3, %s6933_s18  ;;  %s6938_s8 = sshll.u32 %s7079_s2, 4  ;;  %s6939_s8 = int_to_ptr.vmem [resolvable:$false] %s6938_s8 }
  0xf2   : > { %s6940_s25 = scalar_lea.vmem %s6939_s8, 8192  ;;  %p6941_p13 = scmp.lt.s32.totalorder %s7427_s3, %s6939_s8 }
  0xf3   : > { %p6936_p5 = pnand %p6934_p1, %p6920_p3  ;;  %p6942_p6 = scmp.lt.s32.totalorder %s6940_s25, %s6933_s18 }
  0xf5   : > { %p6937_p0 = pneg %p6936_p5  ;;  %p6943_p9 = por %p6942_p6, %p6941_p13 }
  0xf7   : > { %p6944_p10 = pnand %p6943_p9, %p6937_p0 }
  0xf9   : > { %6947 = shalt.err (!%p6944_p10)
}
  0xfa   : > { %5991 = dma.hbm_to_vmem [thread:$0]  (!%p7431_p7), %s7425_s9, 4096, %s7427_s3, %s7435_s5, %s10586_s14, %s10586_s14, %s10585_s15  }
  0xfb   : > { %s10597_s16 = sld [smem:[#allocation26_spill]] }
 0x101   : > { %p10598_p3 = scmp.ne.s32.totalorder %s10597_s16, 0 }
 0x103   : > { %572 = sbr.rel (%p10598_p3) target bundleno = 3212 (0xc8c), region = 84 }
 0x10a   : > { %s7469_s1 = sand.u32 1, %s7038_s22  }
 0x10b   : > { %s5366_s29 = sshll.u32 %s7469_s1, 8  ;;  %s575_s18 = scalar_lea.sflag [#allocation4], %s7469_s1 }
 0x10c   : > { %s7473_s2 = scalar_lea.vmem [#allocation3], %s5366_s29 }
 0x10d   : > { %7009 = dma.done.wait (%p7400_p11), %s575_s18, 4096  }
 0x10e   : > { %7011 = vsyncadd (%p7400_p11), %s575_s18, 4294963200  ;;  %p10599_p13 = scmp.ne.s32.totalorder %s10575_s30, 0 }
 0x110   : > { %7013 = dma.done.wait (%p10599_p13), [#allocation7], 2080  }
 0x111   : > { %7015 = vsyncadd (%p10599_p13), [#allocation7], 4294965216 }
 0x112   : > { %7017 = dma.done.wait (%p10599_p13), [#allocation10], 6176  }
 0x113   : > { %7019 = vsyncadd (%p10599_p13), [#allocation10], 4294961120 }
 0x114   : > { %7021 = dma.done.wait (%p10599_p13), [#allocation13], 6144  }
 0x115   : > { %7023 = vsyncadd (%p10599_p13), [#allocation13], 4294961152 }
 0x116   : > { %7025 = dma.done.wait (%p10599_p13), [#allocation16], 4096  }
 0x117   : > { %7027 = vsyncadd (%p10599_p13), [#allocation16], 4294963200  ;;  %s7495_s3 = scalar_lea.vmem [#allocation17], %s5366_s29  ;;  %s10600_s15 = sld [smem:[#allocation24_spill]] }
 0x11d   : > { %p5375_p11 = scmp.ne.s32.totalorder %s10600_s15, 0 }
 0x11e   : > { %v662_v0 = vld [vmem:[%s7473_s2] sm:$0xff] (!%p5375_p11)  ;;  %v663_v1 = vld [vmem:[%s7473_s2 + $0x8] sm:$0xff] (!%p5375_p11)  ;;  %v664_v2 = vld [vmem:[%s7473_s2 + $0x10] sm:$0xff] (!%p5375_p11) }
 0x11f   : > { %661 = sbr.rel (%p5375_p11) target bundleno = 303 (0x12f), region = 120  ;;  %694 = vst [vmem:[#allocation2] sm:$0xff] (!%p5375_p11), %v662_v0  ;;  %695 = vst [vmem:[#allocation2 + $0x8] sm:$0xff] (!%p5375_p11), %v663_v1  ;;  %v665_v3 = vld [vmem:[%s7473_s2 + $0x18] sm:$0xff] (!%p5375_p11)  ;;  %v666_v4 = vld [vmem:[%s7473_s2 + $0x20] sm:$0xff] (!%p5375_p11) }
 0x120   : > { %696 = vst [vmem:[#allocation2 + $0x10] sm:$0xff] (!%p5375_p11), %v664_v2  ;;  %v667_v5 = vld [vmem:[%s7473_s2 + $0x28] sm:$0xff] (!%p5375_p11)  ;;  %697 = vst [vmem:[#allocation2 + $0x18] sm:$0xff] (!%p5375_p11), %v665_v3  ;;  %v668_v6 = vld [vmem:[%s7473_s2 + $0x30] sm:$0xff] (!%p5375_p11) }
 0x121   : > { %698 = vst [vmem:[#allocation2 + $0x20] sm:$0xff] (!%p5375_p11), %v666_v4  ;;  %699 = vst [vmem:[#allocation2 + $0x28] sm:$0xff] (!%p5375_p11), %v667_v5  ;;  %v669_v7 = vld [vmem:[%s7473_s2 + $0x38] sm:$0xff] (!%p5375_p11)  ;;  %v670_v8 = vld [vmem:[%s7473_s2 + $0x40] sm:$0xff] (!%p5375_p11) }
 0x122   : > { %700 = vst [vmem:[#allocation2 + $0x30] sm:$0xff] (!%p5375_p11), %v668_v6  ;;  %701 = vst [vmem:[#allocation2 + $0x38] sm:$0xff] (!%p5375_p11), %v669_v7  ;;  %v671_v9 = vld [vmem:[%s7473_s2 + $0x48] sm:$0xff] (!%p5375_p11)  ;;  %v672_v10 = vld [vmem:[%s7473_s2 + $0x50] sm:$0xff] (!%p5375_p11) }
 0x123   : > { %702 = vst [vmem:[#allocation2 + $0x40] sm:$0xff] (!%p5375_p11), %v670_v8  ;;  %v673_v11 = vld [vmem:[%s7473_s2 + $0x58] sm:$0xff] (!%p5375_p11)  ;;  %703 = vst [vmem:[#allocation2 + $0x48] sm:$0xff] (!%p5375_p11), %v671_v9  ;;  %v674_v12 = vld [vmem:[%s7473_s2 + $0x60] sm:$0xff] (!%p5375_p11) }
 0x124   : > { %704 = vst [vmem:[#allocation2 + $0x50] sm:$0xff] (!%p5375_p11), %v672_v10  ;;  %705 = vst [vmem:[#allocation2 + $0x58] sm:$0xff] (!%p5375_p11), %v673_v11  ;;  %v675_v13 = vld [vmem:[%s7473_s2 + $0x68] sm:$0xff] (!%p5375_p11)  ;;  %v676_v14 = vld [vmem:[%s7473_s2 + $0x70] sm:$0xff] (!%p5375_p11) }
 0x125   : > { %706 = vst [vmem:[#allocation2 + $0x60] sm:$0xff] (!%p5375_p11), %v674_v12  ;;  %707 = vst [vmem:[#allocation2 + $0x68] sm:$0xff] (!%p5375_p11), %v675_v13  ;;  %v677_v15 = vld [vmem:[%s7473_s2 + $0x78] sm:$0xff] (!%p5375_p11)  ;;  %v678_v16 = vld [vmem:[%s7473_s2 + $0x80] sm:$0xff] (!%p5375_p11) }
 0x126   : > { %708 = vst [vmem:[#allocation2 + $0x70] sm:$0xff] %v676_v14  ;;  %v679_v17 = vld [vmem:[%s7473_s2 + $0x88] sm:$0xff]  ;;  %709 = vst [vmem:[#allocation2 + $0x78] sm:$0xff] %v677_v15  ;;  %v680_v18 = vld [vmem:[%s7473_s2 + $0x90] sm:$0xff] }
 0x127   : > { %710 = vst [vmem:[#allocation2 + $0x80] sm:$0xff] %v678_v16  ;;  %711 = vst [vmem:[#allocation2 + $0x88] sm:$0xff] %v679_v17  ;;  %v681_v19 = vld [vmem:[%s7473_s2 + $0x98] sm:$0xff]  ;;  %v682_v20 = vld [vmem:[%s7473_s2 + $0xa0] sm:$0xff] }
 0x128   : > { %712 = vst [vmem:[#allocation2 + $0x90] sm:$0xff] %v680_v18  ;;  %713 = vst [vmem:[#allocation2 + $0x98] sm:$0xff] %v681_v19  ;;  %v683_v21 = vld [vmem:[%s7473_s2 + $0xa8] sm:$0xff]  ;;  %v684_v22 = vld [vmem:[%s7473_s2 + $0xb0] sm:$0xff] }
 0x129   : > { %714 = vst [vmem:[#allocation2 + $0xa0] sm:$0xff] %v682_v20  ;;  %v685_v23 = vld [vmem:[%s7473_s2 + $0xb8] sm:$0xff]  ;;  %715 = vst [vmem:[#allocation2 + $0xa8] sm:$0xff] %v683_v21  ;;  %v686_v24 = vld [vmem:[%s7473_s2 + $0xc0] sm:$0xff] }
 0x12a   : > { %716 = vst [vmem:[#allocation2 + $0xb0] sm:$0xff] %v684_v22  ;;  %717 = vst [vmem:[#allocation2 + $0xb8] sm:$0xff] %v685_v23  ;;  %v687_v25 = vld [vmem:[%s7473_s2 + $0xc8] sm:$0xff]  ;;  %v688_v26 = vld [vmem:[%s7473_s2 + $0xd0] sm:$0xff] }
 0x12b   : > { %718 = vst [vmem:[#allocation2 + $0xc0] sm:$0xff] %v686_v24  ;;  %719 = vst [vmem:[#allocation2 + $0xc8] sm:$0xff] %v687_v25  ;;  %v689_v27 = vld [vmem:[%s7473_s2 + $0xd8] sm:$0xff]  ;;  %v690_v28 = vld [vmem:[%s7473_s2 + $0xe0] sm:$0xff] }
 0x12c   : > { %720 = vst [vmem:[#allocation2 + $0xd0] sm:$0xff] %v688_v26  ;;  %v691_v29 = vld [vmem:[%s7473_s2 + $0xe8] sm:$0xff]  ;;  %721 = vst [vmem:[#allocation2 + $0xd8] sm:$0xff] %v689_v27  ;;  %v692_v30 = vld [vmem:[%s7473_s2 + $0xf0] sm:$0xff] }
 0x12d   : > { %722 = vst [vmem:[#allocation2 + $0xe0] sm:$0xff] %v690_v28  ;;  %723 = vst [vmem:[#allocation2 + $0xe8] sm:$0xff] %v691_v29  ;;  %v693_v31 = vld [vmem:[%s7473_s2 + $0xf8] sm:$0xff] }
 0x12e   : > { %724 = vst [vmem:[#allocation2 + $0xf0] sm:$0xff] %v692_v30  ;;  %725 = vst [vmem:[#allocation2 + $0xf8] sm:$0xff] %v693_v31 }
 0x12f PF: > { %v726_v32 = vld [vmem:[#allocation2] sm:$0xff]  ;;  %v727_v34 = vld [vmem:[#allocation2 + $0x8] sm:$0xff]  ;;  %v7569_v50 = vld [vmem:[#allocation2 + $0x90] sm:$0xff]  ;;  %s10601_s30 = sld [smem:[#allocation24_spill]]  ;;  %s10602_s16 = sld [smem:[#allocation56_spill]] }
 0x130   : > { %v728_v33 = vld [vmem:[#allocation2 + $0x10] sm:$0xff]  ;;  %778 = vadd.xlane.f32.xlu0 %v726_v32  ;;  %v729_v35 = vld [vmem:[#allocation2 + $0x18] sm:$0xff]  ;;  %v7563_v48 = vld [vmem:[#allocation2 + $0x80] sm:$0xff] }
 0x131   : > { %782 = vadd.xlane.f32.xlu1 %v728_v33  ;;  %v730_v36 = vld [vmem:[#allocation2 + $0x20] sm:$0xff]  ;;  %v7530_v37 = vld [vmem:[#allocation2 + $0x28] sm:$0xff]  ;;  %v7571_v51 = vld [vmem:[#allocation2 + $0x98] sm:$0xff] }
 0x132   : > { %v7533_v38 = vld [vmem:[#allocation2 + $0x30] sm:$0xff]  ;;  %v7535_v39 = vld [vmem:[#allocation2 + $0x38] sm:$0xff]  ;;  %v7565_v49 = vld [vmem:[#allocation2 + $0x88] sm:$0xff] }
 0x133   : > { %v7539_v40 = vld [vmem:[#allocation2 + $0x40] sm:$0xff]  ;;  %v7541_v41 = vld [vmem:[#allocation2 + $0x48] sm:$0xff]  ;;  %v7599_v11 = vld [vmem:[#allocation2 + $0xb0] sm:$0xff] }
 0x134   : > { %780 = vadd.xlane.f32.xlu0 %v727_v34  ;;  %v7545_v42 = vld [vmem:[#allocation2 + $0x50] sm:$0xff]  ;;  %v7547_v43 = vld [vmem:[#allocation2 + $0x58] sm:$0xff]  ;;  %v7583_v0 = vld [vmem:[#allocation2 + $0xa0] sm:$0xff] }
 0x135   : > { %784 = vadd.xlane.f32.xlu1 %v729_v35  ;;  %v7551_v44 = vld [vmem:[#allocation2 + $0x60] sm:$0xff]  ;;  %v7553_v45 = vld [vmem:[#allocation2 + $0x68] sm:$0xff]  ;;  %v7607_v16 = vld [vmem:[#allocation2 + $0xb8] sm:$0xff]  ;;  %s5464_s14 = smul.u32 192, %s10601_s30  ;;  %s774_s9 = scalar_lea.vmem [#allocation8], %s10601_s30 }
 0x136   : > { %v7557_v46 = vld [vmem:[#allocation2 + $0x70] sm:$0xff]  ;;  %v7559_v47 = vld [vmem:[#allocation2 + $0x78] sm:$0xff]  ;;  %v7592_v6 = vld [vmem:[#allocation2 + $0xa8] sm:$0xff]  ;;  %s776_s20 = scalar_lea.vmem [#allocation9], %s10601_s30  ;;  %s1482_s5 = smul.u32 3, %s10601_s30 }
 0x137   : > { %v7615_v21 = vld [vmem:[#allocation2 + $0xc0] sm:$0xff]  ;;  %v7618_v23 = vld [vmem:[#allocation2 + $0xc8] sm:$0xff]  ;;  %s7626_s13 = scalar_lea.vmem [#allocation11], %s5464_s14  ;;  %v7630_v30 = vld [vmem:[#allocation2 + $0xd0] sm:$0xff]  ;;  %s5465_s18 = sshll.u32 %s10601_s30, 6 }
 0x138   : > { %786 = vadd.xlane.f32.xlu0 %v730_v36  ;;  %v6094_v27 = vld [vmem:[%s7626_s13 + $0x4] ss:$12 sps:$4 sm:$0xff]   ;;  %v6096_v29 = vld [vmem:[%s7626_s13] ss:$12 sps:$4 sm:$0xff]   ;;  %s1483_s29 = scalar_lea.vmem %s10602_s16, %s1482_s5  ;;  %s2773_s2 = scalar_lea.vmem [#allocation12], %s5465_s18 }
 0x139   : > { %788 = vadd.xlane.f32.xlu1 %v7530_v37  ;;  %1629 = vmatprep.subr.bf16.mxu0 %v6094_v27  ;;  %s10630_s14 = sld [smem:[#allocation59_spill]]  ;;  %p5453_p0 = scmp.ne.s32.totalorder %s10601_s30, 1 }
 0x13a   : > { %5918 = vmatprep.subr.bf16.mxu1 %v6094_v27  ;;  %1630 = vmatpush1.bf16.msra.mxu0 %v6096_v29 }
 0x13b   : > { %5926 = vmatpush1.bf16.msra.mxu1 %v6096_v29 }
 0x13c   : > { %790 = vadd.xlane.f32.xlu0 %v7533_v38 }
 0x13d   : > { %792 = vadd.xlane.f32.xlu1 %v7535_v39 }
 0x140   : > { %794 = vadd.xlane.f32.xlu0 %v7539_v40 }
 0x141   : > { %796 = vadd.xlane.f32.xlu1 %v7541_v41 }
 0x144   : > { %798 = vadd.xlane.f32.xlu0 %v7545_v42 }
 0x145   : > { %800 = vadd.xlane.f32.xlu1 %v7547_v43 }
 0x148   : > { %802 = vadd.xlane.f32.xlu0 %v7551_v44 }
 0x149   : > { %804 = vadd.xlane.f32.xlu1 %v7553_v45 }
 0x14c   : > { %806 = vadd.xlane.f32.xlu0 %v7557_v46 }
 0x14d   : > { %808 = vadd.xlane.f32.xlu1 %v7559_v47 }
 0x150   : > { %810 = vadd.xlane.f32.xlu0 %v7563_v48 }
 0x151   : > { %812 = vadd.xlane.f32.xlu1 %v7565_v49 }
 0x154   : > { %814 = vadd.xlane.f32.xlu0 %v7569_v50 }
 0x155   : > { %816 = vadd.xlane.f32.xlu1 %v7571_v51 }
 0x1bd   : > { %v779_v52 = vpop.xlane.xlu0 %778 }
 0x1be   : > { %v783_v53 = vpop.xlane.xlu1 %782  ;;  %v843_v54 = vmul.f32 0.0078125, %v779_v52 }
 0x1bf   : > { %v845_v56 = vmul.f32 0.0078125, %v783_v53 }
 0x1c0   : > { %v7575_v55 = vsub.f32 %v726_v32, %v843_v54 }
 0x1c1   : > { %v781_v57 = vpop.xlane.xlu0 %780  ;;  %v7581_v63 = vsub.f32 %v728_v33, %v845_v56 }
 0x1c2   : > { %v785_v58 = vpop.xlane.xlu1 %784  ;;  %v844_v59 = vmul.f32 0.0078125, %v781_v57  ;;  %v907_v60 = vmul.f32 %v7575_v55, %v7575_v55  ;;  %v6102_v57 = vld [vmem:[%s7626_s13 + $0x30] ss:$12 sps:$4 sm:$0xff]  }
 0x1c3   : > { %v846_v62 = vmul.f32 0.0078125, %v785_v58  ;;  %v909_v3 = vmul.f32 %v7581_v63, %v7581_v63 }
 0x1c4   : > { %939 = vadd.xlane.f32.xlu0 %v907_v60  ;;  %v7579_v61 = vsub.f32 %v727_v34, %v844_v59 }
 0x1c5   : > { %v787_v1 = vpop.xlane.xlu0 %786  ;;  %v7590_v5 = vsub.f32 %v729_v35, %v846_v62  ;;  %v6097_v35 = vld [vmem:[%s7626_s13 + $0x1c] ss:$12 sps:$4 sm:$0xff]  }
 0x1c6   : > { %v908_v2 = vmul.f32 %v7579_v61, %v7579_v61  ;;  %v847_v4 = vmul.f32 0.0078125, %v787_v1  ;;  %v789_v7 = vpop.xlane.xlu1 %788  ;;  %1631 = vmatprep.subr.bf16.mxu0 %v6097_v35  ;;  %5919 = vmatprep.subr.bf16.mxu1 %v6097_v35  ;;  %v6103_v1 = vld [vmem:[%s7626_s13 + $0x4c] ss:$12 sps:$4 sm:$0xff]   ;;  %v6114_v35 = vld [vmem:[%s7626_s13 + $0x90] ss:$12 sps:$4 sm:$0xff]  }
 0x1c7   : > { %v910_v8 = vmul.f32 %v7590_v5, %v7590_v5  ;;  %v848_v9 = vmul.f32 0.0078125, %v789_v7  ;;  %v7666_v7 = vld [vmem:[#allocation2 + $0xe8] sm:$0xff] }
 0x1c8   : > { %818 = vadd.xlane.f32.xlu0 %v7583_v0  ;;  %941 = vadd.xlane.f32.xlu1 %v908_v2  ;;  %v7597_v10 = vsub.f32 %v730_v36, %v847_v4  ;;  %v6105_v2 = vld [vmem:[%s7626_s13 + $0x48] ss:$12 sps:$4 sm:$0xff]  }
 0x1c9   : > { %v791_v12 = vpop.xlane.xlu0 %790  ;;  %v7605_v15 = vsub.f32 %v7530_v37, %v848_v9  ;;  %v6099_v37 = vld [vmem:[%s7626_s13 + $0x18] ss:$12 sps:$4 sm:$0xff]  }
 0x1ca   : > { %v911_v13 = vmul.f32 %v7597_v10, %v7597_v10  ;;  %v849_v14 = vmul.f32 0.0078125, %v791_v12  ;;  %v793_v17 = vpop.xlane.xlu1 %792  ;;  %1632 = vmatpush1.bf16.msra.mxu0 %v6099_v37  ;;  %5927 = vmatpush1.bf16.msra.mxu1 %v6099_v37  ;;  %v6106_v9 = vld [vmem:[%s7626_s13 + $0x64] ss:$12 sps:$4 sm:$0xff]   ;;  %v6108_v12 = vld [vmem:[%s7626_s13 + $0x60] ss:$12 sps:$4 sm:$0xff]  }
 0x1cb   : > { %v912_v18 = vmul.f32 %v7605_v15, %v7605_v15  ;;  %v850_v19 = vmul.f32 0.0078125, %v793_v17 }
 0x1cc   : > { %943 = vadd.xlane.f32.xlu0 %v909_v3  ;;  %820 = vadd.xlane.f32.xlu1 %v7592_v6  ;;  %v7613_v20 = vsub.f32 %v7533_v38, %v849_v14  ;;  %v7640_v38 = vld [vmem:[#allocation2 + $0xd8] sm:$0xff] }
 0x1cd   : > { %v795_v22 = vpop.xlane.xlu0 %794  ;;  %v7624_v26 = vsub.f32 %v7535_v39, %v850_v19  ;;  %v7676_v19 = vld [vmem:[#allocation2 + $0xf0] sm:$0xff] }
 0x1ce   : > { %v913_v24 = vmul.f32 %v7613_v20, %v7613_v20  ;;  %v851_v25 = vmul.f32 0.0078125, %v795_v22  ;;  %v797_v28 = vpop.xlane.xlu1 %796  ;;  %v6109_v22 = vld [vmem:[%s7626_s13 + $0x7c] ss:$12 sps:$4 sm:$0xff]  }
 0x1cf   : > { %v914_v32 = vmul.f32 %v7624_v26, %v7624_v26  ;;  %v852_v33 = vmul.f32 0.0078125, %v797_v28 }
 0x1d0   : > { %822 = vadd.xlane.f32.xlu0 %v7599_v11  ;;  %945 = vadd.xlane.f32.xlu1 %v910_v8  ;;  %v7636_v34 = vsub.f32 %v7539_v40, %v851_v25  ;;  %v6100_v40 = vld [vmem:[%s7626_s13 + $0x34] ss:$12 sps:$4 sm:$0xff]  }
 0x1d1   : > { %v799_v31 = vpop.xlane.xlu0 %798  ;;  %v7646_v54 = vsub.f32 %v7541_v41, %v852_v33  ;;  %1633 = vmatprep.subr.bf16.mxu0 %v6100_v40  ;;  %5920 = vmatprep.subr.bf16.mxu1 %v6100_v40  ;;  %v7656_v41 = vld [vmem:[#allocation2 + $0xe0] sm:$0xff] }
 0x1d2   : > { %v853_v36 = vmul.f32 0.0078125, %v799_v31  ;;  %v801_v39 = vpop.xlane.xlu1 %800  ;;  %v915_v53 = vmul.f32 %v7636_v34, %v7636_v34  ;;  %1634 = vmatpush1.bf16.msra.mxu0 %v6102_v57  ;;  %5928 = vmatpush1.bf16.msra.mxu1 %v6102_v57  ;;  %v6117_v57 = vld [vmem:[%s7626_s13 + $0xa8] ss:$12 sps:$4 sm:$0xff]  }
 0x1d3   : > { %v854_v56 = vmul.f32 0.0078125, %v801_v39  ;;  %v916_v59 = vmul.f32 %v7646_v54, %v7646_v54  ;;  %1635 = vmatprep.subr.bf16.mxu0 %v6103_v1  ;;  %5921 = vmatprep.subr.bf16.mxu1 %v6103_v1  ;;  %v10533_v1 = vmov 0  }
 0x1d4   : > { %824 = vadd.xlane.f32.xlu1 %v7607_v16  ;;  %947 = vadd.xlane.f32.xlu0 %v911_v13  ;;  %v7654_v60 = vsub.f32 %v7545_v42, %v853_v36 }
 0x1d5   : > { %v803_v52 = vpop.xlane.xlu0 %802  ;;  %v7664_v42 = vsub.f32 %v7547_v43, %v854_v56  ;;  %v6115_v56 = vld [vmem:[%s7626_s13 + $0xac] ss:$12 sps:$4 sm:$0xff]   ;;  %1661 = vmatprep.mubr.bf16.mxu0 %v10533_v1  ;;  %1781 = vmatprep.mubr.bf16.mxu1 %v10533_v1 }
 0x1d6   : > { %v805_v58 = vpop.xlane.xlu1 %804  ;;  %v917_v3 = vmul.f32 %v7654_v60, %v7654_v60  ;;  %v855_v4 = vmul.f32 0.0078125, %v803_v52  ;;  %1636 = vmatpush1.bf16.msra.mxu0 %v6105_v2  ;;  %5929 = vmatpush1.bf16.msra.mxu1 %v6105_v2 }
 0x1d7   : > { %v856_v13 = vmul.f32 0.0078125, %v805_v58  ;;  %1637 = vmatprep.subr.bf16.mxu0 %v6106_v9  ;;  %5922 = vmatprep.subr.bf16.mxu1 %v6106_v9  ;;  %v918_v43 = vmul.f32 %v7664_v42, %v7664_v42 }
 0x1d8   : > { %949 = vadd.xlane.f32.xlu1 %v912_v18  ;;  %826 = vadd.xlane.f32.xlu0 %v7615_v21  ;;  %v7674_v18 = vsub.f32 %v7551_v44, %v855_v4 }
 0x1d9   : > { %v807_v62 = vpop.xlane.xlu0 %806  ;;  %v7681_v27 = vsub.f32 %v7553_v45, %v856_v13  ;;  %v6112_v45 = vld [vmem:[%s7626_s13 + $0x94] ss:$12 sps:$4 sm:$0xff]  }
 0x1da   : > { %v809_v8 = vpop.xlane.xlu1 %808  ;;  %v857_v17 = vmul.f32 0.0078125, %v807_v62  ;;  %1638 = vmatpush1.bf16.msra.mxu0 %v6108_v12  ;;  %5930 = vmatpush1.bf16.msra.mxu1 %v6108_v12  ;;  %v919_v44 = vmul.f32 %v7674_v18, %v7674_v18 }
 0x1db   : > { %v858_v25 = vmul.f32 0.0078125, %v809_v8  ;;  %1639 = vmatprep.subr.bf16.mxu0 %v6109_v22  ;;  %5923 = vmatprep.subr.bf16.mxu1 %v6109_v22  ;;  %v920_v36 = vmul.f32 %v7681_v27, %v7681_v27 }
 0x1dc   : > { %828 = vadd.xlane.f32.xlu1 %v7618_v23  ;;  %951 = vadd.xlane.f32.xlu0 %v913_v24  ;;  %v6111_v24 = vld [vmem:[%s7626_s13 + $0x78] ss:$12 sps:$4 sm:$0xff]   ;;  %v7687_v31 = vsub.f32 %v7557_v46, %v857_v17 }
 0x1dd   : > { %v811_v14 = vpop.xlane.xlu0 %810  ;;  %v7696_v37 = vsub.f32 %v7559_v47, %v858_v25 }
 0x1de   : > { %v813_v28 = vpop.xlane.xlu1 %812  ;;  %v859_v29 = vmul.f32 0.0078125, %v811_v14  ;;  %1640 = vmatpush1.bf16.msra.mxu0 %v6111_v24  ;;  %5931 = vmatpush1.bf16.msra.mxu1 %v6111_v24  ;;  %v921_v46 = vmul.f32 %v7687_v31, %v7687_v31 }
 0x1df   : > { %1641 = vmatprep.subr.bf16.mxu0 %v6112_v45  ;;  %5924 = vmatprep.subr.bf16.mxu1 %v6112_v45  ;;  %v860_v39 = vmul.f32 0.0078125, %v813_v28  ;;  %v922_v47 = vmul.f32 %v7696_v37, %v7696_v37 }
 0x1e0   : > { %953 = vadd.xlane.f32.xlu1 %v914_v32  ;;  %830 = vadd.xlane.f32.xlu0 %v7630_v30  ;;  %v7689_v32 = vld [vmem:[#allocation2 + $0xf8] sm:$0xff] }
 0x1e1   : > { %v815_v33 = vpop.xlane.xlu0 %814  ;;  %v7711_v62 = vsub.f32 %v7565_v49, %v860_v39 }
 0x1e2   : > { %v861_v52 = vmul.f32 0.0078125, %v815_v33  ;;  %v817_v40 = vpop.xlane.xlu1 %816  ;;  %1642 = vmatpush1.bf16.msra.mxu0 %v6114_v35  ;;  %5932 = vmatpush1.bf16.msra.mxu1 %v6114_v35 }
 0x1e3   : > { %1643 = vmatprep.subr.bf16.mxu0 %v6115_v56  ;;  %5925 = vmatprep.subr.bf16.mxu1 %v6115_v56  ;;  %v924_v2 = vmul.f32 %v7711_v62, %v7711_v62 }
 0x1e4   : > { %832 = vadd.xlane.f32.xlu1 %v7640_v38  ;;  %955 = vadd.xlane.f32.xlu0 %v915_v53  ;;  %v7702_v53 = vsub.f32 %v7563_v48, %v859_v29  ;;  %v7714_v48 = vsub.f32 %v7569_v50, %v861_v52 }
 0x1e6   : > { %v923_v58 = vmul.f32 %v7702_v53, %v7702_v53  ;;  %1644 = vmatpush1.bf16.msra.mxu0 %v6117_v57  ;;  %5933 = vmatpush1.bf16.msra.mxu1 %v6117_v57 }
 0x1e8   : > { %957 = vadd.xlane.f32.xlu1 %v916_v59  ;;  %834 = vadd.xlane.f32.xlu0 %v7656_v41  ;;  %v862_v59 = vmul.f32 0.0078125, %v817_v40 }
 0x1ea   : > { %v7723_v49 = vsub.f32 %v7571_v51, %v862_v59 }
 0x1ec   : > { %836 = vadd.xlane.f32.xlu1 %v7666_v7  ;;  %959 = vadd.xlane.f32.xlu0 %v917_v3  ;;  %v925_v3 = vmul.f32 %v7714_v48, %v7714_v48  ;;  %v926_v50 = vmul.f32 %v7723_v49, %v7723_v49 }
 0x1f0   : > { %961 = vadd.xlane.f32.xlu1 %v918_v43  ;;  %838 = vadd.xlane.f32.xlu0 %v7676_v19 }
 0x1f4   : > { %840 = vadd.xlane.f32.xlu1 %v7689_v32  ;;  %963 = vadd.xlane.f32.xlu0 %v919_v44 }
 0x1f8   : > { %965 = vadd.xlane.f32.xlu1 %v920_v36  ;;  %967 = vadd.xlane.f32.xlu0 %v921_v46 }
 0x1fc   : > { %969 = vadd.xlane.f32.xlu1 %v922_v47  ;;  %971 = vadd.xlane.f32.xlu0 %v923_v58 }
 0x200   : > { %973 = vadd.xlane.f32.xlu1 %v924_v2  ;;  %975 = vadd.xlane.f32.xlu0 %v925_v3 }
 0x204   : > { %977 = vadd.xlane.f32.xlu1 %v926_v50 }
 0x251   : > { %v940_v4 = vpop.xlane.xlu0 %939 }
 0x252   : > { %v1003_v8 = vmul.f32 0.007874016, %v940_v4 }
 0x254   : > { %6174 = vrsqrt.f32 %v1003_v8  ;;  %vm1037_vm0 = vcmp.eq.f32.partialorder %v1003_v8, inf  ;;  %v1040_v46 = vand.u32 2147483648, %v1003_v8  ;;  %vm1039_vm1 = vcmp.eq.f32.partialorder %v1003_v8, 0.0 }
 0x255   : > { %v942_v9 = vpop.xlane.xlu1 %941  ;;  %v819_v12 = vpop.xlane.xlu0 %818 }
 0x256   : > { %v1004_v13 = vmul.f32 0.007874016, %v942_v9  ;;  %v863_v14 = vmul.f32 0.0078125, %v819_v12 }
 0x258   : > { %6176 = vrsqrt.f32 %v1004_v13  ;;  %v7728_v22 = vsub.f32 %v7583_v0, %v863_v14  ;;  %vm1044_vm2 = vcmp.eq.f32.partialorder %v1004_v13, inf  ;;  %v1047_v50 = vand.u32 2147483648, %v1004_v13 }
 0x259   : > { %v821_v43 = vpop.xlane.xlu1 %820  ;;  %v944_v17 = vpop.xlane.xlu0 %943  ;;  %vm1046_vm3 = vcmp.eq.f32.partialorder %v1004_v13, 0.0 }
 0x25a   : > { %v864_v51 = vmul.f32 0.0078125, %v821_v43  ;;  %v1005_v24 = vmul.f32 0.007874016, %v944_v17  ;;  %v927_v25 = vmul.f32 %v7728_v22, %v7728_v22 }
 0x25c   : > { %6178 = vrsqrt.f32 %v1005_v24  ;;  %979 = vadd.xlane.f32.xlu0 %v927_v25  ;;  %v7733_v29 = vsub.f32 %v7592_v6, %v864_v51  ;;  %vm1051_vm4 = vcmp.eq.f32.partialorder %v1005_v24, inf  ;;  %vm1053_vm5 = vcmp.eq.f32.partialorder %v1005_v24, 0.0 }
 0x25d   : > { %v946_v28 = vpop.xlane.xlu1 %945  ;;  %v823_v44 = vpop.xlane.xlu0 %822 }
 0x25e   : > { %v6175_v33 = vpop.eup %6174  ;;  %v7735_v45 = vmul.f32 0.007874016, %v946_v28  ;;  %v865_v35 = vmul.f32 0.0078125, %v823_v44  ;;  %v928_v0 = vmul.f32 %v7733_v29, %v7733_v29 }
 0x25f   : > { %v1036_v36 = vmul.f32 %v6175_v33, %v1003_v8 }
 0x260   : > { %6180 = vrsqrt.f32 %v7735_v45  ;;  %981 = vadd.xlane.f32.xlu1 %v928_v0  ;;  %v7741_v6 = vsub.f32 %v7599_v11, %v865_v35  ;;  %vm1058_vm6 = vcmp.eq.f32.partialorder %v7735_v45, inf  ;;  %vm1060_vm7 = vcmp.eq.f32.partialorder %v7735_v45, 0.0 }
 0x261   : > { %v1038_v39 = vsel %vm1037_vm0, %v1003_v8, %v1036_v36  ;;  %v825_v52 = vpop.xlane.xlu1 %824  ;;  %v948_v40 = vpop.xlane.xlu0 %947 }
 0x262   : > { %v6177_v56 = vpop.eup %6176  ;;  %v866_v57 = vmul.f32 0.0078125, %v825_v52  ;;  %v7743_v47 = vmul.f32 0.007874016, %v948_v40  ;;  %v1041_v58 = vsel %vm1039_vm1, %v1040_v46, %v1038_v39  ;;  %v929_v2 = vmul.f32 %v7741_v6, %v7741_v6  ;;  %v7764_v52 = vld [vmem:[%s774_s9] ss:$0 sm:$0xff] }
 0x263   : > { %v1043_v59 = vmul.f32 %v6177_v56, %v1004_v13  ;;  %v1297_v3 = vadd.f32 1e-06, %v1041_v58 }
 0x264   : > { %6182 = vrsqrt.f32 %v7743_v47  ;;  %983 = vadd.xlane.f32.xlu0 %v929_v2  ;;  %v7749_v9 = vsub.f32 %v7607_v16, %v866_v57  ;;  %vm1065_vm8 = vcmp.eq.f32.partialorder %v7743_v47, inf  ;;  %vm1067_vm9 = vcmp.eq.f32.partialorder %v7743_v47, 0.0 }
 0x265   : > { %v1045_v4 = vsel %vm1044_vm2, %v1004_v13, %v1043_v59  ;;  %v950_v8 = vpop.xlane.xlu1 %949  ;;  %v827_v11 = vpop.xlane.xlu0 %826  ;;  %6184 = vrcp.f32 %v1297_v3  ;;  %v1054_v13 = vand.u32 2147483648, %v1005_v24 }
 0x266   : > { %v6179_v12 = vpop.eup %6178  ;;  %v7751_v14 = vmul.f32 0.007874016, %v950_v8  ;;  %v867_v43 = vmul.f32 0.0078125, %v827_v11  ;;  %v1048_v17 = vsel %vm1046_vm3, %v1047_v50, %v1045_v4  ;;  %v930_v25 = vmul.f32 %v7749_v9, %v7749_v9 }
 0x267   : > { %v1050_v51 = vmul.f32 %v6179_v12, %v1005_v24  ;;  %v1298_v28 = vadd.f32 1e-06, %v1048_v17  ;;  %v1265_v50 = vmul.f32 %v7764_v52, %v7575_v55  ;;  %v7790_v55 = vmul.f32 %v7764_v52, %v7590_v5 }
 0x268   : > { %6186 = vrsqrt.f32 %v7751_v14  ;;  %985 = vadd.xlane.f32.xlu1 %v930_v25  ;;  %v7757_v35 = vsub.f32 %v7615_v21, %v867_v43  ;;  %v1061_v21 = vand.u32 2147483648, %v7735_v45  ;;  %v1267_v43 = vmul.f32 %v7764_v52, %v7581_v63 }
 0x269   : > { %v1052_v44 = vsel %vm1051_vm4, %v1005_v24, %v1050_v51  ;;  %v829_v16 = vpop.xlane.xlu1 %828  ;;  %v952_v33 = vpop.xlane.xlu0 %951  ;;  %6188 = vrcp.f32 %v1298_v28  ;;  %v1266_v51 = vmul.f32 %v7764_v52, %v7579_v61  ;;  %v1068_v63 = vand.u32 2147483648, %v7743_v47 }
 0x26a   : > { %v6181_v36 = vpop.eup %6180  ;;  %v868_v0 = vmul.f32 0.0078125, %v829_v16  ;;  %v7759_v46 = vmul.f32 0.007874016, %v952_v33  ;;  %v1055_v39 = vsel %vm1053_vm5, %v1054_v13, %v1052_v44  ;;  %v931_v24 = vmul.f32 %v7757_v35, %v7757_v35 }
 0x26b   : > { %v1057_v40 = vmul.f32 %v6181_v36, %v7735_v45  ;;  %v1299_v56 = vadd.f32 1e-06, %v1055_v39  ;;  %vm1072_vm10 = vcmp.eq.f32.partialorder %v7751_v14, inf  ;;  %vm1074_vm11 = vcmp.eq.f32.partialorder %v7751_v14, 0.0 }
 0x26c   : > { %6190 = vrsqrt.f32 %v7759_v46  ;;  %987 = vadd.xlane.f32.xlu0 %v931_v24  ;;  %v7775_v2 = vsub.f32 %v7618_v23, %v868_v0  ;;  %v7804_v0 = vmul.f32 %v7764_v52, %v7597_v10  ;;  %vm1079_vm12 = vcmp.eq.f32.partialorder %v7759_v46, inf }
 0x26d   : > { %v1059_v57 = vsel %vm1058_vm6, %v7735_v45, %v1057_v40  ;;  %v954_v58 = vpop.xlane.xlu1 %953  ;;  %v831_v59 = vpop.xlane.xlu0 %830  ;;  %6192 = vrcp.f32 %v1299_v56  ;;  %v1075_v56 = vand.u32 2147483648, %v7751_v14  ;;  %vm1081_vm13 = vcmp.eq.f32.partialorder %v7759_v46, 0.0 }
 0x26e   : > { %v6183_v3 = vpop.eup %6182  ;;  %v7779_v4 = vmul.f32 0.007874016, %v954_v58  ;;  %v869_v8 = vmul.f32 0.0078125, %v831_v59  ;;  %v1062_v11 = vsel %vm1060_vm7, %v1061_v21, %v1059_v57  ;;  %v932_v17 = vmul.f32 %v7775_v2, %v7775_v2 }
 0x26f   : > { %v6185_v12 = vpop.eup %6184  ;;  %v1064_v45 = vmul.f32 %v6183_v3, %v7743_v47  ;;  %v1300_v23 = vadd.f32 1e-06, %v1062_v11 }
 0x270   : > { %6194 = vrsqrt.f32 %v7779_v4  ;;  %989 = vadd.xlane.f32.xlu1 %v932_v17  ;;  %v7797_v44 = vsub.f32 %v7630_v30, %v869_v8  ;;  %v1330_v33 = vmul.f32 %v6185_v12, %v1265_v50  ;;  %v7812_v30 = vld [vmem:[%s776_s20] ss:$0 sm:$0xff]  ;;  %vm1086_vm14 = vcmp.eq.f32.partialorder %v7779_v4, inf }
 0x271   : > { %v1066_v25 = vsel %vm1065_vm8, %v7743_v47, %v1064_v45  ;;  %v833_v28 = vpop.xlane.xlu1 %832  ;;  %v956_v13 = vpop.xlane.xlu0 %955  ;;  %6196 = vrcp.f32 %v1300_v23  ;;  %v7816_v47 = vmul.f32 %v7764_v52, %v7605_v15  ;;  %vm1088_vm15 = vcmp.eq.f32.partialorder %v7779_v4, 0.0 }
 0x272   : > { %v6187_v61 = vpop.eup %6186  ;;  %v870_v5 = vmul.f32 0.0078125, %v833_v28  ;;  %v7800_v16 = vmul.f32 0.007874016, %v956_v13  ;;  %v933_v40 = vmul.f32 %v7797_v44, %v7797_v44  ;;  %v1069_v24 = vsel %vm1067_vm9, %v1068_v63, %v1066_v25 }
 0x273   : > { %v6189_v36 = vpop.eup %6188  ;;  %v1071_v39 = vmul.f32 %v6187_v61, %v7751_v14  ;;  %v1399_v8 = vadd.f32 %v7812_v30, %v1330_v33  ;;  %v1301_v11 = vadd.f32 1e-06, %v1069_v24  ;;  %v7841_v25 = vmul.f32 %v7764_v52, %v7624_v26 }
 0x274   : > { %6198 = vrsqrt.f32 %v7800_v16  ;;  %991 = vadd.xlane.f32.xlu0 %v933_v40  ;;  %v7824_v58 = vsub.f32 %v7640_v38, %v870_v5  ;;  %v1332_v59 = vmul.f32 %v6189_v36, %v1266_v51  ;;  %v7837_v51 = vmul.f32 %v7764_v52, %v7613_v20 }
 0x275   : > { %v1073_v10 = vsel %vm1072_vm10, %v7751_v14, %v1071_v39  ;;  %v958_v21 = vpop.xlane.xlu1 %957  ;;  %v835_v57 = vpop.xlane.xlu0 %834  ;;  %v1082_v63 = vand.u32 2147483648, %v7759_v46  ;;  %vm1093_vm0 = vcmp.eq.f32.partialorder %v7800_v16, inf  ;;  %vm1095_vm1 = vcmp.eq.f32.partialorder %v7800_v16, 0.0 }
 0x276   : > { %v6191_v3 = vpop.eup %6190  ;;  %v7826_v15 = vmul.f32 0.007874016, %v958_v21  ;;  %v871_v50 = vmul.f32 0.0078125, %v835_v57  ;;  %v934_v17 = vmul.f32 %v7824_v58, %v7824_v58  ;;  %v1400_v23 = vadd.f32 %v7812_v30, %v1332_v59 }
 0x277   : > { %v6193_v12 = vpop.eup %6192  ;;  %v1078_v45 = vmul.f32 %v6191_v3, %v7759_v46  ;;  %v1076_v38 = vsel %vm1074_vm11, %v1075_v56, %v1073_v10 }
 0x278   : > { %6200 = vrsqrt.f32 %v7826_v15  ;;  %993 = vadd.xlane.f32.xlu1 %v934_v17  ;;  %v7847_v13 = vpack.c.bf16 %v1400_v23, %v1399_v8  ;;  %v7850_v20 = vsub.f32 %v7656_v41, %v871_v50  ;;  %v1334_v33 = vmul.f32 %v6193_v12, %v1267_v43 }
 0x279   : > { %v837_v28 = vpop.xlane.xlu1 %836  ;;  %v960_v14 = vpop.xlane.xlu0 %959  ;;  %v1302_v36 = vadd.f32 1e-06, %v1076_v38  ;;  %v1080_v40 = vsel %vm1079_vm12, %v7759_v46, %v1078_v45  ;;  %6202 = vrcp.f32 %v1301_v11  ;;  %v1089_v41 = vand.u32 2147483648, %v7779_v4 }
 0x27a   : > { %v6195_v61 = vpop.eup %6194  ;;  %v872_v5 = vmul.f32 0.0078125, %v837_v28  ;;  %v7852_v26 = vmul.f32 0.007874016, %v960_v14  ;;  %1662 = vmatmul.mubr.bf16.vlgmr.msra.gmra.mrb[0].mxu0 %v7847_v13  ;;  %v935_v10 = vmul.f32 %v7850_v20, %v7850_v20  ;;  %v1401_v11 = vadd.f32 %v7812_v30, %v1334_v33 }
 0x27b   : > { %v6197_v39 = vpop.eup %6196  ;;  %v1085_v24 = vmul.f32 %v6195_v61, %v7779_v4  ;;  %1671 = vmatprep.mubr.bf16.mxu0 %v10533_v1  ;;  %v1083_v12 = vsel %vm1081_vm13, %v1082_v63, %v1080_v40  ;;  %v7882_v23 = vmul.f32 %v7764_v52, %v7636_v34  ;;  %v7886_v38 = vmul.f32 %v7764_v52, %v7646_v54 }
 0x27c   : > { %6204 = vrsqrt.f32 %v7852_v26  ;;  %995 = vadd.xlane.f32.xlu0 %v935_v10  ;;  %v7866_v57 = vsub.f32 %v7666_v7, %v872_v5  ;;  %v1336_v59 = vmul.f32 %v6197_v39, %v7790_v55  ;;  %v1303_v34 = vadd.f32 1e-06, %v1083_v12 }
 0x27d   : > { %v1087_v43 = vsel %vm1086_vm14, %v7779_v4, %v1085_v24  ;;  %v962_v56 = vpop.xlane.xlu1 %961  ;;  %v839_v21 = vpop.xlane.xlu0 %838  ;;  %6206 = vrcp.f32 %v1302_v36  ;;  %v1096_v5 = vand.u32 2147483648, %v7800_v16  ;;  %vm1100_vm2 = vcmp.eq.f32.partialorder %v7826_v15, inf }
 0x27e   : > { %v6199_v3 = vpop.eup %6198  ;;  %v7869_v50 = vmul.f32 0.007874016, %v962_v56  ;;  %v873_v8 = vmul.f32 0.0078125, %v839_v21  ;;  %v936_v17 = vmul.f32 %v7866_v57, %v7866_v57  ;;  %v1402_v7 = vadd.f32 %v7812_v30, %v1336_v59 }
 0x27f   : > { %v1092_v45 = vmul.f32 %v6199_v3, %v7800_v16  ;;  %v1090_v55 = vsel %vm1088_vm15, %v1089_v41, %v1087_v43  ;;  %v7913_v10 = vmul.f32 %v7764_v52, %v7664_v42  ;;  %vm1102_vm3 = vcmp.eq.f32.partialorder %v7826_v15, 0.0 }
 0x280   : > { %6208 = vrsqrt.f32 %v7869_v50  ;;  %997 = vadd.xlane.f32.xlu1 %v936_v17  ;;  %v7891_v14 = vpack.c.bf16 %v1402_v7, %v1401_v11  ;;  %v7894_v4 = vsub.f32 %v7676_v19, %v873_v8  ;;  %v1304_v36 = vadd.f32 1e-06, %v1090_v55 }
 0x281   : > { %v1094_v46 = vsel %vm1093_vm0, %v7800_v16, %v1092_v45  ;;  %v841_v63 = vpop.xlane.xlu1 %840  ;;  %v964_v28 = vpop.xlane.xlu0 %963  ;;  %6210 = vrcp.f32 %v1303_v34  ;;  %v7906_v19 = vmul.f32 %v7764_v52, %v7654_v60  ;;  %v1103_v59 = vand.u32 2147483648, %v7826_v15 }
 0x282   : > { %v6201_v61 = vpop.eup %6200  ;;  %v874_v54 = vmul.f32 0.0078125, %v841_v63  ;;  %v7897_v33 = vmul.f32 0.007874016, %v964_v28  ;;  %1672 = vmatmul.mubr.bf16.gmra.mrb[4].mxu0 %v7891_v14  ;;  %v937_v40 = vmul.f32 %v7894_v4, %v7894_v4  ;;  %v1097_v24 = vsel %vm1095_vm1, %v1096_v5, %v1094_v46 }
 0x283   : > { %v1099_v39 = vmul.f32 %v6201_v61, %v7826_v15  ;;  %1681 = vmatprep.mubr.bf16.mxu0 %v10533_v1  ;;  %v6203_v16 = vpop.eup %6202  ;;  %vm1107_vm4 = vcmp.eq.f32.partialorder %v7852_v26, inf  ;;  %vm1109_vm5 = vcmp.eq.f32.partialorder %v7852_v26, 0.0  ;;  %v1110_v17 = vand.u32 2147483648, %v7852_v26 }
 0x284   : > { %6212 = vrsqrt.f32 %v7897_v33  ;;  %999 = vadd.xlane.f32.xlu0 %v937_v40  ;;  %v7917_v60 = vsub.f32 %v7689_v32, %v874_v54  ;;  %v1305_v32 = vadd.f32 1e-06, %v1097_v24  ;;  %v1338_v45 = vmul.f32 %v6203_v16, %v7804_v0 }
 0x285   : > { %v1101_v41 = vsel %vm1100_vm2, %v7826_v15, %v1099_v39  ;;  %v966_v43 = vpop.xlane.xlu1 %965  ;;  %v968_v56 = vpop.xlane.xlu0 %967  ;;  %6214 = vrcp.f32 %v1304_v36  ;;  %vm1114_vm6 = vcmp.eq.f32.partialorder %v7869_v50, inf  ;;  %vm1116_vm7 = vcmp.eq.f32.partialorder %v7869_v50, 0.0 }
 0x286   : > { %v6205_v21 = vpop.eup %6204  ;;  %v7921_v3 = vmul.f32 0.007874016, %v966_v43  ;;  %v7923_v8 = vmul.f32 0.007874016, %v968_v56  ;;  %v938_v11 = vmul.f32 %v7917_v60, %v7917_v60  ;;  %v1104_v15 = vsel %vm1102_vm3, %v1103_v59, %v1101_v41 }
 0x287   : > { %v6207_v42 = vpop.eup %6206  ;;  %v1106_v12 = vmul.f32 %v6205_v21, %v7852_v26  ;;  %v1117_v63 = vand.u32 2147483648, %v7869_v50  ;;  %vm1121_vm8 = vcmp.eq.f32.partialorder %v7897_v33, inf  ;;  %v1306_v5 = vadd.f32 1e-06, %v1104_v15 }
 0x288   : > { %6216 = vrsqrt.f32 %v7921_v3  ;;  %1001 = vadd.xlane.f32.xlu1 %v938_v11  ;;  %v1340_v0 = vmul.f32 %v6207_v42, %v7816_v47  ;;  %v1124_v36 = vand.u32 2147483648, %v7897_v33  ;;  %v1403_v39 = vadd.f32 %v7812_v30, %v1338_v45 }
 0x289   : > { %6218 = vrsqrt.f32 %v7923_v8  ;;  %v970_v7 = vpop.xlane.xlu1 %969  ;;  %v972_v55 = vpop.xlane.xlu0 %971  ;;  %v1108_v54 = vsel %vm1107_vm4, %v7852_v26, %v1106_v12  ;;  %vm1123_vm9 = vcmp.eq.f32.partialorder %v7897_v33, 0.0  ;;  %vm1128_vm10 = vcmp.eq.f32.partialorder %v7921_v3, inf }
 0x28a   : > { %v6209_v46 = vpop.eup %6208  ;;  %v7937_v28 = vmul.f32 0.007874016, %v970_v7  ;;  %v7939_v34 = vmul.f32 0.007874016, %v972_v55  ;;  %6220 = vrcp.f32 %v1305_v32  ;;  %v1131_v24 = vand.u32 2147483648, %v7921_v3 }
 0x28b   : > { %v1113_v61 = vmul.f32 %v6209_v46, %v7869_v50  ;;  %v6211_v40 = vpop.eup %6210  ;;  %vm1130_vm11 = vcmp.eq.f32.partialorder %v7921_v3, 0.0  ;;  %vm1135_vm12 = vcmp.eq.f32.partialorder %v7923_v8, inf  ;;  %v1404_v56 = vadd.f32 %v7812_v30, %v1340_v0 }
 0x28c   : > { %6222 = vrsqrt.f32 %v7937_v28  ;;  %vm1137_vm13 = vcmp.eq.f32.partialorder %v7923_v8, 0.0  ;;  %v1138_v32 = vand.u32 2147483648, %v7923_v8  ;;  %v1111_v12 = vsel %vm1109_vm5, %v1110_v17, %v1108_v54 }
 0x28d   : > { %v1115_v47 = vsel %vm1114_vm6, %v7869_v50, %v1113_v61  ;;  %6224 = vrsqrt.f32 %v7939_v34  ;;  %v974_v16 = vpop.xlane.xlu1 %973  ;;  %v976_v41 = vpop.xlane.xlu0 %975  ;;  %vm1142_vm14 = vcmp.eq.f32.partialorder %v7937_v28, inf  ;;  %v1145_v45 = vand.u32 2147483648, %v7937_v28 }
 0x28e   : > { %v6213_v43 = vpop.eup %6212  ;;  %v7960_v21 = vmul.f32 0.007874016, %v974_v16  ;;  %v7962_v59 = vmul.f32 0.007874016, %v976_v41  ;;  %6226 = vrcp.f32 %v1306_v5  ;;  %v7971_v15 = vpack.c.bf16 %v1404_v56, %v1403_v39 }
 0x28f   : > { %v6215_v42 = vpop.eup %6214  ;;  %v1120_v11 = vmul.f32 %v6213_v43, %v7897_v33  ;;  %v1118_v7 = vsel %vm1116_vm7, %v1117_v63, %v1115_v47  ;;  %vm1144_vm15 = vcmp.eq.f32.partialorder %v7937_v28, 0.0  ;;  %vm1149_vm0 = vcmp.eq.f32.partialorder %v7939_v34, inf }
 0x290   : > { %6228 = vrsqrt.f32 %v7960_v21  ;;  %vm1151_vm1 = vcmp.eq.f32.partialorder %v7939_v34, 0.0  ;;  %v1342_v17 = vmul.f32 %v6211_v40, %v7837_v51  ;;  %v1152_v46 = vand.u32 2147483648, %v7939_v34  ;;  %1682 = vmatmul.mubr.bf16.gmra.mrb[8].mxu0 %v7971_v15 }
 0x291   : > { %6230 = vrsqrt.f32 %v7962_v59  ;;  %v978_v26 = vpop.xlane.xlu1 %977  ;;  %vm1156_vm2 = vcmp.eq.f32.partialorder %v7960_v21, inf  ;;  %v1344_v63 = vmul.f32 %v6215_v42, %v7841_v25  ;;  %v1122_v61 = vsel %vm1121_vm8, %v7897_v33, %v1120_v11  ;;  %1691 = vmatprep.mubr.bf16.mxu0 %v10533_v1 }
 0x292   : > { %v6217_v55 = vpop.eup %6216  ;;  %v7984_v50 = vmul.f32 0.007874016, %v978_v26  ;;  %vm1158_vm3 = vcmp.eq.f32.partialorder %v7960_v21, 0.0  ;;  %v1307_v51 = vadd.f32 1e-06, %v1111_v12  ;;  %v1159_v40 = vand.u32 2147483648, %v7960_v21 }
 0x293   : > { %v6219_v0 = vpop.eup %6218  ;;  %v1127_v5 = vmul.f32 %v6217_v55, %v7921_v3  ;;  %v1308_v54 = vadd.f32 1e-06, %v1118_v7  ;;  %vm1163_vm4 = vcmp.eq.f32.partialorder %v7962_v59, inf  ;;  %v1405_v16 = vadd.f32 %v7812_v30, %v1342_v17 }
 0x294   : > { %v1134_v39 = vmul.f32 %v6219_v0, %v7923_v8  ;;  %6232 = vrsqrt.f32 %v7984_v50  ;;  %v6221_v25 = vpop.eup %6220  ;;  %v1406_v41 = vadd.f32 %v7812_v30, %v1344_v63  ;;  %vm1165_vm5 = vcmp.eq.f32.partialorder %v7962_v59, 0.0 }
 0x295   : > { %v1129_v47 = vsel %vm1128_vm10, %v7921_v3, %v1127_v5  ;;  %6234 = vrcp.f32 %v1307_v51  ;;  %v1125_v42 = vsel %vm1123_vm9, %v1124_v36, %v1122_v61  ;;  %v1346_v63 = vmul.f32 %v6221_v25, %v7882_v23 }
 0x296   : > { %v6223_v43 = vpop.eup %6222  ;;  %v1136_v56 = vsel %vm1135_vm12, %v7923_v8, %v1134_v39  ;;  %6236 = vrcp.f32 %v1308_v54  ;;  %v8009_v7 = vpack.c.bf16 %v1406_v41, %v1405_v16  ;;  %v1132_v26 = vsel %vm1130_vm11, %v1131_v24, %v1129_v47 }
 0x297   : > { %v6225_v11 = vpop.eup %6224  ;;  %v1141_v12 = vmul.f32 %v6223_v43, %v7937_v28  ;;  %v1309_v17 = vadd.f32 1e-06, %v1125_v42  ;;  %v1310_v0 = vadd.f32 1e-06, %v1132_v26  ;;  %v1139_v5 = vsel %vm1137_vm13, %v1138_v32, %v1136_v56 }
 0x298   : > { %v1148_v55 = vmul.f32 %v6225_v11, %v7939_v34  ;;  %v6227_v51 = vpop.eup %6226  ;;  %v1166_v36 = vand.u32 2147483648, %v7962_v59  ;;  %v1311_v61 = vadd.f32 1e-06, %v1139_v5  ;;  %1692 = vmatmul.mubr.bf16.gmra.mrb[12].mxu0 %v8009_v7  ;;  %v1407_v16 = vadd.f32 %v7812_v30, %v1346_v63 }
 0x299   : > { %v1143_v33 = vsel %vm1142_vm14, %v7937_v28, %v1141_v12  ;;  %6238 = vrcp.f32 %v1309_v17  ;;  %v1348_v23 = vmul.f32 %v6227_v51, %v7886_v38  ;;  %1701 = vmatprep.mubr.bf16.mxu0 %v10533_v1  ;;  %vm1170_vm6 = vcmp.eq.f32.partialorder %v7984_v50, inf }
 0x29a   : > { %v6229_v3 = vpop.eup %6228  ;;  %v1150_v24 = vsel %vm1149_vm0, %v7939_v34, %v1148_v55  ;;  %6240 = vrcp.f32 %v1310_v0  ;;  %v1146_v8 = vsel %vm1144_vm15, %v1145_v45, %v1143_v33  ;;  %v1173_v45 = vand.u32 2147483648, %v7984_v50 }
 0x29b   : > { %v6231_v32 = vpop.eup %6230  ;;  %v1155_v54 = vmul.f32 %v6229_v3, %v7960_v21  ;;  %v1312_v39 = vadd.f32 1e-06, %v1146_v8  ;;  %6242 = vrcp.f32 %v1311_v61  ;;  %v1153_v25 = vsel %vm1151_vm1, %v1152_v46, %v1150_v24  ;;  %v8071_v8 = vld [vmem:[%s7626_s13 + $0x8] ss:$12 sps:$4 sm:$0xff]  }
 0x29c   : > { %v1162_v47 = vmul.f32 %v6231_v32, %v7962_v59  ;;  %v1408_v38 = vadd.f32 %v7812_v30, %v1348_v23  ;;  %v1313_v41 = vadd.f32 1e-06, %v1153_v25  ;;  %vm1172_vm7 = vcmp.eq.f32.partialorder %v7984_v50, 0.0  ;;  %5694 = vmatprep.subr.bf16.mxu1 %v8071_v8 }
 0x29d   : > { %v1157_v28 = vsel %vm1156_vm2, %v7960_v21, %v1155_v54  ;;  %6244 = vrcp.f32 %v1312_v39 }
 0x29e   : > { %v6233_v43 = vpop.eup %6232  ;;  %v1164_v34 = vsel %vm1163_vm4, %v7962_v59, %v1162_v47  ;;  %v8043_v46 = vpack.c.bf16 %v1408_v38, %v1407_v16  ;;  %v1160_v56 = vsel %vm1158_vm3, %v1159_v40, %v1157_v28  ;;  %6246 = vrcp.f32 %v1313_v41 }
 0x29f   : > { %v6235_v42 = vpop.eup %6234  ;;  %v1169_v11 = vmul.f32 %v6233_v43, %v7984_v50  ;;  %v1314_v12 = vadd.f32 1e-06, %v1160_v56  ;;  %v1167_v26 = vsel %vm1165_vm5, %v1166_v36, %v1164_v34  ;;  %v1277_v40 = vmul.f32 %v7764_v52, %v7674_v18 }
 0x2a0   : > { %v6237_v17 = vpop.eup %6236  ;;  %v1350_v55 = vmul.f32 %v6235_v42, %v7906_v19  ;;  %v1315_v63 = vadd.f32 1e-06, %v1167_v26  ;;  %1702 = vmatmul.mubr.bf16.gmra.mrb[16].mxu0 %v8043_v46  ;;  %v1278_v19 = vmul.f32 %v7764_v52, %v7681_v27  ;;  %v1279_v18 = vmul.f32 %v7764_v52, %v7687_v31 }
 0x2a1   : > { %v1171_v0 = vsel %vm1170_vm6, %v7984_v50, %v1169_v11  ;;  %v1352_v21 = vmul.f32 %v6237_v17, %v7913_v10  ;;  %6248 = vrcp.f32 %v1314_v12  ;;  %1711 = vmatprep.mubr.bf16.mxu0 %v10533_v1  ;;  %v1280_v27 = vmul.f32 %v7764_v52, %v7696_v37 }
 0x2a2   : > { %v1174_v5 = vsel %vm1172_vm7, %v1173_v45, %v1171_v0  ;;  %6250 = vrcp.f32 %v1315_v63  ;;  %v1409_v51 = vadd.f32 %v7812_v30, %v1350_v55  ;;  %v1281_v31 = vmul.f32 %v7764_v52, %v7702_v53 }
 0x2a3   : > { %v6239_v59 = vpop.eup %6238  ;;  %v1410_v50 = vadd.f32 %v7812_v30, %v1352_v21  ;;  %v1316_v10 = vadd.f32 1e-06, %v1174_v5  ;;  %v1282_v37 = vmul.f32 %v7764_v52, %v7711_v62  ;;  %v1283_v53 = vmul.f32 %v7764_v52, %v7714_v48 }
 0x2a4   : > { %v6241_v33 = vpop.eup %6240  ;;  %v1354_v36 = vmul.f32 %v6239_v59, %v1277_v40  ;;  %v1284_v62 = vmul.f32 %v7764_v52, %v7723_v49 }
 0x2a5   : > { %v6243_v61 = vpop.eup %6242  ;;  %v8066_v3 = vpack.c.bf16 %v1410_v50, %v1409_v51  ;;  %v1356_v24 = vmul.f32 %v6241_v33, %v1278_v19  ;;  %6252 = vrcp.f32 %v1316_v10 }
 0x2a6   : > { %v1358_v23 = vmul.f32 %v6243_v61, %v1279_v18  ;;  %v1411_v54 = vadd.f32 %v7812_v30, %v1354_v36 }
 0x2a7   : > { %v6245_v32 = vpop.eup %6244  ;;  %v1412_v39 = vadd.f32 %v7812_v30, %v1356_v24 }
 0x2a8   : > { %v6247_v25 = vpop.eup %6246  ;;  %v1360_v47 = vmul.f32 %v6245_v32, %v1280_v27  ;;  %1712 = vmatmul.mubr.bf16.gmra.mrb[20].mxu0 %v8066_v3  ;;  %v1413_v38 = vadd.f32 %v7812_v30, %v1358_v23 }
 0x2a9   : > { %v8078_v16 = vpack.c.bf16 %v1412_v39, %v1411_v54  ;;  %v1362_v28 = vmul.f32 %v6247_v25, %v1281_v31  ;;  %1721 = vmatprep.mubr.bf16.mxu0 %v10533_v1 }
 0x2aa   : > { %v1414_v41 = vadd.f32 %v7812_v30, %v1360_v47 }
 0x2ab   : > { %v6249_v45 = vpop.eup %6248  ;;  %v1415_v42 = vadd.f32 %v7812_v30, %v1362_v28 }
 0x2ac   : > { %v6251_v43 = vpop.eup %6250  ;;  %v8088_v34 = vpack.c.bf16 %v1414_v41, %v1413_v38  ;;  %v1364_v56 = vmul.f32 %v6249_v45, %v1282_v37 }
 0x2ad   : > { %v1366_v12 = vmul.f32 %v6251_v43, %v1283_v53 }
 0x2ae   : > { %v1416_v11 = vadd.f32 %v7812_v30, %v1364_v56 }
 0x2af   : > { %v6253_v26 = vpop.eup %6252  ;;  %v1417_v63 = vadd.f32 %v7812_v30, %v1366_v12 }
 0x2b0   : > { %v8094_v17 = vpack.c.bf16 %v1416_v11, %v1415_v42  ;;  %v1368_v55 = vmul.f32 %v6253_v26, %v1284_v62  ;;  %1722 = vmatmul.mubr.bf16.gmra.mrb[24].mxu0 %v8078_v16 }
 0x2b1   : > { %1731 = vmatprep.mubr.bf16.mxu0 %v10533_v1 }
 0x2b2   : > { %v1418_v48 = vadd.f32 %v7812_v30, %v1368_v55 }
 0x2b4   : > { %v8100_v0 = vpack.c.bf16 %v1418_v48, %v1417_v63 }
 0x2b8   : > { %1732 = vmatmul.mubr.bf16.gmra.mrb[28].mxu0 %v8088_v34 }
 0x2b9   : > { %1741 = vmatprep.mubr.bf16.mxu0 %v10533_v1 }
 0x2c0   : > { %1742 = vmatmul.mubr.bf16.gmra.mrb[32].mxu0 %v8094_v17 }
 0x2c1   : > { %1751 = vmatprep.mubr.bf16.mxu0 %v10533_v1 }
 0x2c8   : > { %1752 = vmatmul.mubr.bf16.gmra.mrb[36].mxu0 %v8100_v0 }
 0x2c9   : > { %1761 = vmatprep.mubr.bf16.mxu0 %v10533_v1 }
 0x2e9   : > { %v980_v49 = vpop.xlane.xlu0 %979 }
 0x2ea   : > { %v1023_v21 = vmul.f32 0.007874016, %v980_v49 }
 0x2ec   : > { %6254 = vrsqrt.f32 %v1023_v21  ;;  %vm1177_vm8 = vcmp.eq.f32.partialorder %v1023_v21, inf  ;;  %v1180_v18 = vand.u32 2147483648, %v1023_v21  ;;  %vm1179_vm9 = vcmp.eq.f32.partialorder %v1023_v21, 0.0 }
 0x2ed   : > { %v982_v40 = vpop.xlane.xlu1 %981 }
 0x2ee   : > { %v1024_v5 = vmul.f32 0.007874016, %v982_v40 }
 0x2f0   : > { %6256 = vrsqrt.f32 %v1024_v5  ;;  %vm1184_vm10 = vcmp.eq.f32.partialorder %v1024_v5, inf  ;;  %v1187_v39 = vand.u32 2147483648, %v1024_v5  ;;  %vm1186_vm11 = vcmp.eq.f32.partialorder %v1024_v5, 0.0 }
 0x2f1   : > { %v984_v59 = vpop.xlane.xlu0 %983 }
 0x2f2   : > { %v1025_v19 = vmul.f32 0.007874016, %v984_v59 }
 0x2f4   : > { %6258 = vrsqrt.f32 %v1025_v19  ;;  %vm1191_vm12 = vcmp.eq.f32.partialorder %v1025_v19, inf  ;;  %v1194_v45 = vand.u32 2147483648, %v1025_v19  ;;  %vm1193_vm13 = vcmp.eq.f32.partialorder %v1025_v19, 0.0 }
 0x2f5   : > { %v986_v51 = vpop.xlane.xlu1 %985 }
 0x2f6   : > { %v6255_v50 = vpop.eup %6254  ;;  %v1026_v10 = vmul.f32 0.007874016, %v986_v51  ;;  %v1285_v51 = vmul.f32 %v7764_v52, %v7728_v22 }
 0x2f7   : > { %v1176_v33 = vmul.f32 %v6255_v50, %v1023_v21 }
 0x2f8   : > { %6260 = vrsqrt.f32 %v1026_v10  ;;  %vm1198_vm14 = vcmp.eq.f32.partialorder %v1026_v10, inf  ;;  %v1201_v26 = vand.u32 2147483648, %v1026_v10  ;;  %vm1200_vm15 = vcmp.eq.f32.partialorder %v1026_v10, 0.0 }
 0x2f9   : > { %v1178_v36 = vsel %vm1177_vm8, %v1023_v21, %v1176_v33  ;;  %v988_v61 = vpop.xlane.xlu0 %987 }
 0x2fa   : > { %v6257_v24 = vpop.eup %6256  ;;  %v1027_v27 = vmul.f32 0.007874016, %v988_v61  ;;  %v1181_v23 = vsel %vm1179_vm9, %v1180_v18, %v1178_v36 }
 0x2fb   : > { %v1183_v32 = vmul.f32 %v6257_v24, %v1024_v5  ;;  %v1317_v54 = vadd.f32 1e-06, %v1181_v23  ;;  %v1286_v24 = vmul.f32 %v7764_v52, %v7733_v29 }
 0x2fc   : > { %6262 = vrsqrt.f32 %v1027_v27  ;;  %vm1205_vm0 = vcmp.eq.f32.partialorder %v1027_v27, inf  ;;  %vm1207_vm1 = vcmp.eq.f32.partialorder %v1027_v27, 0.0 }
 0x2fd   : > { %v1185_v25 = vsel %vm1184_vm10, %v1024_v5, %v1183_v32  ;;  %v990_v31 = vpop.xlane.xlu1 %989  ;;  %6264 = vrcp.f32 %v1317_v54 }
 0x2fe   : > { %v6259_v47 = vpop.eup %6258  ;;  %v1028_v37 = vmul.f32 0.007874016, %v990_v31  ;;  %v1188_v38 = vsel %vm1186_vm11, %v1187_v39, %v1185_v25 }
 0x2ff   : > { %v1190_v41 = vmul.f32 %v6259_v47, %v1025_v19  ;;  %v1318_v28 = vadd.f32 1e-06, %v1188_v38 }
 0x300   : > { %6266 = vrsqrt.f32 %v1028_v37  ;;  %vm1212_vm2 = vcmp.eq.f32.partialorder %v1028_v37, inf  ;;  %v1215_v39 = vand.u32 2147483648, %v1028_v37  ;;  %vm1214_vm3 = vcmp.eq.f32.partialorder %v1028_v37, 0.0 }
 0x301   : > { %v1192_v43 = vsel %vm1191_vm12, %v1025_v19, %v1190_v41  ;;  %v992_v53 = vpop.xlane.xlu0 %991  ;;  %6268 = vrcp.f32 %v1318_v28  ;;  %v1208_v19 = vand.u32 2147483648, %v1027_v27 }
 0x302   : > { %v6261_v56 = vpop.eup %6260  ;;  %v1029_v62 = vmul.f32 0.007874016, %v992_v53  ;;  %v1195_v42 = vsel %vm1193_vm13, %v1194_v45, %v1192_v43  ;;  %v1287_v53 = vmul.f32 %v7764_v52, %v7741_v6 }
 0x303   : > { %v1197_v11 = vmul.f32 %v6261_v56, %v1026_v10  ;;  %v1319_v12 = vadd.f32 1e-06, %v1195_v42 }
 0x304   : > { %6270 = vrsqrt.f32 %v1029_v62  ;;  %vm1219_vm4 = vcmp.eq.f32.partialorder %v1029_v62, inf  ;;  %v1222_v56 = vand.u32 2147483648, %v1029_v62  ;;  %vm1221_vm5 = vcmp.eq.f32.partialorder %v1029_v62, 0.0 }
 0x305   : > { %v1199_v55 = vsel %vm1198_vm14, %v1026_v10, %v1197_v11  ;;  %v994_v63 = vpop.xlane.xlu1 %993  ;;  %6272 = vrcp.f32 %v1319_v12 }
 0x306   : > { %v6263_v48 = vpop.eup %6262  ;;  %v8108_v49 = vmul.f32 0.007874016, %v994_v63  ;;  %v1202_v21 = vsel %vm1200_vm15, %v1201_v26, %v1199_v55 }
 0x307   : > { %v1204_v40 = vmul.f32 %v6263_v48, %v1027_v27  ;;  %v1320_v5 = vadd.f32 1e-06, %v1202_v21  ;;  %v6265_v59 = vpop.eup %6264  ;;  %v1288_v48 = vmul.f32 %v7764_v52, %v7749_v9 }
 0x308   : > { %6274 = vrsqrt.f32 %v8108_v49  ;;  %v1370_v32 = vmul.f32 %v6265_v59, %v1285_v51  ;;  %vm1226_vm6 = vcmp.eq.f32.partialorder %v8108_v49, inf  ;;  %vm1228_vm7 = vcmp.eq.f32.partialorder %v8108_v49, 0.0 }
 0x309   : > { %v1206_v50 = vsel %vm1205_vm0, %v1027_v27, %v1204_v40  ;;  %v996_v33 = vpop.xlane.xlu0 %995  ;;  %6276 = vrcp.f32 %v1320_v5 }
 0x30a   : > { %v6267_v10 = vpop.eup %6266  ;;  %v8113_v18 = vmul.f32 0.007874016, %v996_v33  ;;  %v1209_v36 = vsel %vm1207_vm1, %v1208_v19, %v1206_v50  ;;  %v1419_v28 = vadd.f32 %v7812_v30, %v1370_v32 }
 0x30b   : > { %v6269_v61 = vpop.eup %6268  ;;  %v1211_v23 = vmul.f32 %v6267_v10, %v1028_v37  ;;  %v1321_v54 = vadd.f32 1e-06, %v1209_v36 }
 0x30c   : > { %6278 = vrsqrt.f32 %v8113_v18  ;;  %v1372_v25 = vmul.f32 %v6269_v61, %v1286_v24  ;;  %vm1233_vm8 = vcmp.eq.f32.partialorder %v8113_v18, inf  ;;  %vm1235_vm9 = vcmp.eq.f32.partialorder %v8113_v18, 0.0 }
 0x30d   : > { %v1213_v22 = vsel %vm1212_vm2, %v1028_v37, %v1211_v23  ;;  %v998_v27 = vpop.xlane.xlu1 %997  ;;  %6280 = vrcp.f32 %v1321_v54  ;;  %v1289_v23 = vmul.f32 %v7764_v52, %v7757_v35 }
 0x30e   : > { %v6271_v31 = vpop.eup %6270  ;;  %v8118_v47 = vmul.f32 0.007874016, %v998_v27  ;;  %v1216_v38 = vsel %vm1214_vm3, %v1215_v39, %v1213_v22  ;;  %v1420_v29 = vadd.f32 %v7812_v30, %v1372_v25  ;;  %v1290_v22 = vmul.f32 %v7764_v52, %v7775_v2 }
 0x30f   : > { %v1218_v41 = vmul.f32 %v6271_v31, %v1029_v62  ;;  %v1322_v45 = vadd.f32 1e-06, %v1216_v38  ;;  %v6273_v43 = vpop.eup %6272 }
 0x310   : > { %6282 = vrsqrt.f32 %v8118_v47  ;;  %v8125_v11 = vpack.c.bf16 %v1420_v29, %v1419_v28  ;;  %v1374_v21 = vmul.f32 %v6273_v43, %v1287_v53  ;;  %vm1240_vm10 = vcmp.eq.f32.partialorder %v8118_v47, inf }
 0x311   : > { %v1220_v37 = vsel %vm1219_vm4, %v1029_v62, %v1218_v41  ;;  %v1000_v42 = vpop.xlane.xlu0 %999  ;;  %6284 = vrcp.f32 %v1322_v45  ;;  %v1229_v62 = vand.u32 2147483648, %v8108_v49  ;;  %v1243_v41 = vand.u32 2147483648, %v8118_v47 }
 0x312   : > { %v6275_v12 = vpop.eup %6274  ;;  %v8127_v26 = vmul.f32 0.007874016, %v1000_v42  ;;  %v1223_v55 = vsel %vm1221_vm5, %v1222_v56, %v1220_v37  ;;  %1762 = vmatmul.mubr.bf16.gmra.mrb[40].mxu0 %v8125_v11  ;;  %v1421_v36 = vadd.f32 %v7812_v30, %v1374_v21  ;;  %vm1242_vm11 = vcmp.eq.f32.partialorder %v8118_v47, 0.0 }
 0x313   : > { %v6277_v63 = vpop.eup %6276  ;;  %v1225_v6 = vmul.f32 %v6275_v12, %v8108_v49  ;;  %v1323_v40 = vadd.f32 1e-06, %v1223_v55  ;;  %1771 = vmatprep.mubr.bf16.mxu0 %v10533_v1  ;;  %v1291_v42 = vmul.f32 %v7764_v52, %v7797_v44 }
 0x314   : > { %6286 = vrsqrt.f32 %v8127_v26  ;;  %v1376_v9 = vmul.f32 %v6277_v63, %v1288_v48  ;;  %vm1247_vm12 = vcmp.eq.f32.partialorder %v8127_v26, inf  ;;  %v1250_v12 = vand.u32 2147483648, %v8127_v26 }
 0x315   : > { %v1227_v5 = vsel %vm1226_vm6, %v8108_v49, %v1225_v6  ;;  %v1002_v59 = vpop.xlane.xlu1 %1001  ;;  %6288 = vrcp.f32 %v1323_v40  ;;  %v1236_v49 = vand.u32 2147483648, %v8113_v18  ;;  %vm1249_vm13 = vcmp.eq.f32.partialorder %v8127_v26, 0.0 }
 0x316   : > { %v6279_v19 = vpop.eup %6278  ;;  %v8139_v51 = vmul.f32 0.007874016, %v1002_v59  ;;  %v1230_v50 = vsel %vm1228_vm7, %v1229_v62, %v1227_v5  ;;  %v1422_v61 = vadd.f32 %v7812_v30, %v1376_v9  ;;  %v1292_v6 = vmul.f32 %v7764_v52, %v7824_v58  ;;  %v6120_v58 = vld [vmem:[%s7626_s13 + $0x38] ss:$12 sps:$4 sm:$0xff]  }
 0x317   : > { %v6281_v33 = vpop.eup %6280  ;;  %v1232_v10 = vmul.f32 %v6279_v19, %v8113_v18  ;;  %v1324_v24 = vadd.f32 1e-06, %v1230_v50 }
 0x318   : > { %6290 = vrsqrt.f32 %v8139_v51  ;;  %v8151_v54 = vpack.c.bf16 %v1422_v61, %v1421_v36  ;;  %v1378_v27 = vmul.f32 %v6281_v33, %v1289_v23  ;;  %vm1254_vm14 = vcmp.eq.f32.partialorder %v8139_v51, inf }
 0x319   : > { %v1234_v32 = vsel %vm1233_vm8, %v8113_v18, %v1232_v10  ;;  %6292 = vrcp.f32 %v1324_v24  ;;  %vm1256_vm15 = vcmp.eq.f32.partialorder %v8139_v51, 0.0  ;;  %v6558_v10 = vld [vmem:[%s774_s9] ss:$0 sm:$0xff]  ;;  %v6121_v24 = vld [vmem:[%s7626_s13 + $0x50] ss:$12 sps:$4 sm:$0xff]  }
 0x31a   : > { %v6283_v39 = vpop.eup %6282  ;;  %v1237_v25 = vsel %vm1235_vm9, %v1236_v49, %v1234_v32  ;;  %1772 = vmatmul.mubr.bf16.gmra.mrb[44].mxu0 %v8151_v54  ;;  %v1423_v29 = vadd.f32 %v7812_v30, %v1378_v27  ;;  %v1293_v36 = vmul.f32 %v6558_v10, %v7850_v20 }
 0x31b   : > { %v6285_v35 = vpop.eup %6284  ;;  %v1239_v31 = vmul.f32 %v6283_v39, %v8118_v47  ;;  %v1325_v38 = vadd.f32 1e-06, %v1237_v25  ;;  %v6122_v39 = vld [vmem:[%s7626_s13 + $0x68] ss:$12 sps:$4 sm:$0xff]  }
 0x31c   : > { %v1380_v18 = vmul.f32 %v6285_v35, %v1290_v22  ;;  %v6123_v35 = vld [vmem:[%s7626_s13 + $0x80] ss:$12 sps:$4 sm:$0xff]  }
 0x31d   : > { %v1241_v28 = vsel %vm1240_vm10, %v8118_v47, %v1239_v31  ;;  %6294 = vrcp.f32 %v1325_v38  ;;  %v6119_v47 = vld [vmem:[%s7626_s13 + $0x20] ss:$12 sps:$4 sm:$0xff]   ;;  %v1296_v31 = vmul.f32 %v6558_v10, %v7917_v60  ;;  %v6125_v60 = vld [vmem:[%s7626_s13 + $0xb0] ss:$12 sps:$4 sm:$0xff]  }
 0x31e   : > { %v6287_v2 = vpop.eup %6286  ;;  %v1424_v45 = vadd.f32 %v7812_v30, %v1380_v18  ;;  %v1244_v43 = vsel %vm1242_vm11, %v1243_v41, %v1241_v28  ;;  %v6124_v18 = vld [vmem:[%s7626_s13 + $0x98] ss:$12 sps:$4 sm:$0xff]   ;;  %s10603_s13 = sld [smem:[#allocation57_spill]] }
 0x31f   : > { %v6289_v53 = vpop.eup %6288  ;;  %v1246_v56 = vmul.f32 %v6287_v2, %v8127_v26  ;;  %v1326_v37 = vadd.f32 1e-06, %v1244_v43 }
 0x320   : > { %v8168_v55 = vpack.c.bf16 %v1424_v45, %v1423_v29  ;;  %v1382_v44 = vmul.f32 %v6289_v53, %v1291_v42  ;;  %v1486_v45 = vlaneseq }
 0x321   : > { %v1248_v63 = vsel %vm1247_vm12, %v8127_v26, %v1246_v56  ;;  %6296 = vrcp.f32 %v1326_v37  ;;  %v1257_v26 = vand.u32 2147483648, %v8139_v51  ;;  %v8222_v56 = vld [vmem:[%s1483_s29] sm:$0x7]  ;;  %s10629_s29 = sld [smem:[#allocation58_spill]] }
 0x322   : > { %v6291_v48 = vpop.eup %6290  ;;  %1782 = vmatmul.mubr.bf16.vlgmr.msra.gmra.mrb[0].mxu1 %v8168_v55  ;;  %v1251_v21 = vsel %vm1249_vm13, %v1250_v12, %v1248_v63  ;;  %v1425_v9 = vadd.f32 %v7812_v30, %v1382_v44  ;;  %v8215_v43 = vshrl.u32 %v1486_v45, 7 }
 0x323   : > { %v6293_v40 = vpop.eup %6292  ;;  %v1253_v62 = vmul.f32 %v6291_v48, %v8139_v51  ;;  %5695 = vmatpush3.bf16.msra.mxu1 %v8071_v8  ;;  %1791 = vmatprep.mubr.bf16.mxu1 %v10533_v1  ;;  %v1327_v5 = vadd.f32 1e-06, %v1251_v21 }
 0x324   : > { %5696 = vmatprep.subr.bf16.mxu1 %v6119_v47  ;;  %v1384_v52 = vmul.f32 %v6293_v40, %v1292_v6  ;;  %v10532_v53 = vsub.s32 0, %v8215_v43  ;;  %s2790_s9 = scalar_lea.vmem %s10603_s13, %s10601_s30  ;;  %s9156_s13 = scalar_lea.vmem %s10630_s14, %s10601_s30 }
 0x325   : > { %v1255_v59 = vsel %vm1254_vm14, %v8139_v51, %v1253_v62  ;;  %6298 = vrcp.f32 %v1327_v5  ;;  %v1294_v51 = vmul.f32 %v6558_v10, %v7866_v57  ;;  %v1295_v57 = vmul.f32 %v6558_v10, %v7894_v4  ;;  %v6559_v4 = vld [vmem:[%s776_s20] ss:$0 sm:$0xff]  ;;  %s5466_s20 = sshll.u32 %s10601_s30, 7  ;;  %s10661_s14 = sld [smem:[#allocation62_spill]] (!%p5453_p0) }
 0x326   : > { %v1426_v8 = vadd.f32 %v7812_v30, %v1384_v52  ;;  %v1258_v19 = vsel %vm1256_vm15, %v1257_v26, %v1255_v59  ;;  %s8959_s5 = scalar_lea.vmem [#allocation14], %s5466_s20  ;;  %s9015_s8 = scalar_lea.vmem [#allocation15], %s5466_s20 }
 0x327   : > { %v6295_v50 = vpop.eup %6294  ;;  %5697 = vmatpush3.bf16.msra.mxu1 %v6119_v47  ;;  %v1328_v33 = vadd.f32 1e-06, %v1258_v19  ;;  %s9119_s18 = scalar_lea.vmem %s10629_s29, %s10601_s30  ;;  %s10662_s20 = sld [smem:[#allocation63_spill]] (!%p5453_p0) }
 0x328   : > { %v8189_v61 = vpack.c.bf16 %v1426_v8, %v1425_v9  ;;  %5698 = vmatprep.subr.bf16.mxu1 %v6120_v58  ;;  %v1386_v23 = vmul.f32 %v6295_v50, %v1293_v36 }
 0x329   : > { %6300 = vrcp.f32 %v1328_v33 }
 0x32a   : > { %1792 = vmatmul.mubr.bf16.gmra.mrb[4].mxu1 %v8189_v61  ;;  %v1427_v20 = vadd.f32 %v7812_v30, %v1386_v23 }
 0x32b   : > { %v6297_v49 = vpop.eup %6296  ;;  %5699 = vmatpush3.bf16.msra.mxu1 %v6120_v58  ;;  %1801 = vmatprep.mubr.bf16.mxu1 %v10533_v1 }
 0x32c   : > { %5700 = vmatprep.subr.bf16.mxu1 %v6121_v24  ;;  %v1388_v32 = vmul.f32 %v6297_v49, %v1294_v51 }
 0x32e   : > { %v1428_v22 = vadd.f32 %v7812_v30, %v1388_v32 }
 0x32f   : > { %v6299_v27 = vpop.eup %6298  ;;  %5701 = vmatpush3.bf16.msra.mxu1 %v6121_v24 }
 0x330   : > { %v8199_v25 = vpack.c.bf16 %v1428_v22, %v1427_v20  ;;  %5702 = vmatprep.subr.bf16.mxu1 %v6122_v39  ;;  %v1390_v38 = vmul.f32 %v6299_v27, %v1295_v57 }
 0x332   : > { %1802 = vmatmul.mubr.bf16.gmra.mrb[8].mxu1 %v8199_v25  ;;  %v1429_v28 = vadd.f32 %v6559_v4, %v1390_v38 }
 0x333   : > { %v6301_v41 = vpop.eup %6300  ;;  %5703 = vmatpush3.bf16.msra.mxu1 %v6122_v39  ;;  %1811 = vmatprep.mubr.bf16.mxu1 %v10533_v1 }
 0x334   : > { %5704 = vmatprep.subr.bf16.mxu1 %v6123_v35  ;;  %v1392_v30 = vmul.f32 %v6301_v41, %v1296_v31 }
 0x336   : > { %v1430_v2 = vadd.f32 %v6559_v4, %v1392_v30 }
 0x337   : > { %5705 = vmatpush3.bf16.msra.mxu1 %v6123_v35 }
 0x338   : > { %v8208_v29 = vpack.c.bf16 %v1430_v2, %v1429_v28  ;;  %5706 = vmatprep.subr.bf16.mxu1 %v6124_v18 }
 0x33a   : > { %1812 = vmatmul.mubr.bf16.gmra.mrb[12].mxu1 %v8208_v29 }
 0x33b   : > { %5707 = vmatpush3.bf16.msra.mxu1 %v6124_v18  ;;  %5710 = vmatprep.mubr.bf16.mxu1 %v7847_v13  ;;  %v10531_v13 = vsub.s32 1, %v8215_v43 }
 0x33c   : > { %5708 = vmatprep.subr.bf16.mxu1 %v6125_v60 }
 0x33d   : > { %v8235_v37 = vrot.slane %v8222_v56, %v10531_v13 }
 0x33f   : > { %5709 = vmatpush3.bf16.msra.mxu1 %v6125_v60 }
 0x342   : > { %5711 = vmatmul.mubr.bf16.vlgmr.msra.gmra.mrb[16].mxu1 %v7891_v14  ;;  %v8229_v14 = vrot.slane %v8222_v56, %v10532_v53 }
 0x343   : > { %5714 = vmatprep.mubr.bf16.mxu1 %v7971_v15 }
 0x34a   : > { %5715 = vmatmul.mubr.bf16.gmra.mrb[20].mxu1 %v8009_v7 }
 0x34b   : > { %5718 = vmatprep.mubr.bf16.mxu1 %v8043_v46 }
 0x34d   : > { %v1663_v15 = vpop.f32.mrb[0].mxu0 }
 0x34e   : > { %v1664_v42 = vadd.f32 %v1663_v15, %v8229_v14  ;;  %v1665_v12 = vpop.f32.mrb[1].mxu0 }
 0x34f   : > { %v1667_v47 = vpop.f32.mrb[2].mxu0  ;;  %v1666_v48 = vadd.f32 %v1665_v12, %v8235_v37 }
 0x350   : > { %v1668_v63 = vadd.f32 %v1667_v47, %v8229_v14  ;;  %v1669_v7 = vpop.f32.mrb[3].mxu0  ;;  %v8241_v44 = vmul.f32 0.088388346, %v1664_v42 }
 0x351   : > { %v1670_v6 = vadd.f32 %v1669_v7, %v8235_v37 }
 0x352   : > { %v8243_v46 = vmul.f32 0.088388346, %v1668_v63  ;;  %5719 = vmatmul.mubr.bf16.gmra.mrb[24].mxu1 %v8066_v3 }
 0x353   : > { %v2031_v21 = vpack.c.bf16 %v1670_v6, %v1666_v48  ;;  %5722 = vmatprep.mubr.bf16.mxu1 %v8078_v16 }
 0x354   : > { %v2015_v40 = vpack.c.bf16 %v8243_v46, %v8241_v44 }
 0x355   : > { %v1673_v62 = vpop.f32.mrb[4].mxu0  ;;  %5742 = vmatprep.subr.bf16.mxu1 %v2031_v21 }
 0x356   : > { %v1674_v5 = vadd.f32 %v1673_v62, %v8229_v14  ;;  %v1675_v26 = vpop.f32.mrb[5].mxu0  ;;  %5743 = vmatpush3.bf16.xpose.msra.mxu1 %v2031_v21 }
 0x357   : > { %v1677_v52 = vpop.f32.mrb[6].mxu0  ;;  %v1676_v9 = vadd.f32 %v1675_v26, %v8235_v37 }
 0x358   : > { %v1678_v58 = vadd.f32 %v1677_v52, %v8229_v14  ;;  %v1679_v59 = vpop.f32.mrb[7].mxu0  ;;  %v8253_v8 = vmul.f32 0.088388346, %v1674_v5 }
 0x359   : > { %v1680_v3 = vadd.f32 %v1679_v59, %v8235_v37 }
 0x35a   : > { %v8255_v16 = vmul.f32 0.088388346, %v1678_v58  ;;  %5723 = vmatmul.mubr.bf16.gmra.mrb[28].mxu1 %v8088_v34 }
 0x35b   : > { %v2032_v19 = vpack.c.bf16 %v1680_v3, %v1676_v9  ;;  %5726 = vmatprep.mubr.bf16.mxu1 %v8094_v17 }
 0x35c   : > { %v2016_v50 = vpack.c.bf16 %v8255_v16, %v8253_v8 }
 0x35d   : > { %5744 = vmatprep.subr.bf16.mxu1 %v2032_v19 }
 0x35e   : > { %5745 = vmatpush3.bf16.xpose.msra.mxu1 %v2032_v19 }
 0x362   : > { %5727 = vmatmul.mubr.bf16.gmra.mrb[32].mxu1 %v8100_v0 }
 0x363   : > { %5730 = vmatprep.mubr.bf16.mxu1 %v8125_v11  ;;  %v1683_v33 = vpop.f32.mrb[8].mxu0 }
 0x364   : > { %v1684_v10 = vadd.f32 %v1683_v33, %v8229_v14  ;;  %v1685_v36 = vpop.f32.mrb[9].mxu0 }
 0x365   : > { %v1687_v24 = vpop.f32.mrb[10].mxu0  ;;  %v1686_v23 = vadd.f32 %v1685_v36, %v8235_v37 }
 0x366   : > { %v1688_v51 = vadd.f32 %v1687_v24, %v8229_v14  ;;  %v1689_v34 = vpop.f32.mrb[11].mxu0  ;;  %v8267_v49 = vmul.f32 0.088388346, %v1684_v10 }
 0x367   : > { %v1690_v17 = vadd.f32 %v1689_v34, %v8235_v37 }
 0x368   : > { %v8269_v32 = vmul.f32 0.088388346, %v1688_v51 }
 0x369   : > { %v2033_v39 = vpack.c.bf16 %v1690_v17, %v1686_v23 }
 0x36a   : > { %5731 = vmatmul.mubr.bf16.gmra.mrb[36].mxu1 %v8151_v54  ;;  %v2017_v0 = vpack.c.bf16 %v8269_v32, %v8267_v49 }
 0x36b   : > { %5734 = vmatprep.mubr.bf16.mxu1 %v8168_v55  ;;  %v1693_v11 = vpop.f32.mrb[12].mxu0  ;;  %5746 = vmatprep.subr.bf16.mxu1 %v2033_v39 }
 0x36c   : > { %v1694_v20 = vadd.f32 %v1693_v11, %v8229_v14  ;;  %v1695_v22 = vpop.f32.mrb[13].mxu0  ;;  %5747 = vmatpush3.bf16.xpose.msra.mxu1 %v2033_v39 }
 0x36d   : > { %v1697_v27 = vpop.f32.mrb[14].mxu0  ;;  %v1696_v31 = vadd.f32 %v1695_v22, %v8235_v37 }
 0x36e   : > { %v1698_v57 = vadd.f32 %v1697_v27, %v8229_v14  ;;  %v1699_v35 = vpop.f32.mrb[15].mxu0  ;;  %v8279_v54 = vmul.f32 0.088388346, %v1694_v20 }
 0x36f   : > { %v1700_v38 = vadd.f32 %v1699_v35, %v8235_v37 }
 0x370   : > { %v8281_v41 = vmul.f32 0.088388346, %v1698_v57 }
 0x371   : > { %v2034_v30 = vpack.c.bf16 %v1700_v38, %v1696_v31 }
 0x372   : > { %5735 = vmatmul.mubr.bf16.gmra.mrb[40].mxu1 %v8189_v61  ;;  %v2018_v55 = vpack.c.bf16 %v8281_v41, %v8279_v54 }
 0x373   : > { %5738 = vmatprep.mubr.bf16.mxu1 %v8199_v25  ;;  %v1703_v18 = vpop.f32.mrb[16].mxu0  ;;  %5748 = vmatprep.subr.bf16.mxu1 %v2034_v30 }
 0x374   : > { %v1704_v4 = vadd.f32 %v1703_v18, %v8229_v14  ;;  %v1705_v28 = vpop.f32.mrb[17].mxu0  ;;  %5749 = vmatpush3.bf16.xpose.msra.mxu1 %v2034_v30 }
 0x375   : > { %v1707_v2 = vpop.f32.mrb[18].mxu0  ;;  %v1706_v15 = vadd.f32 %v1705_v28, %v8235_v37 }
 0x376   : > { %v1708_v60 = vadd.f32 %v1707_v2, %v8229_v14  ;;  %v1709_v45 = vpop.f32.mrb[19].mxu0  ;;  %v8291_v61 = vmul.f32 0.088388346, %v1704_v4 }
 0x377   : > { %v1710_v42 = vadd.f32 %v1709_v45, %v8235_v37 }
 0x378   : > { %v8293_v12 = vmul.f32 0.088388346, %v1708_v60 }
 0x379   : > { %v2035_v47 = vpack.c.bf16 %v1710_v42, %v1706_v15 }
 0x37a   : > { %5739 = vmatmul.mubr.bf16.gmra.mrb[44].mxu1 %v8208_v29  ;;  %v2019_v25 = vpack.c.bf16 %v8293_v12, %v8291_v61 }
 0x37b   : > { %5758 = vmatprep.mubr.bf16.mxu1 %v2015_v40  ;;  %v1713_v63 = vpop.f32.mrb[20].mxu0  ;;  %5750 = vmatprep.subr.bf16.mxu1 %v2035_v47 }
 0x37c   : > { %v1714_v7 = vadd.f32 %v1713_v63, %v8229_v14  ;;  %v1715_v48 = vpop.f32.mrb[21].mxu0  ;;  %5751 = vmatpush3.bf16.xpose.msra.mxu1 %v2035_v47 }
 0x37d   : > { %v1717_v6 = vpop.f32.mrb[22].mxu0  ;;  %v1716_v5 = vadd.f32 %v1715_v48, %v8235_v37 }
 0x37e   : > { %v1718_v21 = vadd.f32 %v1717_v6, %v8229_v14  ;;  %v1719_v62 = vpop.f32.mrb[23].mxu0  ;;  %v8305_v26 = vmul.f32 0.088388346, %v1714_v7 }
 0x37f   : > { %v1720_v29 = vadd.f32 %v1719_v62, %v8235_v37 }
 0x380   : > { %v8307_v52 = vmul.f32 0.088388346, %v1718_v21 }
 0x381   : > { %v2036_v44 = vpack.c.bf16 %v1720_v29, %v1716_v5 }
 0x382   : > { %v2020_v46 = vpack.c.bf16 %v8307_v52, %v8305_v26 }
 0x383   : > { %v1723_v40 = vpop.f32.mrb[24].mxu0  ;;  %5752 = vmatprep.subr.bf16.mxu1 %v2036_v44 }
 0x384   : > { %v1724_v58 = vadd.f32 %v1723_v40, %v8229_v14  ;;  %v1725_v59 = vpop.f32.mrb[25].mxu0  ;;  %5753 = vmatpush3.bf16.xpose.msra.mxu1 %v2036_v44 }
 0x385   : > { %v1727_v9 = vpop.f32.mrb[26].mxu0  ;;  %v1726_v33 = vadd.f32 %v1725_v59, %v8235_v37 }
 0x386   : > { %v1728_v3 = vadd.f32 %v1727_v9, %v8229_v14  ;;  %v1729_v19 = vpop.f32.mrb[27].mxu0  ;;  %v1995_v36 = vmul.f32 0.088388346, %v1724_v58 }
 0x387   : > { %v1730_v10 = vadd.f32 %v1729_v19, %v8235_v37 }
 0x388   : > { %v1996_v24 = vmul.f32 0.088388346, %v1728_v3 }
 0x389   : > { %v2037_v51 = vpack.c.bf16 %v1730_v10, %v1726_v33 }
 0x38a   : > { %v2021_v34 = vpack.c.bf16 %v1996_v24, %v1995_v36 }
 0x38b   : > { %v1733_v23 = vpop.f32.mrb[28].mxu0  ;;  %5754 = vmatprep.subr.bf16.mxu1 %v2037_v51 }
 0x38c   : > { %v1734_v17 = vadd.f32 %v1733_v23, %v8229_v14  ;;  %v1735_v39 = vpop.f32.mrb[29].mxu0  ;;  %5755 = vmatpush3.bf16.xpose.msra.mxu1 %v2037_v51 }
 0x38d   : > { %v1737_v11 = vpop.f32.mrb[30].mxu0  ;;  %v1736_v27 = vadd.f32 %v1735_v39, %v8235_v37 }
 0x38e   : > { %v1738_v20 = vadd.f32 %v1737_v11, %v8229_v14  ;;  %v1739_v22 = vpop.f32.mrb[31].mxu0  ;;  %v1997_v35 = vmul.f32 0.088388346, %v1734_v17 }
 0x38f   : > { %v1740_v57 = vadd.f32 %v1739_v22, %v8235_v37 }
 0x390   : > { %v1998_v31 = vmul.f32 0.088388346, %v1738_v20 }
 0x391   : > { %v2038_v38 = vpack.c.bf16 %v1740_v57, %v1736_v27 }
 0x392   : > { %v2022_v30 = vpack.c.bf16 %v1998_v31, %v1997_v35 }
 0x393   : > { %v1743_v18 = vpop.f32.mrb[32].mxu0  ;;  %5756 = vmatprep.subr.bf16.mxu1 %v2038_v38 }
 0x394   : > { %v1744_v4 = vadd.f32 %v1743_v18, %v8229_v14  ;;  %v1745_v28 = vpop.f32.mrb[33].mxu0  ;;  %5757 = vmatpush3.bf16.xpose.msra.mxu1 %v2038_v38 }
 0x395   : > { %v1747_v2 = vpop.f32.mrb[34].mxu0  ;;  %v1746_v15 = vadd.f32 %v1745_v28, %v8235_v37 }
 0x396   : > { %v1748_v60 = vadd.f32 %v1747_v2, %v8229_v14  ;;  %v1749_v45 = vpop.f32.mrb[35].mxu0  ;;  %v1999_v47 = vmul.f32 0.088388346, %v1744_v4 }
 0x397   : > { %v1750_v42 = vadd.f32 %v1749_v45, %v8235_v37 }
 0x398   : > { %v2000_v63 = vmul.f32 0.088388346, %v1748_v60 }
 0x399   : > { %v2039_v7 = vpack.c.bf16 %v1750_v42, %v1746_v15 }
 0x39a   : > { %v2023_v48 = vpack.c.bf16 %v2000_v63, %v1999_v47 }
 0x39b   : > { %v1753_v6 = vpop.f32.mrb[36].mxu0  ;;  %5759 = vmatmul.mubr.bf16.vlgmr.msra.gmra.mrb[48].mxu1 %v2016_v50  ;;  %5774 = vmatprep.subr.bf16.mxu0 %v2039_v7 }
 0x39c   : > { %v1754_v21 = vadd.f32 %v1753_v6, %v8229_v14  ;;  %v1755_v62 = vpop.f32.mrb[37].mxu0  ;;  %5762 = vmatprep.mubr.bf16.mxu1 %v2017_v0  ;;  %5775 = vmatpush3.bf16.xpose.msra.mxu0 %v2039_v7 }
 0x39d   : > { %5790 = vmatprep.mubr.bf16.mxu0 %v2023_v48  ;;  %v1757_v5 = vpop.f32.mrb[38].mxu0  ;;  %v1756_v40 = vadd.f32 %v1755_v62, %v8235_v37 }
 0x39e   : > { %v1758_v29 = vadd.f32 %v1757_v5, %v8229_v14  ;;  %v1759_v44 = vpop.f32.mrb[39].mxu0  ;;  %v8333_v8 = vmul.f32 0.088388346, %v1754_v21 }
 0x39f   : > { %v1760_v58 = vadd.f32 %v1759_v44, %v8235_v37 }
 0x3a0   : > { %v8335_v16 = vmul.f32 0.088388346, %v1758_v29 }
 0x3a1   : > { %v2040_v50 = vpack.c.bf16 %v1760_v58, %v1756_v40 }
 0x3a2   : > { %v2024_v59 = vpack.c.bf16 %v8335_v16, %v8333_v8 }
 0x3a3   : > { %5763 = vmatmul.mubr.bf16.gmra.mrb[52].mxu1 %v2018_v55  ;;  %5776 = vmatprep.subr.bf16.mxu0 %v2040_v50 }
 0x3a4   : > { %5766 = vmatprep.mubr.bf16.mxu1 %v2019_v25  ;;  %5777 = vmatpush3.bf16.xpose.msra.mxu0 %v2040_v50 }
 0x3ab   : > { %5767 = vmatmul.mubr.bf16.gmra.mrb[56].mxu1 %v2020_v46 }
 0x3ac   : > { %5770 = vmatprep.mubr.bf16.mxu1 %v2021_v34 }
 0x3b3   : > { %5771 = vmatmul.mubr.bf16.gmra.mrb[60].mxu1 %v2022_v30 }
 0x3e5   : > { %v1763_v49 = vpop.f32.mrb[40].mxu0 }
 0x3e6   : > { %v1764_v32 = vadd.f32 %v1763_v49, %v8229_v14  ;;  %v1765_v0 = vpop.f32.mrb[41].mxu0 }
 0x3e7   : > { %v1767_v9 = vpop.f32.mrb[42].mxu0  ;;  %v1766_v55 = vadd.f32 %v1765_v0, %v8235_v37 }
 0x3e8   : > { %v1768_v54 = vadd.f32 %v1767_v9, %v8229_v14  ;;  %v1769_v41 = vpop.f32.mrb[43].mxu0  ;;  %v8352_v12 = vmul.f32 0.088388346, %v1764_v32 }
 0x3e9   : > { %v1770_v61 = vadd.f32 %v1769_v41, %v8235_v37 }
 0x3ea   : > { %v8354_v25 = vmul.f32 0.088388346, %v1768_v54 }
 0x3eb   : > { %v2041_v26 = vpack.c.bf16 %v1770_v61, %v1766_v55 }
 0x3ec   : > { %v2025_v52 = vpack.c.bf16 %v8354_v25, %v8352_v12 }
 0x3ed   : > { %v1773_v46 = vpop.f32.mrb[44].mxu0  ;;  %5778 = vmatprep.subr.bf16.mxu0 %v2041_v26 }
 0x3ee   : > { %v1774_v3 = vadd.f32 %v1773_v46, %v8229_v14  ;;  %v1775_v19 = vpop.f32.mrb[45].mxu0  ;;  %5779 = vmatpush3.bf16.xpose.msra.mxu0 %v2041_v26 }
 0x3ef   : > { %v1777_v33 = vpop.f32.mrb[46].mxu0  ;;  %v1776_v24 = vadd.f32 %v1775_v19, %v8235_v37 }
 0x3f0   : > { %v1778_v10 = vadd.f32 %v1777_v33, %v8229_v14  ;;  %v1779_v36 = vpop.f32.mrb[47].mxu0  ;;  %v8362_v34 = vmul.f32 0.088388346, %v1774_v3  ;;  %v1496_v33 = vsub.s32 2, %v8215_v43 }
 0x3f1   : > { %v1780_v51 = vadd.f32 %v1779_v36, %v8235_v37 }
 0x3f2   : > { %v8364_v23 = vmul.f32 0.088388346, %v1778_v10 }
 0x3f3   : > { %v2042_v17 = vpack.c.bf16 %v1780_v51, %v1776_v24 }
 0x3f4   : > { %v2026_v39 = vpack.c.bf16 %v8364_v23, %v8362_v34 }
 0x3f5   : > { %v1783_v11 = vpop.f32.mrb[0].mxu1  ;;  %5780 = vmatprep.subr.bf16.mxu0 %v2042_v17 }
 0x3f6   : > { %v1784_v20 = vadd.f32 %v1783_v11, %v8229_v14  ;;  %v1785_v22 = vpop.f32.mrb[1].mxu1  ;;  %5781 = vmatpush3.bf16.xpose.msra.mxu0 %v2042_v17 }
 0x3f7   : > { %v1787_v27 = vpop.f32.mrb[2].mxu1  ;;  %v1786_v31 = vadd.f32 %v1785_v22, %v8235_v37 }
 0x3f8   : > { %v1788_v57 = vadd.f32 %v1787_v27, %v8229_v14  ;;  %v1789_v35 = vpop.f32.mrb[3].mxu1  ;;  %v8372_v30 = vmul.f32 0.088388346, %v1784_v20  ;;  %v8410_v20 = vrot.slane %v8222_v56, %v1496_v33 }
 0x3f9   : > { %v1790_v38 = vadd.f32 %v1789_v35, %v8235_v37 }
 0x3fa   : > { %v8374_v18 = vmul.f32 0.088388346, %v1788_v57 }
 0x3fb   : > { %v2043_v4 = vpack.c.bf16 %v1790_v38, %v1786_v31 }
 0x3fc   : > { %v2027_v28 = vpack.c.bf16 %v8374_v18, %v8372_v30 }
 0x3fd   : > { %v1793_v2 = vpop.f32.mrb[4].mxu1  ;;  %5782 = vmatprep.subr.bf16.mxu0 %v2043_v4 }
 0x3fe   : > { %v1794_v60 = vadd.f32 %v1793_v2, %v8229_v14  ;;  %v1795_v45 = vpop.f32.mrb[5].mxu1  ;;  %5783 = vmatpush3.bf16.xpose.msra.mxu0 %v2043_v4 }
 0x3ff   : > { %v1797_v15 = vpop.f32.mrb[6].mxu1  ;;  %v1796_v63 = vadd.f32 %v1795_v45, %v8235_v37 }
 0x400   : > { %v1798_v42 = vadd.f32 %v1797_v15, %v8229_v14  ;;  %v1799_v47 = vpop.f32.mrb[7].mxu1  ;;  %v8382_v48 = vmul.f32 0.088388346, %v1794_v60 }
 0x401   : > { %v1800_v7 = vadd.f32 %v1799_v47, %v8235_v37 }
 0x402   : > { %v8384_v6 = vmul.f32 0.088388346, %v1798_v42 }
 0x403   : > { %v2044_v21 = vpack.c.bf16 %v1800_v7, %v1796_v63 }
 0x404   : > { %v2028_v62 = vpack.c.bf16 %v8384_v6, %v8382_v48 }
 0x405   : > { %v1803_v5 = vpop.f32.mrb[8].mxu1  ;;  %5784 = vmatprep.subr.bf16.mxu0 %v2044_v21 }
 0x406   : > { %v1804_v29 = vadd.f32 %v1803_v5, %v8229_v14  ;;  %v1805_v44 = vpop.f32.mrb[9].mxu1  ;;  %5785 = vmatpush3.bf16.xpose.msra.mxu0 %v2044_v21 }
 0x407   : > { %v1807_v40 = vpop.f32.mrb[10].mxu1  ;;  %v1806_v49 = vadd.f32 %v1805_v44, %v8235_v37 }
 0x408   : > { %v1808_v58 = vadd.f32 %v1807_v40, %v8229_v14  ;;  %v1809_v50 = vpop.f32.mrb[11].mxu1  ;;  %v8392_v0 = vmul.f32 0.088388346, %v1804_v29 }
 0x409   : > { %v1810_v32 = vadd.f32 %v1809_v50, %v8235_v37 }
 0x40a   : > { %v8394_v9 = vmul.f32 0.088388346, %v1808_v58 }
 0x40b   : > { %v2045_v54 = vpack.c.bf16 %v1810_v32, %v1806_v49 }
 0x40c   : > { %v2029_v41 = vpack.c.bf16 %v8394_v9, %v8392_v0 }
 0x40d   : > { %v1813_v55 = vpop.f32.mrb[12].mxu1  ;;  %5786 = vmatprep.subr.bf16.mxu0 %v2045_v54 }
 0x40e   : > { %v1814_v61 = vadd.f32 %v1813_v55, %v8229_v14  ;;  %v1815_v26 = vpop.f32.mrb[13].mxu1  ;;  %5787 = vmatpush3.bf16.xpose.msra.mxu0 %v2045_v54 }
 0x40f   : > { %v1817_v46 = vpop.f32.mrb[14].mxu1  ;;  %v1816_v10 = vadd.f32 %v1815_v26, %v8235_v37 }
 0x410   : > { %v1818_v3 = vadd.f32 %v1817_v46, %v8229_v14  ;;  %v1819_v19 = vpop.f32.mrb[15].mxu1  ;;  %v8403_v24 = vmul.f32 0.088388346, %v1814_v61 }
 0x411   : > { %v1820_v36 = vadd.f32 %v1819_v19, %v8235_v37 }
 0x412   : > { %v8405_v51 = vmul.f32 0.088388346, %v1818_v3 }
 0x413   : > { %v2046_v17 = vpack.c.bf16 %v1820_v36, %v1816_v10 }
 0x414   : > { %v2030_v11 = vpack.c.bf16 %v8405_v51, %v8403_v24 }
 0x415   : > { %v5712_v22 = vpop.f32.mrb[16].mxu1  ;;  %5788 = vmatprep.subr.bf16.mxu0 %v2046_v17 }
 0x416   : > { %v1856_v14 = vpop.f32.mrb[17].mxu1  ;;  %5789 = vmatpush3.bf16.xpose.msra.mxu0 %v2046_v17  ;;  %v1865_v57 = vadd.f32 %v5712_v22, %v8410_v20 }
 0x417   : > { %v5713_v27 = vpop.f32.mrb[18].mxu1  ;;  %v1857_v31 = vadd.f32 %v1856_v14, %v8410_v20 }
 0x418   : > { %v1868_v37 = vadd.f32 %v5713_v27, %v8410_v20  ;;  %v1859_v35 = vpop.f32.mrb[19].mxu1 }
 0x419   : > { %v1860_v38 = vadd.f32 %v1859_v35, %v8410_v20 }
 0x41a   : > { %v2048_v4 = vpack.c.bf16 %v1868_v37, %v1865_v57 }
 0x41b   : > { %v2047_v2 = vpack.c.bf16 %v1860_v38, %v1857_v31 }
 0x41d   : > { %v5716_v60 = vpop.f32.mrb[20].mxu1  ;;  %5806 = vmatprep.subr.bf16.mxu1 %v2047_v2  ;;  %5791 = vmatmul.mubr.bf16.vlgmr.msra.gmra.mrb[48].mxu0 %v2024_v59 }
 0x41e   : > { %v1872_v56 = vpop.f32.mrb[21].mxu1  ;;  %5807 = vmatpush3.bf16.msra.mxu1 %v2047_v2  ;;  %5794 = vmatprep.mubr.bf16.mxu0 %v2025_v52  ;;  %v1881_v15 = vadd.f32 %v5716_v60, %v8410_v20 }
 0x41f   : > { %v5717_v45 = vpop.f32.mrb[22].mxu1  ;;  %5808 = vmatprep.subr.bf16.mxu1 %v2048_v4  ;;  %v1873_v63 = vadd.f32 %v1872_v56, %v8410_v20 }
 0x420   : > { %v1884_v42 = vadd.f32 %v5717_v45, %v8410_v20  ;;  %v1875_v47 = vpop.f32.mrb[23].mxu1 }
 0x421   : > { %v1876_v7 = vadd.f32 %v1875_v47, %v8410_v20 }
 0x422   : > { %v2050_v21 = vpack.c.bf16 %v1884_v42, %v1881_v15  ;;  %5809 = vmatpush3.bf16.msra.mxu1 %v2048_v4 }
 0x423   : > { %v2049_v8 = vpack.c.bf16 %v1876_v7, %v1873_v63 }
 0x425   : > { %v5720_v16 = vpop.f32.mrb[24].mxu1  ;;  %5810 = vmatprep.subr.bf16.mxu1 %v2049_v8  ;;  %5795 = vmatmul.mubr.bf16.gmra.mrb[52].mxu0 %v2026_v39 }
 0x426   : > { %v1888_v59 = vpop.f32.mrb[25].mxu1  ;;  %5811 = vmatpush3.bf16.msra.mxu1 %v2049_v8  ;;  %5798 = vmatprep.mubr.bf16.mxu0 %v2027_v28  ;;  %v1897_v25 = vadd.f32 %v5720_v16, %v8410_v20 }
 0x427   : > { %v5721_v12 = vpop.f32.mrb[26].mxu1  ;;  %5812 = vmatprep.subr.bf16.mxu1 %v2050_v21  ;;  %v1889_v29 = vadd.f32 %v1888_v59, %v8410_v20  ;;  %v8482_v59 = vld [vmem:[#allocation6] sm:$0xff] }
 0x428   : > { %v1900_v52 = vadd.f32 %v5721_v12, %v8410_v20  ;;  %v1891_v5 = vpop.f32.mrb[27].mxu1 }
 0x429   : > { %v1892_v44 = vadd.f32 %v1891_v5, %v8410_v20 }
 0x42a   : > { %v2052_v40 = vpack.c.bf16 %v1900_v52, %v1897_v25  ;;  %5813 = vmatpush3.bf16.msra.mxu1 %v2050_v21  ;;  %v8484_v52 = vld [vmem:[#allocation6 + $0x8] sm:$0xff] }
 0x42b   : > { %v2051_v34 = vpack.c.bf16 %v1892_v44, %v1889_v29  ;;  %v8489_v44 = vld [vmem:[#allocation6 + $0x10] sm:$0xff] }
 0x42d   : > { %v5724_v23 = vpop.f32.mrb[28].mxu1  ;;  %5814 = vmatprep.subr.bf16.mxu1 %v2051_v34  ;;  %5799 = vmatmul.mubr.bf16.gmra.mrb[56].mxu0 %v2028_v62 }
 0x42e   : > { %v1904_v39 = vpop.f32.mrb[29].mxu1  ;;  %5815 = vmatpush3.bf16.msra.mxu1 %v2051_v34  ;;  %5802 = vmatprep.mubr.bf16.mxu0 %v2029_v41  ;;  %v1913_v18 = vadd.f32 %v5724_v23, %v8410_v20 }
 0x42f   : > { %v5725_v30 = vpop.f32.mrb[30].mxu1  ;;  %5816 = vmatprep.subr.bf16.mxu1 %v2052_v40  ;;  %v1905_v50 = vadd.f32 %v1904_v39, %v8410_v20  ;;  %v8501_v39 = vld [vmem:[#allocation6 + $0x20] sm:$0xff] }
 0x430   : > { %v1916_v28 = vadd.f32 %v5725_v30, %v8410_v20  ;;  %v1907_v58 = vpop.f32.mrb[31].mxu1 }
 0x431   : > { %v1908_v49 = vadd.f32 %v1907_v58, %v8410_v20  ;;  %v8507_v58 = vld [vmem:[#allocation6 + $0x28] sm:$0xff] }
 0x432   : > { %v2054_v32 = vpack.c.bf16 %v1916_v28, %v1913_v18  ;;  %5817 = vmatpush3.bf16.msra.mxu1 %v2052_v40 }
 0x433   : > { %v2053_v48 = vpack.c.bf16 %v1908_v49, %v1905_v50 }
 0x435   : > { %v5728_v6 = vpop.f32.mrb[32].mxu1  ;;  %5818 = vmatprep.subr.bf16.mxu1 %v2053_v48  ;;  %5803 = vmatmul.mubr.bf16.gmra.mrb[60].mxu0 %v2030_v11 }
 0x436   : > { %v1929_v62 = vadd.f32 %v5728_v6, %v8410_v20  ;;  %v1920_v0 = vpop.f32.mrb[33].mxu1  ;;  %5819 = vmatpush3.bf16.msra.mxu1 %v2053_v48 }
 0x437   : > { %v5729_v9 = vpop.f32.mrb[34].mxu1  ;;  %5820 = vmatprep.subr.bf16.mxu1 %v2054_v32  ;;  %v1921_v55 = vadd.f32 %v1920_v0, %v8410_v20 }
 0x438   : > { %v1932_v54 = vadd.f32 %v5729_v9, %v8410_v20  ;;  %v1923_v41 = vpop.f32.mrb[35].mxu1  ;;  %v8520_v9 = vld [vmem:[#allocation6 + $0x40] sm:$0xff] }
 0x439   : > { %v1924_v61 = vadd.f32 %v1923_v41, %v8410_v20 }
 0x43a   : > { %v8453_v26 = vpack.c.bf16 %v1932_v54, %v1929_v62  ;;  %5821 = vmatpush3.bf16.msra.mxu1 %v2054_v32  ;;  %v764_v32 = vld [vmem:[#allocation6 + $0x30] sm:$0xff]  ;;  %v765_v62 = vld [vmem:[#allocation6 + $0x38] sm:$0xff] }
 0x43b   : > { %v8455_v46 = vpack.c.bf16 %v1924_v61, %v1921_v55  ;;  %v8525_v61 = vld [vmem:[#allocation6 + $0x48] sm:$0xff] }
 0x43d   : > { %v5732_v3 = vpop.f32.mrb[36].mxu1  ;;  %5838 = vmatprep.subr.bf16.mxu1 %v8455_v46 }
 0x43e   : > { %v1945_v19 = vadd.f32 %v5732_v3, %v8410_v20  ;;  %v1936_v33 = vpop.f32.mrb[37].mxu1 }
 0x43f   : > { %v1937_v10 = vadd.f32 %v1936_v33, %v8410_v20  ;;  %v5733_v36 = vpop.f32.mrb[38].mxu1  ;;  %v8531_v33 = vld [vmem:[#allocation6 + $0x50] sm:$0xff] }
 0x440   : > { %v1948_v24 = vadd.f32 %v5733_v36, %v8410_v20  ;;  %v1939_v51 = vpop.f32.mrb[39].mxu1 }
 0x441   : > { %v1940_v17 = vadd.f32 %v1939_v51, %v8410_v20 }
 0x442   : > { %v8462_v11 = vpack.c.bf16 %v1948_v24, %v1945_v19  ;;  %v8537_v24 = vld [vmem:[#allocation6 + $0x58] sm:$0xff] }
 0x443   : > { %v8464_v22 = vpack.c.bf16 %v1940_v17, %v1937_v10  ;;  %v8543_v17 = vld [vmem:[#allocation6 + $0x60] sm:$0xff] }
 0x445   : > { %v5736_v14 = vpop.f32.mrb[40].mxu1 }
 0x446   : > { %v1961_v27 = vadd.f32 %v5736_v14, %v8410_v20  ;;  %v1952_v57 = vpop.f32.mrb[41].mxu1 }
 0x447   : > { %v1953_v37 = vadd.f32 %v1952_v57, %v8410_v20  ;;  %v5737_v35 = vpop.f32.mrb[42].mxu1 }
 0x448   : > { %v1964_v31 = vadd.f32 %v5737_v35, %v8410_v20  ;;  %v1955_v38 = vpop.f32.mrb[43].mxu1 }
 0x449   : > { %v1956_v4 = vadd.f32 %v1955_v38, %v8410_v20  ;;  %v8555_v38 = vld [vmem:[#allocation6 + $0x70] sm:$0xff] }
 0x44a   : > { %v8470_v2 = vpack.c.bf16 %v1964_v31, %v1961_v27 }
 0x44b   : > { %v8472_v60 = vpack.c.bf16 %v1956_v4, %v1953_v37  ;;  %v8549_v37 = vld [vmem:[#allocation6 + $0x68] sm:$0xff] }
 0x44d   : > { %v5740_v56 = vpop.f32.mrb[44].mxu1 }
 0x44e   : > { %v1977_v45 = vadd.f32 %v5740_v56, %v8410_v20  ;;  %v1968_v15 = vpop.f32.mrb[45].mxu1 }
 0x44f   : > { %v1969_v42 = vadd.f32 %v1968_v15, %v8410_v20  ;;  %v5741_v47 = vpop.f32.mrb[46].mxu1 }
 0x450   : > { %v1980_v63 = vadd.f32 %v5741_v47, %v8410_v20  ;;  %v1971_v7 = vpop.f32.mrb[47].mxu1 }
 0x451   : > { %v1972_v21 = vadd.f32 %v1971_v7, %v8410_v20  ;;  %v8495_v20 = vld [vmem:[#allocation6 + $0x18] sm:$0xff] }
 0x452   : > { %v8478_v8 = vpack.c.bf16 %v1980_v63, %v1977_v45  ;;  %v8561_v45 = vld [vmem:[#allocation6 + $0x78] sm:$0xff] }
 0x453   : > { %v8480_v16 = vpack.c.bf16 %v1972_v21, %v1969_v42 }
 0x46e   : > { %v5760_v12 = vpop.f32.mrb[48].mxu1 }
 0x46f   : > { %v2097_v25 = vpop.f32.mrb[49].mxu1  ;;  %v8498_v23 = vadd.f32 %v5760_v12, %v8489_v44 }
 0x470   : > { %v8487_v5 = vadd.f32 %v2097_v25, %v8482_v59  ;;  %v5761_v29 = vpop.f32.mrb[50].mxu1 }
 0x471   : > { %v2100_v40 = vpop.f32.mrb[51].mxu1  ;;  %v8504_v30 = vadd.f32 %v5761_v29, %v8495_v20 }
 0x472   : > { %v8492_v34 = vadd.f32 %v2100_v40, %v8484_v52  ;;  %2257 = vmax.xlane.f32.xlu0 %v8487_v5 }
 0x474   : > { %2259 = vmax.xlane.f32.xlu1 %v8492_v34 }
 0x476   : > { %v5764_v18 = vpop.f32.mrb[52].mxu1  ;;  %2261 = vmax.xlane.f32.xlu0 %v8498_v23 }
 0x477   : > { %v2113_v28 = vpop.f32.mrb[53].mxu1  ;;  %v8517_v0 = vadd.f32 %v5764_v18, %v764_v32 }
 0x478   : > { %v8510_v50 = vadd.f32 %v2113_v28, %v8501_v39  ;;  %v5765_v49 = vpop.f32.mrb[54].mxu1  ;;  %2263 = vmax.xlane.f32.xlu1 %v8504_v30 }
 0x479   : > { %v2116_v48 = vpop.f32.mrb[55].mxu1  ;;  %v8522_v54 = vadd.f32 %v5765_v49, %v765_v62 }
 0x47a   : > { %v8514_v6 = vadd.f32 %v2116_v48, %v8507_v58  ;;  %2265 = vmax.xlane.f32.xlu0 %v8510_v50 }
 0x47c   : > { %2267 = vmax.xlane.f32.xlu1 %v8514_v6 }
 0x47e   : > { %v5768_v41 = vpop.f32.mrb[56].mxu1  ;;  %2269 = vmax.xlane.f32.xlu0 %v8517_v0 }
 0x47f   : > { %v2129_v55 = vpop.f32.mrb[57].mxu1  ;;  %v8540_v51 = vadd.f32 %v5768_v41, %v8531_v33 }
 0x480   : > { %v8528_v3 = vadd.f32 %v2129_v55, %v8520_v9  ;;  %v5769_v19 = vpop.f32.mrb[58].mxu1  ;;  %2271 = vmax.xlane.f32.xlu1 %v8522_v54 }
 0x481   : > { %v2132_v10 = vpop.f32.mrb[59].mxu1  ;;  %v8546_v14 = vadd.f32 %v5769_v19, %v8537_v24 }
 0x482   : > { %v8534_v36 = vadd.f32 %v2132_v10, %v8525_v61  ;;  %2273 = vmax.xlane.f32.xlu0 %v8528_v3 }
 0x484   : > { %2275 = vmax.xlane.f32.xlu1 %v8534_v36 }
 0x486   : > { %v5772_v27 = vpop.f32.mrb[60].mxu1  ;;  %2277 = vmax.xlane.f32.xlu0 %v8540_v51 }
 0x487   : > { %v2145_v57 = vpop.f32.mrb[61].mxu1  ;;  %v8564_v15 = vadd.f32 %v5772_v27, %v8555_v38 }
 0x488   : > { %v8552_v35 = vadd.f32 %v2145_v57, %v8543_v17  ;;  %v5773_v31 = vpop.f32.mrb[62].mxu1  ;;  %2279 = vmax.xlane.f32.xlu1 %v8546_v14 }
 0x489   : > { %v2148_v4 = vpop.f32.mrb[63].mxu1  ;;  %v8568_v42 = vadd.f32 %v5773_v31, %v8561_v45 }
 0x48a   : > { %v8558_v56 = vadd.f32 %v2148_v4, %v8549_v37  ;;  %2281 = vmax.xlane.f32.xlu0 %v8552_v35 }
 0x48c   : > { %2283 = vmax.xlane.f32.xlu1 %v8558_v56 }
 0x48e   : > { %2285 = vmax.xlane.f32.xlu0 %v8564_v15 }
 0x490   : > { %2287 = vmax.xlane.f32.xlu1 %v8568_v42 }
 0x4f0   : > { %v5792_v47 = vpop.f32.mrb[48].mxu0 }
 0x4f1   : > { %v2194_v63 = vpop.f32.mrb[49].mxu0  ;;  %v8580_v29 = vadd.f32 %v5792_v47, %v8489_v44 }
 0x4f2   : > { %v8573_v7 = vadd.f32 %v2194_v63, %v8482_v59  ;;  %v5793_v21 = vpop.f32.mrb[50].mxu0 }
 0x4f3   : > { %v2197_v12 = vpop.f32.mrb[51].mxu0  ;;  %v8584_v40 = vadd.f32 %v5793_v21, %v8495_v20 }
 0x4f4   : > { %v8576_v25 = vadd.f32 %v2197_v12, %v8484_v52  ;;  %2289 = vmax.xlane.f32.xlu0 %v8573_v7 }
 0x4f6   : > { %2291 = vmax.xlane.f32.xlu1 %v8576_v25 }
 0x4f8   : > { %v5796_v18 = vpop.f32.mrb[52].mxu0  ;;  %2293 = vmax.xlane.f32.xlu0 %v8580_v29 }
 0x4f9   : > { %v8587_v59 = vadd.f32 %v5796_v18, %v764_v32  ;;  %v2210_v28 = vpop.f32.mrb[53].mxu0 }
 0x4fa   : > { %v5797_v49 = vpop.f32.mrb[54].mxu0  ;;  %2295 = vmax.xlane.f32.xlu1 %v8584_v40  ;;  %v8594_v44 = vadd.f32 %v2210_v28, %v8501_v39 }
 0x4fb   : > { %v8590_v52 = vadd.f32 %v5797_v49, %v765_v62  ;;  %v2213_v48 = vpop.f32.mrb[55].mxu0 }
 0x4fc   : > { %2301 = vmax.xlane.f32.xlu0 %v8587_v59  ;;  %v8599_v32 = vadd.f32 %v2213_v48, %v8507_v58 }
 0x4fe   : > { %2303 = vmax.xlane.f32.xlu1 %v8590_v52 }
 0x4ff   : > { %v2258_v20 = vpop.xlane.xlu0 %2257 }
 0x500   : > { %v2321_v41 = vsub.f32 %v8487_v5, %v2258_v20  ;;  %v5800_v55 = vpop.f32.mrb[56].mxu0  ;;  %2297 = vmax.xlane.f32.xlu0 %v8594_v44 }
 0x501   : > { %v2260_v19 = vpop.xlane.xlu1 %2259  ;;  %v2226_v62 = vpop.f32.mrb[57].mxu0 }
 0x502   : > { %v2353_v10 = vmul.f32 1.442695, %v2321_v41  ;;  %v2322_v27 = vsub.f32 %v8492_v34, %v2260_v19  ;;  %v5801_v57 = vpop.f32.mrb[58].mxu0  ;;  %2299 = vmax.xlane.f32.xlu1 %v8599_v32 }
 0x503   : > { %v2262_v39 = vpop.xlane.xlu0 %2261  ;;  %v2229_v31 = vpop.f32.mrb[59].mxu0 }
 0x504   : > { %6302 = vpow2.f32 %v2353_v10  ;;  %v2355_v4 = vmul.f32 1.442695, %v2322_v27  ;;  %v2323_v5 = vsub.f32 %v8498_v23, %v2262_v39 }
 0x505   : > { %v2264_v47 = vpop.xlane.xlu1 %2263 }
 0x506   : > { %6304 = vpow2.f32 %v2355_v4  ;;  %v2357_v58 = vmul.f32 1.442695, %v2323_v5  ;;  %v2324_v63 = vsub.f32 %v8504_v30, %v2264_v47 }
 0x507   : > { %v2266_v21 = vpop.xlane.xlu0 %2265 }
 0x508   : > { %6306 = vpow2.f32 %v2357_v58  ;;  %v2359_v12 = vmul.f32 1.442695, %v2324_v63  ;;  %v8606_v18 = vpop.f32.mrb[60].mxu0  ;;  %v2325_v20 = vsub.f32 %v8510_v50, %v2266_v21  ;;  %v8626_v63 = vadd.f32 %v2226_v62, %v8520_v9 }
 0x509   : > { %v2268_v34 = vpop.xlane.xlu1 %2267  ;;  %v2242_v28 = vpop.f32.mrb[61].mxu0  ;;  %v8638_v9 = vadd.f32 %v5801_v57, %v8537_v24 }
 0x50a   : > { %6308 = vpow2.f32 %v2359_v12  ;;  %v8608_v49 = vpop.f32.mrb[62].mxu0  ;;  %v2326_v19 = vsub.f32 %v8514_v6, %v2268_v34  ;;  %v2361_v27 = vmul.f32 1.442695, %v2325_v20  ;;  %v8630_v12 = vadd.f32 %v2229_v31, %v8525_v61 }
 0x50b   : > { %v2245_v48 = vpop.f32.mrb[63].mxu0  ;;  %v2270_v41 = vpop.xlane.xlu0 %2269 }
 0x50c   : > { %v2327_v39 = vsub.f32 %v8517_v0, %v2270_v41  ;;  %v2363_v5 = vmul.f32 1.442695, %v2326_v19  ;;  %6310 = vpow2.f32 %v2361_v27 }
 0x50d   : > { %v2272_v10 = vpop.xlane.xlu1 %2271 }
 0x50e   : > { %v8611_v23 = vpop.eup %6302  ;;  %v2328_v50 = vsub.f32 %v8522_v54, %v2272_v10  ;;  %v2365_v6 = vmul.f32 1.442695, %v2327_v39  ;;  %6312 = vpow2.f32 %v2363_v5  ;;  %v8634_v54 = vadd.f32 %v5800_v55, %v8531_v33 }
 0x50f   : > { %2417 = vadd.xlane.f32.xlu0 %v8611_v23  ;;  %v2274_v47 = vpop.xlane.xlu0 %2273  ;;  %v8659_v5 = vadd.f32 %v2242_v28, %v8543_v17  ;;  %v8670_v17 = vadd.f32 %v8606_v18, %v8555_v38 }
 0x510   : > { %v8615_v30 = vpop.eup %6304  ;;  %v2367_v0 = vmul.f32 1.442695, %v2328_v50  ;;  %6314 = vpow2.f32 %v2365_v6  ;;  %v2329_v20 = vsub.f32 %v8528_v3, %v2274_v47 }
 0x511   : > { %2419 = vadd.xlane.f32.xlu1 %v8615_v30  ;;  %v2276_v21 = vpop.xlane.xlu1 %2275 }
 0x512   : > { %v8619_v4 = vpop.eup %6306  ;;  %6316 = vpow2.f32 %v2367_v0  ;;  %v2330_v31 = vsub.f32 %v8534_v36, %v2276_v21  ;;  %v2369_v41 = vmul.f32 1.442695, %v2329_v20 }
 0x513   : > { %2421 = vadd.xlane.f32.xlu0 %v8619_v4  ;;  %v2278_v34 = vpop.xlane.xlu0 %2277 }
 0x514   : > { %v8623_v58 = vpop.eup %6308  ;;  %v2331_v24 = vsub.f32 %v8540_v51, %v2278_v34  ;;  %v2371_v3 = vmul.f32 1.442695, %v2330_v31  ;;  %6318 = vpow2.f32 %v2369_v41 }
 0x515   : > { %2423 = vadd.xlane.f32.xlu1 %v8623_v58  ;;  %v2280_v62 = vpop.xlane.xlu1 %2279 }
 0x516   : > { %v8643_v61 = vpop.eup %6310  ;;  %v2332_v10 = vsub.f32 %v8546_v14, %v2280_v62  ;;  %v2373_v36 = vmul.f32 1.442695, %v2331_v24  ;;  %6320 = vpow2.f32 %v2371_v3  ;;  %v8664_v14 = vadd.f32 %v2245_v48, %v8549_v37 }
 0x517   : > { %2305 = vmax.xlane.f32.xlu0 %v8626_v63  ;;  %v2282_v33 = vpop.xlane.xlu0 %2281  ;;  %v8676_v37 = vadd.f32 %v8608_v49, %v8561_v45 }
 0x518   : > { %v8647_v55 = vpop.eup %6312  ;;  %v2333_v39 = vsub.f32 %v8552_v35, %v2282_v33  ;;  %v2375_v50 = vmul.f32 1.442695, %v2332_v10  ;;  %6322 = vpow2.f32 %v2373_v36 }
 0x519   : > { %2307 = vmax.xlane.f32.xlu1 %v8630_v12  ;;  %v2284_v57 = vpop.xlane.xlu1 %2283 }
 0x51a   : > { %v8651_v19 = vpop.eup %6314  ;;  %v2334_v47 = vsub.f32 %v8558_v56, %v2284_v57  ;;  %v2377_v21 = vmul.f32 1.442695, %v2333_v39  ;;  %6324 = vpow2.f32 %v2375_v50 }
 0x51b   : > { %2309 = vmax.xlane.f32.xlu0 %v8634_v54  ;;  %v2286_v51 = vpop.xlane.xlu0 %2285 }
 0x51c   : > { %v8655_v27 = vpop.eup %6316  ;;  %v2335_v35 = vsub.f32 %v8564_v15, %v2286_v51  ;;  %v2379_v28 = vmul.f32 1.442695, %v2334_v47  ;;  %6326 = vpow2.f32 %v2377_v21 }
 0x51d   : > { %2311 = vmax.xlane.f32.xlu1 %v8638_v9  ;;  %v2288_v6 = vpop.xlane.xlu1 %2287 }
 0x51e   : > { %v2336_v56 = vsub.f32 %v8568_v42, %v2288_v6  ;;  %v2381_v48 = vmul.f32 1.442695, %v2335_v35  ;;  %v8680_v15 = vpop.eup %6318  ;;  %6328 = vpow2.f32 %v2379_v28 }
 0x51f   : > { %2425 = vadd.xlane.f32.xlu0 %v8643_v61 }
 0x520   : > { %v2383_v38 = vmul.f32 1.442695, %v2336_v56  ;;  %v8683_v18 = vpop.eup %6320  ;;  %6330 = vpow2.f32 %v2381_v48 }
 0x521   : > { %2427 = vadd.xlane.f32.xlu1 %v8647_v55 }
 0x522   : > { %v8686_v42 = vpop.eup %6322  ;;  %6332 = vpow2.f32 %v2383_v38 }
 0x523   : > { %2429 = vadd.xlane.f32.xlu0 %v8651_v19 }
 0x524   : > { %v8689_v45 = vpop.eup %6324 }
 0x525   : > { %2431 = vadd.xlane.f32.xlu1 %v8655_v27 }
 0x526   : > { %v8692_v49 = vpop.eup %6326 }
 0x527   : > { %2313 = vmax.xlane.f32.xlu0 %v8659_v5 }
 0x528   : > { %v8695_v0 = vpop.eup %6328 }
 0x529   : > { %2315 = vmax.xlane.f32.xlu1 %v8664_v14 }
 0x52a   : > { %v8698_v34 = vpop.eup %6330 }
 0x52b   : > { %2317 = vmax.xlane.f32.xlu0 %v8670_v17 }
 0x52c   : > { %v8701_v62 = vpop.eup %6332 }
 0x52d   : > { %2319 = vmax.xlane.f32.xlu1 %v8676_v37 }
 0x52f   : > { %2433 = vadd.xlane.f32.xlu0 %v8680_v15 }
 0x531   : > { %2435 = vadd.xlane.f32.xlu1 %v8683_v18 }
 0x533   : > { %2437 = vadd.xlane.f32.xlu0 %v8686_v42 }
 0x535   : > { %2439 = vadd.xlane.f32.xlu1 %v8689_v45 }
 0x537   : > { %2441 = vadd.xlane.f32.xlu0 %v8692_v49 }
 0x539   : > { %2443 = vadd.xlane.f32.xlu1 %v8695_v0 }
 0x53b   : > { %2445 = vadd.xlane.f32.xlu0 %v8698_v34 }
 0x53d   : > { %2447 = vadd.xlane.f32.xlu1 %v8701_v62 }
 0x581   : > { %v2290_v20 = vpop.xlane.xlu0 %2289 }
 0x582   : > { %v2337_v31 = vsub.f32 %v8573_v7, %v2290_v20 }
 0x583   : > { %v2292_v33 = vpop.xlane.xlu1 %2291 }
 0x584   : > { %v2385_v41 = vmul.f32 1.442695, %v2337_v31  ;;  %v2338_v24 = vsub.f32 %v8576_v25, %v2292_v33 }
 0x585   : > { %v2294_v57 = vpop.xlane.xlu0 %2293 }
 0x586   : > { %6334 = vpow2.f32 %v2385_v41  ;;  %v2387_v3 = vmul.f32 1.442695, %v2338_v24  ;;  %v2339_v10 = vsub.f32 %v8580_v29, %v2294_v57 }
 0x587   : > { %v2296_v36 = vpop.xlane.xlu1 %2295 }
 0x588   : > { %6336 = vpow2.f32 %v2387_v3  ;;  %v2389_v39 = vmul.f32 1.442695, %v2339_v10  ;;  %v2340_v51 = vsub.f32 %v8584_v40, %v2296_v36 }
 0x589   : > { %v2302_v50 = vpop.xlane.xlu0 %2301 }
 0x58a   : > { %6338 = vpow2.f32 %v2389_v39  ;;  %v2391_v47 = vmul.f32 1.442695, %v2340_v51  ;;  %v2343_v21 = vsub.f32 %v8587_v59, %v2302_v50 }
 0x58b   : > { %v2304_v6 = vpop.xlane.xlu1 %2303 }
 0x58c   : > { %6340 = vpow2.f32 %v2391_v47  ;;  %v2344_v29 = vsub.f32 %v8590_v52, %v2304_v6  ;;  %v2397_v38 = vmul.f32 1.442695, %v2343_v21 }
 0x58d   : > { %v2298_v7 = vpop.xlane.xlu0 %2297 }
 0x58e   : > { %v2341_v25 = vsub.f32 %v8594_v44, %v2298_v7  ;;  %v2399_v44 = vmul.f32 1.442695, %v2344_v29 }
 0x58f   : > { %v2300_v35 = vpop.xlane.xlu1 %2299 }
 0x590   : > { %v8710_v28 = vpop.eup %6334  ;;  %v2393_v56 = vmul.f32 1.442695, %v2341_v25  ;;  %v2342_v48 = vsub.f32 %v8599_v32, %v2300_v35 }
 0x591   : > { %2449 = vadd.xlane.f32.xlu0 %v8710_v28 }
 0x592   : > { %v8715_v40 = vpop.eup %6336  ;;  %6342 = vpow2.f32 %v2393_v56  ;;  %v2395_v20 = vmul.f32 1.442695, %v2342_v48 }
 0x593   : > { %2451 = vadd.xlane.f32.xlu1 %v8715_v40 }
 0x594   : > { %v8718_v59 = vpop.eup %6338  ;;  %6344 = vpow2.f32 %v2395_v20 }
 0x595   : > { %2453 = vadd.xlane.f32.xlu0 %v8718_v59  ;;  %6346 = vpow2.f32 %v2397_v38 }
 0x596   : > { %v8721_v31 = vpop.eup %6340  ;;  %6348 = vpow2.f32 %v2399_v44 }
 0x597   : > { %2455 = vadd.xlane.f32.xlu1 %v8721_v31 }
 0x59c   : > { %v8724_v52 = vpop.eup %6342  ;;  %v2418_v32 = vpop.xlane.xlu0 %2417 }
 0x59d   : > { %6350 = vrcp.f32 %v2418_v32  ;;  %2457 = vadd.xlane.f32.xlu0 %v8724_v52 }
 0x59e   : > { %v8727_v33 = vpop.eup %6344  ;;  %v2420_v41 = vpop.xlane.xlu1 %2419 }
 0x59f   : > { %6352 = vrcp.f32 %v2420_v41  ;;  %2459 = vadd.xlane.f32.xlu1 %v8727_v33  ;;  %v8730_v24 = vpop.eup %6346 }
 0x5a0   : > { %v2422_v57 = vpop.xlane.xlu0 %2421  ;;  %v8733_v3 = vpop.eup %6348 }
 0x5a1   : > { %6354 = vrcp.f32 %v2422_v57  ;;  %2461 = vadd.xlane.f32.xlu0 %v8730_v24 }
 0x5a2   : > { %v2424_v10 = vpop.xlane.xlu1 %2423 }
 0x5a3   : > { %6356 = vrcp.f32 %v2424_v10  ;;  %2463 = vadd.xlane.f32.xlu1 %v8733_v3 }
 0x5a4   : > { %v2306_v36 = vpop.xlane.xlu0 %2305 }
 0x5a5   : > { %v2345_v39 = vsub.f32 %v8626_v63, %v2306_v36 }
 0x5a6   : > { %v2308_v51 = vpop.xlane.xlu1 %2307 }
 0x5a7   : > { %v6351_v50 = vpop.eup %6350  ;;  %v2401_v47 = vmul.f32 1.442695, %v2345_v39  ;;  %v2346_v6 = vsub.f32 %v8630_v12, %v2308_v51 }
 0x5a8   : > { %v2310_v7 = vpop.xlane.xlu0 %2309  ;;  %v2513_v56 = vmul.f32 %v6351_v50, %v8611_v23 }
 0x5a9   : > { %v6353_v21 = vpop.eup %6352  ;;  %6358 = vpow2.f32 %v2401_v47  ;;  %v2403_v25 = vmul.f32 1.442695, %v2346_v6  ;;  %v2347_v35 = vsub.f32 %v8634_v54, %v2310_v7 }
 0x5aa   : > { %v2312_v29 = vpop.xlane.xlu1 %2311  ;;  %v2514_v48 = vmul.f32 %v6353_v21, %v8615_v30 }
 0x5ab   : > { %v6355_v38 = vpop.eup %6354  ;;  %6360 = vpow2.f32 %v2403_v25  ;;  %v2405_v20 = vmul.f32 1.442695, %v2347_v35  ;;  %v2348_v63 = vsub.f32 %v8638_v9, %v2312_v29 }
 0x5ac   : > { %v2426_v44 = vpop.xlane.xlu0 %2425  ;;  %v2545_v32 = vpack.c.bf16 %v2514_v48, %v2513_v56  ;;  %v2515_v57 = vmul.f32 %v6355_v38, %v8619_v4 }
 0x5ad   : > { %v6357_v41 = vpop.eup %6356  ;;  %6362 = vpow2.f32 %v2405_v20  ;;  %v2407_v12 = vmul.f32 1.442695, %v2348_v63 }
 0x5ae   : > { %v2516_v10 = vmul.f32 %v6357_v41, %v8623_v58  ;;  %6364 = vrcp.f32 %v2426_v44  ;;  %v2428_v54 = vpop.xlane.xlu1 %2427  ;;  %5822 = vmatprep.mubr.bf16.mxu1 %v2545_v32 }
 0x5af   : > { %6366 = vpow2.f32 %v2407_v12 }
 0x5b0   : > { %6368 = vrcp.f32 %v2428_v54  ;;  %v2430_v23 = vpop.xlane.xlu0 %2429  ;;  %v2546_v30 = vpack.c.bf16 %v2516_v10, %v2515_v57 }
 0x5b1   : > { %6370 = vrcp.f32 %v2430_v23 }
 0x5b2   : > { %v2432_v36 = vpop.xlane.xlu1 %2431  ;;  %5823 = vmatmul.mubr.bf16.vlgmr.msra.gmra.mrb[64].mxu1 %v2546_v30 }
 0x5b3   : > { %v8744_v9 = vpop.eup %6358  ;;  %6372 = vrcp.f32 %v2432_v36  ;;  %5839 = vmatpush3.bf16.msra.mxu1 %v8455_v46 }
 0x5b4   : > { %5840 = vmatprep.subr.bf16.mxu1 %v8453_v26  ;;  %2465 = vadd.xlane.f32.xlu0 %v8744_v9  ;;  %v2314_v4 = vpop.xlane.xlu0 %2313 }
 0x5b5   : > { %v8749_v58 = vpop.eup %6360  ;;  %v2349_v39 = vsub.f32 %v8659_v5, %v2314_v4 }
 0x5b6   : > { %2467 = vadd.xlane.f32.xlu1 %v8749_v58  ;;  %v2316_v51 = vpop.xlane.xlu1 %2315 }
 0x5b7   : > { %v8753_v50 = vpop.eup %6362  ;;  %v2409_v47 = vmul.f32 1.442695, %v2349_v39  ;;  %5841 = vmatpush3.bf16.msra.mxu1 %v8453_v26  ;;  %v2350_v6 = vsub.f32 %v8664_v14, %v2316_v51 }
 0x5b8   : > { %v6365_v46 = vpop.eup %6364  ;;  %5842 = vmatprep.subr.bf16.mxu1 %v8464_v22  ;;  %2469 = vadd.xlane.f32.xlu0 %v8753_v50  ;;  %v2318_v7 = vpop.xlane.xlu0 %2317 }
 0x5b9   : > { %v8759_v21 = vpop.eup %6366  ;;  %6374 = vpow2.f32 %v2409_v47  ;;  %v2411_v5 = vmul.f32 1.442695, %v2350_v6  ;;  %v2351_v25 = vsub.f32 %v8670_v17, %v2318_v7  ;;  %v2517_v26 = vmul.f32 %v6365_v46, %v8643_v61 }
 0x5ba   : > { %v6369_v35 = vpop.eup %6368  ;;  %2471 = vadd.xlane.f32.xlu1 %v8759_v21  ;;  %v2320_v29 = vpop.xlane.xlu1 %2319 }
 0x5bb   : > { %v6371_v56 = vpop.eup %6370  ;;  %6376 = vpow2.f32 %v2411_v5  ;;  %v2413_v14 = vmul.f32 1.442695, %v2351_v25  ;;  %5843 = vmatpush3.bf16.msra.mxu1 %v8464_v22  ;;  %v2352_v48 = vsub.f32 %v8676_v37, %v2320_v29  ;;  %v2518_v38 = vmul.f32 %v6369_v35, %v8647_v55 }
 0x5bc   : > { %5844 = vmatprep.subr.bf16.mxu1 %v8462_v11  ;;  %v2434_v20 = vpop.xlane.xlu0 %2433  ;;  %v2519_v61 = vmul.f32 %v6371_v56, %v8651_v19  ;;  %v6130_v56 = vld [vmem:[%s2773_s2 + $0x20] sm:$0xff]  }
 0x5bd   : > { %v6373_v63 = vpop.eup %6372  ;;  %6378 = vpow2.f32 %v2413_v14  ;;  %v2415_v17 = vmul.f32 1.442695, %v2352_v48  ;;  %v2547_v44 = vpack.c.bf16 %v2518_v38, %v2517_v26  ;;  %v6127_v26 = vld [vmem:[%s2773_s2 + $0x8] sm:$0xff]   ;;  %v6133_v14 = vld [vmem:[%s2773_s2 + $0x38] sm:$0xff]  }
 0x5be   : > { %6380 = vrcp.f32 %v2434_v20  ;;  %v2436_v32 = vpop.xlane.xlu1 %2435  ;;  %v2520_v41 = vmul.f32 %v6373_v63, %v8655_v27 }
 0x5bf   : > { %6382 = vpow2.f32 %v2415_v17  ;;  %5826 = vmatprep.mubr.bf16.mxu1 %v2547_v44  ;;  %5845 = vmatpush3.bf16.msra.mxu1 %v8462_v11 }
 0x5c0   : > { %6384 = vrcp.f32 %v2436_v32  ;;  %5846 = vmatprep.subr.bf16.mxu1 %v8472_v60  ;;  %v2438_v22 = vpop.xlane.xlu0 %2437  ;;  %v2548_v55 = vpack.c.bf16 %v2520_v41, %v2519_v61 }
 0x5c1   : > { %6386 = vrcp.f32 %v2438_v22 }
 0x5c2   : > { %5827 = vmatmul.mubr.bf16.gmra.mrb[68].mxu1 %v2548_v55  ;;  %v2440_v37 = vpop.xlane.xlu1 %2439 }
 0x5c3   : > { %v8772_v12 = vpop.eup %6374  ;;  %5847 = vmatpush3.bf16.msra.mxu1 %v8472_v60  ;;  %6388 = vrcp.f32 %v2440_v37 }
 0x5c4   : > { %5848 = vmatprep.subr.bf16.mxu1 %v8470_v2  ;;  %2473 = vadd.xlane.f32.xlu0 %v8772_v12  ;;  %v2442_v19 = vpop.xlane.xlu0 %2441 }
 0x5c5   : > { %v8777_v27 = vpop.eup %6376  ;;  %6390 = vrcp.f32 %v2442_v19 }
 0x5c6   : > { %2475 = vadd.xlane.f32.xlu1 %v8777_v27  ;;  %v2444_v11 = vpop.xlane.xlu1 %2443 }
 0x5c7   : > { %v8780_v57 = vpop.eup %6378  ;;  %5849 = vmatpush3.bf16.msra.mxu1 %v8470_v2  ;;  %6392 = vrcp.f32 %v2444_v11 }
 0x5c8   : > { %v6381_v10 = vpop.eup %6380  ;;  %5850 = vmatprep.subr.bf16.mxu1 %v8480_v16  ;;  %2477 = vadd.xlane.f32.xlu0 %v8780_v57  ;;  %v2446_v60 = vpop.xlane.xlu0 %2445 }
 0x5c9   : > { %v8785_v54 = vpop.eup %6382  ;;  %6394 = vrcp.f32 %v2446_v60  ;;  %v2521_v2 = vmul.f32 %v6381_v10, %v8680_v15 }
 0x5ca   : > { %v6385_v23 = vpop.eup %6384  ;;  %2479 = vadd.xlane.f32.xlu1 %v8785_v54  ;;  %v2448_v30 = vpop.xlane.xlu1 %2447 }
 0x5cb   : > { %v6387_v36 = vpop.eup %6386  ;;  %5851 = vmatpush3.bf16.msra.mxu1 %v8480_v16  ;;  %6396 = vrcp.f32 %v2448_v30  ;;  %v2522_v4 = vmul.f32 %v6385_v23, %v8683_v18 }
 0x5cc   : > { %5852 = vmatprep.subr.bf16.mxu1 %v8478_v8  ;;  %v2523_v47 = vmul.f32 %v6387_v36, %v8686_v42 }
 0x5cd   : > { %v6389_v39 = vpop.eup %6388  ;;  %v2549_v51 = vpack.c.bf16 %v2522_v4, %v2521_v2 }
 0x5ce   : > { %v2524_v6 = vmul.f32 %v6389_v39, %v8689_v45 }
 0x5cf   : > { %v6391_v46 = vpop.eup %6390  ;;  %5830 = vmatprep.mubr.bf16.mxu1 %v2549_v51  ;;  %5853 = vmatpush3.bf16.msra.mxu1 %v8478_v8  ;;  %v6126_v8 = vld [vmem:[%s2773_s2] sm:$0xff]  }
 0x5d0   : > { %v2550_v7 = vpack.c.bf16 %v2524_v6, %v2523_v47  ;;  %v2525_v15 = vmul.f32 %v6391_v46, %v8692_v49  ;;  %5870 = vmatprep.subr.bf16.mxu0 %v6126_v8  ;;  %v6128_v49 = vld [vmem:[%s2773_s2 + $0x10] sm:$0xff]  }
 0x5d1   : > { %v6393_v16 = vpop.eup %6392  ;;  %5871 = vmatpush3.bf16.msra.mxu0 %v6126_v8 }
 0x5d2   : > { %5831 = vmatmul.mubr.bf16.gmra.mrb[72].mxu1 %v2550_v7  ;;  %v2526_v18 = vmul.f32 %v6393_v16, %v8695_v0  ;;  %5872 = vmatprep.subr.bf16.mxu0 %v6127_v26  ;;  %v6129_v0 = vld [vmem:[%s2773_s2 + $0x18] sm:$0xff]  }
 0x5d3   : > { %v6395_v5 = vpop.eup %6394 }
 0x5d4   : > { %v2551_v25 = vpack.c.bf16 %v2526_v18, %v2525_v15  ;;  %v2527_v42 = vmul.f32 %v6395_v5, %v8698_v34  ;;  %v6131_v34 = vld [vmem:[%s2773_s2 + $0x28] sm:$0xff]  }
 0x5d5   : > { %v6397_v35 = vpop.eup %6396  ;;  %5873 = vmatpush3.bf16.msra.mxu0 %v6127_v26 }
 0x5d6   : > { %5834 = vmatprep.mubr.bf16.mxu1 %v2551_v25  ;;  %v2528_v45 = vmul.f32 %v6397_v35, %v8701_v62  ;;  %5874 = vmatprep.subr.bf16.mxu0 %v6128_v49  ;;  %v6132_v62 = vld [vmem:[%s2773_s2 + $0x30] sm:$0xff]  }
 0x5d8   : > { %v2552_v29 = vpack.c.bf16 %v2528_v45, %v2527_v42 }
 0x5d9   : > { %5875 = vmatpush3.bf16.msra.mxu0 %v6128_v49 }
 0x5da   : > { %5835 = vmatmul.mubr.bf16.gmra.mrb[76].mxu1 %v2552_v29  ;;  %5876 = vmatprep.subr.bf16.mxu0 %v6129_v0 }
 0x5dd   : > { %5877 = vmatpush3.bf16.msra.mxu0 %v6129_v0 }
 0x5de   : > { %5878 = vmatprep.subr.bf16.mxu0 %v6130_v56 }
 0x5e1   : > { %5879 = vmatpush3.bf16.msra.mxu0 %v6130_v56 }
 0x5e2   : > { %5880 = vmatprep.subr.bf16.mxu0 %v6131_v34 }
 0x5e5   : > { %5881 = vmatpush3.bf16.msra.mxu0 %v6131_v34 }
 0x5e6   : > { %5882 = vmatprep.subr.bf16.mxu0 %v6132_v62 }
 0x5e9   : > { %5883 = vmatpush3.bf16.msra.mxu0 %v6132_v62 }
 0x5ea   : > { %5884 = vmatprep.subr.bf16.mxu0 %v6133_v14 }
 0x5ed   : > { %5885 = vmatpush3.bf16.msra.mxu0 %v6133_v14 }
 0x61e   : > { %v2450_v48 = vpop.xlane.xlu0 %2449 }
 0x61f   : > { %6398 = vrcp.f32 %v2450_v48 }
 0x620   : > { %v2452_v38 = vpop.xlane.xlu1 %2451 }
 0x621   : > { %6400 = vrcp.f32 %v2452_v38 }
 0x622   : > { %v2454_v20 = vpop.xlane.xlu0 %2453 }
 0x623   : > { %6402 = vrcp.f32 %v2454_v20 }
 0x624   : > { %v2456_v63 = vpop.xlane.xlu1 %2455 }
 0x625   : > { %6404 = vrcp.f32 %v2456_v63 }
 0x629   : > { %v6399_v17 = vpop.eup %6398 }
 0x62a   : > { %v2458_v44 = vpop.xlane.xlu0 %2457  ;;  %v2529_v41 = vmul.f32 %v6399_v17, %v8710_v28 }
 0x62b   : > { %v6401_v32 = vpop.eup %6400  ;;  %6406 = vrcp.f32 %v2458_v44 }
 0x62c   : > { %v2460_v61 = vpop.xlane.xlu1 %2459  ;;  %v2530_v22 = vmul.f32 %v6401_v32, %v8715_v40 }
 0x62d   : > { %v6403_v55 = vpop.eup %6402  ;;  %6408 = vrcp.f32 %v2460_v61 }
 0x62e   : > { %v2462_v37 = vpop.xlane.xlu0 %2461  ;;  %v2553_v19 = vpack.c.bf16 %v2530_v22, %v2529_v41  ;;  %v2531_v10 = vmul.f32 %v6403_v55, %v8718_v59 }
 0x62f   : > { %v6405_v11 = vpop.eup %6404  ;;  %6410 = vrcp.f32 %v2462_v37 }
 0x630   : > { %v2532_v60 = vmul.f32 %v6405_v11, %v8721_v31  ;;  %v2464_v23 = vpop.xlane.xlu1 %2463  ;;  %5854 = vmatprep.mubr.bf16.mxu1 %v2553_v19 }
 0x631   : > { %6412 = vrcp.f32 %v2464_v23 }
 0x632   : > { %v2554_v30 = vpack.c.bf16 %v2532_v60, %v2531_v10 }
 0x634   : > { %5855 = vmatmul.mubr.bf16.vlgmr.msra.gmra.mrb[80].mxu1 %v2554_v30 }
 0x635   : > { %v6407_v36 = vpop.eup %6406 }
 0x636   : > { %v2533_v28 = vmul.f32 %v6407_v36, %v8724_v52 }
 0x637   : > { %v6409_v2 = vpop.eup %6408 }
 0x638   : > { %v2534_v40 = vmul.f32 %v6409_v2, %v8727_v33 }
 0x639   : > { %v6411_v4 = vpop.eup %6410 }
 0x63a   : > { %v2555_v39 = vpack.c.bf16 %v2534_v40, %v2533_v28  ;;  %v2535_v47 = vmul.f32 %v6411_v4, %v8730_v24 }
 0x63b   : > { %v6413_v51 = vpop.eup %6412 }
 0x63c   : > { %5858 = vmatprep.mubr.bf16.mxu1 %v2555_v39  ;;  %v2536_v59 = vmul.f32 %v6413_v51, %v8733_v3 }
 0x63e   : > { %v2556_v31 = vpack.c.bf16 %v2536_v59, %v2535_v47 }
 0x640   : > { %5859 = vmatmul.mubr.bf16.gmra.mrb[84].mxu1 %v2556_v31 }
 0x641   : > { %v2466_v6 = vpop.xlane.xlu0 %2465 }
 0x642   : > { %6414 = vrcp.f32 %v2466_v6 }
 0x643   : > { %v2468_v46 = vpop.xlane.xlu1 %2467 }
 0x644   : > { %6416 = vrcp.f32 %v2468_v46 }
 0x645   : > { %v2470_v7 = vpop.xlane.xlu0 %2469 }
 0x646   : > { %6418 = vrcp.f32 %v2470_v7 }
 0x647   : > { %v2472_v16 = vpop.xlane.xlu1 %2471 }
 0x648   : > { %6420 = vrcp.f32 %v2472_v16 }
 0x64c   : > { %v6415_v52 = vpop.eup %6414 }
 0x64d   : > { %v2537_v15 = vmul.f32 %v6415_v52, %v8744_v9 }
 0x64e   : > { %v6417_v33 = vpop.eup %6416 }
 0x64f   : > { %v2538_v18 = vmul.f32 %v6417_v33, %v8749_v58 }
 0x650   : > { %v6419_v5 = vpop.eup %6418 }
 0x651   : > { %v2474_v24 = vpop.xlane.xlu0 %2473  ;;  %v2557_v25 = vpack.c.bf16 %v2538_v18, %v2537_v15  ;;  %v2539_v42 = vmul.f32 %v6419_v5, %v8753_v50 }
 0x652   : > { %v6421_v3 = vpop.eup %6420  ;;  %6422 = vrcp.f32 %v2474_v24 }
 0x653   : > { %v2476_v35 = vpop.xlane.xlu1 %2475  ;;  %5862 = vmatprep.mubr.bf16.mxu1 %v2557_v25  ;;  %v2540_v45 = vmul.f32 %v6421_v3, %v8759_v21 }
 0x654   : > { %6424 = vrcp.f32 %v2476_v35 }
 0x655   : > { %v2478_v29 = vpop.xlane.xlu0 %2477  ;;  %v2558_v8 = vpack.c.bf16 %v2540_v45, %v2539_v42 }
 0x656   : > { %6426 = vrcp.f32 %v2478_v29 }
 0x657   : > { %v2480_v26 = vpop.xlane.xlu1 %2479  ;;  %5863 = vmatmul.mubr.bf16.gmra.mrb[88].mxu1 %v2558_v8  ;;  %v8821_v8 = vld [vmem:[%s2790_s9] ss:$0 sm:$0xff]  ;;  %s5418_s9 = sshll.u32 %s10601_s30, 1 }
 0x658   : > { %6428 = vrcp.f32 %v2480_v26 }
 0x65c   : > { %v6423_v9 = vpop.eup %6422 }
 0x65d   : > { %v2541_v49 = vmul.f32 %v6423_v9, %v8772_v12 }
 0x65e   : > { %v6425_v58 = vpop.eup %6424 }
 0x65f   : > { %v2542_v0 = vmul.f32 %v6425_v58, %v8777_v27 }
 0x660   : > { %v6427_v56 = vpop.eup %6426 }
 0x661   : > { %v2559_v34 = vpack.c.bf16 %v2542_v0, %v2541_v49  ;;  %v2543_v50 = vmul.f32 %v6427_v56, %v8780_v57 }
 0x662   : > { %v6429_v62 = vpop.eup %6428 }
 0x663   : > { %5866 = vmatprep.mubr.bf16.mxu1 %v2559_v34  ;;  %v2544_v21 = vmul.f32 %v6429_v62, %v8785_v54  ;;  %v6560_v34 = vld [vmem:[#allocation2] sm:$0xff] }
 0x665   : > { %v2560_v14 = vpack.c.bf16 %v2544_v21, %v2543_v50 }
 0x667   : > { %5867 = vmatmul.mubr.bf16.gmra.mrb[92].mxu1 %v2560_v14  ;;  %v6561_v14 = vld [vmem:[#allocation2 + $0x8] sm:$0xff] }
 0x668   : > { %3856 = vmatprep.mubr.bf16.mxu1 %v10533_v1 }
 0x685   : > { %v5824_v48 = vpop.f32.mrb[64].mxu1 }
 0x686   : > { %v2595_v38 = vpop.f32.mrb[65].mxu1 }
 0x687   : > { %v5825_v20 = vpop.f32.mrb[66].mxu1 }
 0x688   : > { %v2756_v63 = vpack.c.bf16 %v5825_v20, %v5824_v48  ;;  %v2598_v17 = vpop.f32.mrb[67].mxu1 }
 0x689   : > { %v2755_v12 = vpack.c.bf16 %v2598_v17, %v2595_v38  ;;  %v6562_v38 = vld [vmem:[#allocation2 + $0x10] sm:$0xff] }
 0x68b   : > { %5886 = vmatprep.mubr.bf16.mxu0 %v2755_v12 }
 0x68c   : > { %5887 = vmatmul.mubr.bf16.vlgmr.msra.gmra.mrb[64].mxu0 %v2756_v63  ;;  %v6563_v63 = vld [vmem:[#allocation2 + $0x18] sm:$0xff] }
 0x695   : > { %v5828_v27 = vpop.f32.mrb[68].mxu1 }
 0x696   : > { %v2611_v44 = vpop.f32.mrb[69].mxu1 }
 0x697   : > { %v5829_v32 = vpop.f32.mrb[70].mxu1 }
 0x698   : > { %v2758_v61 = vpack.c.bf16 %v5829_v32, %v5828_v27  ;;  %v2614_v41 = vpop.f32.mrb[71].mxu1 }
 0x699   : > { %v2757_v57 = vpack.c.bf16 %v2614_v41, %v2611_v44 }
 0x69b   : > { %5890 = vmatprep.mubr.bf16.mxu0 %v2757_v57  ;;  %v6564_v57 = vld [vmem:[#allocation2 + $0x20] sm:$0xff] }
 0x69c   : > { %5891 = vmatmul.mubr.bf16.gmra.mrb[68].mxu0 %v2758_v61 }
 0x6a5   : > { %v5832_v54 = vpop.f32.mrb[72].mxu1 }
 0x6a6   : > { %v2627_v22 = vpop.f32.mrb[73].mxu1 }
 0x6a7   : > { %v5833_v55 = vpop.f32.mrb[74].mxu1 }
 0x6a8   : > { %v2760_v37 = vpack.c.bf16 %v5833_v55, %v5832_v54  ;;  %v2630_v19 = vpop.f32.mrb[75].mxu1 }
 0x6a9   : > { %v2759_v11 = vpack.c.bf16 %v2630_v19, %v2627_v22 }
 0x6ab   : > { %5894 = vmatprep.mubr.bf16.mxu0 %v2759_v11  ;;  %v6566_v11 = vld [vmem:[#allocation2 + $0x30] sm:$0xff] }
 0x6ac   : > { %5895 = vmatmul.mubr.bf16.gmra.mrb[72].mxu0 %v2760_v37  ;;  %v6565_v37 = vld [vmem:[#allocation2 + $0x28] sm:$0xff] }
 0x6ad   : > { %v5836_v10 = vpop.f32.mrb[76].mxu1 }
 0x6ae   : > { %v2643_v60 = vpop.f32.mrb[77].mxu1 }
 0x6af   : > { %v5837_v23 = vpop.f32.mrb[78].mxu1 }
 0x6b0   : > { %v2762_v30 = vpack.c.bf16 %v5837_v23, %v5836_v10  ;;  %v2646_v36 = vpop.f32.mrb[79].mxu1 }
 0x6b1   : > { %v2761_v2 = vpack.c.bf16 %v2646_v36, %v2643_v60  ;;  %v6567_v60 = vld [vmem:[#allocation2 + $0x38] sm:$0xff] }
 0x6b3   : > { %5898 = vmatprep.mubr.bf16.mxu0 %v2761_v2 }
 0x6b4   : > { %5899 = vmatmul.mubr.bf16.gmra.mrb[76].mxu0 %v2762_v30 }
 0x707   : > { %v5856_v28 = vpop.f32.mrb[80].mxu1 }
 0x708   : > { %v2692_v40 = vpop.f32.mrb[81].mxu1 }
 0x709   : > { %v5857_v4 = vpop.f32.mrb[82].mxu1 }
 0x70a   : > { %v2764_v39 = vpack.c.bf16 %v5857_v4, %v5856_v28  ;;  %v2695_v51 = vpop.f32.mrb[83].mxu1 }
 0x70b   : > { %v2763_v47 = vpack.c.bf16 %v2695_v51, %v2692_v40 }
 0x70d   : > { %5902 = vmatprep.mubr.bf16.mxu0 %v2763_v47 }
 0x70e   : > { %5903 = vmatmul.mubr.bf16.gmra.mrb[80].mxu0 %v2764_v39  ;;  %v6568_v39 = vld [vmem:[#allocation2 + $0x40] sm:$0xff] }
 0x713   : > { %v5860_v59 = vpop.f32.mrb[84].mxu1 }
 0x714   : > { %v2708_v31 = vpop.f32.mrb[85].mxu1 }
 0x715   : > { %v5861_v6 = vpop.f32.mrb[86].mxu1 }
 0x716   : > { %v2766_v46 = vpack.c.bf16 %v5861_v6, %v5860_v59  ;;  %v2711_v7 = vpop.f32.mrb[87].mxu1 }
 0x717   : > { %v2765_v16 = vpack.c.bf16 %v2711_v7, %v2708_v31  ;;  %v6569_v31 = vld [vmem:[#allocation2 + $0x48] sm:$0xff] }
 0x719   : > { %5906 = vmatprep.mubr.bf16.mxu0 %v2765_v16 }
 0x71a   : > { %5907 = vmatmul.mubr.bf16.gmra.mrb[84].mxu0 %v2766_v46  ;;  %v6570_v46 = vld [vmem:[#allocation2 + $0x50] sm:$0xff] }
 0x72a   : > { %v5864_v52 = vpop.f32.mrb[88].mxu1 }
 0x72b   : > { %v2724_v33 = vpop.f32.mrb[89].mxu1 }
 0x72c   : > { %v5865_v15 = vpop.f32.mrb[90].mxu1 }
 0x72d   : > { %v2768_v18 = vpack.c.bf16 %v5865_v15, %v5864_v52  ;;  %v2727_v5 = vpop.f32.mrb[91].mxu1 }
 0x72e   : > { %v2767_v24 = vpack.c.bf16 %v2727_v5, %v2724_v33  ;;  %v6571_v33 = vld [vmem:[#allocation2 + $0x58] sm:$0xff] }
 0x730   : > { %5910 = vmatprep.mubr.bf16.mxu0 %v2767_v24 }
 0x731   : > { %5911 = vmatmul.mubr.bf16.gmra.mrb[88].mxu0 %v2768_v18 }
 0x73a   : > { %v5868_v25 = vpop.f32.mrb[92].mxu1 }
 0x73b   : > { %v2740_v3 = vpop.f32.mrb[93].mxu1 }
 0x73c   : > { %v5869_v35 = vpop.f32.mrb[94].mxu1 }
 0x73d   : > { %v2770_v42 = vpack.c.bf16 %v5869_v35, %v5868_v25  ;;  %v2743_v45 = vpop.f32.mrb[95].mxu1 }
 0x73e   : > { %v2769_v29 = vpack.c.bf16 %v2743_v45, %v2740_v3  ;;  %v6572_v3 = vld [vmem:[#allocation2 + $0x60] sm:$0xff] }
 0x740   : > { %5914 = vmatprep.mubr.bf16.mxu0 %v2769_v29  ;;  %v6573_v29 = vld [vmem:[#allocation2 + $0x68] sm:$0xff] }
 0x741   : > { %5915 = vmatmul.mubr.bf16.gmra.mrb[92].mxu0 %v2770_v42 }
 0x75f   : > { %v5888_v26 = vpop.f32.mrb[64].mxu0 }
 0x760   : > { %v2880_v9 = vpop.f32.mrb[65].mxu0  ;;  %v2889_v56 = vadd.f32 %v5888_v26, %v8821_v8 }
 0x761   : > { %v2881_v58 = vadd.f32 %v8821_v8, %v2880_v9  ;;  %v5889_v49 = vpop.f32.mrb[66].mxu0  ;;  %v6574_v9 = vld [vmem:[#allocation2 + $0x70] sm:$0xff] }
 0x762   : > { %v2883_v0 = vpop.f32.mrb[67].mxu0  ;;  %v2892_v21 = vadd.f32 %v5889_v49, %v8821_v8  ;;  %v8832_v20 = vadd.f32 %v6562_v38, %v2889_v56  ;;  %v6575_v49 = vld [vmem:[#allocation2 + $0x78] sm:$0xff] }
 0x763   : > { %v8825_v62 = vadd.f32 %v6560_v34, %v2881_v58  ;;  %v2884_v50 = vadd.f32 %v8821_v8, %v2883_v0 }
 0x764   : > { %v8835_v17 = vadd.f32 %v6563_v63, %v2892_v21  ;;  %v6576_v63 = vld [vmem:[#allocation2 + $0x80] sm:$0xff] }
 0x765   : > { %v8829_v48 = vadd.f32 %v6561_v14, %v2884_v50  ;;  %3043 = vadd.xlane.f32.xlu0 %v8825_v62 }
 0x767   : > { %3045 = vadd.xlane.f32.xlu1 %v8829_v48 }
 0x769   : > { %3047 = vadd.xlane.f32.xlu0 %v8832_v20 }
 0x76b   : > { %3049 = vadd.xlane.f32.xlu1 %v8835_v17 }
 0x76f   : > { %v5892_v12 = vpop.f32.mrb[68].mxu0 }
 0x770   : > { %v2896_v27 = vpop.f32.mrb[69].mxu0  ;;  %v2905_v41 = vadd.f32 %v5892_v12, %v8821_v8 }
 0x771   : > { %v2897_v44 = vadd.f32 %v8821_v8, %v2896_v27  ;;  %v5893_v32 = vpop.f32.mrb[70].mxu0 }
 0x772   : > { %v2899_v61 = vpop.f32.mrb[71].mxu0  ;;  %v2908_v55 = vadd.f32 %v5893_v32, %v8821_v8  ;;  %v8848_v10 = vadd.f32 %v6566_v11, %v2905_v41  ;;  %v6577_v32 = vld [vmem:[#allocation2 + $0x88] sm:$0xff]  ;;  %v6578_v41 = vld [vmem:[#allocation2 + $0x90] sm:$0xff] }
 0x773   : > { %v8841_v54 = vadd.f32 %v6564_v57, %v2897_v44  ;;  %v2900_v22 = vadd.f32 %v8821_v8, %v2899_v61 }
 0x774   : > { %10605 = vst [vmem:[#allocation28_spill] sm:$0xff] %v8848_v10  ;;  %v8851_v23 = vadd.f32 %v6567_v60, %v2908_v55 }
 0x775   : > { %v8845_v19 = vadd.f32 %v6565_v37, %v2900_v22  ;;  %3051 = vadd.xlane.f32.xlu0 %v8841_v54  ;;  %v6579_v22 = vld [vmem:[#allocation2 + $0x98] sm:$0xff] }
 0x776   : > { %10606 = vst [vmem:[#allocation29_spill] sm:$0xff] %v8851_v23 }
 0x777   : > { %10604 = vst [vmem:[#allocation27_spill] sm:$0xff] %v8845_v19  ;;  %3053 = vadd.xlane.f32.xlu1 %v8845_v19 }
 0x779   : > { %3055 = vadd.xlane.f32.xlu0 %v8848_v10 }
 0x77b   : > { %3057 = vadd.xlane.f32.xlu1 %v8851_v23 }
 0x77f   : > { %v5896_v30 = vpop.f32.mrb[72].mxu0 }
 0x780   : > { %v2912_v36 = vpop.f32.mrb[73].mxu0  ;;  %v2921_v4 = vadd.f32 %v5896_v30, %v8821_v8 }
 0x781   : > { %v2913_v2 = vadd.f32 %v8821_v8, %v2912_v36  ;;  %v5897_v28 = vpop.f32.mrb[74].mxu0 }
 0x782   : > { %v2915_v40 = vpop.f32.mrb[75].mxu0  ;;  %v2924_v59 = vadd.f32 %v5897_v28, %v8821_v8  ;;  %v8864_v7 = vadd.f32 %v6570_v46, %v2921_v4 }
 0x783   : > { %v8857_v51 = vadd.f32 %v6568_v39, %v2913_v2  ;;  %v2916_v47 = vadd.f32 %v8821_v8, %v2915_v40 }
 0x784   : > { %10609 = vst [vmem:[#allocation32_spill] sm:$0xff] %v8864_v7  ;;  %v8867_v15 = vadd.f32 %v6571_v33, %v2924_v59 }
 0x785   : > { %10607 = vst [vmem:[#allocation30_spill] sm:$0xff] %v8857_v51  ;;  %v8861_v6 = vadd.f32 %v6569_v31, %v2916_v47  ;;  %3059 = vadd.xlane.f32.xlu0 %v8857_v51 }
 0x786   : > { %10610 = vst [vmem:[#allocation33_spill] sm:$0xff] %v8867_v15 }
 0x787   : > { %10608 = vst [vmem:[#allocation31_spill] sm:$0xff] %v8861_v6  ;;  %3061 = vadd.xlane.f32.xlu1 %v8861_v6  ;;  %v5900_v16 = vpop.f32.mrb[76].mxu0 }
 0x788   : > { %v2928_v52 = vpop.f32.mrb[77].mxu0  ;;  %v2937_v25 = vadd.f32 %v5900_v16, %v8821_v8 }
 0x789   : > { %v2929_v18 = vadd.f32 %v8821_v8, %v2928_v52  ;;  %3063 = vadd.xlane.f32.xlu0 %v8864_v7  ;;  %v5901_v5 = vpop.f32.mrb[78].mxu0 }
 0x78a   : > { %v2931_v24 = vpop.f32.mrb[79].mxu0  ;;  %v2940_v45 = vadd.f32 %v5901_v5, %v8821_v8  ;;  %v8880_v58 = vadd.f32 %v6574_v9, %v2937_v25  ;;  %v6580_v5 = vld [vmem:[#allocation2 + $0xa0] sm:$0xff] }
 0x78b   : > { %v8872_v35 = vadd.f32 %v6572_v3, %v2929_v18  ;;  %v2932_v42 = vadd.f32 %v8821_v8, %v2931_v24  ;;  %3065 = vadd.xlane.f32.xlu1 %v8867_v15  ;;  %v6581_v3 = vld [vmem:[#allocation2 + $0xa8] sm:$0xff] }
 0x78c   : > { %10613 = vst [vmem:[#allocation36_spill] sm:$0xff] %v8880_v58  ;;  %v8883_v0 = vadd.f32 %v6575_v49, %v2940_v45 }
 0x78d   : > { %10611 = vst [vmem:[#allocation34_spill] sm:$0xff] %v8872_v35  ;;  %v8877_v26 = vadd.f32 %v6573_v29, %v2932_v42  ;;  %3067 = vadd.xlane.f32.xlu0 %v8872_v35 }
 0x78e   : > { %10614 = vst [vmem:[#allocation37_spill] sm:$0xff] %v8883_v0 }
 0x78f   : > { %10612 = vst [vmem:[#allocation35_spill] sm:$0xff] %v8877_v26  ;;  %3069 = vadd.xlane.f32.xlu1 %v8877_v26 }
 0x791   : > { %3071 = vadd.xlane.f32.xlu0 %v8880_v58 }
 0x793   : > { %3073 = vadd.xlane.f32.xlu1 %v8883_v0 }
 0x7e1   : > { %v5904_v56 = vpop.f32.mrb[80].mxu0 }
 0x7e2   : > { %v2944_v34 = vpop.f32.mrb[81].mxu0  ;;  %v2953_v38 = vadd.f32 %v5904_v56, %v8821_v8 }
 0x7e3   : > { %v2945_v50 = vadd.f32 %v8821_v8, %v2944_v34  ;;  %v5905_v21 = vpop.f32.mrb[82].mxu0 }
 0x7e4   : > { %v2947_v14 = vpop.f32.mrb[83].mxu0  ;;  %v2956_v44 = vadd.f32 %v5905_v21, %v8821_v8  ;;  %v8896_v57 = vadd.f32 %v6578_v41, %v2953_v38 }
 0x7e5   : > { %v8889_v12 = vadd.f32 %v6576_v63, %v2945_v50  ;;  %v2948_v27 = vadd.f32 %v8821_v8, %v2947_v14  ;;  %v6582_v50 = vld [vmem:[#allocation2 + $0xb0] sm:$0xff] }
 0x7e6   : > { %10617 = vst [vmem:[#allocation40_spill] sm:$0xff] %v8896_v57  ;;  %v8899_v55 = vadd.f32 %v6579_v22, %v2956_v44 }
 0x7e7   : > { %10615 = vst [vmem:[#allocation38_spill] sm:$0xff] %v8889_v12  ;;  %v8893_v61 = vadd.f32 %v6577_v32, %v2948_v27  ;;  %3075 = vadd.xlane.f32.xlu0 %v8889_v12  ;;  %v6583_v27 = vld [vmem:[#allocation2 + $0xb8] sm:$0xff] }
 0x7e8   : > { %10618 = vst [vmem:[#allocation41_spill] sm:$0xff] %v8899_v55 }
 0x7e9   : > { %10616 = vst [vmem:[#allocation39_spill] sm:$0xff] %v8893_v61  ;;  %3077 = vadd.xlane.f32.xlu1 %v8893_v61 }
 0x7eb   : > { %3079 = vadd.xlane.f32.xlu0 %v8896_v57 }
 0x7ed   : > { %3081 = vadd.xlane.f32.xlu1 %v8899_v55  ;;  %v5908_v37 = vpop.f32.mrb[84].mxu0 }
 0x7ee   : > { %v2960_v11 = vpop.f32.mrb[85].mxu0  ;;  %v2969_v29 = vadd.f32 %v5908_v37, %v8821_v8 }
 0x7ef   : > { %v5909_v60 = vpop.f32.mrb[86].mxu0  ;;  %v2961_v59 = vadd.f32 %v8821_v8, %v2960_v11 }
 0x7f0   : > { %v2963_v30 = vpop.f32.mrb[87].mxu0  ;;  %v2972_v49 = vadd.f32 %v5909_v60, %v8821_v8  ;;  %v8933_v21 = vadd.f32 %v6582_v50, %v2969_v29  ;;  %v6134_v29 = vld [vmem:[%s8959_s5] ss:$8 sps:$4 sm:$0xff]   ;;  %v6139_v50 = vld [vmem:[%s8959_s5 + $0x14] ss:$8 sps:$4 sm:$0xff]  }
 0x7f1   : > { %v2964_v52 = vadd.f32 %v8821_v8, %v2963_v30  ;;  %v8915_v24 = vadd.f32 %v6580_v5, %v2961_v59 }
 0x7f2   : > { %v3044_v36 = vpop.xlane.xlu0 %3043  ;;  %10621 = vst [vmem:[#allocation44_spill] sm:$0xff] %v8933_v21  ;;  %v8935_v44 = vadd.f32 %v6583_v27, %v2972_v49 }
 0x7f3   : > { %v3107_v2 = vmul.f32 0.0078125, %v3044_v36  ;;  %10619 = vst [vmem:[#allocation42_spill] sm:$0xff] %v8915_v24  ;;  %v8920_v42 = vadd.f32 %v6581_v3, %v2964_v52 }
 0x7f4   : > { %v3046_v28 = vpop.xlane.xlu1 %3045  ;;  %10622 = vst [vmem:[#allocation45_spill] sm:$0xff] %v8935_v44 }
 0x7f5   : > { %v8904_v40 = vsub.f32 %v8825_v62, %v3107_v2  ;;  %v3108_v4 = vmul.f32 0.0078125, %v3046_v28  ;;  %10620 = vst [vmem:[#allocation43_spill] sm:$0xff] %v8920_v42 }
 0x7f6   : > { %v3048_v39 = vpop.xlane.xlu0 %3047 }
 0x7f7   : > { %v8907_v47 = vsub.f32 %v8829_v48, %v3108_v4  ;;  %v3109_v31 = vmul.f32 0.0078125, %v3048_v39  ;;  %v3171_v46 = vmul.f32 %v8904_v40, %v8904_v40 }
 0x7f8   : > { %v3050_v16 = vpop.xlane.xlu1 %3049 }
 0x7f9   : > { %v3110_v33 = vmul.f32 0.0078125, %v3050_v16  ;;  %3203 = vadd.xlane.f32.xlu0 %v3171_v46  ;;  %v3172_v18 = vmul.f32 %v8907_v47, %v8907_v47  ;;  %v8918_v25 = vsub.f32 %v8832_v20, %v3109_v31  ;;  %v6584_v46 = vld [vmem:[#allocation2 + $0xc0] sm:$0xff] }
 0x7fb   : > { %3205 = vadd.xlane.f32.xlu1 %v3172_v18  ;;  %v8923_v45 = vsub.f32 %v8835_v17, %v3110_v33  ;;  %v3173_v9 = vmul.f32 %v8918_v25, %v8918_v25  ;;  %v6136_v33 = vld [vmem:[%s8959_s5 + $0x4] ss:$8 sps:$4 sm:$0xff]  }
 0x7fc   : > { %v6585_v18 = vld [vmem:[#allocation2 + $0xc8] sm:$0xff]  ;;  %3824 = vmatprep.subr.bf16.mxu1 %v6136_v33 }
 0x7fd   : > { %3083 = vadd.xlane.f32.xlu0 %v8915_v24  ;;  %v3174_v56 = vmul.f32 %v8923_v45, %v8923_v45  ;;  %3825 = vmatpush1.bf16.msra.mxu1 %v6134_v29 }
 0x7fe   : > { %3826 = vmatprep.subr.bf16.mxu1 %v6139_v50 }
 0x7ff   : > { %3085 = vadd.xlane.f32.xlu1 %v8920_v42 }
 0x801   : > { %3207 = vadd.xlane.f32.xlu0 %v3173_v9 }
 0x802   : > { %v3052_v34 = vpop.xlane.xlu0 %3051 }
 0x803   : > { %v3111_v14 = vmul.f32 0.0078125, %v3052_v34  ;;  %3209 = vadd.xlane.f32.xlu1 %v3174_v56 }
 0x804   : > { %v3054_v38 = vpop.xlane.xlu1 %3053  ;;  %v5912_v63 = vpop.f32.mrb[88].mxu0 }
 0x805   : > { %v8938_v32 = vsub.f32 %v8841_v54, %v3111_v14  ;;  %v3112_v41 = vmul.f32 0.0078125, %v3054_v38  ;;  %v2976_v22 = vpop.f32.mrb[89].mxu0  ;;  %3087 = vadd.xlane.f32.xlu0 %v8933_v21  ;;  %v2985_v9 = vadd.f32 %v5912_v63, %v8821_v8  ;;  %v6137_v38 = vld [vmem:[%s8959_s5 + $0x10] ss:$8 sps:$4 sm:$0xff]  }
 0x806   : > { %v5913_v37 = vpop.f32.mrb[90].mxu0  ;;  %v3056_v11 = vpop.xlane.xlu0 %3055  ;;  %v2977_v36 = vadd.f32 %v8821_v8, %v2976_v22  ;;  %3827 = vmatpush1.bf16.msra.mxu1 %v6137_v38 }
 0x807   : > { %v8942_v60 = vsub.f32 %v8845_v19, %v3112_v41  ;;  %3089 = vadd.xlane.f32.xlu1 %v8935_v44  ;;  %v2979_v30 = vpop.f32.mrb[91].mxu0  ;;  %v3113_v2 = vmul.f32 0.0078125, %v3056_v11  ;;  %v3175_v4 = vmul.f32 %v8938_v32, %v8938_v32  ;;  %v2988_v56 = vadd.f32 %v5913_v37, %v8821_v8  ;;  %v6586_v41 = vld [vmem:[#allocation2 + $0xd0] sm:$0xff] }
 0x808   : > { %v3058_v28 = vpop.xlane.xlu1 %3057  ;;  %v2980_v39 = vadd.f32 %v8821_v8, %v2979_v30  ;;  %v8952_v16 = vadd.f32 %v6584_v46, %v2977_v36  ;;  %v8978_v22 = vadd.f32 %v6586_v41, %v2985_v9  ;;  %v6587_v30 = vld [vmem:[#allocation2 + $0xd8] sm:$0xff]  ;;  %v6588_v41 = vld [vmem:[#allocation2 + $0xe0] sm:$0xff] }
 0x809   : > { %v3114_v59 = vmul.f32 0.0078125, %v3058_v28  ;;  %v3176_v31 = vmul.f32 %v8942_v60, %v8942_v60  ;;  %3211 = vadd.xlane.f32.xlu0 %v3175_v4  ;;  %v8955_v52 = vsub.f32 %v8848_v10, %v3113_v2  ;;  %v8980_v37 = vadd.f32 %v6587_v30, %v2988_v56  ;;  %v6142_v4 = vld [vmem:[%s8959_s5 + $0x24] ss:$8 sps:$4 sm:$0xff]  }
 0x80a   : > { %10623 = vst [vmem:[#allocation46_spill] sm:$0xff] %v8952_v16  ;;  %v8962_v5 = vadd.f32 %v6585_v18, %v2980_v39  ;;  %10625 = vst [vmem:[#allocation48_spill] sm:$0xff] %v8978_v22  ;;  %3828 = vmatprep.subr.bf16.mxu1 %v6142_v4 }
 0x80b   : > { %3213 = vadd.xlane.f32.xlu1 %v3176_v31  ;;  %v8965_v3 = vsub.f32 %v8851_v23, %v3114_v59  ;;  %v3177_v49 = vmul.f32 %v8955_v52, %v8955_v52  ;;  %10626 = vst [vmem:[#allocation49_spill] sm:$0xff] %v8980_v37  ;;  %v6140_v31 = vld [vmem:[%s8959_s5 + $0x20] ss:$8 sps:$4 sm:$0xff]  }
 0x80c   : > { %10624 = vst [vmem:[#allocation47_spill] sm:$0xff] %v8962_v5  ;;  %3829 = vmatpush1.bf16.msra.mxu1 %v6140_v31  ;;  %v6148_v31 = vld [vmem:[%s8959_s5 + $0x44] ss:$8 sps:$4 sm:$0xff]  }
 0x80d   : > { %3091 = vadd.xlane.f32.xlu0 %v8952_v16  ;;  %v3178_v34 = vmul.f32 %v8965_v3, %v8965_v3 }
 0x80f   : > { %3093 = vadd.xlane.f32.xlu1 %v8962_v5 }
 0x811   : > { %3215 = vadd.xlane.f32.xlu0 %v3177_v49 }
 0x812   : > { %v3060_v14 = vpop.xlane.xlu0 %3059 }
 0x813   : > { %v3115_v27 = vmul.f32 0.0078125, %v3060_v14  ;;  %3217 = vadd.xlane.f32.xlu1 %v3178_v34  ;;  %v6145_v14 = vld [vmem:[%s8959_s5 + $0x34] ss:$8 sps:$4 sm:$0xff]  }
 0x814   : > { %v3062_v63 = vpop.xlane.xlu1 %3061  ;;  %v5916_v11 = vpop.f32.mrb[92].mxu0  ;;  %3830 = vmatprep.subr.bf16.mxu1 %v6145_v14 }
 0x815   : > { %v8983_v36 = vsub.f32 %v8857_v51, %v3115_v27  ;;  %v3116_v2 = vmul.f32 0.0078125, %v3062_v63  ;;  %v2992_v28 = vpop.f32.mrb[93].mxu0  ;;  %3095 = vadd.xlane.f32.xlu0 %v8978_v22  ;;  %v6143_v27 = vld [vmem:[%s8959_s5 + $0x30] ss:$8 sps:$4 sm:$0xff]  }
 0x816   : > { %v5917_v39 = vpop.f32.mrb[94].mxu0  ;;  %v3064_v59 = vpop.xlane.xlu0 %3063  ;;  %v2993_v18 = vadd.f32 %v8821_v8, %v2992_v28  ;;  %v6589_v28 = vld [vmem:[#allocation2 + $0xe8] sm:$0xff]  ;;  %3831 = vmatpush1.bf16.msra.mxu1 %v6143_v27 }
 0x817   : > { %v8989_v46 = vsub.f32 %v8861_v6, %v3116_v2  ;;  %3097 = vadd.xlane.f32.xlu1 %v8980_v37  ;;  %v2995_v33 = vpop.f32.mrb[95].mxu0  ;;  %v3117_v29 = vmul.f32 0.0078125, %v3064_v59  ;;  %v3179_v49 = vmul.f32 %v8983_v36, %v8983_v36  ;;  %3832 = vmatprep.subr.bf16.mxu1 %v6148_v31 }
 0x818   : > { %v3066_v9 = vpop.xlane.xlu1 %3065  ;;  %v2996_v56 = vadd.f32 %v8821_v8, %v2995_v33  ;;  %v9000_v63 = vadd.f32 %v6588_v41, %v2993_v18 }
 0x819   : > { %v3118_v34 = vmul.f32 0.0078125, %v3066_v9  ;;  %v3180_v50 = vmul.f32 %v8989_v46, %v8989_v46  ;;  %3219 = vadd.xlane.f32.xlu0 %v3179_v49  ;;  %v9003_v30 = vsub.f32 %v8864_v7, %v3117_v29  ;;  %v6146_v9 = vld [vmem:[%s8959_s5 + $0x40] ss:$8 sps:$4 sm:$0xff]   ;;  %v3001_v49 = vadd.f32 %v5916_v11, %v8821_v8  ;;  %v6590_v11 = vld [vmem:[#allocation2 + $0xf0] sm:$0xff] }
 0x81a   : > { %v3068_v38 = vpop.xlane.xlu0 %3067  ;;  %10627 = vst [vmem:[#allocation50_spill] sm:$0xff] %v9000_v63  ;;  %v9005_v4 = vadd.f32 %v6589_v28, %v2996_v56  ;;  %3833 = vmatpush1.bf16.msra.mxu1 %v6146_v9  ;;  %v6151_v28 = vld [vmem:[%s8959_s5 + $0x54] ss:$8 sps:$4 sm:$0xff]  }
 0x81b   : > { %3221 = vadd.xlane.f32.xlu1 %v3180_v50  ;;  %v9008_v59 = vsub.f32 %v8867_v15, %v3118_v34  ;;  %v3119_v18 = vmul.f32 0.0078125, %v3068_v38  ;;  %v3181_v34 = vmul.f32 %v9003_v30, %v9003_v30  ;;  %v3004_v50 = vadd.f32 %v5917_v39, %v8821_v8  ;;  %v6149_v38 = vld [vmem:[%s8959_s5 + $0x50] ss:$8 sps:$4 sm:$0xff]   ;;  %3834 = vmatprep.subr.bf16.mxu1 %v6151_v28 }
 0x81c   : > { %v3070_v2 = vpop.xlane.xlu1 %3069  ;;  %10628 = vst [vmem:[#allocation51_spill] sm:$0xff] %v9005_v4  ;;  %v6591_v8 = vld [vmem:[#allocation2 + $0xf8] sm:$0xff] }
 0x81d   : > { %3099 = vadd.xlane.f32.xlu0 %v9000_v63  ;;  %v3120_v29 = vmul.f32 0.0078125, %v3070_v2  ;;  %v3182_v41 = vmul.f32 %v9008_v59, %v9008_v59  ;;  %v9026_v2 = vadd.f32 %v6590_v11, %v3001_v49  ;;  %v9029_v31 = vsub.f32 %v8872_v35, %v3119_v18  ;;  %v6154_v49 = vld [vmem:[%s8959_s5 + $0x64] ss:$8 sps:$4 sm:$0xff]   ;;  %v6155_v28 = vld [vmem:[%s8959_s5 + $0x70] ss:$8 sps:$4 sm:$0xff]  }
 0x81e   : > { %v3072_v33 = vpop.xlane.xlu0 %3071  ;;  %v9031_v39 = vadd.f32 %v6591_v8, %v3004_v50  ;;  %3835 = vmatpush1.bf16.msra.mxu1 %v6149_v38 }
 0x81f   : > { %3101 = vadd.xlane.f32.xlu1 %v9005_v4  ;;  %v3121_v14 = vmul.f32 0.0078125, %v3072_v33  ;;  %v9034_v33 = vsub.f32 %v8877_v26, %v3120_v29  ;;  %v3183_v18 = vmul.f32 %v9029_v31, %v9029_v31  ;;  %3836 = vmatprep.subr.bf16.mxu1 %v6154_v49 }
 0x820   : > { %v3074_v56 = vpop.xlane.xlu1 %3073 }
 0x821   : > { %v3122_v27 = vmul.f32 0.0078125, %v3074_v56  ;;  %3223 = vadd.xlane.f32.xlu0 %v3181_v34  ;;  %v9039_v9 = vsub.f32 %v8880_v58, %v3121_v14  ;;  %v3184_v29 = vmul.f32 %v9034_v33, %v9034_v33  ;;  %v6152_v34 = vld [vmem:[%s8959_s5 + $0x60] ss:$8 sps:$4 sm:$0xff]   ;;  %v6157_v14 = vld [vmem:[%s8959_s5 + $0x74] ss:$8 sps:$4 sm:$0xff]  }
 0x822   : > { %3837 = vmatpush1.bf16.msra.mxu1 %v6152_v34 }
 0x823   : > { %3225 = vadd.xlane.f32.xlu1 %v3182_v41  ;;  %v9045_v56 = vsub.f32 %v8883_v0, %v3122_v27  ;;  %v3185_v50 = vmul.f32 %v9039_v9, %v9039_v9  ;;  %3838 = vmatprep.subr.bf16.mxu1 %v6157_v14 }
 0x825   : > { %3103 = vadd.xlane.f32.xlu0 %v9026_v2  ;;  %v3186_v41 = vmul.f32 %v9045_v56, %v9045_v56 }
 0x826   : > { %3839 = vmatpush1.bf16.msra.mxu1 %v6155_v28 }
 0x827   : > { %3105 = vadd.xlane.f32.xlu1 %v9031_v39 }
 0x829   : > { %3227 = vadd.xlane.f32.xlu0 %v3183_v18 }
 0x82b   : > { %3229 = vadd.xlane.f32.xlu1 %v3184_v29 }
 0x82d   : > { %3231 = vadd.xlane.f32.xlu0 %v3185_v50 }
 0x82f   : > { %3233 = vadd.xlane.f32.xlu1 %v3186_v41 }
 0x874   : > { %v3076_v27 = vpop.xlane.xlu0 %3075 }
 0x875   : > { %v3123_v38 = vmul.f32 0.0078125, %v3076_v27 }
 0x876   : > { %v3078_v11 = vpop.xlane.xlu1 %3077 }
 0x877   : > { %v9057_v8 = vsub.f32 %v8889_v12, %v3123_v38  ;;  %v3124_v18 = vmul.f32 0.0078125, %v3078_v11 }
 0x878   : > { %v3080_v49 = vpop.xlane.xlu0 %3079 }
 0x879   : > { %v9060_v29 = vsub.f32 %v8893_v61, %v3124_v18  ;;  %v3125_v34 = vmul.f32 0.0078125, %v3080_v49  ;;  %v3187_v13 = vmul.f32 %v9057_v8, %v9057_v8 }
 0x87a   : > { %v3082_v53 = vpop.xlane.xlu1 %3081 }
 0x87b   : > { %v9065_v50 = vsub.f32 %v8896_v57, %v3125_v34  ;;  %v3126_v14 = vmul.f32 0.0078125, %v3082_v53  ;;  %3235 = vadd.xlane.f32.xlu0 %v3187_v13  ;;  %v3188_v41 = vmul.f32 %v9060_v29, %v9060_v29 }
 0x87d   : > { %v9070_v28 = vsub.f32 %v8899_v55, %v3126_v14  ;;  %3237 = vadd.xlane.f32.xlu1 %v3188_v41  ;;  %v3189_v27 = vmul.f32 %v9065_v50, %v9065_v50 }
 0x87f   : > { %3239 = vadd.xlane.f32.xlu0 %v3189_v27  ;;  %v3190_v38 = vmul.f32 %v9070_v28, %v9070_v28 }
 0x881   : > { %3241 = vadd.xlane.f32.xlu1 %v3190_v38 }
 0x886   : > { %v3204_v11 = vpop.xlane.xlu0 %3203 }
 0x887   : > { %v3267_v18 = vmul.f32 0.007874016, %v3204_v11 }
 0x888   : > { %v3206_v49 = vpop.xlane.xlu1 %3205 }
 0x889   : > { %6430 = vrsqrt.f32 %v3267_v18  ;;  %v3268_v53 = vmul.f32 0.007874016, %v3206_v49  ;;  %vm3301_vm0 = vcmp.eq.f32.partialorder %v3267_v18, inf  ;;  %vm3303_vm1 = vcmp.eq.f32.partialorder %v3267_v18, 0.0 }
 0x88a   : > { %v3084_v13 = vpop.xlane.xlu0 %3083 }
 0x88b   : > { %v3127_v34 = vmul.f32 0.0078125, %v3084_v13  ;;  %6432 = vrsqrt.f32 %v3268_v53  ;;  %vm3308_vm2 = vcmp.eq.f32.partialorder %v3268_v53, inf  ;;  %vm3310_vm3 = vcmp.eq.f32.partialorder %v3268_v53, 0.0 }
 0x88c   : > { %v3086_v1 = vpop.xlane.xlu1 %3085 }
 0x88d   : > { %v9077_v14 = vsub.f32 %v8915_v24, %v3127_v34  ;;  %v3128_v41 = vmul.f32 0.0078125, %v3086_v1 }
 0x88e   : > { %v3208_v55 = vpop.xlane.xlu0 %3207 }
 0x88f   : > { %v9080_v27 = vsub.f32 %v8920_v42, %v3128_v41  ;;  %v3269_v57 = vmul.f32 0.007874016, %v3208_v55  ;;  %v3191_v38 = vmul.f32 %v9077_v14, %v9077_v14  ;;  %v3304_v55 = vand.u32 2147483648, %v3267_v18 }
 0x890   : > { %v3210_v11 = vpop.xlane.xlu1 %3209 }
 0x891   : > { %6434 = vrsqrt.f32 %v3269_v57  ;;  %3243 = vadd.xlane.f32.xlu0 %v3191_v38  ;;  %v9084_v49 = vmul.f32 0.007874016, %v3210_v11  ;;  %v3192_v61 = vmul.f32 %v9080_v27, %v9080_v27  ;;  %vm3315_vm4 = vcmp.eq.f32.partialorder %v3269_v57, inf }
 0x892   : > { %v3088_v13 = vpop.xlane.xlu0 %3087  ;;  %vm3317_vm5 = vcmp.eq.f32.partialorder %v3269_v57, 0.0 }
 0x893   : > { %v6431_v34 = vpop.eup %6430  ;;  %v3129_v24 = vmul.f32 0.0078125, %v3088_v13  ;;  %6436 = vrsqrt.f32 %v9084_v49  ;;  %3245 = vadd.xlane.f32.xlu1 %v3192_v61  ;;  %vm3322_vm6 = vcmp.eq.f32.partialorder %v9084_v49, inf  ;;  %vm3324_vm7 = vcmp.eq.f32.partialorder %v9084_v49, 0.0 }
 0x894   : > { %v3300_v1 = vmul.f32 %v6431_v34, %v3267_v18  ;;  %v3090_v41 = vpop.xlane.xlu1 %3089  ;;  %v3311_v34 = vand.u32 2147483648, %v3268_v53 }
 0x895   : > { %v9090_v42 = vsub.f32 %v8933_v21, %v3129_v24  ;;  %v3130_v12 = vmul.f32 0.0078125, %v3090_v41  ;;  %v6433_v38 = vpop.eup %6432 }
 0x896   : > { %v3302_v11 = vsel %vm3301_vm0, %v3267_v18, %v3300_v1  ;;  %v3307_v58 = vmul.f32 %v6433_v38, %v3268_v53  ;;  %v3212_v13 = vpop.xlane.xlu0 %3211 }
 0x897   : > { %v3305_v0 = vsel %vm3303_vm1, %v3304_v55, %v3302_v11  ;;  %v9093_v26 = vsub.f32 %v8935_v44, %v3130_v12  ;;  %v9095_v61 = vmul.f32 0.007874016, %v3212_v13  ;;  %v3193_v24 = vmul.f32 %v9090_v42, %v9090_v42 }
 0x898   : > { %v3214_v35 = vpop.xlane.xlu1 %3213  ;;  %v3561_v21 = vadd.f32 1e-06, %v3305_v0  ;;  %v3309_v41 = vsel %vm3308_vm2, %v3268_v53, %v3307_v58 }
 0x899   : > { %v9099_v15 = vmul.f32 0.007874016, %v3214_v35  ;;  %v3194_v18 = vmul.f32 %v9093_v26, %v9093_v26  ;;  %v3312_v1 = vsel %vm3310_vm3, %v3311_v34, %v3309_v41  ;;  %3247 = vadd.xlane.f32.xlu0 %v3193_v24  ;;  %6438 = vrsqrt.f32 %v9095_v61 }
 0x89a   : > { %v3562_v55 = vadd.f32 1e-06, %v3312_v1  ;;  %v3092_v38 = vpop.xlane.xlu0 %3091  ;;  %v3318_v35 = vand.u32 2147483648, %v3269_v57  ;;  %vm3329_vm8 = vcmp.eq.f32.partialorder %v9095_v61, inf  ;;  %vm3331_vm10 = vcmp.eq.f32.partialorder %v9095_v61, 0.0 }
 0x89b   : > { %v6435_v12 = vpop.eup %6434  ;;  %3249 = vadd.xlane.f32.xlu1 %v3194_v18  ;;  %6440 = vrsqrt.f32 %v9099_v15  ;;  %v3131_v58 = vmul.f32 0.0078125, %v3092_v38  ;;  %vm3336_vm9 = vcmp.eq.f32.partialorder %v9099_v15, inf  ;;  %vm3338_vm11 = vcmp.eq.f32.partialorder %v9099_v15, 0.0 }
 0x89c   : > { %v3314_v11 = vmul.f32 %v6435_v12, %v3269_v57  ;;  %v3094_v13 = vpop.xlane.xlu1 %3093  ;;  %6442 = vrcp.f32 %v3561_v21 }
 0x89d   : > { %v3132_v0 = vmul.f32 0.0078125, %v3094_v13  ;;  %v6437_v53 = vpop.eup %6436  ;;  %6444 = vrcp.f32 %v3562_v55  ;;  %v9108_v18 = vsub.f32 %v8952_v16, %v3131_v58  ;;  %v3325_v55 = vand.u32 2147483648, %v9084_v49  ;;  %v9129_v13 = vld [vmem:[%s9119_s18] ss:$0 sm:$0xff] }
 0x89e   : > { %v3316_v44 = vsel %vm3315_vm4, %v3269_v57, %v3314_v11  ;;  %v3321_v34 = vmul.f32 %v6437_v53, %v9084_v49  ;;  %v3216_v24 = vpop.xlane.xlu0 %3215 }
 0x89f   : > { %v3319_v41 = vsel %vm3317_vm5, %v3318_v35, %v3316_v44  ;;  %v9111_v1 = vsub.f32 %v8962_v5, %v3132_v0  ;;  %v9113_v21 = vmul.f32 0.007874016, %v3216_v24  ;;  %v3195_v35 = vmul.f32 %v9108_v18, %v9108_v18 }
 0x8a0   : > { %v3218_v12 = vpop.xlane.xlu1 %3217  ;;  %v3323_v57 = vsel %vm3322_vm6, %v9084_v49, %v3321_v34  ;;  %v3563_v38 = vadd.f32 1e-06, %v3319_v41 }
 0x8a1   : > { %v9122_v44 = vmul.f32 0.007874016, %v3218_v12  ;;  %6446 = vrsqrt.f32 %v9113_v21  ;;  %v3196_v0 = vmul.f32 %v9111_v1, %v9111_v1  ;;  %v3326_v34 = vsel %vm3324_vm7, %v3325_v55, %v3323_v57  ;;  %3251 = vadd.xlane.f32.xlu0 %v3195_v35 }
 0x8a2   : > { %v3096_v11 = vpop.xlane.xlu0 %3095  ;;  %v3564_v5 = vadd.f32 1e-06, %v3326_v34  ;;  %v3332_v34 = vand.u32 2147483648, %v9095_v61  ;;  %vm3343_vm12 = vcmp.eq.f32.partialorder %v9113_v21, inf  ;;  %vm3345_vm13 = vcmp.eq.f32.partialorder %v9113_v21, 0.0 }
 0x8a3   : > { %6448 = vrsqrt.f32 %v9122_v44  ;;  %v3133_v58 = vmul.f32 0.0078125, %v3096_v11  ;;  %v6439_v24 = vpop.eup %6438  ;;  %3253 = vadd.xlane.f32.xlu1 %v3196_v0  ;;  %v3529_v11 = vmul.f32 %v9129_v13, %v8904_v40  ;;  %vm3350_vm14 = vcmp.eq.f32.partialorder %v9122_v44, inf }
 0x8a4   : > { %v3098_v53 = vpop.xlane.xlu1 %3097  ;;  %v3328_v49 = vmul.f32 %v6439_v24, %v9095_v61  ;;  %6450 = vrcp.f32 %v3563_v38  ;;  %vm3352_vm15 = vcmp.eq.f32.partialorder %v9122_v44, 0.0 }
 0x8a5   : > { %v3134_v12 = vmul.f32 0.0078125, %v3098_v53  ;;  %v6441_v41 = vpop.eup %6440  ;;  %v9137_v16 = vsub.f32 %v8978_v22, %v3133_v58  ;;  %6452 = vrcp.f32 %v3564_v5  ;;  %v3530_v53 = vmul.f32 %v9129_v13, %v8907_v47 }
 0x8a6   : > { %v6443_v7 = vpop.eup %6442  ;;  %v3335_v6 = vmul.f32 %v6441_v41, %v9099_v15  ;;  %v3220_v55 = vpop.xlane.xlu0 %3219  ;;  %v3330_v5 = vsel %vm3329_vm8, %v9095_v61, %v3328_v49  ;;  %v3339_v41 = vand.u32 2147483648, %v9099_v15 }
 0x8a7   : > { %v9143_v57 = vsub.f32 %v8980_v37, %v3134_v12  ;;  %v9148_v35 = vmul.f32 0.007874016, %v3220_v55  ;;  %v3197_v38 = vmul.f32 %v9137_v16, %v9137_v16  ;;  %v6445_v40 = vpop.eup %6444  ;;  %v3594_v12 = vmul.f32 %v6443_v7, %v3529_v11  ;;  %v9171_v55 = vld [vmem:[%s9156_s13] ss:$0 sm:$0xff] }
 0x8a8   : > { %v3222_v58 = vpop.xlane.xlu1 %3221  ;;  %v3337_v24 = vsel %vm3336_vm9, %v9099_v15, %v3335_v6  ;;  %v3596_v6 = vmul.f32 %v6445_v40, %v3530_v53  ;;  %v3333_v51 = vsel %vm3331_vm10, %v3332_v34, %v3330_v5  ;;  %v3531_v7 = vmul.f32 %v9129_v13, %v8918_v25 }
 0x8a9   : > { %v9160_v47 = vmul.f32 0.007874016, %v3222_v58  ;;  %v3198_v0 = vmul.f32 %v9143_v57, %v9143_v57  ;;  %6454 = vrsqrt.f32 %v9148_v35  ;;  %3255 = vadd.xlane.f32.xlu0 %v3197_v38  ;;  %v3340_v11 = vsel %vm3338_vm11, %v3339_v41, %v3337_v24 }
 0x8aa   : > { %v3100_v49 = vpop.xlane.xlu0 %3099  ;;  %v3565_v38 = vadd.f32 1e-06, %v3333_v51  ;;  %v3663_v19 = vadd.f32 %v9171_v55, %v3594_v12  ;;  %v3664_v15 = vadd.f32 %v9171_v55, %v3596_v6  ;;  %v3532_v53 = vmul.f32 %v9129_v13, %v8923_v45 }
 0x8ab   : > { %6456 = vrsqrt.f32 %v9160_v47  ;;  %3257 = vadd.xlane.f32.xlu1 %v3198_v0  ;;  %v6447_v58 = vpop.eup %6446  ;;  %v3135_v37 = vmul.f32 0.0078125, %v3100_v49  ;;  %v9186_v40 = vmul.f32 %v9129_v13, %v8938_v32  ;;  %v3566_v12 = vadd.f32 1e-06, %v3340_v11 }
 0x8ac   : > { %v3102_v22 = vpop.xlane.xlu1 %3101  ;;  %v3342_v10 = vmul.f32 %v6447_v58, %v9113_v21  ;;  %6458 = vrcp.f32 %v3565_v38  ;;  %v3353_v6 = vand.u32 2147483648, %v9122_v44  ;;  %vm3357_vm0 = vcmp.eq.f32.partialorder %v9148_v35, inf }
 0x8ad   : > { %v6449_v23 = vpop.eup %6448  ;;  %v3136_v61 = vmul.f32 0.0078125, %v3102_v22  ;;  %v9178_v0 = vsub.f32 %v9000_v63, %v3135_v37  ;;  %v3695_v37 = vpack.c.bf16 %v3664_v15, %v3663_v19  ;;  %v3346_v19 = vand.u32 2147483648, %v9113_v21 }
 0x8ae   : > { %v3349_v25 = vmul.f32 %v6449_v23, %v9122_v44  ;;  %v3224_v22 = vpop.xlane.xlu0 %3223  ;;  %v6451_v5 = vpop.eup %6450  ;;  %v3344_v49 = vsel %vm3343_vm12, %v9113_v21, %v3342_v10  ;;  %v10631_v15 = vmov 0   ;;  %vm3359_vm1 = vcmp.eq.f32.partialorder %v9148_v35, 0.0 }
 0x8af   : > { %v9190_v51 = vsub.f32 %v9005_v4, %v3136_v61  ;;  %v9192_v34 = vmul.f32 0.007874016, %v3224_v22  ;;  %v6453_v41 = vpop.eup %6452  ;;  %v3199_v32 = vmul.f32 %v9178_v0, %v9178_v0  ;;  %3857 = vmatmul.mubr.bf16.vlgmr.msra.gmra.mrb[96].mxu1 %v3695_v37  ;;  %v3598_v22 = vmul.f32 %v6451_v5, %v3531_v7 }
 0x8b0   : > { %v3226_v24 = vpop.xlane.xlu1 %3225  ;;  %v3351_v58 = vsel %vm3350_vm14, %v9122_v44, %v3349_v25  ;;  %3866 = vmatprep.mubr.bf16.mxu1 %v10631_v15  ;;  %v3600_v37 = vmul.f32 %v6453_v41, %v3532_v53  ;;  %v3534_v4 = vmul.f32 %v9129_v13, %v8942_v60  ;;  %v9222_v53 = vmul.f32 %v9129_v13, %v8955_v52 }
 0x8b1   : > { %v9195_v45 = vmul.f32 0.007874016, %v3226_v24  ;;  %v3200_v23 = vmul.f32 %v9190_v51, %v9190_v51  ;;  %6460 = vrsqrt.f32 %v9192_v34  ;;  %3259 = vadd.xlane.f32.xlu0 %v3199_v32  ;;  %v3347_v32 = vsel %vm3345_vm13, %v3346_v19, %v3344_v49 }
 0x8b2   : > { %v3104_v61 = vpop.xlane.xlu0 %3103  ;;  %v3666_v63 = vadd.f32 %v9171_v55, %v3600_v37  ;;  %v3354_v7 = vsel %vm3352_vm15, %v3353_v6, %v3351_v58  ;;  %v3567_v19 = vadd.f32 1e-06, %v3347_v32  ;;  %vm3364_vm2 = vcmp.eq.f32.partialorder %v9160_v47, inf }
 0x8b3   : > { %6462 = vrsqrt.f32 %v9195_v45  ;;  %3261 = vadd.xlane.f32.xlu1 %v3200_v23  ;;  %v6455_v11 = vpop.eup %6454  ;;  %v3137_v10 = vmul.f32 0.0078125, %v3104_v61  ;;  %v3665_v61 = vadd.f32 %v9171_v55, %v3598_v22  ;;  %vm3366_vm3 = vcmp.eq.f32.partialorder %v9160_v47, 0.0 }
 0x8b4   : > { %v3106_v38 = vpop.xlane.xlu1 %3105  ;;  %6464 = vrcp.f32 %v3566_v12  ;;  %v3356_v60 = vmul.f32 %v6455_v11, %v9148_v35  ;;  %v3568_v11 = vadd.f32 1e-06, %v3354_v7  ;;  %vm3371_vm4 = vcmp.eq.f32.partialorder %v9192_v34, inf }
 0x8b5   : > { %v6457_v24 = vpop.eup %6456  ;;  %v3138_v25 = vmul.f32 0.0078125, %v3106_v38  ;;  %v9216_v23 = vsub.f32 %v9026_v2, %v3137_v10  ;;  %v3696_v12 = vpack.c.bf16 %v3666_v63, %v3665_v61  ;;  %v3360_v38 = vand.u32 2147483648, %v9148_v35 }
 0x8b6   : > { %v3363_v44 = vmul.f32 %v6457_v24, %v9160_v47  ;;  %v3228_v21 = vpop.xlane.xlu0 %3227  ;;  %v6459_v10 = vpop.eup %6458  ;;  %v3358_v63 = vsel %vm3357_vm0, %v9148_v35, %v3356_v60  ;;  %vm3378_vm5 = vcmp.eq.f32.partialorder %v9195_v45, inf  ;;  %vm3373_vm6 = vcmp.eq.f32.partialorder %v9192_v34, 0.0 }
 0x8b7   : > { %v9227_v5 = vsub.f32 %v9031_v39, %v3138_v25  ;;  %v9230_v41 = vmul.f32 0.007874016, %v3228_v21  ;;  %v3201_v52 = vmul.f32 %v9216_v23, %v9216_v23  ;;  %3867 = vmatmul.mubr.bf16.gmra.mrb[100].mxu1 %v3696_v12  ;;  %v3367_v25 = vand.u32 2147483648, %v9160_v47 }
 0x8b8   : > { %v3230_v49 = vpop.xlane.xlu1 %3229  ;;  %v3365_v22 = vsel %vm3364_vm2, %v9160_v47, %v3363_v44  ;;  %3876 = vmatprep.mubr.bf16.mxu1 %v10631_v15  ;;  %v3602_v21 = vmul.f32 %v6459_v10, %v9186_v40  ;;  %vm3380_vm7 = vcmp.eq.f32.partialorder %v9195_v45, 0.0 }
 0x8b9   : > { %v9232_v58 = vmul.f32 0.007874016, %v3230_v49  ;;  %v3202_v6 = vmul.f32 %v9227_v5, %v9227_v5  ;;  %6466 = vrsqrt.f32 %v9230_v41  ;;  %3263 = vadd.xlane.f32.xlu0 %v3201_v52  ;;  %v3361_v52 = vsel %vm3359_vm1, %v3360_v38, %v3358_v63 }
 0x8ba   : > { %v3232_v37 = vpop.xlane.xlu0 %3231  ;;  %v3569_v35 = vadd.f32 1e-06, %v3361_v52  ;;  %v3667_v63 = vadd.f32 %v9171_v55, %v3602_v21  ;;  %vm3385_vm8 = vcmp.eq.f32.partialorder %v9230_v41, inf  ;;  %vm3387_vm9 = vcmp.eq.f32.partialorder %v9230_v41, 0.0 }
 0x8bb   : > { %6468 = vrsqrt.f32 %v9232_v58  ;;  %3265 = vadd.xlane.f32.xlu1 %v3202_v6  ;;  %v6461_v24 = vpop.eup %6460  ;;  %v9248_v32 = vmul.f32 0.007874016, %v3232_v37  ;;  %v3368_v6 = vsel %vm3366_vm3, %v3367_v25, %v3365_v22  ;;  %v3374_v37 = vand.u32 2147483648, %v9192_v34 }
 0x8bc   : > { %v3234_v61 = vpop.xlane.xlu1 %3233  ;;  %6470 = vrcp.f32 %v3567_v19  ;;  %v3370_v60 = vmul.f32 %v6461_v24, %v9192_v34  ;;  %v3570_v47 = vadd.f32 1e-06, %v3368_v6  ;;  %vm3392_vm10 = vcmp.eq.f32.partialorder %v9232_v58, inf }
 0x8bd   : > { %v6463_v7 = vpop.eup %6462  ;;  %v9252_v44 = vmul.f32 0.007874016, %v3234_v61  ;;  %6472 = vrcp.f32 %v3568_v11  ;;  %v3381_v11 = vand.u32 2147483648, %v9195_v45  ;;  %v3536_v61 = vmul.f32 %v9129_v13, %v8965_v3 }
 0x8be   : > { %v6465_v12 = vpop.eup %6464  ;;  %v3377_v49 = vmul.f32 %v6463_v7, %v9195_v45  ;;  %6474 = vrsqrt.f32 %v9248_v32  ;;  %v3372_v19 = vsel %vm3371_vm4, %v9192_v34, %v3370_v60  ;;  %v3537_v34 = vmul.f32 %v9129_v13, %v8983_v36 }
 0x8bf   : > { %6476 = vrsqrt.f32 %v9252_v44  ;;  %v3604_v10 = vmul.f32 %v6465_v12, %v3534_v4  ;;  %v3375_v38 = vsel %vm3373_vm6, %v3374_v37, %v3372_v19  ;;  %v3388_v12 = vand.u32 2147483648, %v9230_v41 }
 0x8c0   : > { %v3379_v40 = vsel %vm3378_vm5, %v9195_v45, %v3377_v49  ;;  %v3571_v25 = vadd.f32 1e-06, %v3375_v38  ;;  %6478 = vrcp.f32 %v3569_v35  ;;  %vm3394_vm11 = vcmp.eq.f32.partialorder %v9232_v58, 0.0 }
 0x8c1   : > { %v3668_v22 = vadd.f32 %v9171_v55, %v3604_v10  ;;  %v3382_v24 = vsel %vm3380_vm7, %v3381_v11, %v3379_v40  ;;  %6480 = vrcp.f32 %v3570_v47  ;;  %v3395_v49 = vand.u32 2147483648, %v9232_v58 }
 0x8c2   : > { %v3572_v7 = vadd.f32 1e-06, %v3382_v24  ;;  %6482 = vrcp.f32 %v3571_v25  ;;  %vm3399_vm12 = vcmp.eq.f32.partialorder %v9248_v32, inf  ;;  %vm3401_vm13 = vcmp.eq.f32.partialorder %v9248_v32, 0.0 }
 0x8c3   : > { %v6467_v4 = vpop.eup %6466  ;;  %v3697_v45 = vpack.c.bf16 %v3668_v22, %v3667_v63  ;;  %v3402_v11 = vand.u32 2147483648, %v9248_v32  ;;  %vm3406_vm14 = vcmp.eq.f32.partialorder %v9252_v44, inf  ;;  %vm3408_vm15 = vcmp.eq.f32.partialorder %v9252_v44, 0.0 }
 0x8c4   : > { %v3384_v21 = vmul.f32 %v6467_v4, %v9230_v41  ;;  %6484 = vrcp.f32 %v3572_v7 }
 0x8c5   : > { %v6469_v60 = vpop.eup %6468  ;;  %3877 = vmatmul.mubr.bf16.gmra.mrb[104].mxu1 %v3697_v45 }
 0x8c6   : > { %v6471_v3 = vpop.eup %6470  ;;  %v3391_v36 = vmul.f32 %v6469_v60, %v9232_v58  ;;  %v3386_v6 = vsel %vm3385_vm8, %v9230_v41, %v3384_v21  ;;  %3886 = vmatprep.mubr.bf16.mxu1 %v10631_v15  ;;  %v3538_v21 = vmul.f32 %v9129_v13, %v8989_v46 }
 0x8c7   : > { %v6473_v52 = vpop.eup %6472  ;;  %v3606_v19 = vmul.f32 %v6471_v3, %v9222_v53  ;;  %v3389_v35 = vsel %vm3387_vm9, %v3388_v12, %v3386_v6 }
 0x8c8   : > { %v6475_v37 = vpop.eup %6474  ;;  %v3393_v40 = vsel %vm3392_vm10, %v9232_v58, %v3391_v36  ;;  %v3608_v10 = vmul.f32 %v6473_v52, %v3536_v61  ;;  %v3573_v22 = vadd.f32 1e-06, %v3389_v35  ;;  %v3409_v61 = vand.u32 2147483648, %v9252_v44 }
 0x8c9   : > { %v6477_v47 = vpop.eup %6476  ;;  %v3398_v38 = vmul.f32 %v6475_v37, %v9248_v32  ;;  %v3396_v63 = vsel %vm3394_vm11, %v3395_v49, %v3393_v40  ;;  %v3669_v24 = vadd.f32 %v9171_v55, %v3606_v19  ;;  %v3539_v49 = vmul.f32 %v9129_v13, %v9003_v30 }
 0x8ca   : > { %v3405_v53 = vmul.f32 %v6477_v47, %v9252_v44  ;;  %v3670_v25 = vadd.f32 %v9171_v55, %v3608_v10  ;;  %v3574_v7 = vadd.f32 1e-06, %v3396_v63  ;;  %6486 = vrcp.f32 %v3573_v22  ;;  %v6479_v60 = vpop.eup %6478 }
 0x8cb   : > { %v3400_v41 = vsel %vm3399_vm12, %v9248_v32, %v3398_v38  ;;  %v6481_v36 = vpop.eup %6480  ;;  %v3610_v52 = vmul.f32 %v6479_v60, %v3537_v34  ;;  %v3542_v38 = vmul.f32 %v9129_v13, %v9034_v33 }
 0x8cc   : > { %v3407_v58 = vsel %vm3406_vm14, %v9252_v44, %v3405_v53  ;;  %v3698_v4 = vpack.c.bf16 %v3670_v25, %v3669_v24  ;;  %6488 = vrcp.f32 %v3574_v7  ;;  %v3403_v45 = vsel %vm3401_vm13, %v3402_v11, %v3400_v41  ;;  %v6483_v19 = vpop.eup %6482 }
 0x8cd   : > { %v3410_v12 = vsel %vm3408_vm15, %v3409_v61, %v3407_v58  ;;  %v3575_v3 = vadd.f32 1e-06, %v3403_v45  ;;  %v3540_v44 = vmul.f32 %v9129_v13, %v9008_v59  ;;  %v3612_v32 = vmul.f32 %v6481_v36, %v3538_v21  ;;  %v6158_v21 = vld [vmem:[%s9015_s8 + $0x40] sm:$0xff]   ;;  %v6161_v36 = vld [vmem:[%s9015_s8 + $0x8] sm:$0xff]  }
 0x8ce   : > { %3887 = vmatmul.mubr.bf16.gmra.mrb[108].mxu1 %v3698_v4  ;;  %v3576_v6 = vadd.f32 1e-06, %v3410_v12  ;;  %v6485_v37 = vpop.eup %6484  ;;  %v3614_v40 = vmul.f32 %v6483_v19, %v3539_v49  ;;  %v3671_v46 = vadd.f32 %v9171_v55, %v3610_v52  ;;  %v3541_v59 = vmul.f32 %v9129_v13, %v9029_v31  ;;  %v6159_v12 = vld [vmem:[%s9015_s8] sm:$0xff]   ;;  %5582 = vmatprep.subr.bf16.mxu0 %v6158_v21  ;;  %v6162_v49 = vld [vmem:[%s9015_s8 + $0x50] sm:$0xff]   ;;  %v6165_v19 = vld [vmem:[%s9015_s8 + $0x18] sm:$0xff]  }
 0x8cf   : > { %3896 = vmatprep.mubr.bf16.mxu1 %v10631_v15  ;;  %6490 = vrcp.f32 %v3575_v3  ;;  %v3672_v11 = vadd.f32 %v9171_v55, %v3612_v32  ;;  %v3616_v10 = vmul.f32 %v6485_v37, %v3540_v44  ;;  %v3543_v25 = vmul.f32 %v9129_v13, %v9039_v9  ;;  %5583 = vmatpush3.bf16.msra.mxu0 %v6159_v12  ;;  %v6160_v3 = vld [vmem:[%s9015_s8 + $0x48] sm:$0xff]   ;;  %v6163_v52 = vld [vmem:[%s9015_s8 + $0x10] sm:$0xff]   ;;  %v6166_v44 = vld [vmem:[%s9015_s8 + $0x60] sm:$0xff]  }
 0x8d0   : > { %6492 = vrcp.f32 %v3576_v6  ;;  %v3673_v34 = vadd.f32 %v9171_v55, %v3614_v40  ;;  %v3544_v31 = vmul.f32 %v9129_v13, %v9045_v56  ;;  %5584 = vmatprep.subr.bf16.mxu0 %v6160_v3  ;;  %v6164_v6 = vld [vmem:[%s9015_s8 + $0x58] sm:$0xff]   ;;  %v6167_v32 = vld [vmem:[%s9015_s8 + $0x20] sm:$0xff]   ;;  %v6168_v37 = vld [vmem:[%s9015_s8 + $0x68] sm:$0xff]  }
 0x8d1   : > { %v3699_v30 = vpack.c.bf16 %v3672_v11, %v3671_v46  ;;  %v3674_v35 = vadd.f32 %v9171_v55, %v3616_v10  ;;  %v6169_v46 = vld [vmem:[%s9015_s8 + $0x28] sm:$0xff]  }
 0x8d3   : > { %v3700_v63 = vpack.c.bf16 %v3674_v35, %v3673_v34  ;;  %5585 = vmatpush3.bf16.msra.mxu0 %v6161_v36 }
 0x8d4   : > { %v6487_v47 = vpop.eup %6486  ;;  %5586 = vmatprep.subr.bf16.mxu0 %v6162_v49 }
 0x8d5   : > { %v3618_v53 = vmul.f32 %v6487_v47, %v3541_v59  ;;  %v6171_v59 = vld [vmem:[%s9015_s8 + $0x30] sm:$0xff]  }
 0x8d6   : > { %v6489_v22 = vpop.eup %6488  ;;  %3897 = vmatmul.mubr.bf16.gmra.mrb[112].mxu1 %v3699_v30  ;;  %v6170_v30 = vld [vmem:[%s9015_s8 + $0x70] sm:$0xff]  }
 0x8d7   : > { %3906 = vmatprep.mubr.bf16.mxu1 %v10631_v15  ;;  %v3620_v24 = vmul.f32 %v6489_v22, %v3542_v38  ;;  %v3675_v41 = vadd.f32 %v9171_v55, %v3618_v53  ;;  %5587 = vmatpush3.bf16.msra.mxu0 %v6163_v52  ;;  %v6172_v38 = vld [vmem:[%s9015_s8 + $0x78] sm:$0xff]  }
 0x8d8   : > { %5588 = vmatprep.subr.bf16.mxu0 %v6164_v6  ;;  %v6173_v53 = vld [vmem:[%s9015_s8 + $0x38] sm:$0xff]   ;;  %s10632_s8 = sld [smem:[#allocation60_spill]] }
 0x8d9   : > { %v6491_v7 = vpop.eup %6490  ;;  %v3676_v33 = vadd.f32 %v9171_v55, %v3620_v24 }
 0x8da   : > { %v6493_v61 = vpop.eup %6492  ;;  %v3622_v58 = vmul.f32 %v6491_v7, %v3543_v25 }
 0x8db   : > { %v3701_v4 = vpack.c.bf16 %v3676_v33, %v3675_v41  ;;  %v3624_v45 = vmul.f32 %v6493_v61, %v3544_v31  ;;  %5589 = vmatpush3.bf16.msra.mxu0 %v6165_v19 }
 0x8dc   : > { %v3677_v60 = vadd.f32 %v9171_v55, %v3622_v58  ;;  %5590 = vmatprep.subr.bf16.mxu0 %v6166_v44 }
 0x8dd   : > { %v3678_v9 = vadd.f32 %v9171_v55, %v3624_v45 }
 0x8de   : > { %3907 = vmatmul.mubr.bf16.gmra.mrb[116].mxu1 %v3700_v63  ;;  %s3731_s25 = scalar_lea.vmem %s10632_s8, %s5418_s9 }
 0x8df   : > { %3916 = vmatprep.mubr.bf16.mxu1 %v10631_v15  ;;  %v3702_v56 = vpack.c.bf16 %v3678_v9, %v3677_v60  ;;  %5591 = vmatpush3.bf16.msra.mxu0 %v6167_v32 }
 0x8e0   : > { %5592 = vmatprep.subr.bf16.mxu0 %v6168_v37 }
 0x8e3   : > { %5593 = vmatpush3.bf16.msra.mxu0 %v6169_v46 }
 0x8e4   : > { %5594 = vmatprep.subr.bf16.mxu0 %v6170_v30 }
 0x8e6   : > { %3917 = vmatmul.mubr.bf16.gmra.mrb[120].mxu1 %v3701_v4 }
 0x8e7   : > { %3926 = vmatprep.mubr.bf16.mxu1 %v10631_v15  ;;  %5595 = vmatpush3.bf16.msra.mxu0 %v6171_v59 }
 0x8e8   : > { %5596 = vmatprep.subr.bf16.mxu0 %v6172_v38 }
 0x8eb   : > { %5597 = vmatpush3.bf16.msra.mxu0 %v6173_v53  ;;  %v3546_v53 = vmul.f32 %v9129_v13, %v9060_v29 }
 0x8ee   : > { %3927 = vmatmul.mubr.bf16.gmra.mrb[124].mxu1 %v3702_v56 }
 0x8ef   : > { %3936 = vmatprep.mubr.bf16.mxu1 %v10631_v15 }
 0x908   : > { %v3236_v40 = vpop.xlane.xlu0 %3235 }
 0x909   : > { %v3283_v11 = vmul.f32 0.007874016, %v3236_v40 }
 0x90a   : > { %v3238_v10 = vpop.xlane.xlu1 %3237 }
 0x90b   : > { %6494 = vrsqrt.f32 %v3283_v11  ;;  %v3284_v34 = vmul.f32 0.007874016, %v3238_v10  ;;  %vm3413_vm0 = vcmp.eq.f32.partialorder %v3283_v11, inf  ;;  %v3416_v7 = vand.u32 2147483648, %v3283_v11 }
 0x90c   : > { %v3240_v35 = vpop.xlane.xlu0 %3239  ;;  %vm3415_vm1 = vcmp.eq.f32.partialorder %v3283_v11, 0.0 }
 0x90d   : > { %v3285_v47 = vmul.f32 0.007874016, %v3240_v35  ;;  %6496 = vrsqrt.f32 %v3284_v34  ;;  %vm3420_vm2 = vcmp.eq.f32.partialorder %v3284_v34, inf  ;;  %v3423_v4 = vand.u32 2147483648, %v3284_v34 }
 0x90e   : > { %v3242_v63 = vpop.xlane.xlu1 %3241  ;;  %vm3422_vm3 = vcmp.eq.f32.partialorder %v3284_v34, 0.0  ;;  %v3545_v35 = vmul.f32 %v9129_v13, %v9057_v8 }
 0x90f   : > { %6498 = vrsqrt.f32 %v3285_v47  ;;  %v3286_v22 = vmul.f32 0.007874016, %v3242_v63  ;;  %vm3427_vm4 = vcmp.eq.f32.partialorder %v3285_v47, inf  ;;  %v3430_v56 = vand.u32 2147483648, %v3285_v47 }
 0x910   : > { %vm3429_vm5 = vcmp.eq.f32.partialorder %v3285_v47, 0.0 }
 0x911   : > { %6500 = vrsqrt.f32 %v3286_v22  ;;  %vm3434_vm6 = vcmp.eq.f32.partialorder %v3286_v22, inf  ;;  %v3437_v6 = vand.u32 2147483648, %v3286_v22  ;;  %vm3436_vm7 = vcmp.eq.f32.partialorder %v3286_v22, 0.0 }
 0x915   : > { %v6495_v24 = vpop.eup %6494 }
 0x916   : > { %v3412_v25 = vmul.f32 %v6495_v24, %v3283_v11 }
 0x917   : > { %v6497_v31 = vpop.eup %6496 }
 0x918   : > { %v3414_v41 = vsel %vm3413_vm0, %v3283_v11, %v3412_v25  ;;  %v3419_v61 = vmul.f32 %v6497_v31, %v3284_v34 }
 0x919   : > { %v6499_v33 = vpop.eup %6498  ;;  %v3417_v58 = vsel %vm3415_vm1, %v3416_v7, %v3414_v41  ;;  %v3547_v7 = vmul.f32 %v9129_v13, %v9065_v50  ;;  %v3548_v41 = vmul.f32 %v9129_v13, %v9070_v28 }
 0x91a   : > { %v3426_v45 = vmul.f32 %v6499_v33, %v3285_v47  ;;  %v3577_v60 = vadd.f32 1e-06, %v3417_v58  ;;  %v3421_v9 = vsel %vm3420_vm2, %v3284_v34, %v3419_v61 }
 0x91b   : > { %v6501_v21 = vpop.eup %6500  ;;  %v3424_v3 = vsel %vm3422_vm3, %v3423_v4, %v3421_v9 }
 0x91c   : > { %v3428_v12 = vsel %vm3427_vm4, %v3285_v47, %v3426_v45  ;;  %v3433_v36 = vmul.f32 %v6501_v21, %v3286_v22  ;;  %v3578_v49 = vadd.f32 1e-06, %v3424_v3  ;;  %6502 = vrcp.f32 %v3577_v60 }
 0x91d   : > { %v3431_v52 = vsel %vm3429_vm5, %v3430_v56, %v3428_v12 }
 0x91e   : > { %v3244_v19 = vpop.xlane.xlu0 %3243  ;;  %v3579_v44 = vadd.f32 1e-06, %v3431_v52  ;;  %v3435_v32 = vsel %vm3434_vm6, %v3286_v22, %v3433_v36  ;;  %6504 = vrcp.f32 %v3578_v49 }
 0x91f   : > { %v3287_v37 = vmul.f32 0.007874016, %v3244_v19  ;;  %v3438_v40 = vsel %vm3436_vm7, %v3437_v6, %v3435_v32 }
 0x920   : > { %6506 = vrcp.f32 %v3579_v44  ;;  %v3246_v46 = vpop.xlane.xlu1 %3245  ;;  %v3580_v10 = vadd.f32 1e-06, %v3438_v40 }
 0x921   : > { %6508 = vrsqrt.f32 %v3287_v37  ;;  %v3288_v11 = vmul.f32 0.007874016, %v3246_v46  ;;  %vm3441_vm8 = vcmp.eq.f32.partialorder %v3287_v37, inf  ;;  %vm3443_vm9 = vcmp.eq.f32.partialorder %v3287_v37, 0.0 }
 0x922   : > { %v3444_v33 = vand.u32 2147483648, %v3287_v37 }
 0x923   : > { %6510 = vrsqrt.f32 %v3288_v11  ;;  %vm3448_vm10 = vcmp.eq.f32.partialorder %v3288_v11, inf  ;;  %v3451_v50 = vand.u32 2147483648, %v3288_v11  ;;  %vm3450_vm11 = vcmp.eq.f32.partialorder %v3288_v11, 0.0 }
 0x924   : > { %6512 = vrcp.f32 %v3580_v10 }
 0x926   : > { %v6503_v30 = vpop.eup %6502  ;;  %v3248_v34 = vpop.xlane.xlu0 %3247 }
 0x927   : > { %v9354_v59 = vmul.f32 0.007874016, %v3248_v34  ;;  %v3626_v24 = vmul.f32 %v6503_v30, %v3545_v35 }
 0x928   : > { %v3250_v47 = vpop.xlane.xlu1 %3249  ;;  %v6505_v38 = vpop.eup %6504 }
 0x929   : > { %v9356_v63 = vmul.f32 0.007874016, %v3250_v47  ;;  %6514 = vrsqrt.f32 %v9354_v59  ;;  %v3628_v31 = vmul.f32 %v6505_v38, %v3546_v53  ;;  %v3679_v29 = vadd.f32 %v9171_v55, %v3626_v24 }
 0x92a   : > { %v6507_v22 = vpop.eup %6506  ;;  %vm3455_vm12 = vcmp.eq.f32.partialorder %v9354_v59, inf  ;;  %v3458_v30 = vand.u32 2147483648, %v9354_v59  ;;  %vm3457_vm14 = vcmp.eq.f32.partialorder %v9354_v59, 0.0 }
 0x92b   : > { %v6509_v25 = vpop.eup %6508  ;;  %6516 = vrsqrt.f32 %v9356_v63  ;;  %v3680_v4 = vadd.f32 %v9171_v55, %v3628_v31  ;;  %v3630_v45 = vmul.f32 %v6507_v22, %v3547_v7  ;;  %vm3462_vm13 = vcmp.eq.f32.partialorder %v9356_v63, inf }
 0x92c   : > { %v3440_v8 = vmul.f32 %v6509_v25, %v3287_v37  ;;  %v3465_v47 = vand.u32 2147483648, %v9356_v63  ;;  %vm3464_vm15 = vcmp.eq.f32.partialorder %v9356_v63, 0.0 }
 0x92d   : > { %v6511_v61 = vpop.eup %6510  ;;  %v3703_v21 = vpack.c.bf16 %v3680_v4, %v3679_v29  ;;  %v3681_v28 = vadd.f32 %v9171_v55, %v3630_v45  ;;  %v3551_v4 = vmul.f32 %v9129_v13, %v9090_v42  ;;  %v3552_v45 = vmul.f32 %v9129_v13, %v9093_v26 }
 0x92e   : > { %v3442_v58 = vsel %vm3441_vm8, %v3287_v37, %v3440_v8  ;;  %v6513_v60 = vpop.eup %6512  ;;  %v3447_v9 = vmul.f32 %v6511_v61, %v3288_v11  ;;  %v3252_v6 = vpop.xlane.xlu0 %3251 }
 0x92f   : > { %v3445_v56 = vsel %vm3443_vm9, %v3444_v33, %v3442_v58  ;;  %v3632_v12 = vmul.f32 %v6513_v60, %v3548_v41  ;;  %3937 = vmatmul.mubr.bf16.gmra.mrb[128].mxu1 %v3703_v21  ;;  %v9371_v37 = vmul.f32 0.007874016, %v3252_v6  ;;  %v3550_v33 = vmul.f32 %v9129_v13, %v9080_v27 }
 0x930   : > { %v3581_v3 = vadd.f32 1e-06, %v3445_v56  ;;  %v3449_v36 = vsel %vm3448_vm10, %v3288_v11, %v3447_v9  ;;  %v3254_v19 = vpop.xlane.xlu1 %3253  ;;  %3946 = vmatprep.mubr.bf16.mxu1 %v10631_v15 }
 0x931   : > { %v3682_v49 = vadd.f32 %v9171_v55, %v3632_v12  ;;  %v3452_v52 = vsel %vm3450_vm11, %v3451_v50, %v3449_v36  ;;  %v9373_v40 = vmul.f32 0.007874016, %v3254_v19  ;;  %vm3469_vm0 = vcmp.eq.f32.partialorder %v9371_v37, inf }
 0x932   : > { %6518 = vrcp.f32 %v3581_v3  ;;  %v3582_v44 = vadd.f32 1e-06, %v3452_v52  ;;  %vm3471_vm1 = vcmp.eq.f32.partialorder %v9371_v37, 0.0  ;;  %v3472_v12 = vand.u32 2147483648, %v9371_v37 }
 0x933   : > { %v6515_v32 = vpop.eup %6514  ;;  %v3704_v46 = vpack.c.bf16 %v3682_v49, %v3681_v28  ;;  %vm3476_vm2 = vcmp.eq.f32.partialorder %v9373_v40, inf  ;;  %vm3478_vm3 = vcmp.eq.f32.partialorder %v9373_v40, 0.0  ;;  %v3479_v52 = vand.u32 2147483648, %v9373_v40 }
 0x934   : > { %v3454_v11 = vmul.f32 %v6515_v32, %v9354_v59  ;;  %6520 = vrcp.f32 %v3582_v44 }
 0x935   : > { %v6517_v10 = vpop.eup %6516  ;;  %6522 = vrsqrt.f32 %v9371_v37 }
 0x936   : > { %v3461_v34 = vmul.f32 %v6517_v10, %v9356_v63  ;;  %v3456_v35 = vsel %vm3455_vm12, %v9354_v59, %v3454_v11  ;;  %6524 = vrsqrt.f32 %v9373_v40  ;;  %v3256_v38 = vpop.xlane.xlu0 %3255 }
 0x937   : > { %v9387_v53 = vmul.f32 0.007874016, %v3256_v38  ;;  %v3459_v7 = vsel %vm3457_vm14, %v3458_v30, %v3456_v35  ;;  %3947 = vmatmul.mubr.bf16.gmra.mrb[132].mxu1 %v3704_v46 }
 0x938   : > { %v3463_v22 = vsel %vm3462_vm13, %v9356_v63, %v3461_v34  ;;  %v3258_v24 = vpop.xlane.xlu1 %3257  ;;  %3956 = vmatprep.mubr.bf16.mxu1 %v10631_v15  ;;  %v3583_v59 = vadd.f32 1e-06, %v3459_v7  ;;  %v3549_v63 = vmul.f32 %v9129_v13, %v9077_v14 }
 0x939   : > { %v9389_v25 = vmul.f32 0.007874016, %v3258_v24  ;;  %v3466_v8 = vsel %vm3464_vm15, %v3465_v47, %v3463_v22  ;;  %6526 = vrsqrt.f32 %v9387_v53  ;;  %vm3483_vm4 = vcmp.eq.f32.partialorder %v9387_v53, inf }
 0x93a   : > { %v3584_v41 = vadd.f32 1e-06, %v3466_v8  ;;  %vm3485_vm5 = vcmp.eq.f32.partialorder %v9387_v53, 0.0  ;;  %v3486_v32 = vand.u32 2147483648, %v9387_v53 }
 0x93b   : > { %6528 = vrsqrt.f32 %v9389_v25  ;;  %vm3490_vm6 = vcmp.eq.f32.partialorder %v9389_v25, inf  ;;  %vm3492_vm7 = vcmp.eq.f32.partialorder %v9389_v25, 0.0  ;;  %v3493_v38 = vand.u32 2147483648, %v9389_v25 }
 0x93c   : > { %v6519_v31 = vpop.eup %6518  ;;  %6530 = vrcp.f32 %v3583_v59 }
 0x93d   : > { %v3634_v58 = vmul.f32 %v6519_v31, %v3549_v63  ;;  %6532 = vrcp.f32 %v3584_v41 }
 0x93e   : > { %v6521_v61 = vpop.eup %6520  ;;  %v3260_v60 = vpop.xlane.xlu0 %3259 }
 0x93f   : > { %v6523_v29 = vpop.eup %6522  ;;  %v3636_v56 = vmul.f32 %v6521_v61, %v3550_v33  ;;  %v9404_v27 = vmul.f32 0.007874016, %v3260_v60  ;;  %v3683_v36 = vadd.f32 %v9171_v55, %v3634_v58 }
 0x940   : > { %v3262_v9 = vpop.xlane.xlu1 %3261  ;;  %v6525_v50 = vpop.eup %6524  ;;  %v3468_v14 = vmul.f32 %v6523_v29, %v9371_v37 }
 0x941   : > { %v9406_v21 = vmul.f32 0.007874016, %v3262_v9  ;;  %v3475_v42 = vmul.f32 %v6525_v50, %v9373_v40  ;;  %v3684_v26 = vadd.f32 %v9171_v55, %v3636_v56  ;;  %6534 = vrsqrt.f32 %v9404_v27 }
 0x942   : > { %v3470_v3 = vsel %vm3469_vm0, %v9371_v37, %v3468_v14  ;;  %vm3497_vm8 = vcmp.eq.f32.partialorder %v9404_v27, inf  ;;  %vm3499_vm9 = vcmp.eq.f32.partialorder %v9404_v27, 0.0 }
 0x943   : > { %v6527_v28 = vpop.eup %6526  ;;  %v3477_v49 = vsel %vm3476_vm2, %v9373_v40, %v3475_v42  ;;  %6536 = vrsqrt.f32 %v9406_v21  ;;  %v3705_v44 = vpack.c.bf16 %v3684_v26, %v3683_v36  ;;  %v3473_v10 = vsel %vm3471_vm1, %v3472_v12, %v3470_v3 }
 0x944   : > { %v3482_v19 = vmul.f32 %v6527_v28, %v9387_v53  ;;  %v3480_v11 = vsel %vm3478_vm3, %v3479_v52, %v3477_v49  ;;  %v3585_v30 = vadd.f32 1e-06, %v3473_v10  ;;  %vm3504_vm10 = vcmp.eq.f32.partialorder %v9406_v21, inf }
 0x945   : > { %v6529_v6 = vpop.eup %6528  ;;  %3957 = vmatmul.mubr.bf16.gmra.mrb[136].mxu1 %v3705_v44  ;;  %v3586_v34 = vadd.f32 1e-06, %v3480_v11  ;;  %v3507_v50 = vand.u32 2147483648, %v9406_v21  ;;  %vm3506_vm11 = vcmp.eq.f32.partialorder %v9406_v21, 0.0  ;;  %v3553_v42 = vmul.f32 %v9129_v13, %v9108_v18 }
 0x946   : > { %v3489_v46 = vmul.f32 %v6529_v6, %v9389_v25  ;;  %v3484_v40 = vsel %vm3483_vm4, %v9387_v53, %v3482_v19  ;;  %v6531_v35 = vpop.eup %6530  ;;  %v3264_v22 = vpop.xlane.xlu0 %3263  ;;  %3966 = vmatprep.mubr.bf16.mxu1 %v10631_v15  ;;  %6538 = vrcp.f32 %v3585_v30  ;;  %v6592_v19 = vld [vmem:[%s9119_s18] ss:$0 sm:$0xff]  ;;  %s10635_s18 = sld [smem:[#allocation61_spill]] }
 0x947   : > { %v3487_v37 = vsel %vm3485_vm5, %v3486_v32, %v3484_v40  ;;  %v6533_v7 = vpop.eup %6532  ;;  %v9435_v8 = vmul.f32 0.007874016, %v3264_v22  ;;  %v3638_v59 = vmul.f32 %v6531_v35, %v3551_v4  ;;  %6540 = vrcp.f32 %v3586_v34 }
 0x948   : > { %v3491_v47 = vsel %vm3490_vm6, %v9389_v25, %v3489_v46  ;;  %v3266_v24 = vpop.xlane.xlu1 %3265  ;;  %v3640_v41 = vmul.f32 %v6533_v7, %v3552_v45  ;;  %v3587_v33 = vadd.f32 1e-06, %v3487_v37  ;;  %v3500_v4 = vand.u32 2147483648, %v9404_v27 }
 0x949   : > { %v9437_v31 = vmul.f32 0.007874016, %v3266_v24  ;;  %v3494_v63 = vsel %vm3492_vm7, %v3493_v38, %v3491_v47  ;;  %6542 = vrsqrt.f32 %v9435_v8  ;;  %v3685_v61 = vadd.f32 %v9171_v55, %v3638_v59 }
 0x94a   : > { %v3686_v53 = vadd.f32 %v9171_v55, %v3640_v41  ;;  %v3588_v58 = vadd.f32 1e-06, %v3494_v63  ;;  %v3556_v18 = vmul.f32 %v6592_v19, %v9143_v57  ;;  %vm3511_vm12 = vcmp.eq.f32.partialorder %v9435_v8, inf }
 0x94b   : > { %6544 = vrsqrt.f32 %v9437_v31  ;;  %v6535_v25 = vpop.eup %6534  ;;  %vm3513_vm13 = vcmp.eq.f32.partialorder %v9435_v8, 0.0  ;;  %vm3518_vm14 = vcmp.eq.f32.partialorder %v9437_v31, inf  ;;  %v3521_v57 = vand.u32 2147483648, %v9437_v31 }
 0x94c   : > { %6546 = vrcp.f32 %v3587_v33  ;;  %v3496_v60 = vmul.f32 %v6535_v25, %v9404_v27  ;;  %v3706_v9 = vpack.c.bf16 %v3686_v53, %v3685_v61  ;;  %vm3520_vm15 = vcmp.eq.f32.partialorder %v9437_v31, 0.0  ;;  %s4147_s2 = scalar_lea.vmem %s10635_s18, %s10601_s30 }
 0x94d   : > { %v6537_v29 = vpop.eup %6536  ;;  %6548 = vrcp.f32 %v3588_v58  ;;  %v3557_v41 = vmul.f32 %v6592_v19, %v9178_v0  ;;  %v6593_v58 = vld [vmem:[%s9156_s13] ss:$0 sm:$0xff]  ;;  %v3560_v0 = vmul.f32 %v6592_v19, %v9227_v5  ;;  %v10634_v5 = vsub.s32 1, %v8215_v43 }
 0x94e   : > { %v3503_v45 = vmul.f32 %v6537_v29, %v9406_v21  ;;  %v3498_v56 = vsel %vm3497_vm8, %v9404_v27, %v3496_v60  ;;  %3967 = vmatmul.mubr.bf16.gmra.mrb[140].mxu1 %v3706_v9  ;;  %v3554_v27 = vmul.f32 %v9129_v13, %v9111_v1  ;;  %v3514_v13 = vand.u32 2147483648, %v9435_v8 }
 0x94f   : > { %v3501_v12 = vsel %vm3499_vm9, %v3500_v4, %v3498_v56  ;;  %3976 = vmatprep.mubr.bf16.mxu1 %v10631_v15 }
 0x950   : > { %v3505_v14 = vsel %vm3504_vm10, %v9406_v21, %v3503_v45  ;;  %v3589_v3 = vadd.f32 1e-06, %v3501_v12  ;;  %v6539_v36 = vpop.eup %6538  ;;  %v3555_v21 = vmul.f32 %v6592_v19, %v9137_v16 }
 0x951   : > { %v3508_v26 = vsel %vm3506_vm11, %v3507_v50, %v3505_v14  ;;  %v6541_v49 = vpop.eup %6540  ;;  %v3642_v52 = vmul.f32 %v6539_v36, %v3553_v42  ;;  %v3732_v42 = vld [vmem:[%s3731_s25] sm:$0x3] }
 0x952   : > { %v3590_v28 = vadd.f32 1e-06, %v3508_v26  ;;  %6550 = vrcp.f32 %v3589_v3  ;;  %v3644_v44 = vmul.f32 %v6541_v49, %v3554_v27  ;;  %v9493_v3 = vrot.slane %v3732_v42, %v10634_v5 }
 0x953   : > { %v6543_v6 = vpop.eup %6542  ;;  %v3687_v11 = vadd.f32 %v9171_v55, %v3642_v52 }
 0x954   : > { %6552 = vrcp.f32 %v3590_v28  ;;  %v3510_v46 = vmul.f32 %v6543_v6, %v9435_v8  ;;  %v3688_v16 = vadd.f32 %v9171_v55, %v3644_v44 }
 0x955   : > { %v6545_v32 = vpop.eup %6544 }
 0x956   : > { %v6547_v1 = vpop.eup %6546  ;;  %v3517_v10 = vmul.f32 %v6545_v32, %v9437_v31  ;;  %v3512_v40 = vsel %vm3511_vm12, %v9435_v8, %v3510_v46  ;;  %v3707_v47 = vpack.c.bf16 %v3688_v16, %v3687_v11 }
 0x957   : > { %v3646_v30 = vmul.f32 %v6547_v1, %v3555_v21  ;;  %v6549_v34 = vpop.eup %6548  ;;  %v3515_v38 = vsel %vm3513_vm13, %v3514_v13, %v3512_v40 }
 0x958   : > { %v3519_v35 = vsel %vm3518_vm14, %v9437_v31, %v3517_v10  ;;  %v3648_v22 = vmul.f32 %v6549_v34, %v3556_v18  ;;  %v3591_v37 = vadd.f32 1e-06, %v3515_v38  ;;  %3977 = vmatmul.mubr.bf16.gmra.mrb[144].mxu1 %v3707_v47  ;;  %v3558_v31 = vmul.f32 %v6592_v19, %v9190_v51 }
 0x959   : > { %v3522_v24 = vsel %vm3520_vm15, %v3521_v57, %v3519_v35  ;;  %3986 = vmatprep.mubr.bf16.mxu1 %v10631_v15  ;;  %v3689_v8 = vadd.f32 %v9171_v55, %v3646_v30 }
 0x95a   : > { %v3592_v7 = vadd.f32 1e-06, %v3522_v24  ;;  %v3690_v59 = vadd.f32 %v9171_v55, %v3648_v22  ;;  %6554 = vrcp.f32 %v3591_v37  ;;  %v3559_v55 = vmul.f32 %v6592_v19, %v9216_v23 }
 0x95b   : > { %v10633_v23 = vsub.s32 0, %v8215_v43 }
 0x95c   : > { %6556 = vrcp.f32 %v3592_v7  ;;  %v6551_v63 = vpop.eup %6550  ;;  %v3708_v33 = vpack.c.bf16 %v3690_v59, %v3689_v8 }
 0x95d   : > { %v3650_v61 = vmul.f32 %v6551_v63, %v3557_v41  ;;  %v9489_v26 = vrot.slane %v3732_v42, %v10633_v23 }
 0x95e   : > { %v6553_v25 = vpop.eup %6552 }
 0x95f   : > { %v3652_v53 = vmul.f32 %v6553_v25, %v3558_v31  ;;  %v3691_v29 = vadd.f32 %v6593_v58, %v3650_v61 }
 0x960   : > { %3987 = vmatmul.mubr.bf16.gmra.mrb[148].mxu1 %v3708_v33 }
 0x961   : > { %v3692_v60 = vadd.f32 %v6593_v58, %v3652_v53  ;;  %3996 = vmatprep.mubr.bf16.mxu1 %v10631_v15 }
 0x963   : > { %v3709_v4 = vpack.c.bf16 %v3692_v60, %v3691_v29 }
 0x964   : > { %v6555_v45 = vpop.eup %6554 }
 0x965   : > { %v3654_v56 = vmul.f32 %v6555_v45, %v3559_v55 }
 0x966   : > { %v6557_v9 = vpop.eup %6556 }
 0x967   : > { %v3656_v51 = vmul.f32 %v6557_v9, %v3560_v0  ;;  %v3693_v50 = vadd.f32 %v6593_v58, %v3654_v56 }
 0x968   : > { %3997 = vmatmul.mubr.bf16.gmra.mrb[152].mxu1 %v3709_v4 }
 0x969   : > { %v3694_v14 = vadd.f32 %v6593_v58, %v3656_v51  ;;  %4006 = vmatprep.mubr.bf16.mxu1 %v10631_v15 }
 0x96b   : > { %v3710_v12 = vpack.c.bf16 %v3694_v14, %v3693_v50 }
 0x970   : > { %4007 = vmatmul.mubr.bf16.gmra.mrb[156].mxu1 %v3710_v12 }
 0x982   : > { %v3858_v36 = vpop.f32.mrb[96].mxu1 }
 0x983   : > { %v3859_v27 = vadd.f32 %v3858_v36, %v9489_v26  ;;  %v3860_v15 = vpop.f32.mrb[97].mxu1 }
 0x984   : > { %v3861_v28 = vadd.f32 %v3860_v15, %v9493_v3  ;;  %v3862_v49 = vpop.f32.mrb[98].mxu1 }
 0x985   : > { %v3863_v52 = vadd.f32 %v3862_v49, %v9489_v26  ;;  %v3864_v6 = vpop.f32.mrb[99].mxu1  ;;  %v4017_v21 = vmax.f32 %v3859_v27, 0.0 }
 0x986   : > { %v3865_v19 = vadd.f32 %v3864_v6, %v9493_v3  ;;  %v4018_v32 = vmax.f32 %v3861_v28, 0.0 }
 0x987   : > { %v4019_v44 = vmax.f32 %v3863_v52, 0.0 }
 0x988   : > { %v4020_v18 = vmax.f32 %v3865_v19, 0.0 }
 0x989   : > { %v4081_v46 = vpack.c.bf16 %v4019_v44, %v4017_v21 }
 0x98a   : > { %v4082_v43 = vpack.c.bf16 %v4020_v18, %v4018_v32  ;;  %v3868_v1 = vpop.f32.mrb[100].mxu1 }
 0x98b   : > { %v3869_v13 = vadd.f32 %v3868_v1, %v9489_v26  ;;  %v3870_v10 = vpop.f32.mrb[101].mxu1 }
 0x98c   : > { %v3871_v11 = vadd.f32 %v3870_v10, %v9493_v3  ;;  %v3872_v16 = vpop.f32.mrb[102].mxu1  ;;  %4283 = vmatprep.mubr.bf16.mxu0 %v4082_v43 }
 0x98d   : > { %v3873_v40 = vadd.f32 %v3872_v16, %v9489_v26  ;;  %v3874_v57 = vpop.f32.mrb[103].mxu1  ;;  %4284 = vmatmul.mubr.bf16.vlgmr.msra.gmra.mrb[96].mxu0 %v4081_v46  ;;  %v4021_v34 = vmax.f32 %v3869_v13, 0.0 }
 0x98e   : > { %v3875_v30 = vadd.f32 %v3874_v57, %v9493_v3  ;;  %v4022_v47 = vmax.f32 %v3871_v11, 0.0 }
 0x98f   : > { %v4023_v35 = vmax.f32 %v3873_v40, 0.0 }
 0x990   : > { %v4024_v38 = vmax.f32 %v3875_v30, 0.0 }
 0x991   : > { %v4083_v22 = vpack.c.bf16 %v4023_v35, %v4021_v34 }
 0x992   : > { %v4084_v24 = vpack.c.bf16 %v4024_v38, %v4022_v47 }
 0x994   : > { %4291 = vmatprep.mubr.bf16.mxu0 %v4084_v24 }
 0x995   : > { %4292 = vmatmul.mubr.bf16.gmra.mrb[100].mxu0 %v4083_v22 }
 0x998   : > { %v3878_v37 = vpop.f32.mrb[104].mxu1 }
 0x999   : > { %v3879_v7 = vadd.f32 %v3878_v37, %v9489_v26  ;;  %v3880_v8 = vpop.f32.mrb[105].mxu1 }
 0x99a   : > { %v3881_v59 = vadd.f32 %v3880_v8, %v9493_v3  ;;  %v3882_v41 = vpop.f32.mrb[106].mxu1 }
 0x99b   : > { %v3883_v63 = vadd.f32 %v3882_v41, %v9489_v26  ;;  %v3884_v31 = vpop.f32.mrb[107].mxu1  ;;  %v4025_v25 = vmax.f32 %v3879_v7, 0.0 }
 0x99c   : > { %v3885_v33 = vadd.f32 %v3884_v31, %v9493_v3  ;;  %v4026_v53 = vmax.f32 %v3881_v59, 0.0 }
 0x99d   : > { %v4027_v61 = vmax.f32 %v3883_v63, 0.0 }
 0x99e   : > { %v4028_v58 = vmax.f32 %v3885_v33, 0.0 }
 0x99f   : > { %v4085_v29 = vpack.c.bf16 %v4027_v61, %v4025_v25 }
 0x9a0   : > { %v4086_v60 = vpack.c.bf16 %v4028_v58, %v4026_v53 }
 0x9a1   : > { %v3888_v4 = vpop.f32.mrb[108].mxu1 }
 0x9a2   : > { %v3889_v55 = vadd.f32 %v3888_v4, %v9489_v26  ;;  %v3890_v45 = vpop.f32.mrb[109].mxu1  ;;  %4299 = vmatprep.mubr.bf16.mxu0 %v4086_v60 }
 0x9a3   : > { %v3891_v0 = vadd.f32 %v3890_v45, %v9493_v3  ;;  %v3892_v9 = vpop.f32.mrb[110].mxu1  ;;  %4300 = vmatmul.mubr.bf16.gmra.mrb[104].mxu0 %v4085_v29 }
 0x9a4   : > { %v3893_v56 = vadd.f32 %v3892_v9, %v9489_v26  ;;  %v3894_v51 = vpop.f32.mrb[111].mxu1  ;;  %v4029_v14 = vmax.f32 %v3889_v55, 0.0 }
 0x9a5   : > { %v3895_v50 = vadd.f32 %v3894_v51, %v9493_v3  ;;  %v4030_v42 = vmax.f32 %v3891_v0, 0.0 }
 0x9a6   : > { %v4031_v12 = vmax.f32 %v3893_v56, 0.0 }
 0x9a7   : > { %v4032_v23 = vmax.f32 %v3895_v50, 0.0 }
 0x9a8   : > { %v4087_v5 = vpack.c.bf16 %v4031_v12, %v4029_v14 }
 0x9a9   : > { %v4088_v36 = vpack.c.bf16 %v4032_v23, %v4030_v42  ;;  %v3898_v27 = vpop.f32.mrb[112].mxu1 }
 0x9aa   : > { %v3899_v15 = vadd.f32 %v3898_v27, %v9489_v26  ;;  %v3900_v28 = vpop.f32.mrb[113].mxu1 }
 0x9ab   : > { %v3901_v49 = vadd.f32 %v3900_v28, %v9493_v3  ;;  %v3902_v52 = vpop.f32.mrb[114].mxu1  ;;  %4307 = vmatprep.mubr.bf16.mxu0 %v4088_v36 }
 0x9ac   : > { %v3903_v6 = vadd.f32 %v3902_v52, %v9489_v26  ;;  %v3904_v19 = vpop.f32.mrb[115].mxu1  ;;  %4308 = vmatmul.mubr.bf16.gmra.mrb[108].mxu0 %v4087_v5  ;;  %v4033_v44 = vmax.f32 %v3899_v15, 0.0 }
 0x9ad   : > { %v3905_v21 = vadd.f32 %v3904_v19, %v9493_v3  ;;  %v4034_v18 = vmax.f32 %v3901_v49, 0.0 }
 0x9ae   : > { %v4035_v32 = vmax.f32 %v3903_v6, 0.0 }
 0x9af   : > { %v4036_v46 = vmax.f32 %v3905_v21, 0.0 }
 0x9b0   : > { %v4089_v43 = vpack.c.bf16 %v4035_v32, %v4033_v44 }
 0x9b1   : > { %v4090_v1 = vpack.c.bf16 %v4036_v46, %v4034_v18  ;;  %v3908_v13 = vpop.f32.mrb[116].mxu1 }
 0x9b2   : > { %v3909_v10 = vadd.f32 %v3908_v13, %v9489_v26  ;;  %v3910_v11 = vpop.f32.mrb[117].mxu1 }
 0x9b3   : > { %v3911_v16 = vadd.f32 %v3910_v11, %v9493_v3  ;;  %v3912_v40 = vpop.f32.mrb[118].mxu1  ;;  %4315 = vmatprep.mubr.bf16.mxu0 %v4090_v1 }
 0x9b4   : > { %v3913_v57 = vadd.f32 %v3912_v40, %v9489_v26  ;;  %v3914_v30 = vpop.f32.mrb[119].mxu1  ;;  %4316 = vmatmul.mubr.bf16.gmra.mrb[112].mxu0 %v4089_v43  ;;  %v4037_v35 = vmax.f32 %v3909_v10, 0.0 }
 0x9b5   : > { %v3915_v34 = vadd.f32 %v3914_v30, %v9493_v3  ;;  %v4038_v38 = vmax.f32 %v3911_v16, 0.0 }
 0x9b6   : > { %v4039_v47 = vmax.f32 %v3913_v57, 0.0 }
 0x9b7   : > { %v4040_v22 = vmax.f32 %v3915_v34, 0.0 }
 0x9b8   : > { %v4091_v24 = vpack.c.bf16 %v4039_v47, %v4037_v35 }
 0x9b9   : > { %v4092_v37 = vpack.c.bf16 %v4040_v22, %v4038_v38  ;;  %v3918_v7 = vpop.f32.mrb[120].mxu1 }
 0x9ba   : > { %v3919_v8 = vadd.f32 %v3918_v7, %v9489_v26  ;;  %v3920_v59 = vpop.f32.mrb[121].mxu1 }
 0x9bb   : > { %v3921_v41 = vadd.f32 %v3920_v59, %v9493_v3  ;;  %v3922_v63 = vpop.f32.mrb[122].mxu1  ;;  %4323 = vmatprep.mubr.bf16.mxu0 %v4092_v37 }
 0x9bc   : > { %v3923_v31 = vadd.f32 %v3922_v63, %v9489_v26  ;;  %v3924_v33 = vpop.f32.mrb[123].mxu1  ;;  %4324 = vmatmul.mubr.bf16.gmra.mrb[116].mxu0 %v4091_v24  ;;  %v4041_v61 = vmax.f32 %v3919_v8, 0.0 }
 0x9bd   : > { %v3925_v25 = vadd.f32 %v3924_v33, %v9493_v3  ;;  %v4042_v58 = vmax.f32 %v3921_v41, 0.0 }
 0x9be   : > { %v4043_v53 = vmax.f32 %v3923_v31, 0.0 }
 0x9bf   : > { %v4044_v29 = vmax.f32 %v3925_v25, 0.0 }
 0x9c0   : > { %v4093_v60 = vpack.c.bf16 %v4043_v53, %v4041_v61 }
 0x9c1   : > { %v4094_v4 = vpack.c.bf16 %v4044_v29, %v4042_v58  ;;  %v3928_v55 = vpop.f32.mrb[124].mxu1 }
 0x9c2   : > { %v3929_v45 = vadd.f32 %v3928_v55, %v9489_v26  ;;  %v3930_v0 = vpop.f32.mrb[125].mxu1 }
 0x9c3   : > { %v3931_v9 = vadd.f32 %v3930_v0, %v9493_v3  ;;  %v3932_v56 = vpop.f32.mrb[126].mxu1  ;;  %4331 = vmatprep.mubr.bf16.mxu0 %v4094_v4 }
 0x9c4   : > { %v3933_v51 = vadd.f32 %v3932_v56, %v9489_v26  ;;  %v3934_v50 = vpop.f32.mrb[127].mxu1  ;;  %4332 = vmatmul.mubr.bf16.gmra.mrb[120].mxu0 %v4093_v60  ;;  %v4045_v12 = vmax.f32 %v3929_v45, 0.0 }
 0x9c5   : > { %v3935_v14 = vadd.f32 %v3934_v50, %v9493_v3  ;;  %v4046_v23 = vmax.f32 %v3931_v9, 0.0 }
 0x9c6   : > { %v4047_v42 = vmax.f32 %v3933_v51, 0.0 }
 0x9c7   : > { %v4048_v5 = vmax.f32 %v3935_v14, 0.0 }
 0x9c8   : > { %v4095_v36 = vpack.c.bf16 %v4047_v42, %v4045_v12 }
 0x9c9   : > { %v4096_v27 = vpack.c.bf16 %v4048_v5, %v4046_v23 }
 0x9cb   : > { %4339 = vmatprep.mubr.bf16.mxu0 %v4096_v27 }
 0x9cc   : > { %4340 = vmatmul.mubr.bf16.gmra.mrb[124].mxu0 %v4095_v36 }
 0xa02   : > { %v3938_v15 = vpop.f32.mrb[128].mxu1 }
 0xa03   : > { %v3939_v28 = vadd.f32 %v3938_v15, %v9489_v26  ;;  %v3940_v49 = vpop.f32.mrb[129].mxu1 }
 0xa04   : > { %v3941_v52 = vadd.f32 %v3940_v49, %v9493_v3  ;;  %v3942_v6 = vpop.f32.mrb[130].mxu1 }
 0xa05   : > { %v3943_v19 = vadd.f32 %v3942_v6, %v9489_v26  ;;  %v3944_v21 = vpop.f32.mrb[131].mxu1  ;;  %v4049_v32 = vmax.f32 %v3939_v28, 0.0 }
 0xa06   : > { %v3945_v44 = vadd.f32 %v3944_v21, %v9493_v3  ;;  %v4050_v46 = vmax.f32 %v3941_v52, 0.0 }
 0xa07   : > { %v4051_v18 = vmax.f32 %v3943_v19, 0.0 }
 0xa08   : > { %v4052_v43 = vmax.f32 %v3945_v44, 0.0 }
 0xa09   : > { %v4097_v1 = vpack.c.bf16 %v4051_v18, %v4049_v32 }
 0xa0a   : > { %v4098_v13 = vpack.c.bf16 %v4052_v43, %v4050_v46  ;;  %v3948_v10 = vpop.f32.mrb[132].mxu1 }
 0xa0b   : > { %v3949_v11 = vadd.f32 %v3948_v10, %v9489_v26  ;;  %v3950_v16 = vpop.f32.mrb[133].mxu1 }
 0xa0c   : > { %v3951_v40 = vadd.f32 %v3950_v16, %v9493_v3  ;;  %v3952_v57 = vpop.f32.mrb[134].mxu1  ;;  %4347 = vmatprep.mubr.bf16.mxu0 %v4098_v13 }
 0xa0d   : > { %v3953_v30 = vadd.f32 %v3952_v57, %v9489_v26  ;;  %v3954_v34 = vpop.f32.mrb[135].mxu1  ;;  %4348 = vmatmul.mubr.bf16.gmra.mrb[128].mxu0 %v4097_v1  ;;  %v4053_v47 = vmax.f32 %v3949_v11, 0.0 }
 0xa0e   : > { %v3955_v35 = vadd.f32 %v3954_v34, %v9493_v3  ;;  %v4054_v22 = vmax.f32 %v3951_v40, 0.0 }
 0xa0f   : > { %v4055_v38 = vmax.f32 %v3953_v30, 0.0 }
 0xa10   : > { %v4056_v24 = vmax.f32 %v3955_v35, 0.0 }
 0xa11   : > { %v4099_v37 = vpack.c.bf16 %v4055_v38, %v4053_v47 }
 0xa12   : > { %v4100_v7 = vpack.c.bf16 %v4056_v24, %v4054_v22 }
 0xa14   : > { %4355 = vmatprep.mubr.bf16.mxu0 %v4100_v7 }
 0xa15   : > { %4356 = vmatmul.mubr.bf16.gmra.mrb[132].mxu0 %v4099_v37 }
 0xa18   : > { %v3958_v8 = vpop.f32.mrb[136].mxu1 }
 0xa19   : > { %v3959_v59 = vadd.f32 %v3958_v8, %v9489_v26  ;;  %v3960_v41 = vpop.f32.mrb[137].mxu1 }
 0xa1a   : > { %v3961_v63 = vadd.f32 %v3960_v41, %v9493_v3  ;;  %v3962_v31 = vpop.f32.mrb[138].mxu1 }
 0xa1b   : > { %v3963_v33 = vadd.f32 %v3962_v31, %v9489_v26  ;;  %v3964_v25 = vpop.f32.mrb[139].mxu1  ;;  %v4057_v53 = vmax.f32 %v3959_v59, 0.0 }
 0xa1c   : > { %v3965_v61 = vadd.f32 %v3964_v25, %v9493_v3  ;;  %v4058_v29 = vmax.f32 %v3961_v63, 0.0 }
 0xa1d   : > { %v4059_v58 = vmax.f32 %v3963_v33, 0.0 }
 0xa1e   : > { %v4060_v60 = vmax.f32 %v3965_v61, 0.0 }
 0xa1f   : > { %v4101_v4 = vpack.c.bf16 %v4059_v58, %v4057_v53 }
 0xa20   : > { %v4102_v55 = vpack.c.bf16 %v4060_v60, %v4058_v29 }
 0xa21   : > { %v3968_v45 = vpop.f32.mrb[140].mxu1 }
 0xa22   : > { %4363 = vmatprep.mubr.bf16.mxu0 %v4102_v55  ;;  %v3969_v0 = vadd.f32 %v3968_v45, %v9489_v26  ;;  %v3970_v9 = vpop.f32.mrb[141].mxu1 }
 0xa23   : > { %4364 = vmatmul.mubr.bf16.gmra.mrb[136].mxu0 %v4101_v4  ;;  %v3971_v56 = vadd.f32 %v3970_v9, %v9493_v3  ;;  %v3972_v51 = vpop.f32.mrb[142].mxu1 }
 0xa24   : > { %v3973_v50 = vadd.f32 %v3972_v51, %v9489_v26  ;;  %v3974_v14 = vpop.f32.mrb[143].mxu1  ;;  %v4061_v42 = vmax.f32 %v3969_v0, 0.0 }
 0xa25   : > { %v3975_v12 = vadd.f32 %v3974_v14, %v9493_v3  ;;  %v4062_v5 = vmax.f32 %v3971_v56, 0.0 }
 0xa26   : > { %v4063_v23 = vmax.f32 %v3973_v50, 0.0 }
 0xa27   : > { %v4064_v36 = vmax.f32 %v3975_v12, 0.0 }
 0xa28   : > { %v4103_v27 = vpack.c.bf16 %v4063_v23, %v4061_v42 }
 0xa29   : > { %v4104_v15 = vpack.c.bf16 %v4064_v36, %v4062_v5 }
 0xa2b   : > { %v3978_v28 = vpop.f32.mrb[144].mxu1  ;;  %4371 = vmatprep.mubr.bf16.mxu0 %v4104_v15 }
 0xa2c   : > { %v3979_v49 = vadd.f32 %v3978_v28, %v9489_v26  ;;  %v3980_v52 = vpop.f32.mrb[145].mxu1  ;;  %4372 = vmatmul.mubr.bf16.gmra.mrb[140].mxu0 %v4103_v27 }
 0xa2d   : > { %v3981_v6 = vadd.f32 %v3980_v52, %v9493_v3  ;;  %v3982_v19 = vpop.f32.mrb[146].mxu1  ;;  %v9563_v52 = vld [vmem:[%s4147_s2] ss:$0 sm:$0xff] }
 0xa2e   : > { %v3983_v21 = vadd.f32 %v3982_v19, %v9489_v26  ;;  %v3984_v44 = vpop.f32.mrb[147].mxu1  ;;  %v4065_v18 = vmax.f32 %v3979_v49, 0.0 }
 0xa2f   : > { %v3985_v32 = vadd.f32 %v3984_v44, %v9493_v3  ;;  %v4066_v43 = vmax.f32 %v3981_v6, 0.0 }
 0xa30   : > { %v4067_v46 = vmax.f32 %v3983_v21, 0.0 }
 0xa31   : > { %v4068_v1 = vmax.f32 %v3985_v32, 0.0 }
 0xa32   : > { %v4105_v13 = vpack.c.bf16 %v4067_v46, %v4065_v18 }
 0xa33   : > { %v4106_v10 = vpack.c.bf16 %v4068_v1, %v4066_v43  ;;  %v3988_v11 = vpop.f32.mrb[148].mxu1 }
 0xa34   : > { %v3989_v16 = vadd.f32 %v3988_v11, %v9489_v26  ;;  %v3990_v40 = vpop.f32.mrb[149].mxu1 }
 0xa35   : > { %v3991_v57 = vadd.f32 %v3990_v40, %v9493_v3  ;;  %v3992_v30 = vpop.f32.mrb[150].mxu1  ;;  %4379 = vmatprep.mubr.bf16.mxu0 %v4106_v10 }
 0xa36   : > { %v3993_v34 = vadd.f32 %v3992_v30, %v9489_v26  ;;  %v3994_v35 = vpop.f32.mrb[151].mxu1  ;;  %4380 = vmatmul.mubr.bf16.gmra.mrb[144].mxu0 %v4105_v13  ;;  %v4069_v38 = vmax.f32 %v3989_v16, 0.0 }
 0xa37   : > { %v3995_v47 = vadd.f32 %v3994_v35, %v9493_v3  ;;  %v4070_v24 = vmax.f32 %v3991_v57, 0.0 }
 0xa38   : > { %v4071_v22 = vmax.f32 %v3993_v34, 0.0 }
 0xa39   : > { %v4072_v37 = vmax.f32 %v3995_v47, 0.0 }
 0xa3a   : > { %v4107_v7 = vpack.c.bf16 %v4071_v22, %v4069_v38 }
 0xa3b   : > { %v4108_v8 = vpack.c.bf16 %v4072_v37, %v4070_v24  ;;  %v3998_v59 = vpop.f32.mrb[152].mxu1 }
 0xa3c   : > { %v3999_v41 = vadd.f32 %v3998_v59, %v9489_v26  ;;  %v4000_v63 = vpop.f32.mrb[153].mxu1 }
 0xa3d   : > { %v4001_v31 = vadd.f32 %v4000_v63, %v9493_v3  ;;  %v4002_v33 = vpop.f32.mrb[154].mxu1  ;;  %4387 = vmatprep.mubr.bf16.mxu0 %v4108_v8 }
 0xa3e   : > { %v4003_v25 = vadd.f32 %v4002_v33, %v9489_v26  ;;  %v4004_v61 = vpop.f32.mrb[155].mxu1  ;;  %4388 = vmatmul.mubr.bf16.gmra.mrb[148].mxu0 %v4107_v7  ;;  %v4073_v58 = vmax.f32 %v3999_v41, 0.0  ;;  %v10636_v7 = vld [vmem:[#allocation27_spill] sm:$0xff] }
 0xa3f   : > { %v4005_v53 = vadd.f32 %v4004_v61, %v9493_v3  ;;  %v4074_v60 = vmax.f32 %v4001_v31, 0.0  ;;  %v10637_v61 = vld [vmem:[#allocation28_spill] sm:$0xff] }
 0xa40   : > { %v4075_v29 = vmax.f32 %v4003_v25, 0.0 }
 0xa41   : > { %v4076_v4 = vmax.f32 %v4005_v53, 0.0 }
 0xa42   : > { %v4109_v55 = vpack.c.bf16 %v4075_v29, %v4073_v58  ;;  %v10638_v58 = vld [vmem:[#allocation29_spill] sm:$0xff] }
 0xa43   : > { %v4110_v45 = vpack.c.bf16 %v4076_v4, %v4074_v60  ;;  %v4008_v0 = vpop.f32.mrb[156].mxu1 }
 0xa44   : > { %v4009_v9 = vadd.f32 %v4008_v0, %v9489_v26  ;;  %v4010_v56 = vpop.f32.mrb[157].mxu1 }
 0xa45   : > { %v4011_v51 = vadd.f32 %v4010_v56, %v9493_v3  ;;  %v4012_v50 = vpop.f32.mrb[158].mxu1  ;;  %4395 = vmatprep.mubr.bf16.mxu0 %v4110_v45 }
 0xa46   : > { %v4013_v14 = vadd.f32 %v4012_v50, %v9489_v26  ;;  %v4014_v12 = vpop.f32.mrb[159].mxu1  ;;  %4396 = vmatmul.mubr.bf16.gmra.mrb[152].mxu0 %v4109_v55  ;;  %v4077_v23 = vmax.f32 %v4009_v9, 0.0 }
 0xa47   : > { %v4015_v42 = vadd.f32 %v4014_v12, %v9493_v3  ;;  %v4078_v36 = vmax.f32 %v4011_v51, 0.0  ;;  %v10639_v51 = vld [vmem:[#allocation30_spill] sm:$0xff]  ;;  %v10640_v12 = vld [vmem:[#allocation31_spill] sm:$0xff] }
 0xa48   : > { %v4079_v5 = vmax.f32 %v4013_v14, 0.0 }
 0xa49   : > { %v4080_v27 = vmax.f32 %v4015_v42, 0.0 }
 0xa4a   : > { %v4111_v15 = vpack.c.bf16 %v4079_v5, %v4077_v23 }
 0xa4b   : > { %v4112_v28 = vpack.c.bf16 %v4080_v27, %v4078_v36 }
 0xa4d   : > { %4403 = vmatprep.mubr.bf16.mxu0 %v4112_v28 }
 0xa4e   : > { %4404 = vmatmul.mubr.bf16.gmra.mrb[156].mxu0 %v4111_v15 }
 0xa60   : > { %v5598_v49 = vpop.f32.mrb[96].mxu0 }
 0xa61   : > { %v5599_v26 = vpop.f32.mrb[97].mxu0 }
 0xa62   : > { %v5600_v6 = vadd.f32 %v5599_v26, %v5598_v49  ;;  %v5601_v19 = vpop.f32.mrb[98].mxu0  ;;  %v10641_v26 = vld [vmem:[#allocation32_spill] sm:$0xff] }
 0xa63   : > { %v5602_v21 = vpop.f32.mrb[99].mxu0 }
 0xa64   : > { %v4286_v3 = vadd.f32 %v5600_v6, %v9563_v52  ;;  %v5603_v44 = vadd.f32 %v5602_v21, %v5601_v19  ;;  %v10642_v21 = vld [vmem:[#allocation33_spill] sm:$0xff] }
 0xa66   : > { %v9567_v32 = vadd.f32 %v4286_v3, %v8825_v62  ;;  %v4289_v18 = vadd.f32 %v5603_v44, %v9563_v52 }
 0xa68   : > { %4444 = vst [vmem:[#allocation2] sm:$0xff] %v9567_v32  ;;  %v9572_v46 = vadd.f32 %v4289_v18, %v8829_v48  ;;  %v5604_v43 = vpop.f32.mrb[100].mxu0  ;;  %4482 = vadd.xlane.f32.xlu0 (!%p5453_p0), %v9567_v32 }
 0xa69   : > { %v5605_v1 = vpop.f32.mrb[101].mxu0 }
 0xa6a   : > { %4445 = vst [vmem:[#allocation2 + $0x8] sm:$0xff] %v9572_v46  ;;  %v5606_v13 = vadd.f32 %v5605_v1, %v5604_v43  ;;  %v5607_v10 = vpop.f32.mrb[102].mxu0 }
 0xa6b   : > { %v5608_v11 = vpop.f32.mrb[103].mxu0 }
 0xa6c   : > { %v4294_v16 = vadd.f32 %v5606_v13, %v9563_v52  ;;  %v5609_v40 = vadd.f32 %v5608_v11, %v5607_v10  ;;  %4484 = vadd.xlane.f32.xlu0 (!%p5453_p0), %v9572_v46 }
 0xa6e   : > { %v9577_v62 = vadd.f32 %v4294_v16, %v8832_v20  ;;  %v4297_v57 = vadd.f32 %v5609_v40, %v9563_v52  ;;  %v10643_v16 = vld [vmem:[#allocation34_spill] sm:$0xff] }
 0xa70   : > { %4446 = vst [vmem:[#allocation2 + $0x10] sm:$0xff] %v9577_v62  ;;  %v9582_v48 = vadd.f32 %v4297_v57, %v8835_v17  ;;  %4486 = vadd.xlane.f32.xlu1 (!%p5453_p0), %v9577_v62 }
 0xa72   : > { %4447 = vst [vmem:[#allocation2 + $0x18] sm:$0xff] %v9582_v48 }
 0xa74   : > { %4488 = vadd.xlane.f32.xlu1 (!%p5453_p0), %v9582_v48 }
 0xa76   : > { %v5610_v30 = vpop.f32.mrb[104].mxu0 }
 0xa77   : > { %v5611_v34 = vpop.f32.mrb[105].mxu0 }
 0xa78   : > { %v5612_v35 = vadd.f32 %v5611_v34, %v5610_v30  ;;  %v5613_v47 = vpop.f32.mrb[106].mxu0  ;;  %v10644_v30 = vld [vmem:[#allocation35_spill] sm:$0xff] }
 0xa79   : > { %v5614_v38 = vpop.f32.mrb[107].mxu0 }
 0xa7a   : > { %v4302_v22 = vadd.f32 %v5612_v35, %v9563_v52  ;;  %v5615_v24 = vadd.f32 %v5614_v38, %v5613_v47 }
 0xa7c   : > { %v9587_v20 = vadd.f32 %v4302_v22, %v8841_v54  ;;  %v4305_v37 = vadd.f32 %v5615_v24, %v9563_v52 }
 0xa7e   : > { %4448 = vst [vmem:[#allocation2 + $0x20] sm:$0xff] %v9587_v20  ;;  %v9592_v17 = vadd.f32 %v4305_v37, %v10636_v7  ;;  %4490 = vadd.xlane.f32.xlu0 (!%p5453_p0), %v9587_v20 }
 0xa7f   : > { %v5616_v8 = vpop.f32.mrb[108].mxu0 }
 0xa80   : > { %v5617_v59 = vpop.f32.mrb[109].mxu0  ;;  %4449 = vst [vmem:[#allocation2 + $0x28] sm:$0xff] %v9592_v17  ;;  %4492 = vadd.xlane.f32.xlu1 (!%p5453_p0), %v9592_v17 }
 0xa81   : > { %v5618_v41 = vadd.f32 %v5617_v59, %v5616_v8  ;;  %v5619_v63 = vpop.f32.mrb[110].mxu0  ;;  %v10645_v8 = vld [vmem:[#allocation36_spill] sm:$0xff] }
 0xa82   : > { %v5620_v31 = vpop.f32.mrb[111].mxu0 }
 0xa83   : > { %v4310_v33 = vadd.f32 %v5618_v41, %v9563_v52  ;;  %v5621_v25 = vadd.f32 %v5620_v31, %v5619_v63  ;;  %v10646_v63 = vld [vmem:[#allocation37_spill] sm:$0xff] }
 0xa85   : > { %v9597_v54 = vadd.f32 %v4310_v33, %v10637_v61  ;;  %v4313_v53 = vadd.f32 %v5621_v25, %v9563_v52 }
 0xa87   : > { %4450 = vst [vmem:[#allocation2 + $0x30] sm:$0xff] %v9597_v54  ;;  %v9602_v29 = vadd.f32 %v4313_v53, %v10638_v58  ;;  %v5622_v60 = vpop.f32.mrb[112].mxu0  ;;  %4494 = vadd.xlane.f32.xlu0 (!%p5453_p0), %v9597_v54 }
 0xa88   : > { %v5623_v4 = vpop.f32.mrb[113].mxu0 }
 0xa89   : > { %4451 = vst [vmem:[#allocation2 + $0x38] sm:$0xff] %v9602_v29  ;;  %v5624_v55 = vadd.f32 %v5623_v4, %v5622_v60  ;;  %v5625_v45 = vpop.f32.mrb[114].mxu0  ;;  %4496 = vadd.xlane.f32.xlu1 (!%p5453_p0), %v9602_v29 }
 0xa8a   : > { %v5626_v0 = vpop.f32.mrb[115].mxu0 }
 0xa8b   : > { %v4318_v9 = vadd.f32 %v5624_v55, %v9563_v52  ;;  %v5627_v56 = vadd.f32 %v5626_v0, %v5625_v45  ;;  %v10647_v55 = vld [vmem:[#allocation38_spill] sm:$0xff] }
 0xa8d   : > { %v9607_v50 = vadd.f32 %v4318_v9, %v10639_v51  ;;  %v4321_v14 = vadd.f32 %v5627_v56, %v9563_v52  ;;  %v10648_v9 = vld [vmem:[#allocation39_spill] sm:$0xff] }
 0xa8f   : > { %4452 = vst [vmem:[#allocation2 + $0x40] sm:$0xff] %v9607_v50  ;;  %v9612_v42 = vadd.f32 %v4321_v14, %v10640_v12  ;;  %v5628_v23 = vpop.f32.mrb[116].mxu0  ;;  %4498 = vadd.xlane.f32.xlu0 (!%p5453_p0), %v9607_v50 }
 0xa90   : > { %v5629_v5 = vpop.f32.mrb[117].mxu0 }
 0xa91   : > { %4453 = vst [vmem:[#allocation2 + $0x48] sm:$0xff] %v9612_v42  ;;  %v5630_v36 = vadd.f32 %v5629_v5, %v5628_v23  ;;  %v5631_v27 = vpop.f32.mrb[118].mxu0  ;;  %4500 = vadd.xlane.f32.xlu1 (!%p5453_p0), %v9612_v42 }
 0xa92   : > { %v5632_v15 = vpop.f32.mrb[119].mxu0 }
 0xa93   : > { %v4326_v28 = vadd.f32 %v5630_v36, %v9563_v52  ;;  %v5633_v49 = vadd.f32 %v5632_v15, %v5631_v27  ;;  %v10649_v15 = vld [vmem:[#allocation40_spill] sm:$0xff] }
 0xa95   : > { %v9617_v6 = vadd.f32 %v4326_v28, %v10641_v26  ;;  %v4329_v19 = vadd.f32 %v5633_v49, %v9563_v52  ;;  %v10650_v26 = vld [vmem:[#allocation41_spill] sm:$0xff] }
 0xa97   : > { %4454 = vst [vmem:[#allocation2 + $0x50] sm:$0xff] %v9617_v6  ;;  %v9622_v3 = vadd.f32 %v4329_v19, %v10642_v21  ;;  %v5634_v44 = vpop.f32.mrb[120].mxu0  ;;  %4502 = vadd.xlane.f32.xlu0 (!%p5453_p0), %v9617_v6 }
 0xa98   : > { %v5635_v18 = vpop.f32.mrb[121].mxu0 }
 0xa99   : > { %4455 = vst [vmem:[#allocation2 + $0x58] sm:$0xff] %v9622_v3  ;;  %v5636_v43 = vadd.f32 %v5635_v18, %v5634_v44  ;;  %v5637_v1 = vpop.f32.mrb[122].mxu0  ;;  %4504 = vadd.xlane.f32.xlu1 (!%p5453_p0), %v9622_v3 }
 0xa9a   : > { %v5638_v13 = vpop.f32.mrb[123].mxu0 }
 0xa9b   : > { %v4334_v10 = vadd.f32 %v5636_v43, %v9563_v52  ;;  %v5639_v11 = vadd.f32 %v5638_v13, %v5637_v1 }
 0xa9d   : > { %v9627_v40 = vadd.f32 %v4334_v10, %v10643_v16  ;;  %v4337_v57 = vadd.f32 %v5639_v11, %v9563_v52  ;;  %v10651_v11 = vld [vmem:[#allocation42_spill] sm:$0xff] }
 0xa9f   : > { %4456 = vst [vmem:[#allocation2 + $0x60] sm:$0xff] %v9627_v40  ;;  %v9632_v34 = vadd.f32 %v4337_v57, %v10644_v30  ;;  %v5640_v35 = vpop.f32.mrb[124].mxu0  ;;  %v10652_v30 = vld [vmem:[#allocation43_spill] sm:$0xff]  ;;  %4506 = vadd.xlane.f32.xlu0 (!%p5453_p0), %v9627_v40 }
 0xaa0   : > { %v5641_v47 = vpop.f32.mrb[125].mxu0 }
 0xaa1   : > { %4457 = vst [vmem:[#allocation2 + $0x68] sm:$0xff] %v9632_v34  ;;  %v5642_v38 = vadd.f32 %v5641_v47, %v5640_v35  ;;  %v5643_v22 = vpop.f32.mrb[126].mxu0  ;;  %4508 = vadd.xlane.f32.xlu1 (!%p5453_p0), %v9632_v34 }
 0xaa2   : > { %v5644_v24 = vpop.f32.mrb[127].mxu0 }
 0xaa3   : > { %v4342_v37 = vadd.f32 %v5642_v38, %v9563_v52  ;;  %v5645_v7 = vadd.f32 %v5644_v24, %v5643_v22 }
 0xaa5   : > { %v9637_v59 = vadd.f32 %v4342_v37, %v10645_v8  ;;  %v4345_v41 = vadd.f32 %v5645_v7, %v9563_v52 }
 0xaa7   : > { %4458 = vst [vmem:[#allocation2 + $0x70] sm:$0xff] %v9637_v59  ;;  %v9642_v31 = vadd.f32 %v4345_v41, %v10646_v63  ;;  %v10653_v41 = vld [vmem:[#allocation44_spill] sm:$0xff]  ;;  %4510 = vadd.xlane.f32.xlu0 (!%p5453_p0), %v9637_v59 }
 0xaa9   : > { %4459 = vst [vmem:[#allocation2 + $0x78] sm:$0xff] %v9642_v31  ;;  %4512 = vadd.xlane.f32.xlu1 (!%p5453_p0), %v9642_v31 }
 0xae0   : > { %v5646_v33 = vpop.f32.mrb[128].mxu0 }
 0xae1   : > { %v5647_v25 = vpop.f32.mrb[129].mxu0 }
 0xae2   : > { %v5648_v61 = vadd.f32 %v5647_v25, %v5646_v33  ;;  %v5649_v53 = vpop.f32.mrb[130].mxu0  ;;  %v10654_v25 = vld [vmem:[#allocation45_spill] sm:$0xff] }
 0xae3   : > { %v5650_v58 = vpop.f32.mrb[131].mxu0 }
 0xae4   : > { %v4350_v60 = vadd.f32 %v5648_v61, %v9563_v52  ;;  %v5651_v4 = vadd.f32 %v5650_v58, %v5649_v53 }
 0xae6   : > { %v9647_v45 = vadd.f32 %v4350_v60, %v10647_v55  ;;  %v4353_v0 = vadd.f32 %v5651_v4, %v9563_v52 }
 0xae8   : > { %4460 = vst [vmem:[#allocation2 + $0x80] sm:$0xff] %v9647_v45  ;;  %v9652_v56 = vadd.f32 %v4353_v0, %v10648_v9  ;;  %v5652_v51 = vpop.f32.mrb[132].mxu0  ;;  %4514 = vadd.xlane.f32.xlu0 (!%p5453_p0), %v9647_v45 }
 0xae9   : > { %v5653_v14 = vpop.f32.mrb[133].mxu0 }
 0xaea   : > { %4461 = vst [vmem:[#allocation2 + $0x88] sm:$0xff] %v9652_v56  ;;  %v5654_v12 = vadd.f32 %v5653_v14, %v5652_v51  ;;  %v5655_v23 = vpop.f32.mrb[134].mxu0  ;;  %v10655_v51 = vld [vmem:[#allocation46_spill] sm:$0xff]  ;;  %4516 = vadd.xlane.f32.xlu1 (!%p5453_p0), %v9652_v56 }
 0xaeb   : > { %v5656_v5 = vpop.f32.mrb[135].mxu0 }
 0xaec   : > { %v4358_v36 = vadd.f32 %v5654_v12, %v9563_v52  ;;  %v5657_v27 = vadd.f32 %v5656_v5, %v5655_v23  ;;  %v10656_v23 = vld [vmem:[#allocation47_spill] sm:$0xff] }
 0xaee   : > { %v9657_v28 = vadd.f32 %v4358_v36, %v10649_v15  ;;  %v4361_v49 = vadd.f32 %v5657_v27, %v9563_v52 }
 0xaf0   : > { %4462 = vst [vmem:[#allocation2 + $0x90] sm:$0xff] %v9657_v28  ;;  %v9662_v19 = vadd.f32 %v4361_v49, %v10650_v26  ;;  %4518 = vadd.xlane.f32.xlu0 (!%p5453_p0), %v9657_v28 }
 0xaf2   : > { %4463 = vst [vmem:[#allocation2 + $0x98] sm:$0xff] %v9662_v19  ;;  %4520 = vadd.xlane.f32.xlu1 (!%p5453_p0), %v9662_v19 }
 0xaf6   : > { %v5658_v21 = vpop.f32.mrb[136].mxu0 }
 0xaf7   : > { %v5659_v44 = vpop.f32.mrb[137].mxu0 }
 0xaf8   : > { %v5660_v18 = vadd.f32 %v5659_v44, %v5658_v21  ;;  %v5661_v43 = vpop.f32.mrb[138].mxu0 }
 0xaf9   : > { %v5662_v1 = vpop.f32.mrb[139].mxu0 }
 0xafa   : > { %v4366_v13 = vadd.f32 %v5660_v18, %v9563_v52  ;;  %v5663_v10 = vadd.f32 %v5662_v1, %v5661_v43  ;;  %v10657_v18 = vld [vmem:[#allocation48_spill] sm:$0xff] }
 0xafc   : > { %v9667_v16 = vadd.f32 %v4366_v13, %v10651_v11  ;;  %v4369_v57 = vadd.f32 %v5663_v10, %v9563_v52  ;;  %v10658_v13 = vld [vmem:[#allocation49_spill] sm:$0xff] }
 0xafe   : > { %4464 = vst [vmem:[#allocation2 + $0xa0] sm:$0xff] %v9667_v16  ;;  %v9672_v35 = vadd.f32 %v4369_v57, %v10652_v30  ;;  %4522 = vadd.xlane.f32.xlu0 (!%p5453_p0), %v9667_v16 }
 0xaff   : > { %v5664_v47 = vpop.f32.mrb[140].mxu0 }
 0xb00   : > { %4465 = vst [vmem:[#allocation2 + $0xa8] sm:$0xff] %v9672_v35  ;;  %v5665_v38 = vpop.f32.mrb[141].mxu0  ;;  %4524 = vadd.xlane.f32.xlu1 (!%p5453_p0), %v9672_v35 }
 0xb01   : > { %v5666_v22 = vadd.f32 %v5665_v38, %v5664_v47  ;;  %v5667_v24 = vpop.f32.mrb[142].mxu0 }
 0xb02   : > { %v5668_v37 = vpop.f32.mrb[143].mxu0 }
 0xb03   : > { %v4374_v7 = vadd.f32 %v5666_v22, %v9563_v52  ;;  %v5669_v8 = vadd.f32 %v5668_v37, %v5667_v24  ;;  %v10659_v37 = vld [vmem:[#allocation50_spill] sm:$0xff] }
 0xb05   : > { %v9677_v63 = vadd.f32 %v4374_v7, %v10653_v41  ;;  %v4377_v33 = vadd.f32 %v5669_v8, %v9563_v52  ;;  %v10660_v41 = vld [vmem:[#allocation51_spill] sm:$0xff] }
 0xb07   : > { %4466 = vst [vmem:[#allocation2 + $0xb0] sm:$0xff] %v9677_v63  ;;  %v9682_v61 = vadd.f32 %v4377_v33, %v10654_v25  ;;  %4526 = vadd.xlane.f32.xlu0 (!%p5453_p0), %v9677_v63 }
 0xb09   : > { %4467 = vst [vmem:[#allocation2 + $0xb8] sm:$0xff] %v9682_v61  ;;  %v5670_v53 = vpop.f32.mrb[144].mxu0  ;;  %4528 = vadd.xlane.f32.xlu1 (!%p5453_p0), %v9682_v61 }
 0xb0a   : > { %v5671_v58 = vpop.f32.mrb[145].mxu0 }
 0xb0b   : > { %v5672_v60 = vadd.f32 %v5671_v58, %v5670_v53  ;;  %v5673_v4 = vpop.f32.mrb[146].mxu0 }
 0xb0c   : > { %v5674_v55 = vpop.f32.mrb[147].mxu0 }
 0xb0d   : > { %v4382_v0 = vadd.f32 %v5672_v60, %v9563_v52  ;;  %v5675_v9 = vadd.f32 %v5674_v55, %v5673_v4 }
 0xb0f   : > { %v9687_v14 = vadd.f32 %v4382_v0, %v10655_v51  ;;  %v4385_v12 = vadd.f32 %v5675_v9, %v9563_v52 }
 0xb11   : > { %4468 = vst [vmem:[#allocation2 + $0xc0] sm:$0xff] %v9687_v14  ;;  %v9692_v5 = vadd.f32 %v4385_v12, %v10656_v23  ;;  %v5676_v36 = vpop.f32.mrb[148].mxu0  ;;  %4530 = vadd.xlane.f32.xlu0 (!%p5453_p0), %v9687_v14 }
 0xb12   : > { %v5677_v27 = vpop.f32.mrb[149].mxu0 }
 0xb13   : > { %4469 = vst [vmem:[#allocation2 + $0xc8] sm:$0xff] %v9692_v5  ;;  %v5678_v15 = vadd.f32 %v5677_v27, %v5676_v36  ;;  %v5679_v49 = vpop.f32.mrb[150].mxu0  ;;  %4532 = vadd.xlane.f32.xlu1 (!%p5453_p0), %v9692_v5 }
 0xb14   : > { %v5680_v26 = vpop.f32.mrb[151].mxu0 }
 0xb15   : > { %v4390_v21 = vadd.f32 %v5678_v15, %v9563_v52  ;;  %v5681_v44 = vadd.f32 %v5680_v26, %v5679_v49 }
 0xb17   : > { %v9697_v43 = vadd.f32 %v4390_v21, %v10657_v18  ;;  %v4393_v1 = vadd.f32 %v5681_v44, %v9563_v52 }
 0xb19   : > { %4470 = vst [vmem:[#allocation2 + $0xd0] sm:$0xff] %v9697_v43  ;;  %v9702_v10 = vadd.f32 %v4393_v1, %v10658_v13  ;;  %v5682_v11 = vpop.f32.mrb[152].mxu0  ;;  %4534 = vadd.xlane.f32.xlu0 (!%p5453_p0), %v9697_v43 }
 0xb1a   : > { %v5683_v57 = vpop.f32.mrb[153].mxu0 }
 0xb1b   : > { %4471 = vst [vmem:[#allocation2 + $0xd8] sm:$0xff] %v9702_v10  ;;  %v5684_v30 = vadd.f32 %v5683_v57, %v5682_v11  ;;  %v5685_v47 = vpop.f32.mrb[154].mxu0  ;;  %4536 = vadd.xlane.f32.xlu1 (!%p5453_p0), %v9702_v10 }
 0xb1c   : > { %v5686_v38 = vpop.f32.mrb[155].mxu0 }
 0xb1d   : > { %v4398_v22 = vadd.f32 %v5684_v30, %v9563_v52  ;;  %v5687_v24 = vadd.f32 %v5686_v38, %v5685_v47 }
 0xb1f   : > { %v9707_v7 = vadd.f32 %v4398_v22, %v10659_v37  ;;  %v4401_v8 = vadd.f32 %v5687_v24, %v9563_v52 }
 0xb21   : > { %4472 = vst [vmem:[#allocation2 + $0xe0] sm:$0xff] %v9707_v7  ;;  %v9712_v33 = vadd.f32 %v4401_v8, %v10660_v41  ;;  %v5688_v25 = vpop.f32.mrb[156].mxu0  ;;  %4538 = vadd.xlane.f32.xlu0 (!%p5453_p0), %v9707_v7 }
 0xb22   : > { %v5689_v53 = vpop.f32.mrb[157].mxu0 }
 0xb23   : > { %4473 = vst [vmem:[#allocation2 + $0xe8] sm:$0xff] %v9712_v33  ;;  %v5690_v58 = vadd.f32 %v5689_v53, %v5688_v25  ;;  %v5691_v60 = vpop.f32.mrb[158].mxu0  ;;  %4540 = vadd.xlane.f32.xlu1 (!%p5453_p0), %v9712_v33 }
 0xb24   : > { %v5692_v4 = vpop.f32.mrb[159].mxu0 }
 0xb25   : > { %v4406_v55 = vadd.f32 %v5690_v58, %v9563_v52  ;;  %v5693_v0 = vadd.f32 %v5692_v4, %v5691_v60  ;;  %4479 = sbr.rel (%p5453_p0) target bundleno = 3184 (0xc70), region = 124 }
 0xb27   : > { %v9717_v9 = vadd.f32 %v4406_v55, %v9026_v2  ;;  %v4409_v51 = vadd.f32 %v5693_v0, %v9563_v52  ;;  %v4483_v2 = vpop.xlane.xlu0 (!%p5453_p0), %4482 }
 0xb28   : > { %v4546_v52 = vmul.f32 (!%p5453_p0), 0.0078125, %v4483_v2 }
 0xb29   : > { %4474 = vst [vmem:[#allocation2 + $0xf0] sm:$0xff] %v9717_v9  ;;  %v9722_v12 = vadd.f32 %v4409_v51, %v9031_v39  ;;  %4542 = vadd.xlane.f32.xlu0 (!%p5453_p0), %v9717_v9  ;;  %v4487_v39 = vpop.xlane.xlu1 (!%p5453_p0), %4486 }
 0xb2a   : > { %v4548_v23 = vmul.f32 (!%p5453_p0), 0.0078125, %v4487_v39  ;;  %v9759_v36 = vsub.f32 (!%p5453_p0), %v9567_v32, %v4546_v52 }
 0xb2b   : > { %4475 = vst [vmem:[#allocation2 + $0xf8] sm:$0xff] %v9722_v12  ;;  %4544 = vadd.xlane.f32.xlu1 (!%p5453_p0), %v9722_v12  ;;  %v4485_v15 = vpop.xlane.xlu0 (!%p5453_p0), %4484 }
 0xb2c   : > { %v9762_v27 = vsub.f32 %v9577_v62, %v4548_v23  ;;  %v4547_v26 = vmul.f32 0.0078125, %v4485_v15  ;;  %v4610_v21 = vmul.f32 %v9759_v36, %v9759_v36 }
 0xb2d   : > { %v4489_v49 = vpop.xlane.xlu1 %4488 }
 0xb2e   : > { %v4549_v44 = vmul.f32 0.0078125, %v4489_v49  ;;  %v9767_v18 = vsub.f32 %v9572_v46, %v4547_v26  ;;  %4642 = vadd.xlane.f32.xlu0 %v4610_v21  ;;  %v4612_v1 = vmul.f32 %v9762_v27, %v9762_v27 }
 0xb2f   : > { %v4491_v13 = vpop.xlane.xlu0 %4490 }
 0xb30   : > { %v9772_v32 = vsub.f32 %v9582_v48, %v4549_v44  ;;  %v4550_v11 = vmul.f32 0.0078125, %v4491_v13  ;;  %v4611_v57 = vmul.f32 %v9767_v18, %v9767_v18 }
 0xb31   : > { %v4493_v62 = vpop.xlane.xlu1 %4492 }
 0xb32   : > { %v4551_v30 = vmul.f32 0.0078125, %v4493_v62  ;;  %v9777_v47 = vsub.f32 %v9587_v20, %v4550_v11  ;;  %4646 = vadd.xlane.f32.xlu0 %v4612_v1  ;;  %4644 = vadd.xlane.f32.xlu1 %v4611_v57  ;;  %v4613_v38 = vmul.f32 %v9772_v32, %v9772_v32 }
 0xb33   : > { %v4495_v48 = vpop.xlane.xlu0 %4494 }
 0xb34   : > { %v9780_v46 = vsub.f32 %v9592_v17, %v4551_v30  ;;  %v4552_v24 = vmul.f32 0.0078125, %v4495_v48  ;;  %v4614_v37 = vmul.f32 %v9777_v47, %v9777_v47 }
 0xb35   : > { %v4497_v22 = vpop.xlane.xlu1 %4496 }
 0xb36   : > { %v4553_v8 = vmul.f32 0.0078125, %v4497_v22  ;;  %v9787_v41 = vsub.f32 %v9597_v54, %v4552_v24  ;;  %4648 = vadd.xlane.f32.xlu1 %v4613_v38  ;;  %4650 = vadd.xlane.f32.xlu0 %v4614_v37  ;;  %v4615_v20 = vmul.f32 %v9780_v46, %v9780_v46 }
 0xb37   : > { %v4499_v25 = vpop.xlane.xlu0 %4498 }
 0xb38   : > { %v9792_v17 = vsub.f32 %v9602_v29, %v4553_v8  ;;  %v4554_v58 = vmul.f32 0.0078125, %v4499_v25  ;;  %v4616_v60 = vmul.f32 %v9787_v41, %v9787_v41 }
 0xb39   : > { %v4501_v53 = vpop.xlane.xlu1 %4500 }
 0xb3a   : > { %v4555_v4 = vmul.f32 0.0078125, %v4501_v53  ;;  %v9797_v55 = vsub.f32 %v9607_v50, %v4554_v58  ;;  %4652 = vadd.xlane.f32.xlu1 %v4615_v20  ;;  %4654 = vadd.xlane.f32.xlu0 %v4616_v60  ;;  %v4617_v0 = vmul.f32 %v9792_v17, %v9792_v17 }
 0xb3b   : > { %v4503_v29 = vpop.xlane.xlu0 %4502 }
 0xb3c   : > { %v9800_v54 = vsub.f32 %v9612_v42, %v4555_v4  ;;  %v4556_v2 = vmul.f32 0.0078125, %v4503_v29  ;;  %v4618_v39 = vmul.f32 %v9797_v55, %v9797_v55 }
 0xb3d   : > { %v4505_v51 = vpop.xlane.xlu1 %4504 }
 0xb3e   : > { %v4557_v52 = vmul.f32 0.0078125, %v4505_v51  ;;  %v9807_v23 = vsub.f32 %v9617_v6, %v4556_v2  ;;  %4656 = vadd.xlane.f32.xlu1 %v4617_v0  ;;  %4658 = vadd.xlane.f32.xlu0 %v4618_v39  ;;  %v4619_v50 = vmul.f32 %v9800_v54, %v9800_v54 }
 0xb3f   : > { %v4507_v15 = vpop.xlane.xlu0 %4506 }
 0xb40   : > { %v9812_v42 = vsub.f32 %v9622_v3, %v4557_v52  ;;  %v4558_v26 = vmul.f32 0.0078125, %v4507_v15  ;;  %v4620_v21 = vmul.f32 %v9807_v23, %v9807_v23 }
 0xb41   : > { %v4509_v49 = vpop.xlane.xlu1 %4508 }
 0xb42   : > { %v4559_v44 = vmul.f32 0.0078125, %v4509_v49  ;;  %v9817_v1 = vsub.f32 %v9627_v40, %v4558_v26  ;;  %4660 = vadd.xlane.f32.xlu1 %v4619_v50  ;;  %4662 = vadd.xlane.f32.xlu0 %v4620_v21  ;;  %v4621_v13 = vmul.f32 %v9812_v42, %v9812_v42 }
 0xb43   : > { %v4511_v3 = vpop.xlane.xlu0 %4510 }
 0xb44   : > { %v9820_v6 = vsub.f32 %v9632_v34, %v4559_v44  ;;  %v4560_v11 = vmul.f32 0.0078125, %v4511_v3  ;;  %v4622_v57 = vmul.f32 %v9817_v1, %v9817_v1 }
 0xb45   : > { %v4513_v62 = vpop.xlane.xlu1 %4512 }
 0xb46   : > { %v4561_v30 = vmul.f32 0.0078125, %v4513_v62  ;;  %v9827_v38 = vsub.f32 %v9637_v59, %v4560_v11  ;;  %4664 = vadd.xlane.f32.xlu1 %v4621_v13  ;;  %4666 = vadd.xlane.f32.xlu0 %v4622_v57  ;;  %v4623_v40 = vmul.f32 %v9820_v6, %v9820_v6 }
 0xb48   : > { %v9832_v34 = vsub.f32 %v9642_v31, %v4561_v30  ;;  %v4624_v37 = vmul.f32 %v9827_v38, %v9827_v38 }
 0xb4a   : > { %4668 = vadd.xlane.f32.xlu1 %v4623_v40  ;;  %4670 = vadd.xlane.f32.xlu0 %v4624_v37  ;;  %v4625_v25 = vmul.f32 %v9832_v34, %v9832_v34 }
 0xb4e   : > { %4672 = vadd.xlane.f32.xlu1 %v4625_v25 }
 0xb75   : > { %v4515_v48 = vpop.xlane.xlu0 %4514 }
 0xb76   : > { %v4562_v24 = vmul.f32 0.0078125, %v4515_v48 }
 0xb77   : > { %v4517_v22 = vpop.xlane.xlu1 %4516 }
 0xb78   : > { %v4563_v8 = vmul.f32 0.0078125, %v4517_v22  ;;  %v9837_v20 = vsub.f32 %v9647_v45, %v4562_v24 }
 0xb7a   : > { %v9840_v59 = vsub.f32 %v9652_v56, %v4563_v8  ;;  %v4626_v60 = vmul.f32 %v9837_v20, %v9837_v20 }
 0xb7c   : > { %4674 = vadd.xlane.f32.xlu0 %v4626_v60  ;;  %v4627_v45 = vmul.f32 %v9840_v59, %v9840_v59 }
 0xb7d   : > { %v4519_v31 = vpop.xlane.xlu0 %4518 }
 0xb7e   : > { %v4564_v58 = vmul.f32 0.0078125, %v4519_v31  ;;  %4676 = vadd.xlane.f32.xlu1 %v4627_v45 }
 0xb7f   : > { %v4521_v53 = vpop.xlane.xlu1 %4520 }
 0xb80   : > { %v4565_v4 = vmul.f32 0.0078125, %v4521_v53  ;;  %v9847_v0 = vsub.f32 %v9657_v28, %v4564_v58 }
 0xb82   : > { %v9852_v56 = vsub.f32 %v9662_v19, %v4565_v4  ;;  %v4628_v39 = vmul.f32 %v9847_v0, %v9847_v0 }
 0xb84   : > { %4678 = vadd.xlane.f32.xlu0 %v4628_v39  ;;  %v4629_v15 = vmul.f32 %v9852_v56, %v9852_v56 }
 0xb86   : > { %4680 = vadd.xlane.f32.xlu1 %v4629_v15 }
 0xb8b   : > { %v4523_v29 = vpop.xlane.xlu0 %4522 }
 0xb8c   : > { %v4566_v2 = vmul.f32 0.0078125, %v4523_v29 }
 0xb8d   : > { %v4525_v51 = vpop.xlane.xlu1 %4524 }
 0xb8e   : > { %v4567_v52 = vmul.f32 0.0078125, %v4525_v51  ;;  %v9857_v50 = vsub.f32 %v9667_v16, %v4566_v2 }
 0xb90   : > { %v9860_v28 = vsub.f32 %v9672_v35, %v4567_v52  ;;  %v4630_v21 = vmul.f32 %v9857_v50, %v9857_v50 }
 0xb92   : > { %4682 = vadd.xlane.f32.xlu0 %v4630_v21  ;;  %v4631_v16 = vmul.f32 %v9860_v28, %v9860_v28 }
 0xb94   : > { %v4527_v19 = vpop.xlane.xlu0 %4526  ;;  %4684 = vadd.xlane.f32.xlu1 %v4631_v16 }
 0xb95   : > { %v4568_v26 = vmul.f32 0.0078125, %v4527_v19 }
 0xb96   : > { %v4529_v49 = vpop.xlane.xlu1 %4528 }
 0xb97   : > { %v4569_v44 = vmul.f32 0.0078125, %v4529_v49  ;;  %v9867_v13 = vsub.f32 %v9677_v63, %v4568_v26 }
 0xb99   : > { %v9872_v35 = vsub.f32 %v9682_v61, %v4569_v44  ;;  %v4632_v57 = vmul.f32 %v9867_v13, %v9867_v13  ;;  %v9883_v61 = vld [vmem:[%s10661_s14] ss:$0 sm:$0xff] }
 0xb9b   : > { %4686 = vadd.xlane.f32.xlu0 %v4632_v57  ;;  %v4633_v48 = vmul.f32 %v9872_v35, %v9872_v35 }
 0xb9d   : > { %4688 = vadd.xlane.f32.xlu1 %v4633_v48 }
 0xb9e   : > { %v4531_v3 = vpop.xlane.xlu0 %4530 }
 0xb9f   : > { %v4570_v11 = vmul.f32 0.0078125, %v4531_v3 }
 0xba0   : > { %v4533_v62 = vpop.xlane.xlu1 %4532 }
 0xba1   : > { %v4571_v30 = vmul.f32 0.0078125, %v4533_v62  ;;  %v4602_v40 = vsub.f32 %v9687_v14, %v4570_v11 }
 0xba3   : > { %v4603_v63 = vsub.f32 %v9692_v5, %v4571_v30  ;;  %v9886_v37 = vmul.f32 %v9883_v61, %v4602_v40  ;;  %v4634_v25 = vmul.f32 %v4602_v40, %v4602_v40 }
 0xba5   : > { %v9889_v8 = vmul.f32 %v9883_v61, %v4603_v63  ;;  %4690 = vadd.xlane.f32.xlu0 %v4634_v25  ;;  %v4635_v53 = vmul.f32 %v4603_v63, %v4603_v63  ;;  %v9929_v25 = vmul.f32 %v9883_v61, %v9767_v18  ;;  %v9947_v18 = vmul.f32 %v9883_v61, %v9787_v41 }
 0xba6   : > { %v4535_v22 = vpop.xlane.xlu0 %4534  ;;  %v9967_v41 = vmul.f32 %v9883_v61, %v9807_v23  ;;  %v9988_v23 = vmul.f32 %v9883_v61, %v9832_v34  ;;  %v10005_v34 = vmul.f32 %v9883_v61, %v9852_v56 }
 0xba7   : > { %v4572_v14 = vmul.f32 0.0078125, %v4535_v22  ;;  %4692 = vadd.xlane.f32.xlu1 %v4635_v53 }
 0xba8   : > { %v4537_v24 = vpop.xlane.xlu1 %4536 }
 0xba9   : > { %v4573_v31 = vmul.f32 0.0078125, %v4537_v24  ;;  %v4604_v5 = vsub.f32 %v9697_v43, %v4572_v14  ;;  %v9925_v14 = vmul.f32 %v9883_v61, %v9762_v27 }
 0xbab   : > { %v4605_v58 = vsub.f32 %v9702_v10, %v4573_v31  ;;  %v9894_v45 = vmul.f32 %v9883_v61, %v4604_v5  ;;  %v4636_v51 = vmul.f32 %v4604_v5, %v4604_v5  ;;  %v9934_v31 = vmul.f32 %v9883_v61, %v9772_v32 }
 0xbac   : > { %v9938_v5 = vmul.f32 %v9883_v61, %v9777_v47  ;;  %v9951_v32 = vmul.f32 %v9883_v61, %v9792_v17  ;;  %v9971_v17 = vmul.f32 %v9883_v61, %v9812_v42  ;;  %v9992_v42 = vmul.f32 %v9883_v61, %v9837_v20 }
 0xbad   : > { %v9897_v39 = vmul.f32 %v9883_v61, %v4605_v58  ;;  %4694 = vadd.xlane.f32.xlu0 %v4636_v51  ;;  %v4637_v15 = vmul.f32 %v4605_v58, %v4605_v58  ;;  %v10001_v51 = vmul.f32 %v9883_v61, %v9847_v0 }
 0xbae   : > { %v4539_v60 = vpop.xlane.xlu0 %4538 }
 0xbaf   : > { %v4574_v29 = vmul.f32 0.0078125, %v4539_v60  ;;  %4696 = vadd.xlane.f32.xlu1 %v4637_v15  ;;  %v9963_v60 = vmul.f32 %v9883_v61, %v9800_v54  ;;  %v9983_v54 = vmul.f32 %v9883_v61, %v9827_v38 }
 0xbb0   : > { %v4541_v4 = vpop.xlane.xlu1 %4540 }
 0xbb1   : > { %v4575_v2 = vmul.f32 0.0078125, %v4541_v4  ;;  %v4606_v52 = vsub.f32 %v9707_v7, %v4574_v29  ;;  %v9975_v4 = vmul.f32 %v9883_v61, %v9817_v1  ;;  %v9996_v1 = vmul.f32 %v9883_v61, %v9840_v59 }
 0xbb3   : > { %v4607_v43 = vsub.f32 %v9712_v33, %v4575_v2  ;;  %v9902_v49 = vmul.f32 %v9883_v61, %v4606_v52  ;;  %v4638_v44 = vmul.f32 %v4606_v52, %v4606_v52 }
 0xbb5   : > { %v9905_v26 = vmul.f32 %v9883_v61, %v4607_v43  ;;  %4698 = vadd.xlane.f32.xlu0 %v4638_v44  ;;  %v4639_v7 = vmul.f32 %v4607_v43, %v4607_v43 }
 0xbb6   : > { %v4543_v19 = vpop.xlane.xlu0 %4542 }
 0xbb7   : > { %v4576_v21 = vmul.f32 0.0078125, %v4543_v19  ;;  %4700 = vadd.xlane.f32.xlu1 %v4639_v7 }
 0xbb8   : > { %v4545_v10 = vpop.xlane.xlu1 %4544 }
 0xbb9   : > { %v4577_v16 = vmul.f32 0.0078125, %v4545_v10  ;;  %v4608_v3 = vsub.f32 %v9717_v9, %v4576_v21 }
 0xbbb   : > { %v4609_v62 = vsub.f32 %v9722_v12, %v4577_v16  ;;  %v9910_v33 = vmul.f32 %v9883_v61, %v4608_v3  ;;  %v4640_v11 = vmul.f32 %v4608_v3, %v4608_v3  ;;  %v4643_v40 = vpop.xlane.xlu0 %4642  ;;  %v9921_v12 = vmul.f32 %v9883_v61, %v9759_v36 }
 0xbbc   : > { %v4706_v63 = vmul.f32 0.007874016, %v4643_v40  ;;  %v9942_v36 = vmul.f32 %v9883_v61, %v9780_v46  ;;  %v9959_v46 = vmul.f32 %v9883_v61, %v9797_v55  ;;  %v9979_v55 = vmul.f32 %v9883_v61, %v9820_v6 }
 0xbbd   : > { %v9913_v57 = vmul.f32 %v9883_v61, %v4609_v62  ;;  %4702 = vadd.xlane.f32.xlu0 %v4640_v11  ;;  %v4641_v30 = vmul.f32 %v4609_v62, %v4609_v62 }
 0xbbe   : > { %6594 = vrsqrt.f32 %v4706_v63  ;;  %vm4740_vm0 = vcmp.eq.f32.partialorder %v4706_v63, inf  ;;  %vm4742_vm1 = vcmp.eq.f32.partialorder %v4706_v63, 0.0  ;;  %v4743_v59 = vand.u32 2147483648, %v4706_v63 }
 0xbbf   : > { %4704 = vadd.xlane.f32.xlu1 %v4641_v30  ;;  %v4645_v9 = vpop.xlane.xlu1 %4644  ;;  %v4647_v48 = vpop.xlane.xlu0 %4646 }
 0xbc0   : > { %v9915_v22 = vmul.f32 0.007874016, %v4645_v9  ;;  %v9917_v24 = vmul.f32 0.007874016, %v4647_v48 }
 0xbc2   : > { %6596 = vrsqrt.f32 %v9915_v22  ;;  %vm4747_vm2 = vcmp.eq.f32.partialorder %v9915_v22, inf  ;;  %vm4749_vm3 = vcmp.eq.f32.partialorder %v9915_v22, 0.0  ;;  %v4750_v43 = vand.u32 2147483648, %v9915_v22 }
 0xbc3   : > { %6598 = vrsqrt.f32 %v9917_v24  ;;  %v4649_v27 = vpop.xlane.xlu1 %4648  ;;  %v4651_v53 = vpop.xlane.xlu0 %4650  ;;  %vm4754_vm4 = vcmp.eq.f32.partialorder %v9917_v24, inf  ;;  %vm4756_vm5 = vcmp.eq.f32.partialorder %v9917_v24, 0.0  ;;  %v4757_v21 = vand.u32 2147483648, %v9917_v24 }
 0xbc4   : > { %v9953_v58 = vmul.f32 0.007874016, %v4649_v27  ;;  %v9955_v47 = vmul.f32 0.007874016, %v4651_v53 }
 0xbc6   : > { %6600 = vrsqrt.f32 %v9953_v58  ;;  %vm4761_vm6 = vcmp.eq.f32.partialorder %v9953_v58, inf  ;;  %vm4763_vm7 = vcmp.eq.f32.partialorder %v9953_v58, 0.0  ;;  %v4764_v30 = vand.u32 2147483648, %v9953_v58 }
 0xbc7   : > { %6602 = vrsqrt.f32 %v9955_v47  ;;  %v4653_v6 = vpop.xlane.xlu1 %4652  ;;  %v4655_v29 = vpop.xlane.xlu0 %4654  ;;  %vm4768_vm8 = vcmp.eq.f32.partialorder %v9955_v47, inf  ;;  %vm4770_vm9 = vcmp.eq.f32.partialorder %v9955_v47, 0.0 }
 0xbc8   : > { %v6595_v38 = vpop.eup %6594  ;;  %v10007_v2 = vmul.f32 0.007874016, %v4653_v6  ;;  %v10009_v20 = vmul.f32 0.007874016, %v4655_v29 }
 0xbc9   : > { %v4739_v52 = vmul.f32 %v6595_v38, %v4706_v63 }
 0xbca   : > { %6604 = vrsqrt.f32 %v10007_v2  ;;  %vm4775_vm10 = vcmp.eq.f32.partialorder %v10007_v2, inf  ;;  %vm4777_vm11 = vcmp.eq.f32.partialorder %v10007_v2, 0.0  ;;  %vm4782_vm12 = vcmp.eq.f32.partialorder %v10009_v20, inf }
 0xbcb   : > { %v4741_v0 = vsel %vm4740_vm0, %v4706_v63, %v4739_v52  ;;  %6606 = vrsqrt.f32 %v10009_v20  ;;  %v4657_v56 = vpop.xlane.xlu1 %4656  ;;  %v4659_v15 = vpop.xlane.xlu0 %4658  ;;  %v4771_v63 = vand.u32 2147483648, %v9955_v47  ;;  %vm4784_vm13 = vcmp.eq.f32.partialorder %v10009_v20, 0.0 }
 0xbcc   : > { %v6597_v19 = vpop.eup %6596  ;;  %v4744_v10 = vsel %vm4742_vm1, %v4743_v59, %v4741_v0  ;;  %v10019_v44 = vmul.f32 0.007874016, %v4657_v56  ;;  %v10021_v16 = vmul.f32 0.007874016, %v4659_v15 }
 0xbcd   : > { %v6599_v3 = vpop.eup %6598  ;;  %v5000_v7 = vadd.f32 1e-06, %v4744_v10  ;;  %v4746_v62 = vmul.f32 %v6597_v19, %v9915_v22 }
 0xbce   : > { %v4753_v11 = vmul.f32 %v6599_v3, %v9917_v24  ;;  %6608 = vrsqrt.f32 %v10019_v44  ;;  %vm4789_vm14 = vcmp.eq.f32.partialorder %v10019_v44, inf  ;;  %vm4791_vm15 = vcmp.eq.f32.partialorder %v10019_v44, 0.0 }
 0xbcf   : > { %6610 = vrcp.f32 %v5000_v7  ;;  %v4748_v40 = vsel %vm4747_vm2, %v9915_v22, %v4746_v62  ;;  %v4661_v9 = vpop.xlane.xlu1 %4660  ;;  %v4663_v48 = vpop.xlane.xlu0 %4662  ;;  %vm4796_vm0 = vcmp.eq.f32.partialorder %v10021_v16, inf  ;;  %vm4798_vm1 = vcmp.eq.f32.partialorder %v10021_v16, 0.0 }
 0xbd0   : > { %v6601_v27 = vpop.eup %6600  ;;  %v4751_v53 = vsel %vm4749_vm3, %v4750_v43, %v4748_v40  ;;  %v4755_v6 = vsel %vm4754_vm4, %v9917_v24, %v4753_v11  ;;  %6612 = vrsqrt.f32 %v10021_v16  ;;  %v4778_v43 = vand.u32 2147483648, %v10007_v2 }
 0xbd1   : > { %v6603_v29 = vpop.eup %6602  ;;  %v5001_v38 = vadd.f32 1e-06, %v4751_v53  ;;  %v4758_v52 = vsel %vm4756_vm5, %v4757_v21, %v4755_v6  ;;  %v4760_v59 = vmul.f32 %v6601_v27, %v9953_v58  ;;  %v10048_v56 = vmul.f32 0.007874016, %v4661_v9 }
 0xbd2   : > { %v5002_v0 = vadd.f32 1e-06, %v4758_v52  ;;  %v4767_v22 = vmul.f32 %v6603_v29, %v9955_v47  ;;  %v10060_v3 = vmul.f32 0.007874016, %v4663_v48  ;;  %v10083_v52 = vld [vmem:[%s10662_s20] ss:$0 sm:$0xff] }
 0xbd3   : > { %6614 = vrcp.f32 %v5001_v38  ;;  %v4762_v15 = vsel %vm4761_vm6, %v9953_v58, %v4760_v59  ;;  %v4665_v24 = vpop.xlane.xlu1 %4664  ;;  %v4667_v9 = vpop.xlane.xlu0 %4666  ;;  %vm4803_vm2 = vcmp.eq.f32.partialorder %v10048_v56, inf  ;;  %vm4805_vm3 = vcmp.eq.f32.partialorder %v10048_v56, 0.0 }
 0xbd4   : > { %v6605_v19 = vpop.eup %6604  ;;  %6616 = vrcp.f32 %v5002_v0  ;;  %v4765_v10 = vsel %vm4763_vm7, %v4764_v30, %v4762_v15  ;;  %v4769_v21 = vsel %vm4768_vm8, %v9955_v47, %v4767_v22  ;;  %v4785_v30 = vand.u32 2147483648, %v10009_v20 }
 0xbd5   : > { %v6607_v7 = vpop.eup %6606  ;;  %v5003_v62 = vadd.f32 1e-06, %v4765_v10  ;;  %v4772_v11 = vsel %vm4770_vm9, %v4771_v63, %v4769_v21  ;;  %v4774_v40 = vmul.f32 %v6605_v19, %v10007_v2  ;;  %6618 = vrsqrt.f32 %v10048_v56 }
 0xbd6   : > { %v5004_v27 = vadd.f32 1e-06, %v4772_v11  ;;  %v4781_v58 = vmul.f32 %v6607_v7, %v10009_v20  ;;  %v4792_v47 = vand.u32 2147483648, %v10019_v44  ;;  %v10090_v19 = vmul.f32 0.007874016, %v4665_v24 }
 0xbd7   : > { %6620 = vrcp.f32 %v5003_v62  ;;  %v4776_v48 = vsel %vm4775_vm10, %v10007_v2, %v4774_v40  ;;  %v4669_v29 = vpop.xlane.xlu1 %4668  ;;  %v10092_v10 = vmul.f32 0.007874016, %v4667_v9  ;;  %v4671_v7 = vpop.xlane.xlu0 %4670  ;;  %v4799_v24 = vand.u32 2147483648, %v10021_v16 }
 0xbd8   : > { %v6609_v63 = vpop.eup %6608  ;;  %6622 = vrcp.f32 %v5004_v27  ;;  %v4779_v53 = vsel %vm4777_vm11, %v4778_v43, %v4776_v48  ;;  %v4783_v6 = vsel %vm4782_vm12, %v10009_v20, %v4781_v58  ;;  %vm4810_vm4 = vcmp.eq.f32.partialorder %v10060_v3, inf }
 0xbd9   : > { %v6611_v38 = vpop.eup %6610  ;;  %v5005_v59 = vadd.f32 1e-06, %v4779_v53  ;;  %v4786_v0 = vsel %vm4784_vm13, %v4785_v30, %v4783_v6  ;;  %v4788_v2 = vmul.f32 %v6609_v63, %v10019_v44  ;;  %6624 = vrsqrt.f32 %v10060_v3 }
 0xbda   : > { %v6613_v22 = vpop.eup %6612  ;;  %v5033_v43 = vmul.f32 %v6611_v38, %v9921_v12  ;;  %v5006_v15 = vadd.f32 1e-06, %v4786_v0  ;;  %vm4812_vm5 = vcmp.eq.f32.partialorder %v10060_v3, 0.0  ;;  %vm4817_vm6 = vcmp.eq.f32.partialorder %v10090_v19, inf }
 0xbdb   : > { %6626 = vrcp.f32 %v5005_v59  ;;  %v4790_v21 = vsel %vm4789_vm14, %v10019_v44, %v4788_v2  ;;  %v4795_v20 = vmul.f32 %v6613_v22, %v10021_v16  ;;  %v10111_v44 = vmul.f32 0.007874016, %v4669_v29  ;;  %v4673_v48 = vpop.xlane.xlu1 %4672 }
 0xbdc   : > { %v5102_v62 = vadd.f32 %v10083_v52, %v5033_v43  ;;  %6628 = vrcp.f32 %v5006_v15  ;;  %v4793_v12 = vsel %vm4791_vm15, %v4792_v47, %v4790_v21  ;;  %vm4819_vm7 = vcmp.eq.f32.partialorder %v10090_v19, 0.0 }
 0xbdd   : > { %v6615_v11 = vpop.eup %6614  ;;  %v5007_v40 = vadd.f32 1e-06, %v4793_v12  ;;  %v4797_v9 = vsel %vm4796_vm0, %v10021_v16, %v4795_v20  ;;  %6630 = vrsqrt.f32 %v10090_v19  ;;  %v10133_v20 = vmul.f32 0.007874016, %v4671_v7 }
 0xbde   : > { %v6617_v27 = vpop.eup %6616  ;;  %5134 = vst [vmem:[%s7495_s3] sm:$0xff] %v5102_v62  ;;  %v5035_v58 = vmul.f32 %v6615_v11, %v9929_v25  ;;  %v4800_v30 = vsel %vm4798_vm1, %v4799_v24, %v4797_v9  ;;  %6632 = vrsqrt.f32 %v10092_v10  ;;  %v4806_v25 = vand.u32 2147483648, %v10048_v56 }
 0xbdf   : > { %v6619_v47 = vpop.eup %6618  ;;  %v5037_v63 = vmul.f32 %v6617_v27, %v9925_v14  ;;  %6634 = vrcp.f32 %v5007_v40  ;;  %v5008_v16 = vadd.f32 1e-06, %v4800_v30  ;;  %v4813_v14 = vand.u32 2147483648, %v10060_v3 }
 0xbe0   : > { %v5103_v53 = vadd.f32 %v10083_v52, %v5035_v58  ;;  %v4802_v6 = vmul.f32 %v6619_v47, %v10048_v56  ;;  %v10135_v62 = vmul.f32 0.007874016, %v4673_v48  ;;  %vm4824_vm8 = vcmp.eq.f32.partialorder %v10092_v10, inf }
 0xbe1   : > { %v6621_v29 = vpop.eup %6620  ;;  %v5104_v38 = vadd.f32 %v10083_v52, %v5037_v63  ;;  %6636 = vrcp.f32 %v5008_v16  ;;  %vm4826_vm9 = vcmp.eq.f32.partialorder %v10092_v10, 0.0  ;;  %vm4831_vm10 = vcmp.eq.f32.partialorder %v10111_v44, inf }
 0xbe2   : > { %v6623_v0 = vpop.eup %6622  ;;  %5135 = vst [vmem:[%s7495_s3 + $0x8] sm:$0xff] %v5103_v53  ;;  %v5039_v2 = vmul.f32 %v6621_v29, %v9934_v31  ;;  %v4804_v22 = vsel %vm4803_vm2, %v10048_v56, %v4802_v6  ;;  %6638 = vrsqrt.f32 %v10111_v44  ;;  %vm4833_vm11 = vcmp.eq.f32.partialorder %v10111_v44, 0.0 }
 0xbe3   : > { %v6625_v43 = vpop.eup %6624  ;;  %5136 = vst [vmem:[%s7495_s3 + $0x10] sm:$0xff] %v5104_v38  ;;  %v5041_v15 = vmul.f32 %v6623_v0, %v9938_v5  ;;  %v4807_v21 = vsel %vm4805_vm3, %v4806_v25, %v4804_v22  ;;  %v4820_v5 = vand.u32 2147483648, %v10090_v19  ;;  %6640 = vrsqrt.f32 %v10133_v20 }
 0xbe4   : > { %v5105_v31 = vadd.f32 %v10083_v52, %v5039_v2  ;;  %v5009_v12 = vadd.f32 1e-06, %v4807_v21  ;;  %v4809_v24 = vmul.f32 %v6625_v43, %v10060_v3  ;;  %v4827_v25 = vand.u32 2147483648, %v10092_v10 }
 0xbe5   : > { %v6627_v40 = vpop.eup %6626  ;;  %v5106_v9 = vadd.f32 %v10083_v52, %v5041_v15  ;;  %vm4838_vm12 = vcmp.eq.f32.partialorder %v10133_v20, inf  ;;  %vm4840_vm13 = vcmp.eq.f32.partialorder %v10133_v20, 0.0  ;;  %vm4845_vm14 = vcmp.eq.f32.partialorder %v10135_v62, inf }
 0xbe6   : > { %v6629_v7 = vpop.eup %6628  ;;  %5137 = vst [vmem:[%s7495_s3 + $0x18] sm:$0xff] %v5105_v31  ;;  %v5043_v27 = vmul.f32 %v6627_v40, %v9942_v36  ;;  %6642 = vrcp.f32 %v5009_v12  ;;  %v4811_v58 = vsel %vm4810_vm4, %v10060_v3, %v4809_v24  ;;  %vm4847_vm15 = vcmp.eq.f32.partialorder %v10135_v62, 0.0 }
 0xbe7   : > { %v6631_v30 = vpop.eup %6630  ;;  %5138 = vst [vmem:[%s7495_s3 + $0x20] sm:$0xff] %v5106_v9  ;;  %v5045_v48 = vmul.f32 %v6629_v7, %v9947_v18  ;;  %v4814_v47 = vsel %vm4812_vm5, %v4813_v14, %v4811_v58  ;;  %6644 = vrsqrt.f32 %v10135_v62 }
 0xbe8   : > { %v6633_v63 = vpop.eup %6632  ;;  %v5107_v16 = vadd.f32 %v10083_v52, %v5043_v27  ;;  %v5010_v53 = vadd.f32 1e-06, %v4814_v47  ;;  %v4816_v6 = vmul.f32 %v6631_v30, %v10090_v19 }
 0xbe9   : > { %v6635_v29 = vpop.eup %6634  ;;  %v5108_v18 = vadd.f32 %v10083_v52, %v5045_v48  ;;  %v4823_v3 = vmul.f32 %v6633_v63, %v10092_v10 }
 0xbea   : > { %5139 = vst [vmem:[%s7495_s3 + $0x28] sm:$0xff] %v5107_v16  ;;  %v5047_v38 = vmul.f32 %v6635_v29, %v9951_v32  ;;  %v4818_v14 = vsel %vm4817_vm6, %v10090_v19, %v4816_v6  ;;  %v4834_v32 = vand.u32 2147483648, %v10111_v44 }
 0xbeb   : > { %v6637_v0 = vpop.eup %6636  ;;  %5140 = vst [vmem:[%s7495_s3 + $0x30] sm:$0xff] %v5108_v18  ;;  %v4821_v2 = vsel %vm4819_vm7, %v4820_v5, %v4818_v14  ;;  %v4825_v22 = vsel %vm4824_vm8, %v10092_v10, %v4823_v3 }
 0xbec   : > { %v6639_v43 = vpop.eup %6638  ;;  %v5109_v15 = vadd.f32 %v10083_v52, %v5047_v38  ;;  %v5049_v21 = vmul.f32 %v6637_v0, %v9959_v46  ;;  %v5011_v31 = vadd.f32 1e-06, %v4821_v2  ;;  %v4828_v12 = vsel %vm4826_vm9, %v4827_v25, %v4825_v22 }
 0xbed   : > { %v5012_v24 = vadd.f32 1e-06, %v4828_v12  ;;  %v4830_v19 = vmul.f32 %v6639_v43, %v10111_v44  ;;  %v4841_v46 = vand.u32 2147483648, %v10133_v20  ;;  %v6641_v27 = vpop.eup %6640 }
 0xbee   : > { %5141 = vst [vmem:[%s7495_s3 + $0x38] sm:$0xff] %v5109_v15  ;;  %v5110_v7 = vadd.f32 %v10083_v52, %v5049_v21  ;;  %v4837_v30 = vmul.f32 %v6641_v27, %v10133_v20 }
 0xbef   : > { %v4832_v10 = vsel %vm4831_vm10, %v10111_v44, %v4830_v19 }
 0xbf0   : > { %5142 = vst [vmem:[%s7495_s3 + $0x40] sm:$0xff] %v5110_v7  ;;  %v4835_v58 = vsel %vm4833_vm11, %v4834_v32, %v4832_v10  ;;  %v4839_v44 = vsel %vm4838_vm12, %v10133_v20, %v4837_v30 }
 0xbf1   : > { %v5013_v16 = vadd.f32 1e-06, %v4835_v58 }
 0xc09   : > { %v4675_v59 = vpop.xlane.xlu0 %4674 }
 0xc0a   : > { %v10143_v56 = vmul.f32 0.007874016, %v4675_v59 }
 0xc0b   : > { %v4677_v11 = vpop.xlane.xlu1 %4676 }
 0xc0c   : > { %6646 = vrsqrt.f32 %v10143_v56  ;;  %v10183_v40 = vmul.f32 0.007874016, %v4677_v11  ;;  %v6643_v11 = vpop.eup %6642  ;;  %vm4852_vm0 = vcmp.eq.f32.partialorder %v10143_v56, inf  ;;  %vm4854_vm1 = vcmp.eq.f32.partialorder %v10143_v56, 0.0 }
 0xc0d   : > { %6648 = vrcp.f32 %v5010_v53  ;;  %v5051_v63 = vmul.f32 %v6643_v11, %v9963_v60  ;;  %v4848_v53 = vand.u32 2147483648, %v10135_v62  ;;  %v4842_v60 = vsel %vm4840_vm13, %v4841_v46, %v4839_v44 }
 0xc0e   : > { %6650 = vrcp.f32 %v5011_v31  ;;  %v5014_v14 = vadd.f32 1e-06, %v4842_v60  ;;  %v4855_v22 = vand.u32 2147483648, %v10143_v56  ;;  %vm4859_vm2 = vcmp.eq.f32.partialorder %v10183_v40, inf }
 0xc0f   : > { %6652 = vrcp.f32 %v5012_v24  ;;  %v5111_v29 = vadd.f32 %v10083_v52, %v5051_v63  ;;  %vm4861_vm3 = vcmp.eq.f32.partialorder %v10183_v40, 0.0 }
 0xc10   : > { %6654 = vrsqrt.f32 %v10183_v40 }
 0xc11   : > { %v4679_v36 = vpop.xlane.xlu0 %4678  ;;  %5143 = vst [vmem:[%s7495_s3 + $0x48] sm:$0xff] %v5111_v29 }
 0xc12   : > { %v10185_v9 = vmul.f32 0.007874016, %v4679_v36  ;;  %v6645_v36 = vpop.eup %6644 }
 0xc13   : > { %v4681_v59 = vpop.xlane.xlu1 %4680  ;;  %v4844_v6 = vmul.f32 %v6645_v36, %v10135_v62 }
 0xc14   : > { %v10201_v48 = vmul.f32 0.007874016, %v4681_v59  ;;  %6656 = vrsqrt.f32 %v10185_v9  ;;  %vm4866_vm4 = vcmp.eq.f32.partialorder %v10185_v9, inf  ;;  %vm4868_vm5 = vcmp.eq.f32.partialorder %v10185_v9, 0.0 }
 0xc15   : > { %6658 = vrcp.f32 %v5013_v16  ;;  %v4846_v59 = vsel %vm4845_vm14, %v10135_v62, %v4844_v6  ;;  %v4862_v62 = vand.u32 2147483648, %v10183_v40  ;;  %v4869_v11 = vand.u32 2147483648, %v10185_v9 }
 0xc16   : > { %v6647_v25 = vpop.eup %6646  ;;  %6660 = vrsqrt.f32 %v10201_v48  ;;  %v4849_v20 = vsel %vm4847_vm15, %v4848_v53, %v4846_v59  ;;  %vm4873_vm6 = vcmp.eq.f32.partialorder %v10201_v48, inf  ;;  %vm4875_vm7 = vcmp.eq.f32.partialorder %v10201_v48, 0.0 }
 0xc17   : > { %v6649_v38 = vpop.eup %6648  ;;  %v4851_v0 = vmul.f32 %v6647_v25, %v10143_v56  ;;  %6662 = vrcp.f32 %v5014_v14  ;;  %v5015_v32 = vadd.f32 1e-06, %v4849_v20  ;;  %v4876_v53 = vand.u32 2147483648, %v10201_v48 }
 0xc18   : > { %v5053_v2 = vmul.f32 %v6649_v38, %v9967_v41  ;;  %v6651_v31 = vpop.eup %6650 }
 0xc19   : > { %v4853_v43 = vsel %vm4852_vm0, %v10143_v56, %v4851_v0  ;;  %v6653_v19 = vpop.eup %6652 }
 0xc1a   : > { %v5112_v21 = vadd.f32 %v10083_v52, %v5053_v2  ;;  %v4856_v41 = vsel %vm4854_vm1, %v4855_v22, %v4853_v43  ;;  %v6655_v27 = vpop.eup %6654  ;;  %v5057_v10 = vmul.f32 %v6653_v19, %v9975_v4 }
 0xc1b   : > { %v5016_v12 = vadd.f32 1e-06, %v4856_v41 }
 0xc1c   : > { %5144 = vst [vmem:[%s7495_s3 + $0x50] sm:$0xff] %v5112_v21 }
 0xc1e   : > { %v6657_v58 = vpop.eup %6656 }
 0xc1f   : > { %v4683_v5 = vpop.xlane.xlu0 %4682  ;;  %v4865_v36 = vmul.f32 %v6657_v58, %v10185_v9  ;;  %v6659_v63 = vpop.eup %6658 }
 0xc20   : > { %v10215_v18 = vmul.f32 0.007874016, %v4683_v5  ;;  %v5055_v5 = vmul.f32 %v6651_v31, %v9971_v17  ;;  %v4858_v17 = vmul.f32 %v6655_v27, %v10183_v40  ;;  %v6661_v6 = vpop.eup %6660  ;;  %v5059_v25 = vmul.f32 %v6659_v63, %v9979_v55 }
 0xc21   : > { %v4685_v47 = vpop.xlane.xlu1 %4684  ;;  %v4867_v60 = vsel %vm4866_vm4, %v10185_v9, %v4865_v36  ;;  %v4872_v14 = vmul.f32 %v6661_v6, %v10201_v48  ;;  %v6663_v0 = vpop.eup %6662 }
 0xc22   : > { %6664 = vrsqrt.f32 %v10215_v18  ;;  %v10238_v24 = vmul.f32 0.007874016, %v4685_v47  ;;  %v5113_v30 = vadd.f32 %v10083_v52, %v5055_v5  ;;  %v5114_v47 = vadd.f32 %v10083_v52, %v5057_v10 }
 0xc23   : > { %6666 = vrcp.f32 %v5015_v32  ;;  %v4860_v16 = vsel %vm4859_vm2, %v10183_v40, %v4858_v17  ;;  %vm4880_vm8 = vcmp.eq.f32.partialorder %v10215_v18, inf  ;;  %vm4882_vm9 = vcmp.eq.f32.partialorder %v10215_v18, 0.0 }
 0xc24   : > { %6668 = vrcp.f32 %v5016_v12  ;;  %5145 = vst [vmem:[%s7495_s3 + $0x58] sm:$0xff] %v5113_v30  ;;  %5146 = vst [vmem:[%s7495_s3 + $0x60] sm:$0xff] %v5114_v47  ;;  %v4863_v29 = vsel %vm4861_vm3, %v4862_v62, %v4860_v16  ;;  %v4870_v38 = vsel %vm4868_vm5, %v4869_v11, %v4867_v60  ;;  %v4883_v59 = vand.u32 2147483648, %v10215_v18 }
 0xc25   : > { %6670 = vrsqrt.f32 %v10238_v24  ;;  %v5115_v55 = vadd.f32 %v10083_v52, %v5059_v25  ;;  %v5018_v40 = vadd.f32 1e-06, %v4870_v38  ;;  %vm4887_vm10 = vcmp.eq.f32.partialorder %v10238_v24, inf }
 0xc26   : > { %v5061_v20 = vmul.f32 %v6663_v0, %v9983_v54  ;;  %v4874_v9 = vsel %vm4873_vm6, %v10201_v48, %v4872_v14  ;;  %vm4889_vm11 = vcmp.eq.f32.partialorder %v10238_v24, 0.0  ;;  %v4890_v21 = vand.u32 2147483648, %v10238_v24 }
 0xc27   : > { %5147 = vst [vmem:[%s7495_s3 + $0x68] sm:$0xff] %v5115_v55  ;;  %v4877_v43 = vsel %vm4875_vm7, %v4876_v53, %v4874_v9 }
 0xc28   : > { %v4687_v3 = vpop.xlane.xlu0 %4686  ;;  %v5116_v54 = vadd.f32 %v10083_v52, %v5061_v20  ;;  %v5019_v62 = vadd.f32 1e-06, %v4877_v43 }
 0xc29   : > { %v10243_v7 = vmul.f32 0.007874016, %v4687_v3  ;;  %v5017_v3 = vadd.f32 1e-06, %v4863_v29 }
 0xc2a   : > { %v4689_v15 = vpop.xlane.xlu1 %4688  ;;  %5148 = vst [vmem:[%s7495_s3 + $0x70] sm:$0xff] %v5116_v54 }
 0xc2b   : > { %v10245_v56 = vmul.f32 0.007874016, %v4689_v15  ;;  %6672 = vrsqrt.f32 %v10243_v7  ;;  %vm4894_vm12 = vcmp.eq.f32.partialorder %v10243_v7, inf  ;;  %vm4896_vm13 = vcmp.eq.f32.partialorder %v10243_v7, 0.0 }
 0xc2c   : > { %v6665_v2 = vpop.eup %6664  ;;  %v4897_v17 = vand.u32 2147483648, %v10243_v7 }
 0xc2d   : > { %6674 = vrsqrt.f32 %v10245_v56  ;;  %v6667_v32 = vpop.eup %6666  ;;  %v4879_v15 = vmul.f32 %v6665_v2, %v10215_v18  ;;  %vm4901_vm14 = vcmp.eq.f32.partialorder %v10245_v56, inf  ;;  %vm4903_vm15 = vcmp.eq.f32.partialorder %v10245_v56, 0.0 }
 0xc2e   : > { %v5063_v41 = vmul.f32 %v6667_v32, %v9988_v23  ;;  %v6669_v12 = vpop.eup %6668  ;;  %v4904_v25 = vand.u32 2147483648, %v10245_v56  ;;  %v4988_v32 = vmul.f32 %v9883_v61, %v9857_v50  ;;  %v4990_v50 = vmul.f32 %v9883_v61, %v9867_v13 }
 0xc2f   : > { %v4881_v19 = vsel %vm4880_vm8, %v10215_v18, %v4879_v15  ;;  %v5065_v27 = vmul.f32 %v6669_v12, %v9992_v42 }
 0xc30   : > { %v5117_v23 = vadd.f32 %v10083_v52, %v5063_v41  ;;  %v4884_v10 = vsel %vm4882_vm9, %v4883_v59, %v4881_v19 }
 0xc31   : > { %v5020_v58 = vadd.f32 1e-06, %v4884_v10  ;;  %v5118_v36 = vadd.f32 %v10083_v52, %v5065_v27 }
 0xc32   : > { %v4691_v46 = vpop.xlane.xlu0 %4690  ;;  %5149 = vst [vmem:[%s7495_s3 + $0x78] sm:$0xff] %v5117_v23 }
 0xc33   : > { %v10257_v4 = vmul.f32 0.007874016, %v4691_v46  ;;  %v6671_v46 = vpop.eup %6670  ;;  %5150 = vst [vmem:[%s7495_s3 + $0x80] sm:$0xff] %v5118_v36 }
 0xc34   : > { %v4693_v44 = vpop.xlane.xlu1 %4692  ;;  %v4886_v30 = vmul.f32 %v6671_v46, %v10238_v24  ;;  %v4991_v46 = vmul.f32 %v9883_v61, %v9872_v35 }
 0xc35   : > { %6676 = vrsqrt.f32 %v10257_v4  ;;  %v10298_v48 = vmul.f32 0.007874016, %v4693_v44  ;;  %v6673_v11 = vpop.eup %6672  ;;  %vm4908_vm0 = vcmp.eq.f32.partialorder %v10257_v4, inf  ;;  %vm4910_vm1 = vcmp.eq.f32.partialorder %v10257_v4, 0.0 }
 0xc36   : > { %6678 = vrcp.f32 %v5017_v3  ;;  %v4893_v63 = vmul.f32 %v6673_v11, %v10243_v7  ;;  %v4888_v16 = vsel %vm4887_vm10, %v10238_v24, %v4886_v30 }
 0xc37   : > { %6680 = vrcp.f32 %v5018_v40  ;;  %v6675_v47 = vpop.eup %6674  ;;  %v4891_v44 = vsel %vm4889_vm11, %v4890_v21, %v4888_v16  ;;  %vm4915_vm2 = vcmp.eq.f32.partialorder %v10298_v48, inf  ;;  %v4918_v13 = vand.u32 2147483648, %v10298_v48 }
 0xc38   : > { %6682 = vrcp.f32 %v5019_v62  ;;  %v4900_v53 = vmul.f32 %v6675_v47, %v10245_v56  ;;  %v4895_v6 = vsel %vm4894_vm12, %v10243_v7, %v4893_v63  ;;  %v5021_v3 = vadd.f32 1e-06, %v4891_v44 }
 0xc39   : > { %6684 = vrsqrt.f32 %v10298_v48  ;;  %v4898_v38 = vsel %vm4896_vm13, %v4897_v17, %v4895_v6  ;;  %v4911_v7 = vand.u32 2147483648, %v10257_v4  ;;  %vm4917_vm3 = vcmp.eq.f32.partialorder %v10298_v48, 0.0 }
 0xc3a   : > { %v4695_v22 = vpop.xlane.xlu0 %4694  ;;  %6686 = vrcp.f32 %v5020_v58  ;;  %v4902_v14 = vsel %vm4901_vm14, %v10245_v56, %v4900_v53  ;;  %v5022_v59 = vadd.f32 1e-06, %v4898_v38 }
 0xc3b   : > { %v10300_v5 = vmul.f32 0.007874016, %v4695_v22  ;;  %v4905_v0 = vsel %vm4903_vm15, %v4904_v25, %v4902_v14 }
 0xc3c   : > { %v4697_v31 = vpop.xlane.xlu1 %4696  ;;  %v5023_v20 = vadd.f32 1e-06, %v4905_v0 }
 0xc3d   : > { %v10314_v42 = vmul.f32 0.007874016, %v4697_v31  ;;  %6688 = vrsqrt.f32 %v10300_v5  ;;  %vm4922_vm4 = vcmp.eq.f32.partialorder %v10300_v5, inf  ;;  %vm4924_vm5 = vcmp.eq.f32.partialorder %v10300_v5, 0.0 }
 0xc3e   : > { %v4925_v36 = vand.u32 2147483648, %v10300_v5 }
 0xc3f   : > { %v6677_v60 = vpop.eup %6676  ;;  %6690 = vrsqrt.f32 %v10314_v42  ;;  %vm4929_vm6 = vcmp.eq.f32.partialorder %v10314_v42, inf  ;;  %v4932_v6 = vand.u32 2147483648, %v10314_v42  ;;  %vm4931_vm7 = vcmp.eq.f32.partialorder %v10314_v42, 0.0 }
 0xc40   : > { %v6679_v24 = vpop.eup %6678  ;;  %v4907_v55 = vmul.f32 %v6677_v60, %v10257_v4  ;;  %6692 = vrcp.f32 %v5021_v3 }
 0xc41   : > { %v6681_v40 = vpop.eup %6680  ;;  %v5067_v2 = vmul.f32 %v6679_v24, %v9996_v1  ;;  %6694 = vrcp.f32 %v5022_v59 }
 0xc42   : > { %v4699_v18 = vpop.xlane.xlu0 %4698  ;;  %v5069_v9 = vmul.f32 %v6681_v40, %v10001_v51  ;;  %v4909_v56 = vsel %vm4908_vm0, %v10257_v4, %v4907_v55  ;;  %6696 = vrcp.f32 %v5023_v20  ;;  %v6683_v15 = vpop.eup %6682  ;;  %v4989_v4 = vmul.f32 %v9883_v61, %v9860_v28 }
 0xc43   : > { %v5119_v43 = vadd.f32 %v10083_v52, %v5067_v2  ;;  %v4912_v1 = vsel %vm4910_vm1, %v4911_v7, %v4909_v56  ;;  %v10346_v51 = vmul.f32 0.007874016, %v4699_v18  ;;  %v6685_v31 = vpop.eup %6684  ;;  %v5071_v12 = vmul.f32 %v6683_v15, %v10005_v34 }
 0xc44   : > { %v4701_v29 = vpop.xlane.xlu1 %4700  ;;  %v5120_v21 = vadd.f32 %v10083_v52, %v5069_v9  ;;  %v5024_v54 = vadd.f32 1e-06, %v4912_v1  ;;  %v4914_v23 = vmul.f32 %v6685_v31, %v10298_v48  ;;  %v6687_v27 = vpop.eup %6686 }
 0xc45   : > { %v10348_v41 = vmul.f32 0.007874016, %v4701_v29  ;;  %5151 = vst [vmem:[%s7495_s3 + $0x88] sm:$0xff] %v5119_v43  ;;  %v5121_v28 = vadd.f32 %v10083_v52, %v5071_v12  ;;  %v5073_v11 = vmul.f32 %v6687_v27, %v4988_v32  ;;  %vm4936_vm8 = vcmp.eq.f32.partialorder %v10346_v51, inf }
 0xc46   : > { %5152 = vst [vmem:[%s7495_s3 + $0x90] sm:$0xff] %v5120_v21  ;;  %6698 = vrcp.f32 %v5024_v54  ;;  %v4916_v58 = vsel %vm4915_vm2, %v10298_v48, %v4914_v23  ;;  %vm4938_vm9 = vcmp.eq.f32.partialorder %v10346_v51, 0.0  ;;  %v4939_v7 = vand.u32 2147483648, %v10346_v51 }
 0xc47   : > { %6700 = vrsqrt.f32 %v10346_v51  ;;  %v6689_v10 = vpop.eup %6688  ;;  %5153 = vst [vmem:[%s7495_s3 + $0x98] sm:$0xff] %v5121_v28  ;;  %v4919_v35 = vsel %vm4917_vm3, %v4918_v13, %v4916_v58  ;;  %v5122_v17 = vadd.f32 %v10083_v52, %v5073_v11  ;;  %vm4943_vm10 = vcmp.eq.f32.partialorder %v10348_v41, inf }
 0xc48   : > { %6702 = vrsqrt.f32 %v10348_v41  ;;  %v4921_v61 = vmul.f32 %v6689_v10, %v10300_v5  ;;  %v5025_v47 = vadd.f32 1e-06, %v4919_v35  ;;  %vm4945_vm11 = vcmp.eq.f32.partialorder %v10348_v41, 0.0 }
 0xc49   : > { %v6691_v30 = vpop.eup %6690  ;;  %5154 = vst [vmem:[%s7495_s3 + $0xa0] sm:$0xff] %v5122_v17 }
 0xc4a   : > { %v4703_v22 = vpop.xlane.xlu0 %4702  ;;  %v6693_v48 = vpop.eup %6692  ;;  %v4923_v63 = vsel %vm4922_vm4, %v10300_v5, %v4921_v61  ;;  %v4928_v18 = vmul.f32 %v6691_v30, %v10314_v42 }
 0xc4b   : > { %v10356_v19 = vmul.f32 0.007874016, %v4703_v22  ;;  %v6695_v16 = vpop.eup %6694  ;;  %v5075_v53 = vmul.f32 %v6693_v48, %v4989_v4  ;;  %v4926_v44 = vsel %vm4924_vm5, %v4925_v36, %v4923_v63 }
 0xc4c   : > { %v4705_v62 = vpop.xlane.xlu1 %4704  ;;  %v6697_v25 = vpop.eup %6696  ;;  %v5077_v29 = vmul.f32 %v6695_v16, %v4990_v50  ;;  %v5026_v60 = vadd.f32 1e-06, %v4926_v44  ;;  %v4930_v5 = vsel %vm4929_vm6, %v10314_v42, %v4928_v18 }
 0xc4d   : > { %v10366_v34 = vmul.f32 0.007874016, %v4705_v62  ;;  %6704 = vrsqrt.f32 %v10356_v19  ;;  %v5123_v3 = vadd.f32 %v10083_v52, %v5075_v53  ;;  %v5079_v38 = vmul.f32 %v6697_v25, %v4991_v46 }
 0xc4e   : > { %v4933_v14 = vsel %vm4931_vm7, %v4932_v6, %v4930_v5  ;;  %v5124_v24 = vadd.f32 %v10083_v52, %v5077_v29  ;;  %vm4950_vm12 = vcmp.eq.f32.partialorder %v10356_v19, inf  ;;  %vm4952_vm13 = vcmp.eq.f32.partialorder %v10356_v19, 0.0 }
 0xc4f   : > { %6706 = vrsqrt.f32 %v10366_v34  ;;  %v5027_v59 = vadd.f32 1e-06, %v4933_v14  ;;  %5155 = vst [vmem:[%s7495_s3 + $0xa8] sm:$0xff] %v5123_v3  ;;  %v5125_v55 = vadd.f32 %v10083_v52, %v5079_v38  ;;  %v4953_v54 = vand.u32 2147483648, %v10356_v19 }
 0xc50   : > { %6708 = vrcp.f32 %v5025_v47  ;;  %v6699_v0 = vpop.eup %6698  ;;  %5156 = vst [vmem:[%s7495_s3 + $0xb0] sm:$0xff] %v5124_v24  ;;  %vm4957_vm14 = vcmp.eq.f32.partialorder %v10366_v34, inf  ;;  %v4960_v27 = vand.u32 2147483648, %v10366_v34  ;;  %vm4959_vm15 = vcmp.eq.f32.partialorder %v10366_v34, 0.0 }
 0xc51   : > { %6710 = vrcp.f32 %v5026_v60  ;;  %v6701_v40 = vpop.eup %6700  ;;  %v5081_v2 = vmul.f32 %v6699_v0, %v9886_v37  ;;  %5157 = vst [vmem:[%s7495_s3 + $0xb8] sm:$0xff] %v5125_v55  ;;  %v4946_v37 = vand.u32 2147483648, %v10348_v41 }
 0xc52   : > { %6712 = vrcp.f32 %v5027_v59  ;;  %v6703_v42 = vpop.eup %6702  ;;  %v4935_v20 = vmul.f32 %v6701_v40, %v10346_v51 }
 0xc53   : > { %v5126_v56 = vadd.f32 %v10083_v52, %v5081_v2  ;;  %v4942_v22 = vmul.f32 %v6703_v42, %v10348_v41 }
 0xc54   : > { %v4937_v32 = vsel %vm4936_vm8, %v10346_v51, %v4935_v20 }
 0xc55   : > { %5158 = vst [vmem:[%s7495_s3 + $0xc0] sm:$0xff] %v5126_v56  ;;  %v4940_v15 = vsel %vm4938_vm9, %v4939_v7, %v4937_v32  ;;  %v4944_v21 = vsel %vm4943_vm10, %v10348_v41, %v4942_v22 }
 0xc56   : > { %v5028_v31 = vadd.f32 1e-06, %v4940_v15  ;;  %v4947_v4 = vsel %vm4945_vm11, %v4946_v37, %v4944_v21 }
 0xc57   : > { %v6705_v9 = vpop.eup %6704  ;;  %v5029_v46 = vadd.f32 1e-06, %v4947_v4 }
 0xc58   : > { %v4949_v43 = vmul.f32 %v6705_v9, %v10356_v19  ;;  %6714 = vrcp.f32 %v5028_v31 }
 0xc59   : > { %v6707_v1 = vpop.eup %6706  ;;  %6716 = vrcp.f32 %v5029_v46 }
 0xc5a   : > { %v6709_v62 = vpop.eup %6708  ;;  %v4951_v51 = vsel %vm4950_vm12, %v10356_v19, %v4949_v43  ;;  %v4956_v50 = vmul.f32 %v6707_v1, %v10366_v34 }
 0xc5b   : > { %v5083_v12 = vmul.f32 %v6709_v62, %v9889_v8  ;;  %v4954_v23 = vsel %vm4952_vm13, %v4953_v54, %v4951_v51  ;;  %v6711_v13 = vpop.eup %6710 }
 0xc5c   : > { %v5030_v41 = vadd.f32 1e-06, %v4954_v23  ;;  %v4958_v28 = vsel %vm4957_vm14, %v10366_v34, %v4956_v50  ;;  %v5085_v8 = vmul.f32 %v6711_v13, %v9894_v45  ;;  %v6713_v58 = vpop.eup %6712 }
 0xc5d   : > { %v5127_v19 = vadd.f32 %v10083_v52, %v5083_v12  ;;  %v4961_v10 = vsel %vm4959_vm15, %v4960_v27, %v4958_v28  ;;  %v5087_v61 = vmul.f32 %v6713_v58, %v9897_v39 }
 0xc5e   : > { %6718 = vrcp.f32 %v5030_v41  ;;  %v5031_v11 = vadd.f32 1e-06, %v4961_v10  ;;  %v5128_v35 = vadd.f32 %v10083_v52, %v5085_v8 }
 0xc5f   : > { %5159 = vst [vmem:[%s7495_s3 + $0xc8] sm:$0xff] %v5127_v19  ;;  %v5129_v34 = vadd.f32 %v10083_v52, %v5087_v61 }
 0xc60   : > { %6720 = vrcp.f32 %v5031_v11  ;;  %5160 = vst [vmem:[%s7495_s3 + $0xd0] sm:$0xff] %v5128_v35 }
 0xc61   : > { %5161 = vst [vmem:[%s7495_s3 + $0xd8] sm:$0xff] %v5129_v34 }
 0xc62   : > { %v6715_v30 = vpop.eup %6714 }
 0xc63   : > { %v6717_v17 = vpop.eup %6716  ;;  %v5089_v45 = vmul.f32 %v6715_v30, %v9902_v49 }
 0xc64   : > { %v5091_v36 = vmul.f32 %v6717_v17, %v9905_v26 }
 0xc65   : > { %v5130_v48 = vadd.f32 %v10083_v52, %v5089_v45 }
 0xc66   : > { %v5131_v18 = vadd.f32 %v10083_v52, %v5091_v36 }
 0xc67   : > { %5162 = vst [vmem:[%s7495_s3 + $0xe0] sm:$0xff] %v5130_v48 }
 0xc68   : > { %v6719_v47 = vpop.eup %6718  ;;  %5163 = vst [vmem:[%s7495_s3 + $0xe8] sm:$0xff] %v5131_v18 }
 0xc69   : > { %v5093_v63 = vmul.f32 %v6719_v47, %v9910_v33 }
 0xc6a   : > { %v6721_v39 = vpop.eup %6720 }
 0xc6b   : > { %v5132_v16 = vadd.f32 %v10083_v52, %v5093_v63  ;;  %v5095_v53 = vmul.f32 %v6721_v39, %v9913_v57 }
 0xc6d   : > { %5164 = vst [vmem:[%s7495_s3 + $0xf0] sm:$0xff] %v5132_v16  ;;  %v5133_v44 = vadd.f32 %v10083_v52, %v5095_v53 }
 0xc6f   : > { %5165 = vst [vmem:[%s7495_s3 + $0xf8] sm:$0xff] %v5133_v44 }
 0xc70 PF: > { %s10663_s5 = sld [smem:[#allocation25_spill]]  ;;  %s10664_s29 = sld [smem:[#allocation64_spill]] }
 0xc71   : > { %s5181_s2 = sshll.u32 %s7495_s3, 4  ;;  %s5167_s30 = scalar_lea.sflag [#allocation5], %s7469_s1  ;;  %s10443_s2 = int_to_ptr.vmem [resolvable:$true] %s5181_s2 }
 0xc72   : > { %s6948_s15 = scalar_lea.vmem %s10443_s2, 4096  ;;  %p10665_p8 = scmp.ne.s32.totalorder %s10593_s0, 0 }
 0xc73   : > { %p6949_p7 = scmp.ne.s32.totalorder %s10443_s2, %s6948_s15  ;;  %s7081_s14 = smov [#allocation17]  }
 0xc74   : > { %s6952_s13 = sshll.u32 %s7081_s14, 4  ;;  %s6953_s13 = int_to_ptr.vmem [resolvable:$false] %s6952_s13 }
 0xc75   : > { %p6950_p12 = pnand %p6949_p7, %p10665_p8  ;;  %s6954_s9 = scalar_lea.vmem %s6953_s13, 8192 }
 0xc76   : > { %s5469_s8 = sshll.u32 %s10663_s5, 12  ;;  %p6955_p4 = scmp.lt.s32.totalorder %s10443_s2, %s6953_s13 }
 0xc77   : > { %s10440_s18 = scalar_lea.hbm %s10664_s29, %s5469_s8  ;;  %p6951_p2 = pneg %p6950_p12 }
 0xc78   : > { %p6956_p1 = scmp.lt.s32.totalorder %s6954_s9, %s6948_s15 }
 0xc7a   : > { %p6957_p5 = por %p6956_p1, %p6955_p4 }
 0xc7c   : > { %p6958_p6 = pnand %p6957_p5, %p6951_p2 }
 0xc7e   : > { %6961 = shalt.err (!%p6958_p6)
}
 0xc7f   : > { %s6962_s3 = scalar_lea.hbm %s10440_s18, 4096  ;;  %s6966_s8 = scalar_lea.hbm %s10664_s29, 8192 }
 0xc80   : > { %p6963_p9 = scmp.ne.s32.totalorder %s10440_s18, %s6962_s3  ;;  %p6967_p13 = scmp.lt.u32.totalorder %s10440_s18, %s10664_s29 }
 0xc81   : > { %p6968_p11 = scmp.lt.u32.totalorder %s6966_s8, %s6962_s3  ;;  %p6970_p7 = scmp.lt.u32.totalorder %s6962_s3, %s10440_s18 }
 0xc82   : > { %p6964_p10 = pnand %p6963_p9, %p10665_p8 }
 0xc83   : > { %p6969_p0 = por %p6968_p11, %p6967_p13 }
 0xc84   : > { %p6965_p3 = pneg %p6964_p10 }
 0xc85   : > { %p6971_p12 = por %p6970_p7, %p6969_p0 }
 0xc87   : > { %p6972_p2 = pnand %p6971_p12, %p6965_p3 }
 0xc89   : > { %6975 = shalt.err (!%p6972_p2)
}
 0xc8a   : > { %s7082_s15 = smov 128   ;;  %s7083_s14 = smov 8  }
 0xc8b   : > { %5964 = dma.vmem_to_hbm [thread:$0]  (%p10665_p8), %s10443_s2, 4096, %s10440_s18, %s5167_s30, %s7082_s15, %s7082_s15, %s7083_s14  }
 0xc8c PF: > { %p6011_p4 = scmp.ge.s32.totalorder %s7062_s28, 2  ;;  %s5196_s13 = sand.u32 1, %s7034_s21  }
 0xc8d   : > { %p10666_p1 = scmp.ne.s32.totalorder %s10594_s11, 0  ;;  %s5197_s9 = scalar_lea.sflag [#allocation5], %s5196_s13 }
 0xc8f   : > { %p5993_p5 = pnand %p6011_p4, %p10666_p1 }
 0xc91   : > { %7029 = dma.done.wait (!%p5993_p5), %s5197_s9, 4096  }
 0xc92   : > { %7031 = vsyncadd (!%p5993_p5), %s5197_s9, 4294963200  ;;  %s36_s28 = sadd.s32 1, %s7062_s28   ;;  %s10667_s0 = smov %s10680_s24 }
 0xc93   : > { %p33_p6 = scmp.ge.s32.totalorder %s36_s28, 6   ;;  %s10668_s21 = smov %s7038_s22 }
 0xc94   : > { %s10669_s22 = smov %s7042_s23  ;;  %s10670_s23 = smov %s7419_s7 }
 0xc95   : > { %s10671_s24 = smov %s7054_s26  ;;  %s10672_s25 = smov %s7058_s27 }
 0xc96   : > { %s10673_s26 = smov %s10676_s17  ;;  %s10674_s27 = smov %s10667_s0 }
 0xc97   :  { %35 = sbr.rel (!%p33_p6) target bundleno = 25 (0x19), region = 177 }
 0xc9e   :  { %5202 = vsyncpa [#allocation4], 1 }
 0xc9f   :  { %5204 = vsyncpa [#allocation4 + $0x1], 1 }
 0xca0   :  { %5205 = vsyncpa [#allocation7], 1 }
 0xca1   :  { %5206 = vsyncpa [#allocation10], 1 }
 0xca2   :  { %5207 = vsyncpa [#allocation13], 1 }
 0xca3   :  { %5208 = vsyncpa [#allocation16], 1 }
 0xca4   :  { %5209 = vsyncpa [#allocation5], 1 }
 0xca5   :  { %5211 = vsyncpa [#allocation5 + $0x1], 1 }

</bundles_post_ra>
